<compile_context>
chip_gen: v5e
topology: v5e:2x2
jax: 0.10.0
libtpu: 0.0.40
codegen_flags: <defaults>
</compile_context>

<pallas_src>
import functools

import jax
import jax.numpy as jnp
from jax.experimental import pallas as pl
from jax.experimental.pallas import tpu as pltpu


# ----------------------------------------------------------------------------- helpers
def _rup(x, m):
    return ((x + m - 1) // m) * m


def _pad2(x, r, c, dtype=jnp.float32):
    return jnp.zeros((r, c), jnp.float32).at[:x.shape[0], :x.shape[1]].set(x).astype(dtype)


def _pad3(x, d0, d1, d2, dtype=jnp.float32):
    return (jnp.zeros((d0, d1, d2), jnp.float32)
            .at[:x.shape[0], :x.shape[1], :x.shape[2]].set(x).astype(dtype))


def _pad_gates(w_t, in_pad, R, Rp, dtype=jnp.float32):
    """(in, 4R) gate-packed weight/bias -> (in_pad, 4*Rp); gate g occupies cols [g*Rp, g*Rp+R)."""
    out = jnp.zeros((in_pad, 4 * Rp), jnp.float32)
    for g in range(4):
        out = out.at[:w_t.shape[0], g * Rp:g * Rp + R].set(w_t[:, g * R:(g + 1) * R])
    return out.astype(dtype)


# ----------------------------------------------------------------------------- kernel
def _make_kernel(B, R, A, Bp, Rp, Hp, Ap, eps, max_att_steps):
    f32 = jnp.float32
    bf16 = jnp.bfloat16
    inv_R = 1.0 / R
    inv_Rm1 = 1.0 / (R - 1)

    def kernel(xt_ref, fc_ref, attf_ref, pattf_ref, sh_ref, sc_ref,
               a_wfc_ref, a_wxt_ref, a_whh_ref, a_b_ref,
               c_w1_ref, c_b1_ref, c_w2_ref, c_b2_ref,
               q_wh_ref, q_wa_ref, q_b_ref,
               h2a_w_ref, h2a_b_ref, al_w_ref, al_b_ref,
               l_watt_ref, l_wq_ref, l_whh_ref, l_b_ref,
               nh_g_ref, nh_b_ref, nc_g_ref, nc_b_ref,
               out_ref, outh_ref, outc_ref, step_ref, cost_ref,
               acc_scr, sel_scr, hl_scr, cl_scr, hcur_scr, ccur_scr, active_scr):

        # ---- state reads FIRST: sh/sc alias the outh/outc output buffers, which are
        #      only written at the very end of the kernel. ----
        h0 = sh_ref[0]
        h1 = sh_ref[1]
        c0 = sc_ref[0]
        c1 = sc_ref[1]
        xt = xt_ref[...]
        fc = fc_ref[...]

        # ---- hoist only the small (1, lanes) rows / scalars.  The (Rp, 4Rp)-class
        #      weights are dereferenced at their dot sites so they never become
        #      long-lived vreg values (the MXU streams them from VMEM anyway). ----
        c_b1 = c_b1_ref[...]
        c_w2 = c_w2_ref[...]                 # (1, Rp) row: confidence layer-2 as VPU dot
        c_b2 = c_b2_ref[...]                 # (1, 1)
        q_b = q_b_ref[...]
        h2a_b = h2a_b_ref[...]
        al_b = al_b_ref[...]                 # (1, 1)
        nh_g = nh_g_ref[...]
        nh_b = nh_b_ref[...]
        nc_g = nc_g_ref[...]
        nc_b = nc_b_ref[...]
        # alpha row broadcast hoisted once (JAX does not CSE broadcast_in_dim); the
        # remaining batch-dim broadcast inside the loop is free.
        alpha_bc = jnp.broadcast_to(al_w_ref[...].reshape(1, 1, Hp), (1, Ap, Hp))

        # mask for padded regions in the softmax (static python branch)
        if Ap != A:
            a_iota = jax.lax.broadcasted_iota(jnp.int32, (1, Ap, 1), 1)
            score_bias = jnp.where(a_iota < A, 0.0, -1e30).astype(f32)
        else:
            score_bias = None

        def lstm_gates(pre, c):
            i = jax.nn.sigmoid(pre[:, 0 * Rp:1 * Rp])
            f = jax.nn.sigmoid(pre[:, 1 * Rp:2 * Rp])
            g = jnp.tanh(pre[:, 2 * Rp:3 * Rp])
            o = jax.nn.sigmoid(pre[:, 3 * Rp:4 * Rp])
            c_new = f * c + i * g
            return o * jnp.tanh(c_new), c_new

        def layer_norm(x, g, b):
            # padded lanes of x are exactly zero -> plain lane sums see only the R real
            # features; unbiased variance via the sum-of-squares identity.  Exact
            # division here (not approx reciprocal): it feeds the returned state.
            mean = jnp.sum(x, axis=-1, keepdims=True) * inv_R
            sq = jnp.sum(x * x, axis=-1, keepdims=True)
            var = jnp.maximum((sq - R * mean * mean) * inv_Rm1, 0.0)
            return g * (x - mean) / (jnp.sqrt(var) + 1e-6) + b

        def confidence(h):
            hid = jnp.maximum(
                jnp.dot(h.astype(bf16), c_w1_ref[...], preferred_element_type=f32) + c_b1,
                0.0)
            # second layer has out_features=1: VPU mul + lane reduce, no N=1 matmul.
            return jax.nn.sigmoid(jnp.sum(hid * c_w2, axis=-1, keepdims=True) + c_b2)

        # ---------------- attention LSTM (concat replaced by split-weight dots) -------
        pre_att = (jnp.dot((fc + h1).astype(bf16), a_wfc_ref[...], preferred_element_type=f32)
                   + jnp.dot(xt.astype(bf16), a_wxt_ref[...], preferred_element_type=f32)
                   + jnp.dot(h0.astype(bf16), a_whh_ref[...], preferred_element_type=f32)
                   + a_b_ref[...])
        h_att, c_att = lstm_gates(pre_att, c0)
        h_att = layer_norm(h_att, nh_g, nh_b)

        p = confidence(h_att)                                    # (Bp, 1)
        selector0 = (p < (1.0 - eps)).astype(f32)                # (Bp, 1)
        if Bp != B:   # padded batch rows never participate in the selector / gating
            bmask = (jax.lax.broadcasted_iota(jnp.int32, (Bp, 1), 0) < B).astype(f32)
            selector0 = selector0 * bmask
        sel_any = jnp.max(selector0)        # scalar: torch's batch-level "if selector.any()"

        # loop-invariant half of h2query (h_att is fixed inside the adaptive loop)
        q_base = jnp.dot(h_att.astype(bf16), q_wa_ref[...], preferred_element_type=f32) + q_b

        # ---- loop-carried state (VMEM scratch; step/cost accumulate in their outputs) ----
        acc_scr[...] = p
        sel_scr[...] = selector0
        hl_scr[...] = p * h_att
        cl_scr[...] = p * c1
        hcur_scr[...] = h1
        ccur_scr[...] = c1
        step_ref[...] = jnp.zeros_like(p)
        cost_ref[...] = 1.0 + (1.0 - p)
        active_scr[0] = sel_any              # SMEM gate scalar for the unrolled loop

        # ---------------- adaptive attention loop (mirrors torch's early break) --------
        for i in range(max_att_steps):
            coeff = float(i + 2)

            @pl.when(active_scr[0] > 0.0)    # cheap SMEM sld; no VMEM vld + XLU reduce
            def _step(coeff=coeff):
                sel = sel_scr[...]
                acc = acc_scr[...]
                h_prev = hcur_scr[...]
                c_prev = ccur_scr[...]

                att_query = jnp.maximum(
                    jnp.dot(h_prev.astype(bf16), q_wh_ref[...],
                            preferred_element_type=f32) + q_base, 0.0)
                att_query_bf = att_query.astype(bf16)

                # ---- attention scores: VPU mul + lane reduce over Hp; softmax over the
                #      region (sublane) axis in the native (Bp,Ap,1) column layout.
                att_h = (jnp.dot(att_query_bf, h2a_w_ref[...],
                                 preferred_element_type=f32) + h2a_b)
                t = jnp.tanh(pattf_ref[...] + att_h[:, None, :])            # (Bp,Ap,Hp) f32
                s = jnp.sum(t * alpha_bc, axis=-1, keepdims=True) + al_b    # (Bp,Ap,1)
                if score_bias is not None:
                    s = s + score_bias
                s = s - jnp.max(s, axis=1, keepdims=True)
                w = jnp.exp(s)
                w = w * pl.reciprocal(jnp.sum(w, axis=1, keepdims=True), approx=True)

                # ---- context: VPU weighted sum over the Ap regions (no M=1 matmuls) ----
                att_ = jnp.sum(w * attf_ref[...], axis=1, keepdims=True).reshape(Bp, Rp)

                # ---- language LSTM (split weights, fused biases) ----
                pre_l = (jnp.dot(att_.astype(bf16), l_watt_ref[...],
                                 preferred_element_type=f32)
                         + jnp.dot(att_query_bf, l_wq_ref[...], preferred_element_type=f32)
                         + jnp.dot(h_prev.astype(bf16), l_whh_ref[...],
                                   preferred_element_type=f32)
                         + l_b_ref[...])
                h_new, c_new = lstm_gates(pre_l, c_prev)
                h_new = layer_norm(h_new, nh_g, nh_b)
                c_new = layer_norm(c_new, nc_g, nc_b)

                p_ = confidence(h_new)
                beta = p_ * (1.0 - acc)
                acc_new = acc + beta * sel
                sel_new = (acc_new < (1.0 - eps)).astype(f32) * sel

                hcur_scr[...] = h_new
                ccur_scr[...] = c_new
                acc_scr[...] = acc_new
                sel_scr[...] = sel_new
                hl_scr[...] = hl_scr[...] + beta * h_new * sel
                cl_scr[...] = cl_scr[...] + beta * c_new * sel
                step_ref[...] = step_ref[...] + sel
                cost_ref[...] = cost_ref[...] + (1.0 + coeff * (1.0 - p_)) * sel
                active_scr[0] = jnp.max(sel_new)     # gate scalar for the next iteration

        # ---------------- finalize ------------------------------------------------------
        inv_acc = 1.0 / acc_scr[...]          # exact: feeds the returned state
        h_if = hl_scr[...] * inv_acc
        c_if = cl_scr[...] * inv_acc
        h_final = sel_any * h_if + (1.0 - sel_any) * h_att
        c_final = sel_any * c_if + (1.0 - sel_any) * c1

        out_ref[...] = h_final                # F.dropout in eval mode == identity
        outh_ref[0] = h_att
        outh_ref[1] = h_final
        outc_ref[0] = c_att
        outc_ref[1] = c_final

    return kernel


# ----------------------------------------------------------------------------- wrapper
@functools.partial(jax.jit, static_argnames=("epsilon", "max_att_steps"))
def aat_core_forward(params, xt, fc_feats, att_feats, p_att_feats, state,
                     *, epsilon, max_att_steps):
    B, E = xt.shape
    R = fc_feats.shape[1]
    A, H = p_att_feats.shape[1], p_att_feats.shape[2]
    Bp, Ep, Rp, Hp, Ap = _rup(B, 8), _rup(E, 128), _rup(R, 128), _rup(H, 128), _rup(A, 8)
    state_h, state_c = state
    f32, bf16 = jnp.float32, jnp.bfloat16

    # --- activations (f32) padded to (sublane, lane) tile multiples;
    #     region features cast to bf16 (MXU/VPU native, halves VMEM residency) ---
    xt_p = _pad2(xt, Bp, Ep)
    fc_p = _pad2(fc_feats, Bp, Rp)
    attf_p = _pad3(att_feats, Bp, Ap, Rp, bf16)
    pattf_p = _pad3(p_att_feats, Bp, Ap, Hp, bf16)
    sh_p = jnp.zeros((2, Bp, Rp), f32).at[:, :B, :R].set(state_h)
    sc_p = jnp.zeros((2, Bp, Rp), f32).at[:, :B, :R].set(state_c)

    # --- weights: pre-split concatenated inputs, repack LSTM gates at Rp-aligned column
    #     offsets, fuse ih+hh biases, cast matmul weights to bf16 (f32 accumulation) ---
    a_wih = params['att_lstm_wih_t']                          # (R+E, 4R): [0:R]->fc+h, [R:]->xt
    a_wfc = _pad_gates(a_wih[:R], Rp, R, Rp, bf16)
    a_wxt = _pad_gates(a_wih[R:], Ep, R, Rp, bf16)
    a_whh = _pad_gates(params['att_lstm_whh_t'], Rp, R, Rp, bf16)
    a_b = _pad_gates(params['att_lstm_bih'] + params['att_lstm_bhh'], 1, R, Rp)

    c_w1 = _pad2(params['conf_w1_t'], Rp, Rp, bf16)
    c_b1 = _pad2(params['conf_b1'], 1, Rp)
    c_w2 = _pad2(params['conf_w2_t'].T, 1, Rp)                # row form for the VPU dot
    c_b2 = params['conf_b2'].astype(f32)                      # (1, 1)

    q_w = params['h2q_w_t']                                   # (2R, R): [0:R]->h_lang_, [R:]->h_att
    q_wh = _pad2(q_w[:R], Rp, Rp, bf16)
    q_wa = _pad2(q_w[R:], Rp, Rp, bf16)
    q_b = _pad2(params['h2q_b'], 1, Rp)

    h2a_w = _pad2(params['h2att_w_t'], Rp, Hp, bf16)
    h2a_b = _pad2(params['h2att_b'], 1, Hp)
    al_w = _pad2(params['alpha_w'], 1, Hp)
    al_b = params['alpha_b'].astype(f32)                      # (1, 1)

    l_wih = params['lang_lstm_wih_t']                         # (2R, 4R): [0:R]->att_, [R:]->att_query
    l_watt = _pad_gates(l_wih[:R], Rp, R, Rp, bf16)
    l_wq = _pad_gates(l_wih[R:], Rp, R, Rp, bf16)
    l_whh = _pad_gates(params['lang_lstm_whh_t'], Rp, R, Rp, bf16)
    l_b = _pad_gates(params['lang_lstm_bih'] + params['lang_lstm_bhh'], 1, R, Rp)

    nh_g = _pad2(params['norm_h_g'], 1, Rp)
    nh_b = _pad2(params['norm_h_b'], 1, Rp)
    nc_g = _pad2(params['norm_c_g'], 1, Rp)
    nc_b = _pad2(params['norm_c_b'], 1, Rp)

    inputs = (xt_p, fc_p, attf_p, pattf_p, sh_p, sc_p,
              a_wfc, a_wxt, a_whh, a_b,
              c_w1, c_b1, c_w2, c_b2,
              q_wh, q_wa, q_b,
              h2a_w, h2a_b, al_w, al_b,
              l_watt, l_wq, l_whh, l_b,
              nh_g, nh_b, nc_g, nc_b)

    out_shapes = (
        jax.ShapeDtypeStruct((Bp, Rp), f32),        # output
        jax.ShapeDtypeStruct((2, Bp, Rp), f32),     # new state h = stack([h_att, h_lang])
        jax.ShapeDtypeStruct((2, Bp, Rp), f32),     # new state c = stack([c_att, c_lang])
        jax.ShapeDtypeStruct((Bp, 1), f32),         # att_step
        jax.ShapeDtypeStruct((Bp, 1), f32),         # att_cost
    )
    scratch = [
        pltpu.VMEM((Bp, 1), f32),    # accum_conf
        pltpu.VMEM((Bp, 1), f32),    # per-row selector
        pltpu.VMEM((Bp, Rp), f32),   # h_lang accumulator
        pltpu.VMEM((Bp, Rp), f32),   # c_lang accumulator
        pltpu.VMEM((Bp, Rp), f32),   # h_lang_ (current)
        pltpu.VMEM((Bp, Rp), f32),   # c_lang_ (current)
        pltpu.SMEM((1,), f32),       # batch-level "any selector active" loop gate
    ]

    # --- advisory cost + a VMEM limit derived from actual residency (v7x has 64 MiB) ---
    _mm = lambda m, k, n: 2 * m * k * n
    conf_fl = _mm(Bp, Rp, Rp) + 2 * Bp * Rp
    att_vpu = 2 * Bp * Ap * Hp + 2 * Bp * Ap * Rp
    step_fl = (_mm(Bp, Rp, Rp) + _mm(Bp, Rp, Hp) + att_vpu
               + 3 * _mm(Bp, Rp, 4 * Rp) + conf_fl)
    flops = (_mm(Bp, Rp, 4 * Rp) * 2 + _mm(Bp, Ep, 4 * Rp) + conf_fl + _mm(Bp, Rp, Rp)
             + max_att_steps * step_fl)
    transc = Bp * ((6 * Rp + 2) * (1 + max_att_steps) + max_att_steps * (Ap * Hp + Ap))
    out_elems = Bp * Rp + 2 * 2 * Bp * Rp + 2 * Bp
    in_bytes = sum(int(x.size) * x.dtype.itemsize for x in inputs)
    scratch_bytes = 4 * (2 * Bp + 4 * Bp * Rp)
    resident = in_bytes + 4 * out_elems + scratch_bytes
    vmem_limit = int(min(64 * 2 ** 20, max(3 * resident + (4 << 20), 16 << 20)))

    kernel = _make_kernel(B, R, A, Bp, Rp, Hp, Ap, float(epsilon), int(max_att_steps))
    vmem = pl.BlockSpec(memory_space=pltpu.MemorySpace.VMEM)

    out, sh, sc, att_step, att_cost = pl.pallas_call(
        kernel,
        out_shape=out_shapes,
        in_specs=[vmem] * len(inputs),
        out_specs=tuple(vmem for _ in out_shapes),
        scratch_shapes=scratch,
        input_output_aliases={4: 1, 5: 2},              # state h/c reuse the output buffers
        compiler_params=pltpu.CompilerParams(vmem_limit_bytes=vmem_limit),
        cost_estimate=pl.CostEstimate(flops=int(flops), transcendentals=int(transc),
                                      bytes_accessed=int(in_bytes + 4 * out_elems)),
    )(*inputs)

    return (out[:B, :R],
            (sh[:, :B, :R], sc[:, :B, :R]),
            att_step[:B, 0],
            att_cost[:B, 0])


# ----------------------------------------------------------------------------- params
def init_params(key, E, R, H):
    """Deterministic synthetic parameters with torch-style uniform(-1/sqrt(fan_in)) init.

    Layout matches the PyTorch module with every weight pre-transposed to
    [in_features, out_features]; all splitting / padding / gate-repacking / bf16 casting
    is done in aat_core_forward (pure layout plumbing).
    """
    keys = jax.random.split(key, 9)

    def lin(k, fan_in, fan_out):
        bound = 1.0 / float(fan_in) ** 0.5
        kw, kb = jax.random.split(k)
        w = jax.random.uniform(kw, (fan_in, fan_out), jnp.float32, -bound, bound)
        b = jax.random.uniform(kb, (1, fan_out), jnp.float32, -bound, bound)
        return w, b

    p = {}
    p['att_lstm_wih_t'], p['att_lstm_bih'] = lin(keys[0], E + R, 4 * R)
    p['att_lstm_whh_t'], p['att_lstm_bhh'] = lin(keys[1], R, 4 * R)
    p['conf_w1_t'], p['conf_b1'] = lin(keys[2], R, R)
    p['conf_w2_t'], p['conf_b2'] = lin(keys[3], R, 1)
    p['h2q_w_t'], p['h2q_b'] = lin(keys[4], 2 * R, R)
    p['h2att_w_t'], p['h2att_b'] = lin(keys[5], R, H)
    w_a, b_a = lin(keys[6], H, 1)
    p['alpha_w'] = w_a.T                 # (1, H)
    p['alpha_b'] = b_a                   # (1, 1)
    p['lang_lstm_wih_t'], p['lang_lstm_bih'] = lin(keys[7], 2 * R, 4 * R)
    p['lang_lstm_whh_t'], p['lang_lstm_bhh'] = lin(keys[8], R, 4 * R)
    p['norm_h_g'] = jnp.ones((1, R), jnp.float32)
    p['norm_h_b'] = jnp.zeros((1, R), jnp.float32)
    p['norm_c_g'] = jnp.ones((1, R), jnp.float32)
    p['norm_c_b'] = jnp.zeros((1, R), jnp.float32)
    return p


if __name__ == "__main__":
    # small shapes: batch=4, input_encoding_size=rnn_size=att_hid_size=32, 16 regions
    B, E, R, A, H = 4, 32, 32, 16, 32
    epsilon, max_att_steps = 0.1, 3

    key = jax.random.PRNGKey(0)
    k1, k2, k3, k4, k5, k6, kp = jax.random.split(key, 7)
    xt = jax.random.normal(k1, (B, E), jnp.float32)
    fc_feats = jax.random.normal(k2, (B, R), jnp.float32)
    att_feats = jax.random.normal(k3, (B, A, R), jnp.float32)
    p_att_feats = jax.random.normal(k4, (B, A, H), jnp.float32)
    state = (0.1 * jax.random.normal(k5, (2, B, R), jnp.float32),
             0.1 * jax.random.normal(k6, (2, B, R), jnp.float32))
    params = init_params(kp, E, R, H)

    output, new_state, att_step, att_cost = aat_core_forward(
        params, xt, fc_feats, att_feats, p_att_feats, state,
        epsilon=epsilon, max_att_steps=max_att_steps)
    jax.block_until_ready((output, new_state, att_step, att_cost))
    print("KERNEL_OK")
</pallas_src>

<mosaic_0001>
module attributes {stable_mosaic.version = 11 : i64} {
  func.func @kernel(%arg0: memref<8x128xf32, #tpu.memory_space<vmem>>, %arg1: memref<8x128xf32, #tpu.memory_space<vmem>>, %arg2: memref<8x16x128xbf16, #tpu.memory_space<vmem>>, %arg3: memref<8x16x128xbf16, #tpu.memory_space<vmem>>, %arg4: memref<2x8x128xf32, #tpu.memory_space<vmem>>, %arg5: memref<2x8x128xf32, #tpu.memory_space<vmem>>, %arg6: memref<128x512xbf16, #tpu.memory_space<vmem>>, %arg7: memref<128x512xbf16, #tpu.memory_space<vmem>>, %arg8: memref<128x512xbf16, #tpu.memory_space<vmem>>, %arg9: memref<1x512xf32, #tpu.memory_space<vmem>>, %arg10: memref<128x128xbf16, #tpu.memory_space<vmem>>, %arg11: memref<1x128xf32, #tpu.memory_space<vmem>>, %arg12: memref<1x128xf32, #tpu.memory_space<vmem>>, %arg13: memref<1x1xf32, #tpu.memory_space<vmem>>, %arg14: memref<128x128xbf16, #tpu.memory_space<vmem>>, %arg15: memref<128x128xbf16, #tpu.memory_space<vmem>>, %arg16: memref<1x128xf32, #tpu.memory_space<vmem>>, %arg17: memref<128x128xbf16, #tpu.memory_space<vmem>>, %arg18: memref<1x128xf32, #tpu.memory_space<vmem>>, %arg19: memref<1x128xf32, #tpu.memory_space<vmem>>, %arg20: memref<1x1xf32, #tpu.memory_space<vmem>>, %arg21: memref<128x512xbf16, #tpu.memory_space<vmem>>, %arg22: memref<128x512xbf16, #tpu.memory_space<vmem>>, %arg23: memref<128x512xbf16, #tpu.memory_space<vmem>>, %arg24: memref<1x512xf32, #tpu.memory_space<vmem>>, %arg25: memref<1x128xf32, #tpu.memory_space<vmem>>, %arg26: memref<1x128xf32, #tpu.memory_space<vmem>>, %arg27: memref<1x128xf32, #tpu.memory_space<vmem>>, %arg28: memref<1x128xf32, #tpu.memory_space<vmem>>, %arg29: memref<8x128xf32, #tpu.memory_space<vmem>>, %arg30: memref<2x8x128xf32, #tpu.memory_space<vmem>>, %arg31: memref<2x8x128xf32, #tpu.memory_space<vmem>>, %arg32: memref<8x1xf32, #tpu.memory_space<vmem>>, %arg33: memref<8x1xf32, #tpu.memory_space<vmem>>, %arg34: memref<8x1xf32, #tpu.memory_space<vmem>>, %arg35: memref<8x1xf32, #tpu.memory_space<vmem>>, %arg36: memref<8x128xf32, #tpu.memory_space<vmem>>, %arg37: memref<8x128xf32, #tpu.memory_space<vmem>>, %arg38: memref<8x128xf32, #tpu.memory_space<vmem>>, %arg39: memref<8x128xf32, #tpu.memory_space<vmem>>, %arg40: memref<1xf32, #tpu.memory_space<smem>>) attributes {dimension_semantics = [], scalar_prefetch = 0 : i64, scratch_operands = 7 : i64, tpu.core_type = #tpu.core_type<tc>} {
    %c0 = arith.constant 0 : index
    %c0_0 = arith.constant 0 : index
    %c0_1 = arith.constant 0 : index
    %0 = vector.load %arg4[%c0, %c0_0, %c0_1] : memref<2x8x128xf32, #tpu.memory_space<vmem>>, vector<1x8x128xf32>
    %1 = vector.shape_cast %0 : vector<1x8x128xf32> to vector<8x128xf32>
    %c1 = arith.constant 1 : index
    %c0_2 = arith.constant 0 : index
    %c0_3 = arith.constant 0 : index
    %2 = vector.load %arg4[%c1, %c0_2, %c0_3] : memref<2x8x128xf32, #tpu.memory_space<vmem>>, vector<1x8x128xf32>
    %3 = vector.shape_cast %2 : vector<1x8x128xf32> to vector<8x128xf32>
    %c0_4 = arith.constant 0 : index
    %c0_5 = arith.constant 0 : index
    %c0_6 = arith.constant 0 : index
    %4 = vector.load %arg5[%c0_4, %c0_5, %c0_6] : memref<2x8x128xf32, #tpu.memory_space<vmem>>, vector<1x8x128xf32>
    %5 = vector.shape_cast %4 : vector<1x8x128xf32> to vector<8x128xf32>
    %c1_7 = arith.constant 1 : index
    %c0_8 = arith.constant 0 : index
    %c0_9 = arith.constant 0 : index
    %6 = vector.load %arg5[%c1_7, %c0_8, %c0_9] : memref<2x8x128xf32, #tpu.memory_space<vmem>>, vector<1x8x128xf32>
    %7 = vector.shape_cast %6 : vector<1x8x128xf32> to vector<8x128xf32>
    %c0_10 = arith.constant 0 : index
    %c0_11 = arith.constant 0 : index
    %8 = vector.load %arg0[%c0_10, %c0_11] : memref<8x128xf32, #tpu.memory_space<vmem>>, vector<8x128xf32>
    %c0_12 = arith.constant 0 : index
    %c0_13 = arith.constant 0 : index
    %9 = vector.load %arg1[%c0_12, %c0_13] : memref<8x128xf32, #tpu.memory_space<vmem>>, vector<8x128xf32>
    %c0_14 = arith.constant 0 : index
    %c0_15 = arith.constant 0 : index
    %10 = vector.load %arg11[%c0_14, %c0_15] : memref<1x128xf32, #tpu.memory_space<vmem>>, vector<1x128xf32>
    %c0_16 = arith.constant 0 : index
    %c0_17 = arith.constant 0 : index
    %11 = vector.load %arg12[%c0_16, %c0_17] : memref<1x128xf32, #tpu.memory_space<vmem>>, vector<1x128xf32>
    %c0_18 = arith.constant 0 : index
    %c0_19 = arith.constant 0 : index
    %12 = vector.load %arg13[%c0_18, %c0_19] : memref<1x1xf32, #tpu.memory_space<vmem>>, vector<1x1xf32>
    %c0_20 = arith.constant 0 : index
    %c0_21 = arith.constant 0 : index
    %13 = vector.load %arg16[%c0_20, %c0_21] : memref<1x128xf32, #tpu.memory_space<vmem>>, vector<1x128xf32>
    %c0_22 = arith.constant 0 : index
    %c0_23 = arith.constant 0 : index
    %14 = vector.load %arg18[%c0_22, %c0_23] : memref<1x128xf32, #tpu.memory_space<vmem>>, vector<1x128xf32>
    %c0_24 = arith.constant 0 : index
    %c0_25 = arith.constant 0 : index
    %15 = vector.load %arg20[%c0_24, %c0_25] : memref<1x1xf32, #tpu.memory_space<vmem>>, vector<1x1xf32>
    %c0_26 = arith.constant 0 : index
    %c0_27 = arith.constant 0 : index
    %16 = vector.load %arg25[%c0_26, %c0_27] : memref<1x128xf32, #tpu.memory_space<vmem>>, vector<1x128xf32>
    %c0_28 = arith.constant 0 : index
    %c0_29 = arith.constant 0 : index
    %17 = vector.load %arg26[%c0_28, %c0_29] : memref<1x128xf32, #tpu.memory_space<vmem>>, vector<1x128xf32>
    %c0_30 = arith.constant 0 : index
    %c0_31 = arith.constant 0 : index
    %18 = vector.load %arg27[%c0_30, %c0_31] : memref<1x128xf32, #tpu.memory_space<vmem>>, vector<1x128xf32>
    %c0_32 = arith.constant 0 : index
    %c0_33 = arith.constant 0 : index
    %19 = vector.load %arg28[%c0_32, %c0_33] : memref<1x128xf32, #tpu.memory_space<vmem>>, vector<1x128xf32>
    %c0_34 = arith.constant 0 : index
    %c0_35 = arith.constant 0 : index
    %20 = vector.load %arg19[%c0_34, %c0_35] : memref<1x128xf32, #tpu.memory_space<vmem>>, vector<1x128xf32>
    %21 = vector.shape_cast %20 : vector<1x128xf32> to vector<1x1x128xf32>
    %22 = vector.shape_cast %21 : vector<1x1x128xf32> to vector<1x1x128xf32>
    %23 = vector.broadcast %22 : vector<1x1x128xf32> to vector<1x16x128xf32>
    %24 = arith.addf %9, %3 : vector<8x128xf32>
    %25 = arith.truncf %24 : vector<8x128xf32> to vector<8x128xbf16>
    %c0_36 = arith.constant 0 : index
    %c0_37 = arith.constant 0 : index
    %26 = vector.load %arg6[%c0_36, %c0_37] : memref<128x512xbf16, #tpu.memory_space<vmem>>, vector<128x512xbf16>
    %cst = arith.constant dense<0.000000e+00> : vector<8x512xf32>
    %27 = tpu.matmul %25, %26, %cst {dimension_numbers = #tpu.dot_dimension_numbers<[1], [0], [0], [1], [0, 0, 1, 1], [], []>} : vector<8x128xbf16>, vector<128x512xbf16>, vector<8x512xf32> -> vector<8x512xf32>
    %28 = arith.truncf %8 : vector<8x128xf32> to vector<8x128xbf16>
    %c0_38 = arith.constant 0 : index
    %c0_39 = arith.constant 0 : index
    %29 = vector.load %arg7[%c0_38, %c0_39] : memref<128x512xbf16, #tpu.memory_space<vmem>>, vector<128x512xbf16>
    %cst_40 = arith.constant dense<0.000000e+00> : vector<8x512xf32>
    %30 = tpu.matmul %28, %29, %cst_40 {dimension_numbers = #tpu.dot_dimension_numbers<[1], [0], [0], [1], [0, 0, 1, 1], [], []>} : vector<8x128xbf16>, vector<128x512xbf16>, vector<8x512xf32> -> vector<8x512xf32>
    %31 = arith.addf %27, %30 : vector<8x512xf32>
    %32 = arith.truncf %1 : vector<8x128xf32> to vector<8x128xbf16>
    %c0_41 = arith.constant 0 : index
    %c0_42 = arith.constant 0 : index
    %33 = vector.load %arg8[%c0_41, %c0_42] : memref<128x512xbf16, #tpu.memory_space<vmem>>, vector<128x512xbf16>
    %cst_43 = arith.constant dense<0.000000e+00> : vector<8x512xf32>
    %34 = tpu.matmul %32, %33, %cst_43 {dimension_numbers = #tpu.dot_dimension_numbers<[1], [0], [0], [1], [0, 0, 1, 1], [], []>} : vector<8x128xbf16>, vector<128x512xbf16>, vector<8x512xf32> -> vector<8x512xf32>
    %35 = arith.addf %31, %34 : vector<8x512xf32>
    %c0_44 = arith.constant 0 : index
    %c0_45 = arith.constant 0 : index
    %36 = vector.load %arg9[%c0_44, %c0_45] : memref<1x512xf32, #tpu.memory_space<vmem>>, vector<1x512xf32>
    %37 = vector.broadcast %36 : vector<1x512xf32> to vector<8x512xf32>
    %38 = arith.addf %35, %37 : vector<8x512xf32>
    %39 = vector.extract_strided_slice %38 {offsets = [0, 0], sizes = [8, 128], strides = [1, 1]} : vector<8x512xf32> to vector<8x128xf32>
    %40 = arith.negf %39 : vector<8x128xf32>
    %41 = math.exp %40 : vector<8x128xf32>
    %cst_46 = arith.constant 1.000000e+00 : f32
    %42 = vector.broadcast %cst_46 : f32 to vector<8x128xf32>
    %43 = arith.addf %42, %41 : vector<8x128xf32>
    %44 = arith.divf %42, %43 : vector<8x128xf32>
    %45 = vector.extract_strided_slice %38 {offsets = [0, 128], sizes = [8, 128], strides = [1, 1]} : vector<8x512xf32> to vector<8x128xf32>
    %46 = arith.negf %45 : vector<8x128xf32>
    %47 = math.exp %46 : vector<8x128xf32>
    %cst_47 = arith.constant 1.000000e+00 : f32
    %48 = vector.broadcast %cst_47 : f32 to vector<8x128xf32>
    %49 = arith.addf %48, %47 : vector<8x128xf32>
    %50 = arith.divf %48, %49 : vector<8x128xf32>
    %51 = vector.extract_strided_slice %38 {offsets = [0, 256], sizes = [8, 128], strides = [1, 1]} : vector<8x512xf32> to vector<8x128xf32>
    %52 = math.tanh %51 : vector<8x128xf32>
    %53 = vector.extract_strided_slice %38 {offsets = [0, 384], sizes = [8, 128], strides = [1, 1]} : vector<8x512xf32> to vector<8x128xf32>
    %54 = arith.negf %53 : vector<8x128xf32>
    %55 = math.exp %54 : vector<8x128xf32>
    %cst_48 = arith.constant 1.000000e+00 : f32
    %56 = vector.broadcast %cst_48 : f32 to vector<8x128xf32>
    %57 = arith.addf %56, %55 : vector<8x128xf32>
    %58 = arith.divf %56, %57 : vector<8x128xf32>
    %59 = arith.mulf %50, %5 : vector<8x128xf32>
    %60 = arith.mulf %44, %52 : vector<8x128xf32>
    %61 = arith.addf %59, %60 : vector<8x128xf32>
    %62 = math.tanh %61 : vector<8x128xf32>
    %63 = arith.mulf %58, %62 : vector<8x128xf32>
    %cst_49 = arith.constant dense<0.000000e+00> : vector<8xf32>
    %64 = vector.multi_reduction <add>, %63, %cst_49 [1] : vector<8x128xf32> to vector<8xf32>
    %65 = vector.shape_cast %64 : vector<8xf32> to vector<8x1xf32>
    %cst_50 = arith.constant 3.125000e-02 : f32
    %66 = vector.broadcast %cst_50 : f32 to vector<8x1xf32>
    %67 = arith.mulf %65, %66 : vector<8x1xf32>
    %68 = arith.mulf %63, %63 : vector<8x128xf32>
    %cst_51 = arith.constant dense<0.000000e+00> : vector<8xf32>
    %69 = vector.multi_reduction <add>, %68, %cst_51 [1] : vector<8x128xf32> to vector<8xf32>
    %70 = vector.shape_cast %69 : vector<8xf32> to vector<8x1xf32>
    %cst_52 = arith.constant 3.200000e+01 : f32
    %71 = vector.broadcast %cst_52 : f32 to vector<8x1xf32>
    %72 = arith.mulf %71, %67 : vector<8x1xf32>
    %73 = arith.mulf %72, %67 : vector<8x1xf32>
    %74 = arith.subf %70, %73 : vector<8x1xf32>
    %cst_53 = arith.constant 0.0322580636 : f32
    %75 = vector.broadcast %cst_53 : f32 to vector<8x1xf32>
    %76 = arith.mulf %74, %75 : vector<8x1xf32>
    %cst_54 = arith.constant 0.000000e+00 : f32
    %77 = vector.broadcast %cst_54 : f32 to vector<8x1xf32>
    %78 = arith.maximumf %76, %77 : vector<8x1xf32>
    %79 = vector.broadcast %67 : vector<8x1xf32> to vector<8x128xf32>
    %80 = arith.subf %63, %79 : vector<8x128xf32>
    %81 = vector.broadcast %16 : vector<1x128xf32> to vector<8x128xf32>
    %82 = arith.mulf %81, %80 : vector<8x128xf32>
    %83 = math.sqrt %78 : vector<8x1xf32>
    %cst_55 = arith.constant 9.99999997E-7 : f32
    %84 = vector.broadcast %cst_55 : f32 to vector<8x1xf32>
    %85 = arith.addf %83, %84 : vector<8x1xf32>
    %86 = vector.broadcast %85 : vector<8x1xf32> to vector<8x128xf32>
    %87 = arith.divf %82, %86 : vector<8x128xf32>
    %88 = vector.broadcast %17 : vector<1x128xf32> to vector<8x128xf32>
    %89 = arith.addf %87, %88 : vector<8x128xf32>
    %90 = arith.truncf %89 : vector<8x128xf32> to vector<8x128xbf16>
    %c0_56 = arith.constant 0 : index
    %c0_57 = arith.constant 0 : index
    %91 = vector.load %arg10[%c0_56, %c0_57] : memref<128x128xbf16, #tpu.memory_space<vmem>>, vector<128x128xbf16>
    %cst_58 = arith.constant dense<0.000000e+00> : vector<8x128xf32>
    %92 = tpu.matmul %90, %91, %cst_58 {dimension_numbers = #tpu.dot_dimension_numbers<[1], [0], [0], [1], [0, 0, 1, 1], [], []>} : vector<8x128xbf16>, vector<128x128xbf16>, vector<8x128xf32> -> vector<8x128xf32>
    %93 = vector.broadcast %10 : vector<1x128xf32> to vector<8x128xf32>
    %94 = arith.addf %92, %93 : vector<8x128xf32>
    %cst_59 = arith.constant 0.000000e+00 : f32
    %95 = vector.broadcast %cst_59 : f32 to vector<8x128xf32>
    %96 = arith.maximumf %94, %95 : vector<8x128xf32>
    %97 = vector.broadcast %11 : vector<1x128xf32> to vector<8x128xf32>
    %98 = arith.mulf %96, %97 : vector<8x128xf32>
    %cst_60 = arith.constant dense<0.000000e+00> : vector<8xf32>
    %99 = vector.multi_reduction <add>, %98, %cst_60 [1] : vector<8x128xf32> to vector<8xf32>
    %100 = vector.shape_cast %99 : vector<8xf32> to vector<8x1xf32>
    %101 = vector.broadcast %12 : vector<1x1xf32> to vector<8x1xf32>
    %102 = arith.addf %100, %101 : vector<8x1xf32>
    %103 = arith.negf %102 : vector<8x1xf32>
    %104 = math.exp %103 : vector<8x1xf32>
    %cst_61 = arith.constant 1.000000e+00 : f32
    %105 = vector.broadcast %cst_61 : f32 to vector<8x1xf32>
    %106 = arith.addf %105, %104 : vector<8x1xf32>
    %107 = arith.divf %105, %106 : vector<8x1xf32>
    %cst_62 = arith.constant 0.899999976 : f32
    %108 = vector.broadcast %cst_62 : f32 to vector<8x1xf32>
    %109 = arith.cmpf olt, %107, %108 : vector<8x1xf32>
    %110 = arith.extui %109 : vector<8x1xi1> to vector<8x1xi32>
    %111 = arith.sitofp %110 : vector<8x1xi32> to vector<8x1xf32>
    %112 = tpu.iota {dimensions = array<i32: 0>} : vector<8x1xi32>
    %c4_i32 = arith.constant 4 : i32
    %113 = vector.broadcast %c4_i32 : i32 to vector<8x1xi32>
    %114 = arith.cmpi slt, %112, %113 : vector<8x1xi32>
    %115 = arith.extui %114 : vector<8x1xi1> to vector<8x1xi32>
    %116 = arith.sitofp %115 : vector<8x1xi32> to vector<8x1xf32>
    %117 = arith.mulf %111, %116 : vector<8x1xf32>
    %118 = vector.shape_cast %117 : vector<8x1xf32> to vector<1x8x1xf32>
    %cst_63 = arith.constant dense<0xFF800000> : vector<1xf32>
    %119 = vector.multi_reduction <maximumf>, %118, %cst_63 [1, 2] : vector<1x8x1xf32> to vector<1xf32>
    %120 = vector.shape_cast %119 : vector<1xf32> to vector<1x1x1xf32>
    %121 = vector.extract %120[0, 0, 0] : f32 from vector<1x1x1xf32>
    %122 = arith.truncf %89 : vector<8x128xf32> to vector<8x128xbf16>
    %c0_64 = arith.constant 0 : index
    %c0_65 = arith.constant 0 : index
    %123 = vector.load %arg15[%c0_64, %c0_65] : memref<128x128xbf16, #tpu.memory_space<vmem>>, vector<128x128xbf16>
    %cst_66 = arith.constant dense<0.000000e+00> : vector<8x128xf32>
    %124 = tpu.matmul %122, %123, %cst_66 {dimension_numbers = #tpu.dot_dimension_numbers<[1], [0], [0], [1], [0, 0, 1, 1], [], []>} : vector<8x128xbf16>, vector<128x128xbf16>, vector<8x128xf32> -> vector<8x128xf32>
    %125 = vector.broadcast %13 : vector<1x128xf32> to vector<8x128xf32>
    %126 = arith.addf %124, %125 : vector<8x128xf32>
    %c0_67 = arith.constant 0 : index
    %c0_68 = arith.constant 0 : index
    %127 = vector.load %arg34[%c0_67, %c0_68] : memref<8x1xf32, #tpu.memory_space<vmem>>, vector<8x1xf32>
    tpu.vector_store %arg34[%c0_67, %c0_68], %107 {strides = array<i32>} : memref<8x1xf32, #tpu.memory_space<vmem>>, vector<8x1xf32>,
    %c0_69 = arith.constant 0 : index
    %c0_70 = arith.constant 0 : index
    %128 = vector.load %arg35[%c0_69, %c0_70] : memref<8x1xf32, #tpu.memory_space<vmem>>, vector<8x1xf32>
    tpu.vector_store %arg35[%c0_69, %c0_70], %117 {strides = array<i32>} : memref<8x1xf32, #tpu.memory_space<vmem>>, vector<8x1xf32>,
    %129 = vector.broadcast %107 : vector<8x1xf32> to vector<8x128xf32>
    %130 = arith.mulf %129, %89 : vector<8x128xf32>
    %c0_71 = arith.constant 0 : index
    %c0_72 = arith.constant 0 : index
    %131 = vector.load %arg36[%c0_71, %c0_72] : memref<8x128xf32, #tpu.memory_space<vmem>>, vector<8x128xf32>
    tpu.vector_store %arg36[%c0_71, %c0_72], %130 {strides = array<i32>} : memref<8x128xf32, #tpu.memory_space<vmem>>, vector<8x128xf32>,
    %132 = vector.broadcast %107 : vector<8x1xf32> to vector<8x128xf32>
    %133 = arith.mulf %132, %7 : vector<8x128xf32>
    %c0_73 = arith.constant 0 : index
    %c0_74 = arith.constant 0 : index
    %134 = vector.load %arg37[%c0_73, %c0_74] : memref<8x128xf32, #tpu.memory_space<vmem>>, vector<8x128xf32>
    tpu.vector_store %arg37[%c0_73, %c0_74], %133 {strides = array<i32>} : memref<8x128xf32, #tpu.memory_space<vmem>>, vector<8x128xf32>,
    %c0_75 = arith.constant 0 : index
    %c0_76 = arith.constant 0 : index
    %135 = vector.load %arg38[%c0_75, %c0_76] : memref<8x128xf32, #tpu.memory_space<vmem>>, vector<8x128xf32>
    tpu.vector_store %arg38[%c0_75, %c0_76], %3 {strides = array<i32>} : memref<8x128xf32, #tpu.memory_space<vmem>>, vector<8x128xf32>,
    %c0_77 = arith.constant 0 : index
    %c0_78 = arith.constant 0 : index
    %136 = vector.load %arg39[%c0_77, %c0_78] : memref<8x128xf32, #tpu.memory_space<vmem>>, vector<8x128xf32>
    tpu.vector_store %arg39[%c0_77, %c0_78], %7 {strides = array<i32>} : memref<8x128xf32, #tpu.memory_space<vmem>>, vector<8x128xf32>,
    %cst_79 = arith.constant 0.000000e+00 : f32
    %137 = vector.broadcast %cst_79 : f32 to vector<8x1xf32>
    %c0_80 = arith.constant 0 : index
    %c0_81 = arith.constant 0 : index
    %138 = vector.load %arg32[%c0_80, %c0_81] : memref<8x1xf32, #tpu.memory_space<vmem>>, vector<8x1xf32>
    tpu.vector_store %arg32[%c0_80, %c0_81], %137 {strides = array<i32>} : memref<8x1xf32, #tpu.memory_space<vmem>>, vector<8x1xf32>,
    %cst_82 = arith.constant 1.000000e+00 : f32
    %139 = vector.broadcast %cst_82 : f32 to vector<8x1xf32>
    %140 = arith.subf %139, %107 : vector<8x1xf32>
    %cst_83 = arith.constant 1.000000e+00 : f32
    %141 = vector.broadcast %cst_83 : f32 to vector<8x1xf32>
    %142 = arith.addf %141, %140 : vector<8x1xf32>
    %c0_84 = arith.constant 0 : index
    %c0_85 = arith.constant 0 : index
    %143 = vector.load %arg33[%c0_84, %c0_85] : memref<8x1xf32, #tpu.memory_space<vmem>>, vector<8x1xf32>
    tpu.vector_store %arg33[%c0_84, %c0_85], %142 {strides = array<i32>} : memref<8x1xf32, #tpu.memory_space<vmem>>, vector<8x1xf32>,
    %c0_86 = arith.constant 0 : index
    %144 = memref.load %arg40[%c0_86] : memref<1xf32, #tpu.memory_space<smem>>
    memref.store %121, %arg40[%c0_86] : memref<1xf32, #tpu.memory_space<smem>>
    %c0_87 = arith.constant 0 : index
    %145 = memref.load %arg40[%c0_87] : memref<1xf32, #tpu.memory_space<smem>>
    %cst_88 = arith.constant 0.000000e+00 : f32
    %146 = arith.cmpf ogt, %145, %cst_88 : f32
    %147 = arith.extui %146 : i1 to i32
    %c0_i32 = arith.constant 0 : i32
    %148 = arith.cmpi ne, %147, %c0_i32 : i32
    scf.if %148 {
      %c0_118 = arith.constant 0 : index
      %c0_119 = arith.constant 0 : index
      %191 = vector.load %arg35[%c0_118, %c0_119] : memref<8x1xf32, #tpu.memory_space<vmem>>, vector<8x1xf32>
      %c0_120 = arith.constant 0 : index
      %c0_121 = arith.constant 0 : index
      %192 = vector.load %arg34[%c0_120, %c0_121] : memref<8x1xf32, #tpu.memory_space<vmem>>, vector<8x1xf32>
      %c0_122 = arith.constant 0 : index
      %c0_123 = arith.constant 0 : index
      %193 = vector.load %arg38[%c0_122, %c0_123] : memref<8x128xf32, #tpu.memory_space<vmem>>, vector<8x128xf32>
      %c0_124 = arith.constant 0 : index
      %c0_125 = arith.constant 0 : index
      %194 = vector.load %arg39[%c0_124, %c0_125] : memref<8x128xf32, #tpu.memory_space<vmem>>, vector<8x128xf32>
      %195 = arith.truncf %193 : vector<8x128xf32> to vector<8x128xbf16>
      %c0_126 = arith.constant 0 : index
      %c0_127 = arith.constant 0 : index
      %196 = vector.load %arg14[%c0_126, %c0_127] : memref<128x128xbf16, #tpu.memory_space<vmem>>, vector<128x128xbf16>
      %cst_128 = arith.constant dense<0.000000e+00> : vector<8x128xf32>
      %197 = tpu.matmul %195, %196, %cst_128 {dimension_numbers = #tpu.dot_dimension_numbers<[1], [0], [0], [1], [0, 0, 1, 1], [], []>} : vector<8x128xbf16>, vector<128x128xbf16>, vector<8x128xf32> -> vector<8x128xf32>
      %198 = arith.addf %197, %126 : vector<8x128xf32>
      %cst_129 = arith.constant 0.000000e+00 : f32
      %199 = vector.broadcast %cst_129 : f32 to vector<8x128xf32>
      %200 = arith.maximumf %198, %199 : vector<8x128xf32>
      %201 = arith.truncf %200 : vector<8x128xf32> to vector<8x128xbf16>
      %c0_130 = arith.constant 0 : index
      %c0_131 = arith.constant 0 : index
      %202 = vector.load %arg17[%c0_130, %c0_131] : memref<128x128xbf16, #tpu.memory_space<vmem>>, vector<128x128xbf16>
      %cst_132 = arith.constant dense<0.000000e+00> : vector<8x128xf32>
      %203 = tpu.matmul %201, %202, %cst_132 {dimension_numbers = #tpu.dot_dimension_numbers<[1], [0], [0], [1], [0, 0, 1, 1], [], []>} : vector<8x128xbf16>, vector<128x128xbf16>, vector<8x128xf32> -> vector<8x128xf32>
      %204 = vector.broadcast %14 : vector<1x128xf32> to vector<8x128xf32>
      %205 = arith.addf %203, %204 : vector<8x128xf32>
      %c0_133 = arith.constant 0 : index
      %c0_134 = arith.constant 0 : index
      %c0_135 = arith.constant 0 : index
      %206 = vector.load %arg3[%c0_133, %c0_134, %c0_135] : memref<8x16x128xbf16, #tpu.memory_space<vmem>>, vector<8x16x128xbf16>
      %207 = vector.shape_cast %205 : vector<8x128xf32> to vector<8x1x128xf32>
      %208 = arith.extf %206 : vector<8x16x128xbf16> to vector<8x16x128xf32>
      %209 = vector.broadcast %207 : vector<8x1x128xf32> to vector<8x16x128xf32>
      %210 = arith.addf %208, %209 : vector<8x16x128xf32>
      %211 = math.tanh %210 : vector<8x16x128xf32>
      %212 = vector.broadcast %23 : vector<1x16x128xf32> to vector<8x16x128xf32>
      %213 = arith.mulf %211, %212 : vector<8x16x128xf32>
      %cst_136 = arith.constant dense<0.000000e+00> : vector<8x16xf32>
      %214 = vector.multi_reduction <add>, %213, %cst_136 [2] : vector<8x16x128xf32> to vector<8x16xf32>
      %215 = vector.shape_cast %214 : vector<8x16xf32> to vector<8x16x1xf32>
      %216 = vector.shape_cast %15 : vector<1x1xf32> to vector<1x1x1xf32>
      %217 = vector.broadcast %216 : vector<1x1x1xf32> to vector<8x16x1xf32>
      %218 = arith.addf %215, %217 : vector<8x16x1xf32>
      %cst_137 = arith.constant dense<0xFF800000> : vector<8x1xf32>
      %219 = vector.multi_reduction <maximumf>, %218, %cst_137 [1] : vector<8x16x1xf32> to vector<8x1xf32>
      %220 = vector.shape_cast %219 : vector<8x1xf32> to vector<8x1x1xf32>
      %221 = vector.broadcast %220 : vector<8x1x1xf32> to vector<8x16x1xf32>
      %222 = arith.subf %218, %221 : vector<8x16x1xf32>
      %223 = math.exp %222 : vector<8x16x1xf32>
      %cst_138 = arith.constant dense<0.000000e+00> : vector<8x1xf32>
      %224 = vector.multi_reduction <add>, %223, %cst_138 [1] : vector<8x16x1xf32> to vector<8x1xf32>
      %225 = vector.shape_cast %224 : vector<8x1xf32> to vector<8x1x1xf32>
      %226 = tpu.reciprocal %225 {approx = true} : vector<8x1x1xf32> -> vector<8x1x1xf32>
      %227 = vector.broadcast %226 : vector<8x1x1xf32> to vector<8x16x1xf32>
      %228 = arith.mulf %223, %227 : vector<8x16x1xf32>
      %c0_139 = arith.constant 0 : index
      %c0_140 = arith.constant 0 : index
      %c0_141 = arith.constant 0 : index
      %229 = vector.load %arg2[%c0_139, %c0_140, %c0_141] : memref<8x16x128xbf16, #tpu.memory_space<vmem>>, vector<8x16x128xbf16>
      %230 = arith.extf %229 : vector<8x16x128xbf16> to vector<8x16x128xf32>
      %231 = vector.broadcast %228 : vector<8x16x1xf32> to vector<8x16x128xf32>
      %232 = arith.mulf %231, %230 : vector<8x16x128xf32>
      %cst_142 = arith.constant dense<0.000000e+00> : vector<8x128xf32>
      %233 = vector.multi_reduction <add>, %232, %cst_142 [1] : vector<8x16x128xf32> to vector<8x128xf32>
      %234 = vector.shape_cast %233 : vector<8x128xf32> to vector<8x1x128xf32>
      %235 = vector.shape_cast %234 : vector<8x1x128xf32> to vector<8x128xf32>
      %236 = arith.truncf %235 : vector<8x128xf32> to vector<8x128xbf16>
      %c0_143 = arith.constant 0 : index
      %c0_144 = arith.constant 0 : index
      %237 = vector.load %arg21[%c0_143, %c0_144] : memref<128x512xbf16, #tpu.memory_space<vmem>>, vector<128x512xbf16>
      %cst_145 = arith.constant dense<0.000000e+00> : vector<8x512xf32>
      %238 = tpu.matmul %236, %237, %cst_145 {dimension_numbers = #tpu.dot_dimension_numbers<[1], [0], [0], [1], [0, 0, 1, 1], [], []>} : vector<8x128xbf16>, vector<128x512xbf16>, vector<8x512xf32> -> vector<8x512xf32>
      %c0_146 = arith.constant 0 : index
      %c0_147 = arith.constant 0 : index
      %239 = vector.load %arg22[%c0_146, %c0_147] : memref<128x512xbf16, #tpu.memory_space<vmem>>, vector<128x512xbf16>
      %cst_148 = arith.constant dense<0.000000e+00> : vector<8x512xf32>
      %240 = tpu.matmul %201, %239, %cst_148 {dimension_numbers = #tpu.dot_dimension_numbers<[1], [0], [0], [1], [0, 0, 1, 1], [], []>} : vector<8x128xbf16>, vector<128x512xbf16>, vector<8x512xf32> -> vector<8x512xf32>
      %241 = arith.addf %238, %240 : vector<8x512xf32>
      %242 = arith.truncf %193 : vector<8x128xf32> to vector<8x128xbf16>
      %c0_149 = arith.constant 0 : index
      %c0_150 = arith.constant 0 : index
      %243 = vector.load %arg23[%c0_149, %c0_150] : memref<128x512xbf16, #tpu.memory_space<vmem>>, vector<128x512xbf16>
      %cst_151 = arith.constant dense<0.000000e+00> : vector<8x512xf32>
      %244 = tpu.matmul %242, %243, %cst_151 {dimension_numbers = #tpu.dot_dimension_numbers<[1], [0], [0], [1], [0, 0, 1, 1], [], []>} : vector<8x128xbf16>, vector<128x512xbf16>, vector<8x512xf32> -> vector<8x512xf32>
      %245 = arith.addf %241, %244 : vector<8x512xf32>
      %c0_152 = arith.constant 0 : index
      %c0_153 = arith.constant 0 : index
      %246 = vector.load %arg24[%c0_152, %c0_153] : memref<1x512xf32, #tpu.memory_space<vmem>>, vector<1x512xf32>
      %247 = vector.broadcast %246 : vector<1x512xf32> to vector<8x512xf32>
      %248 = arith.addf %245, %247 : vector<8x512xf32>
      %249 = vector.extract_strided_slice %248 {offsets = [0, 0], sizes = [8, 128], strides = [1, 1]} : vector<8x512xf32> to vector<8x128xf32>
      %250 = arith.negf %249 : vector<8x128xf32>
      %251 = math.exp %250 : vector<8x128xf32>
      %cst_154 = arith.constant 1.000000e+00 : f32
      %252 = vector.broadcast %cst_154 : f32 to vector<8x128xf32>
      %253 = arith.addf %252, %251 : vector<8x128xf32>
      %254 = arith.divf %252, %253 : vector<8x128xf32>
      %255 = vector.extract_strided_slice %248 {offsets = [0, 128], sizes = [8, 128], strides = [1, 1]} : vector<8x512xf32> to vector<8x128xf32>
      %256 = arith.negf %255 : vector<8x128xf32>
      %257 = math.exp %256 : vector<8x128xf32>
      %cst_155 = arith.constant 1.000000e+00 : f32
      %258 = vector.broadcast %cst_155 : f32 to vector<8x128xf32>
      %259 = arith.addf %258, %257 : vector<8x128xf32>
      %260 = arith.divf %258, %259 : vector<8x128xf32>
      %261 = vector.extract_strided_slice %248 {offsets = [0, 256], sizes = [8, 128], strides = [1, 1]} : vector<8x512xf32> to vector<8x128xf32>
      %262 = math.tanh %261 : vector<8x128xf32>
      %263 = vector.extract_strided_slice %248 {offsets = [0, 384], sizes = [8, 128], strides = [1, 1]} : vector<8x512xf32> to vector<8x128xf32>
      %264 = arith.negf %263 : vector<8x128xf32>
      %265 = math.exp %264 : vector<8x128xf32>
      %cst_156 = arith.constant 1.000000e+00 : f32
      %266 = vector.broadcast %cst_156 : f32 to vector<8x128xf32>
      %267 = arith.addf %266, %265 : vector<8x128xf32>
      %268 = arith.divf %266, %267 : vector<8x128xf32>
      %269 = arith.mulf %260, %194 : vector<8x128xf32>
      %270 = arith.mulf %254, %262 : vector<8x128xf32>
      %271 = arith.addf %269, %270 : vector<8x128xf32>
      %272 = math.tanh %271 : vector<8x128xf32>
      %273 = arith.mulf %268, %272 : vector<8x128xf32>
      %cst_157 = arith.constant dense<0.000000e+00> : vector<8xf32>
      %274 = vector.multi_reduction <add>, %273, %cst_157 [1] : vector<8x128xf32> to vector<8xf32>
      %275 = vector.shape_cast %274 : vector<8xf32> to vector<8x1xf32>
      %cst_158 = arith.constant 3.125000e-02 : f32
      %276 = vector.broadcast %cst_158 : f32 to vector<8x1xf32>
      %277 = arith.mulf %275, %276 : vector<8x1xf32>
      %278 = arith.mulf %273, %273 : vector<8x128xf32>
      %cst_159 = arith.constant dense<0.000000e+00> : vector<8xf32>
      %279 = vector.multi_reduction <add>, %278, %cst_159 [1] : vector<8x128xf32> to vector<8xf32>
      %280 = vector.shape_cast %279 : vector<8xf32> to vector<8x1xf32>
      %cst_160 = arith.constant 3.200000e+01 : f32
      %281 = vector.broadcast %cst_160 : f32 to vector<8x1xf32>
      %282 = arith.mulf %281, %277 : vector<8x1xf32>
      %283 = arith.mulf %282, %277 : vector<8x1xf32>
      %284 = arith.subf %280, %283 : vector<8x1xf32>
      %cst_161 = arith.constant 0.0322580636 : f32
      %285 = vector.broadcast %cst_161 : f32 to vector<8x1xf32>
      %286 = arith.mulf %284, %285 : vector<8x1xf32>
      %cst_162 = arith.constant 0.000000e+00 : f32
      %287 = vector.broadcast %cst_162 : f32 to vector<8x1xf32>
      %288 = arith.maximumf %286, %287 : vector<8x1xf32>
      %289 = vector.broadcast %277 : vector<8x1xf32> to vector<8x128xf32>
      %290 = arith.subf %273, %289 : vector<8x128xf32>
      %291 = vector.broadcast %16 : vector<1x128xf32> to vector<8x128xf32>
      %292 = arith.mulf %291, %290 : vector<8x128xf32>
      %293 = math.sqrt %288 : vector<8x1xf32>
      %cst_163 = arith.constant 9.99999997E-7 : f32
      %294 = vector.broadcast %cst_163 : f32 to vector<8x1xf32>
      %295 = arith.addf %293, %294 : vector<8x1xf32>
      %296 = vector.broadcast %295 : vector<8x1xf32> to vector<8x128xf32>
      %297 = arith.divf %292, %296 : vector<8x128xf32>
      %298 = vector.broadcast %17 : vector<1x128xf32> to vector<8x128xf32>
      %299 = arith.addf %297, %298 : vector<8x128xf32>
      %cst_164 = arith.constant dense<0.000000e+00> : vector<8xf32>
      %300 = vector.multi_reduction <add>, %271, %cst_164 [1] : vector<8x128xf32> to vector<8xf32>
      %301 = vector.shape_cast %300 : vector<8xf32> to vector<8x1xf32>
      %cst_165 = arith.constant 3.125000e-02 : f32
      %302 = vector.broadcast %cst_165 : f32 to vector<8x1xf32>
      %303 = arith.mulf %301, %302 : vector<8x1xf32>
      %304 = arith.mulf %271, %271 : vector<8x128xf32>
      %cst_166 = arith.constant dense<0.000000e+00> : vector<8xf32>
      %305 = vector.multi_reduction <add>, %304, %cst_166 [1] : vector<8x128xf32> to vector<8xf32>
      %306 = vector.shape_cast %305 : vector<8xf32> to vector<8x1xf32>
      %cst_167 = arith.constant 3.200000e+01 : f32
      %307 = vector.broadcast %cst_167 : f32 to vector<8x1xf32>
      %308 = arith.mulf %307, %303 : vector<8x1xf32>
      %309 = arith.mulf %308, %303 : vector<8x1xf32>
      %310 = arith.subf %306, %309 : vector<8x1xf32>
      %cst_168 = arith.constant 0.0322580636 : f32
      %311 = vector.broadcast %cst_168 : f32 to vector<8x1xf32>
      %312 = arith.mulf %310, %311 : vector<8x1xf32>
      %cst_169 = arith.constant 0.000000e+00 : f32
      %313 = vector.broadcast %cst_169 : f32 to vector<8x1xf32>
      %314 = arith.maximumf %312, %313 : vector<8x1xf32>
      %315 = vector.broadcast %303 : vector<8x1xf32> to vector<8x128xf32>
      %316 = arith.subf %271, %315 : vector<8x128xf32>
      %317 = vector.broadcast %18 : vector<1x128xf32> to vector<8x128xf32>
      %318 = arith.mulf %317, %316 : vector<8x128xf32>
      %319 = math.sqrt %314 : vector<8x1xf32>
      %cst_170 = arith.constant 9.99999997E-7 : f32
      %320 = vector.broadcast %cst_170 : f32 to vector<8x1xf32>
      %321 = arith.addf %319, %320 : vector<8x1xf32>
      %322 = vector.broadcast %321 : vector<8x1xf32> to vector<8x128xf32>
      %323 = arith.divf %318, %322 : vector<8x128xf32>
      %324 = vector.broadcast %19 : vector<1x128xf32> to vector<8x128xf32>
      %325 = arith.addf %323, %324 : vector<8x128xf32>
      %326 = arith.truncf %299 : vector<8x128xf32> to vector<8x128xbf16>
      %c0_171 = arith.constant 0 : index
      %c0_172 = arith.constant 0 : index
      %327 = vector.load %arg10[%c0_171, %c0_172] : memref<128x128xbf16, #tpu.memory_space<vmem>>, vector<128x128xbf16>
      %cst_173 = arith.constant dense<0.000000e+00> : vector<8x128xf32>
      %328 = tpu.matmul %326, %327, %cst_173 {dimension_numbers = #tpu.dot_dimension_numbers<[1], [0], [0], [1], [0, 0, 1, 1], [], []>} : vector<8x128xbf16>, vector<128x128xbf16>, vector<8x128xf32> -> vector<8x128xf32>
      %329 = vector.broadcast %10 : vector<1x128xf32> to vector<8x128xf32>
      %330 = arith.addf %328, %329 : vector<8x128xf32>
      %cst_174 = arith.constant 0.000000e+00 : f32
      %331 = vector.broadcast %cst_174 : f32 to vector<8x128xf32>
      %332 = arith.maximumf %330, %331 : vector<8x128xf32>
      %333 = vector.broadcast %11 : vector<1x128xf32> to vector<8x128xf32>
      %334 = arith.mulf %332, %333 : vector<8x128xf32>
      %cst_175 = arith.constant dense<0.000000e+00> : vector<8xf32>
      %335 = vector.multi_reduction <add>, %334, %cst_175 [1] : vector<8x128xf32> to vector<8xf32>
      %336 = vector.shape_cast %335 : vector<8xf32> to vector<8x1xf32>
      %337 = vector.broadcast %12 : vector<1x1xf32> to vector<8x1xf32>
      %338 = arith.addf %336, %337 : vector<8x1xf32>
      %339 = arith.negf %338 : vector<8x1xf32>
      %340 = math.exp %339 : vector<8x1xf32>
      %cst_176 = arith.constant 1.000000e+00 : f32
      %341 = vector.broadcast %cst_176 : f32 to vector<8x1xf32>
      %342 = arith.addf %341, %340 : vector<8x1xf32>
      %343 = arith.divf %341, %342 : vector<8x1xf32>
      %cst_177 = arith.constant 1.000000e+00 : f32
      %344 = vector.broadcast %cst_177 : f32 to vector<8x1xf32>
      %345 = arith.subf %344, %192 : vector<8x1xf32>
      %346 = arith.mulf %343, %345 : vector<8x1xf32>
      %347 = arith.mulf %346, %191 : vector<8x1xf32>
      %348 = arith.addf %192, %347 : vector<8x1xf32>
      %cst_178 = arith.constant 0.899999976 : f32
      %349 = vector.broadcast %cst_178 : f32 to vector<8x1xf32>
      %350 = arith.cmpf olt, %348, %349 : vector<8x1xf32>
      %351 = arith.extui %350 : vector<8x1xi1> to vector<8x1xi32>
      %352 = arith.sitofp %351 : vector<8x1xi32> to vector<8x1xf32>
      %353 = arith.mulf %352, %191 : vector<8x1xf32>
      %c0_179 = arith.constant 0 : index
      %c0_180 = arith.constant 0 : index
      %354 = vector.load %arg38[%c0_179, %c0_180] : memref<8x128xf32, #tpu.memory_space<vmem>>, vector<8x128xf32>
      tpu.vector_store %arg38[%c0_179, %c0_180], %299 {strides = array<i32>} : memref<8x128xf32, #tpu.memory_space<vmem>>, vector<8x128xf32>,
      %c0_181 = arith.constant 0 : index
      %c0_182 = arith.constant 0 : index
      %355 = vector.load %arg39[%c0_181, %c0_182] : memref<8x128xf32, #tpu.memory_space<vmem>>, vector<8x128xf32>
      tpu.vector_store %arg39[%c0_181, %c0_182], %325 {strides = array<i32>} : memref<8x128xf32, #tpu.memory_space<vmem>>, vector<8x128xf32>,
      %c0_183 = arith.constant 0 : index
      %c0_184 = arith.constant 0 : index
      %356 = vector.load %arg34[%c0_183, %c0_184] : memref<8x1xf32, #tpu.memory_space<vmem>>, vector<8x1xf32>
      tpu.vector_store %arg34[%c0_183, %c0_184], %348 {strides = array<i32>} : memref<8x1xf32, #tpu.memory_space<vmem>>, vector<8x1xf32>,
      %c0_185 = arith.constant 0 : index
      %c0_186 = arith.constant 0 : index
      %357 = vector.load %arg35[%c0_185, %c0_186] : memref<8x1xf32, #tpu.memory_space<vmem>>, vector<8x1xf32>
      tpu.vector_store %arg35[%c0_185, %c0_186], %353 {strides = array<i32>} : memref<8x1xf32, #tpu.memory_space<vmem>>, vector<8x1xf32>,
      %c0_187 = arith.constant 0 : index
      %c0_188 = arith.constant 0 : index
      %358 = vector.load %arg36[%c0_187, %c0_188] : memref<8x128xf32, #tpu.memory_space<vmem>>, vector<8x128xf32>
      %359 = vector.broadcast %346 : vector<8x1xf32> to vector<8x128xf32>
      %360 = arith.mulf %359, %299 : vector<8x128xf32>
      %361 = vector.broadcast %191 : vector<8x1xf32> to vector<8x128xf32>
      %362 = arith.mulf %360, %361 : vector<8x128xf32>
      %363 = arith.addf %358, %362 : vector<8x128xf32>
      %c0_189 = arith.constant 0 : index
      %c0_190 = arith.constant 0 : index
      %364 = vector.load %arg36[%c0_189, %c0_190] : memref<8x128xf32, #tpu.memory_space<vmem>>, vector<8x128xf32>
      tpu.vector_store %arg36[%c0_189, %c0_190], %363 {strides = array<i32>} : memref<8x128xf32, #tpu.memory_space<vmem>>, vector<8x128xf32>,
      %c0_191 = arith.constant 0 : index
      %c0_192 = arith.constant 0 : index
      %365 = vector.load %arg37[%c0_191, %c0_192] : memref<8x128xf32, #tpu.memory_space<vmem>>, vector<8x128xf32>
      %366 = vector.broadcast %346 : vector<8x1xf32> to vector<8x128xf32>
      %367 = arith.mulf %366, %325 : vector<8x128xf32>
      %368 = vector.broadcast %191 : vector<8x1xf32> to vector<8x128xf32>
      %369 = arith.mulf %367, %368 : vector<8x128xf32>
      %370 = arith.addf %365, %369 : vector<8x128xf32>
      %c0_193 = arith.constant 0 : index
      %c0_194 = arith.constant 0 : index
      %371 = vector.load %arg37[%c0_193, %c0_194] : memref<8x128xf32, #tpu.memory_space<vmem>>, vector<8x128xf32>
      tpu.vector_store %arg37[%c0_193, %c0_194], %370 {strides = array<i32>} : memref<8x128xf32, #tpu.memory_space<vmem>>, vector<8x128xf32>,
      %c0_195 = arith.constant 0 : index
      %c0_196 = arith.constant 0 : index
      %372 = vector.load %arg32[%c0_195, %c0_196] : memref<8x1xf32, #tpu.memory_space<vmem>>, vector<8x1xf32>
      %373 = arith.addf %372, %191 : vector<8x1xf32>
      %c0_197 = arith.constant 0 : index
      %c0_198 = arith.constant 0 : index
      %374 = vector.load %arg32[%c0_197, %c0_198] : memref<8x1xf32, #tpu.memory_space<vmem>>, vector<8x1xf32>
      tpu.vector_store %arg32[%c0_197, %c0_198], %373 {strides = array<i32>} : memref<8x1xf32, #tpu.memory_space<vmem>>, vector<8x1xf32>,
      %c0_199 = arith.constant 0 : index
      %c0_200 = arith.constant 0 : index
      %375 = vector.load %arg33[%c0_199, %c0_200] : memref<8x1xf32, #tpu.memory_space<vmem>>, vector<8x1xf32>
      %cst_201 = arith.constant 1.000000e+00 : f32
      %376 = vector.broadcast %cst_201 : f32 to vector<8x1xf32>
      %377 = arith.subf %376, %343 : vector<8x1xf32>
      %cst_202 = arith.constant 2.000000e+00 : f32
      %378 = vector.broadcast %cst_202 : f32 to vector<8x1xf32>
      %379 = arith.mulf %378, %377 : vector<8x1xf32>
      %cst_203 = arith.constant 1.000000e+00 : f32
      %380 = vector.broadcast %cst_203 : f32 to vector<8x1xf32>
      %381 = arith.addf %380, %379 : vector<8x1xf32>
      %382 = arith.mulf %381, %191 : vector<8x1xf32>
      %383 = arith.addf %375, %382 : vector<8x1xf32>
      %c0_204 = arith.constant 0 : index
      %c0_205 = arith.constant 0 : index
      %384 = vector.load %arg33[%c0_204, %c0_205] : memref<8x1xf32, #tpu.memory_space<vmem>>, vector<8x1xf32>
      tpu.vector_store %arg33[%c0_204, %c0_205], %383 {strides = array<i32>} : memref<8x1xf32, #tpu.memory_space<vmem>>, vector<8x1xf32>,
      %385 = vector.shape_cast %353 : vector<8x1xf32> to vector<1x8x1xf32>
      %cst_206 = arith.constant dense<0xFF800000> : vector<1xf32>
      %386 = vector.multi_reduction <maximumf>, %385, %cst_206 [1, 2] : vector<1x8x1xf32> to vector<1xf32>
      %387 = vector.shape_cast %386 : vector<1xf32> to vector<1x1x1xf32>
      %388 = vector.extract %387[0, 0, 0] : f32 from vector<1x1x1xf32>
      %c0_207 = arith.constant 0 : index
      %389 = memref.load %arg40[%c0_207] : memref<1xf32, #tpu.memory_space<smem>>
      memref.store %388, %arg40[%c0_207] : memref<1xf32, #tpu.memory_space<smem>>
    } else {
    }
    %c0_89 = arith.constant 0 : index
    %149 = memref.load %arg40[%c0_89] : memref<1xf32, #tpu.memory_space<smem>>
    %cst_90 = arith.constant 0.000000e+00 : f32
    %150 = arith.cmpf ogt, %149, %cst_90 : f32
    %151 = arith.extui %150 : i1 to i32
    %c0_i32_91 = arith.constant 0 : i32
    %152 = arith.cmpi ne, %151, %c0_i32_91 : i32
    scf.if %152 {
      %c0_118 = arith.constant 0 : index
      %c0_119 = arith.constant 0 : index
      %191 = vector.load %arg35[%c0_118, %c0_119] : memref<8x1xf32, #tpu.memory_space<vmem>>, vector<8x1xf32>
      %c0_120 = arith.constant 0 : index
      %c0_121 = arith.constant 0 : index
      %192 = vector.load %arg34[%c0_120, %c0_121] : memref<8x1xf32, #tpu.memory_space<vmem>>, vector<8x1xf32>
      %c0_122 = arith.constant 0 : index
      %c0_123 = arith.constant 0 : index
      %193 = vector.load %arg38[%c0_122, %c0_123] : memref<8x128xf32, #tpu.memory_space<vmem>>, vector<8x128xf32>
      %c0_124 = arith.constant 0 : index
      %c0_125 = arith.constant 0 : index
      %194 = vector.load %arg39[%c0_124, %c0_125] : memref<8x128xf32, #tpu.memory_space<vmem>>, vector<8x128xf32>
      %195 = arith.truncf %193 : vector<8x128xf32> to vector<8x128xbf16>
      %c0_126 = arith.constant 0 : index
      %c0_127 = arith.constant 0 : index
      %196 = vector.load %arg14[%c0_126, %c0_127] : memref<128x128xbf16, #tpu.memory_space<vmem>>, vector<128x128xbf16>
      %cst_128 = arith.constant dense<0.000000e+00> : vector<8x128xf32>
      %197 = tpu.matmul %195, %196, %cst_128 {dimension_numbers = #tpu.dot_dimension_numbers<[1], [0], [0], [1], [0, 0, 1, 1], [], []>} : vector<8x128xbf16>, vector<128x128xbf16>, vector<8x128xf32> -> vector<8x128xf32>
      %198 = arith.addf %197, %126 : vector<8x128xf32>
      %cst_129 = arith.constant 0.000000e+00 : f32
      %199 = vector.broadcast %cst_129 : f32 to vector<8x128xf32>
      %200 = arith.maximumf %198, %199 : vector<8x128xf32>
      %201 = arith.truncf %200 : vector<8x128xf32> to vector<8x128xbf16>
      %c0_130 = arith.constant 0 : index
      %c0_131 = arith.constant 0 : index
      %202 = vector.load %arg17[%c0_130, %c0_131] : memref<128x128xbf16, #tpu.memory_space<vmem>>, vector<128x128xbf16>
      %cst_132 = arith.constant dense<0.000000e+00> : vector<8x128xf32>
      %203 = tpu.matmul %201, %202, %cst_132 {dimension_numbers = #tpu.dot_dimension_numbers<[1], [0], [0], [1], [0, 0, 1, 1], [], []>} : vector<8x128xbf16>, vector<128x128xbf16>, vector<8x128xf32> -> vector<8x128xf32>
      %204 = vector.broadcast %14 : vector<1x128xf32> to vector<8x128xf32>
      %205 = arith.addf %203, %204 : vector<8x128xf32>
      %c0_133 = arith.constant 0 : index
      %c0_134 = arith.constant 0 : index
      %c0_135 = arith.constant 0 : index
      %206 = vector.load %arg3[%c0_133, %c0_134, %c0_135] : memref<8x16x128xbf16, #tpu.memory_space<vmem>>, vector<8x16x128xbf16>
      %207 = vector.shape_cast %205 : vector<8x128xf32> to vector<8x1x128xf32>
      %208 = arith.extf %206 : vector<8x16x128xbf16> to vector<8x16x128xf32>
      %209 = vector.broadcast %207 : vector<8x1x128xf32> to vector<8x16x128xf32>
      %210 = arith.addf %208, %209 : vector<8x16x128xf32>
      %211 = math.tanh %210 : vector<8x16x128xf32>
      %212 = vector.broadcast %23 : vector<1x16x128xf32> to vector<8x16x128xf32>
      %213 = arith.mulf %211, %212 : vector<8x16x128xf32>
      %cst_136 = arith.constant dense<0.000000e+00> : vector<8x16xf32>
      %214 = vector.multi_reduction <add>, %213, %cst_136 [2] : vector<8x16x128xf32> to vector<8x16xf32>
      %215 = vector.shape_cast %214 : vector<8x16xf32> to vector<8x16x1xf32>
      %216 = vector.shape_cast %15 : vector<1x1xf32> to vector<1x1x1xf32>
      %217 = vector.broadcast %216 : vector<1x1x1xf32> to vector<8x16x1xf32>
      %218 = arith.addf %215, %217 : vector<8x16x1xf32>
      %cst_137 = arith.constant dense<0xFF800000> : vector<8x1xf32>
      %219 = vector.multi_reduction <maximumf>, %218, %cst_137 [1] : vector<8x16x1xf32> to vector<8x1xf32>
      %220 = vector.shape_cast %219 : vector<8x1xf32> to vector<8x1x1xf32>
      %221 = vector.broadcast %220 : vector<8x1x1xf32> to vector<8x16x1xf32>
      %222 = arith.subf %218, %221 : vector<8x16x1xf32>
      %223 = math.exp %222 : vector<8x16x1xf32>
      %cst_138 = arith.constant dense<0.000000e+00> : vector<8x1xf32>
      %224 = vector.multi_reduction <add>, %223, %cst_138 [1] : vector<8x16x1xf32> to vector<8x1xf32>
      %225 = vector.shape_cast %224 : vector<8x1xf32> to vector<8x1x1xf32>
      %226 = tpu.reciprocal %225 {approx = true} : vector<8x1x1xf32> -> vector<8x1x1xf32>
      %227 = vector.broadcast %226 : vector<8x1x1xf32> to vector<8x16x1xf32>
      %228 = arith.mulf %223, %227 : vector<8x16x1xf32>
      %c0_139 = arith.constant 0 : index
      %c0_140 = arith.constant 0 : index
      %c0_141 = arith.constant 0 : index
      %229 = vector.load %arg2[%c0_139, %c0_140, %c0_141] : memref<8x16x128xbf16, #tpu.memory_space<vmem>>, vector<8x16x128xbf16>
      %230 = arith.extf %229 : vector<8x16x128xbf16> to vector<8x16x128xf32>
      %231 = vector.broadcast %228 : vector<8x16x1xf32> to vector<8x16x128xf32>
      %232 = arith.mulf %231, %230 : vector<8x16x128xf32>
      %cst_142 = arith.constant dense<0.000000e+00> : vector<8x128xf32>
      %233 = vector.multi_reduction <add>, %232, %cst_142 [1] : vector<8x16x128xf32> to vector<8x128xf32>
      %234 = vector.shape_cast %233 : vector<8x128xf32> to vector<8x1x128xf32>
      %235 = vector.shape_cast %234 : vector<8x1x128xf32> to vector<8x128xf32>
      %236 = arith.truncf %235 : vector<8x128xf32> to vector<8x128xbf16>
      %c0_143 = arith.constant 0 : index
      %c0_144 = arith.constant 0 : index
      %237 = vector.load %arg21[%c0_143, %c0_144] : memref<128x512xbf16, #tpu.memory_space<vmem>>, vector<128x512xbf16>
      %cst_145 = arith.constant dense<0.000000e+00> : vector<8x512xf32>
      %238 = tpu.matmul %236, %237, %cst_145 {dimension_numbers = #tpu.dot_dimension_numbers<[1], [0], [0], [1], [0, 0, 1, 1], [], []>} : vector<8x128xbf16>, vector<128x512xbf16>, vector<8x512xf32> -> vector<8x512xf32>
      %c0_146 = arith.constant 0 : index
      %c0_147 = arith.constant 0 : index
      %239 = vector.load %arg22[%c0_146, %c0_147] : memref<128x512xbf16, #tpu.memory_space<vmem>>, vector<128x512xbf16>
      %cst_148 = arith.constant dense<0.000000e+00> : vector<8x512xf32>
      %240 = tpu.matmul %201, %239, %cst_148 {dimension_numbers = #tpu.dot_dimension_numbers<[1], [0], [0], [1], [0, 0, 1, 1], [], []>} : vector<8x128xbf16>, vector<128x512xbf16>, vector<8x512xf32> -> vector<8x512xf32>
      %241 = arith.addf %238, %240 : vector<8x512xf32>
      %242 = arith.truncf %193 : vector<8x128xf32> to vector<8x128xbf16>
      %c0_149 = arith.constant 0 : index
      %c0_150 = arith.constant 0 : index
      %243 = vector.load %arg23[%c0_149, %c0_150] : memref<128x512xbf16, #tpu.memory_space<vmem>>, vector<128x512xbf16>
      %cst_151 = arith.constant dense<0.000000e+00> : vector<8x512xf32>
      %244 = tpu.matmul %242, %243, %cst_151 {dimension_numbers = #tpu.dot_dimension_numbers<[1], [0], [0], [1], [0, 0, 1, 1], [], []>} : vector<8x128xbf16>, vector<128x512xbf16>, vector<8x512xf32> -> vector<8x512xf32>
      %245 = arith.addf %241, %244 : vector<8x512xf32>
      %c0_152 = arith.constant 0 : index
      %c0_153 = arith.constant 0 : index
      %246 = vector.load %arg24[%c0_152, %c0_153] : memref<1x512xf32, #tpu.memory_space<vmem>>, vector<1x512xf32>
      %247 = vector.broadcast %246 : vector<1x512xf32> to vector<8x512xf32>
      %248 = arith.addf %245, %247 : vector<8x512xf32>
      %249 = vector.extract_strided_slice %248 {offsets = [0, 0], sizes = [8, 128], strides = [1, 1]} : vector<8x512xf32> to vector<8x128xf32>
      %250 = arith.negf %249 : vector<8x128xf32>
      %251 = math.exp %250 : vector<8x128xf32>
      %cst_154 = arith.constant 1.000000e+00 : f32
      %252 = vector.broadcast %cst_154 : f32 to vector<8x128xf32>
      %253 = arith.addf %252, %251 : vector<8x128xf32>
      %254 = arith.divf %252, %253 : vector<8x128xf32>
      %255 = vector.extract_strided_slice %248 {offsets = [0, 128], sizes = [8, 128], strides = [1, 1]} : vector<8x512xf32> to vector<8x128xf32>
      %256 = arith.negf %255 : vector<8x128xf32>
      %257 = math.exp %256 : vector<8x128xf32>
      %cst_155 = arith.constant 1.000000e+00 : f32
      %258 = vector.broadcast %cst_155 : f32 to vector<8x128xf32>
      %259 = arith.addf %258, %257 : vector<8x128xf32>
      %260 = arith.divf %258, %259 : vector<8x128xf32>
      %261 = vector.extract_strided_slice %248 {offsets = [0, 256], sizes = [8, 128], strides = [1, 1]} : vector<8x512xf32> to vector<8x128xf32>
      %262 = math.tanh %261 : vector<8x128xf32>
      %263 = vector.extract_strided_slice %248 {offsets = [0, 384], sizes = [8, 128], strides = [1, 1]} : vector<8x512xf32> to vector<8x128xf32>
      %264 = arith.negf %263 : vector<8x128xf32>
      %265 = math.exp %264 : vector<8x128xf32>
      %cst_156 = arith.constant 1.000000e+00 : f32
      %266 = vector.broadcast %cst_156 : f32 to vector<8x128xf32>
      %267 = arith.addf %266, %265 : vector<8x128xf32>
      %268 = arith.divf %266, %267 : vector<8x128xf32>
      %269 = arith.mulf %260, %194 : vector<8x128xf32>
      %270 = arith.mulf %254, %262 : vector<8x128xf32>
      %271 = arith.addf %269, %270 : vector<8x128xf32>
      %272 = math.tanh %271 : vector<8x128xf32>
      %273 = arith.mulf %268, %272 : vector<8x128xf32>
      %cst_157 = arith.constant dense<0.000000e+00> : vector<8xf32>
      %274 = vector.multi_reduction <add>, %273, %cst_157 [1] : vector<8x128xf32> to vector<8xf32>
      %275 = vector.shape_cast %274 : vector<8xf32> to vector<8x1xf32>
      %cst_158 = arith.constant 3.125000e-02 : f32
      %276 = vector.broadcast %cst_158 : f32 to vector<8x1xf32>
      %277 = arith.mulf %275, %276 : vector<8x1xf32>
      %278 = arith.mulf %273, %273 : vector<8x128xf32>
      %cst_159 = arith.constant dense<0.000000e+00> : vector<8xf32>
      %279 = vector.multi_reduction <add>, %278, %cst_159 [1] : vector<8x128xf32> to vector<8xf32>
      %280 = vector.shape_cast %279 : vector<8xf32> to vector<8x1xf32>
      %cst_160 = arith.constant 3.200000e+01 : f32
      %281 = vector.broadcast %cst_160 : f32 to vector<8x1xf32>
      %282 = arith.mulf %281, %277 : vector<8x1xf32>
      %283 = arith.mulf %282, %277 : vector<8x1xf32>
      %284 = arith.subf %280, %283 : vector<8x1xf32>
      %cst_161 = arith.constant 0.0322580636 : f32
      %285 = vector.broadcast %cst_161 : f32 to vector<8x1xf32>
      %286 = arith.mulf %284, %285 : vector<8x1xf32>
      %cst_162 = arith.constant 0.000000e+00 : f32
      %287 = vector.broadcast %cst_162 : f32 to vector<8x1xf32>
      %288 = arith.maximumf %286, %287 : vector<8x1xf32>
      %289 = vector.broadcast %277 : vector<8x1xf32> to vector<8x128xf32>
      %290 = arith.subf %273, %289 : vector<8x128xf32>
      %291 = vector.broadcast %16 : vector<1x128xf32> to vector<8x128xf32>
      %292 = arith.mulf %291, %290 : vector<8x128xf32>
      %293 = math.sqrt %288 : vector<8x1xf32>
      %cst_163 = arith.constant 9.99999997E-7 : f32
      %294 = vector.broadcast %cst_163 : f32 to vector<8x1xf32>
      %295 = arith.addf %293, %294 : vector<8x1xf32>
      %296 = vector.broadcast %295 : vector<8x1xf32> to vector<8x128xf32>
      %297 = arith.divf %292, %296 : vector<8x128xf32>
      %298 = vector.broadcast %17 : vector<1x128xf32> to vector<8x128xf32>
      %299 = arith.addf %297, %298 : vector<8x128xf32>
      %cst_164 = arith.constant dense<0.000000e+00> : vector<8xf32>
      %300 = vector.multi_reduction <add>, %271, %cst_164 [1] : vector<8x128xf32> to vector<8xf32>
      %301 = vector.shape_cast %300 : vector<8xf32> to vector<8x1xf32>
      %cst_165 = arith.constant 3.125000e-02 : f32
      %302 = vector.broadcast %cst_165 : f32 to vector<8x1xf32>
      %303 = arith.mulf %301, %302 : vector<8x1xf32>
      %304 = arith.mulf %271, %271 : vector<8x128xf32>
      %cst_166 = arith.constant dense<0.000000e+00> : vector<8xf32>
      %305 = vector.multi_reduction <add>, %304, %cst_166 [1] : vector<8x128xf32> to vector<8xf32>
      %306 = vector.shape_cast %305 : vector<8xf32> to vector<8x1xf32>
      %cst_167 = arith.constant 3.200000e+01 : f32
      %307 = vector.broadcast %cst_167 : f32 to vector<8x1xf32>
      %308 = arith.mulf %307, %303 : vector<8x1xf32>
      %309 = arith.mulf %308, %303 : vector<8x1xf32>
      %310 = arith.subf %306, %309 : vector<8x1xf32>
      %cst_168 = arith.constant 0.0322580636 : f32
      %311 = vector.broadcast %cst_168 : f32 to vector<8x1xf32>
      %312 = arith.mulf %310, %311 : vector<8x1xf32>
      %cst_169 = arith.constant 0.000000e+00 : f32
      %313 = vector.broadcast %cst_169 : f32 to vector<8x1xf32>
      %314 = arith.maximumf %312, %313 : vector<8x1xf32>
      %315 = vector.broadcast %303 : vector<8x1xf32> to vector<8x128xf32>
      %316 = arith.subf %271, %315 : vector<8x128xf32>
      %317 = vector.broadcast %18 : vector<1x128xf32> to vector<8x128xf32>
      %318 = arith.mulf %317, %316 : vector<8x128xf32>
      %319 = math.sqrt %314 : vector<8x1xf32>
      %cst_170 = arith.constant 9.99999997E-7 : f32
      %320 = vector.broadcast %cst_170 : f32 to vector<8x1xf32>
      %321 = arith.addf %319, %320 : vector<8x1xf32>
      %322 = vector.broadcast %321 : vector<8x1xf32> to vector<8x128xf32>
      %323 = arith.divf %318, %322 : vector<8x128xf32>
      %324 = vector.broadcast %19 : vector<1x128xf32> to vector<8x128xf32>
      %325 = arith.addf %323, %324 : vector<8x128xf32>
      %326 = arith.truncf %299 : vector<8x128xf32> to vector<8x128xbf16>
      %c0_171 = arith.constant 0 : index
      %c0_172 = arith.constant 0 : index
      %327 = vector.load %arg10[%c0_171, %c0_172] : memref<128x128xbf16, #tpu.memory_space<vmem>>, vector<128x128xbf16>
      %cst_173 = arith.constant dense<0.000000e+00> : vector<8x128xf32>
      %328 = tpu.matmul %326, %327, %cst_173 {dimension_numbers = #tpu.dot_dimension_numbers<[1], [0], [0], [1], [0, 0, 1, 1], [], []>} : vector<8x128xbf16>, vector<128x128xbf16>, vector<8x128xf32> -> vector<8x128xf32>
      %329 = vector.broadcast %10 : vector<1x128xf32> to vector<8x128xf32>
      %330 = arith.addf %328, %329 : vector<8x128xf32>
      %cst_174 = arith.constant 0.000000e+00 : f32
      %331 = vector.broadcast %cst_174 : f32 to vector<8x128xf32>
      %332 = arith.maximumf %330, %331 : vector<8x128xf32>
      %333 = vector.broadcast %11 : vector<1x128xf32> to vector<8x128xf32>
      %334 = arith.mulf %332, %333 : vector<8x128xf32>
      %cst_175 = arith.constant dense<0.000000e+00> : vector<8xf32>
      %335 = vector.multi_reduction <add>, %334, %cst_175 [1] : vector<8x128xf32> to vector<8xf32>
      %336 = vector.shape_cast %335 : vector<8xf32> to vector<8x1xf32>
      %337 = vector.broadcast %12 : vector<1x1xf32> to vector<8x1xf32>
      %338 = arith.addf %336, %337 : vector<8x1xf32>
      %339 = arith.negf %338 : vector<8x1xf32>
      %340 = math.exp %339 : vector<8x1xf32>
      %cst_176 = arith.constant 1.000000e+00 : f32
      %341 = vector.broadcast %cst_176 : f32 to vector<8x1xf32>
      %342 = arith.addf %341, %340 : vector<8x1xf32>
      %343 = arith.divf %341, %342 : vector<8x1xf32>
      %cst_177 = arith.constant 1.000000e+00 : f32
      %344 = vector.broadcast %cst_177 : f32 to vector<8x1xf32>
      %345 = arith.subf %344, %192 : vector<8x1xf32>
      %346 = arith.mulf %343, %345 : vector<8x1xf32>
      %347 = arith.mulf %346, %191 : vector<8x1xf32>
      %348 = arith.addf %192, %347 : vector<8x1xf32>
      %cst_178 = arith.constant 0.899999976 : f32
      %349 = vector.broadcast %cst_178 : f32 to vector<8x1xf32>
      %350 = arith.cmpf olt, %348, %349 : vector<8x1xf32>
      %351 = arith.extui %350 : vector<8x1xi1> to vector<8x1xi32>
      %352 = arith.sitofp %351 : vector<8x1xi32> to vector<8x1xf32>
      %353 = arith.mulf %352, %191 : vector<8x1xf32>
      %c0_179 = arith.constant 0 : index
      %c0_180 = arith.constant 0 : index
      %354 = vector.load %arg38[%c0_179, %c0_180] : memref<8x128xf32, #tpu.memory_space<vmem>>, vector<8x128xf32>
      tpu.vector_store %arg38[%c0_179, %c0_180], %299 {strides = array<i32>} : memref<8x128xf32, #tpu.memory_space<vmem>>, vector<8x128xf32>,
      %c0_181 = arith.constant 0 : index
      %c0_182 = arith.constant 0 : index
      %355 = vector.load %arg39[%c0_181, %c0_182] : memref<8x128xf32, #tpu.memory_space<vmem>>, vector<8x128xf32>
      tpu.vector_store %arg39[%c0_181, %c0_182], %325 {strides = array<i32>} : memref<8x128xf32, #tpu.memory_space<vmem>>, vector<8x128xf32>,
      %c0_183 = arith.constant 0 : index
      %c0_184 = arith.constant 0 : index
      %356 = vector.load %arg34[%c0_183, %c0_184] : memref<8x1xf32, #tpu.memory_space<vmem>>, vector<8x1xf32>
      tpu.vector_store %arg34[%c0_183, %c0_184], %348 {strides = array<i32>} : memref<8x1xf32, #tpu.memory_space<vmem>>, vector<8x1xf32>,
      %c0_185 = arith.constant 0 : index
      %c0_186 = arith.constant 0 : index
      %357 = vector.load %arg35[%c0_185, %c0_186] : memref<8x1xf32, #tpu.memory_space<vmem>>, vector<8x1xf32>
      tpu.vector_store %arg35[%c0_185, %c0_186], %353 {strides = array<i32>} : memref<8x1xf32, #tpu.memory_space<vmem>>, vector<8x1xf32>,
      %c0_187 = arith.constant 0 : index
      %c0_188 = arith.constant 0 : index
      %358 = vector.load %arg36[%c0_187, %c0_188] : memref<8x128xf32, #tpu.memory_space<vmem>>, vector<8x128xf32>
      %359 = vector.broadcast %346 : vector<8x1xf32> to vector<8x128xf32>
      %360 = arith.mulf %359, %299 : vector<8x128xf32>
      %361 = vector.broadcast %191 : vector<8x1xf32> to vector<8x128xf32>
      %362 = arith.mulf %360, %361 : vector<8x128xf32>
      %363 = arith.addf %358, %362 : vector<8x128xf32>
      %c0_189 = arith.constant 0 : index
      %c0_190 = arith.constant 0 : index
      %364 = vector.load %arg36[%c0_189, %c0_190] : memref<8x128xf32, #tpu.memory_space<vmem>>, vector<8x128xf32>
      tpu.vector_store %arg36[%c0_189, %c0_190], %363 {strides = array<i32>} : memref<8x128xf32, #tpu.memory_space<vmem>>, vector<8x128xf32>,
      %c0_191 = arith.constant 0 : index
      %c0_192 = arith.constant 0 : index
      %365 = vector.load %arg37[%c0_191, %c0_192] : memref<8x128xf32, #tpu.memory_space<vmem>>, vector<8x128xf32>
      %366 = vector.broadcast %346 : vector<8x1xf32> to vector<8x128xf32>
      %367 = arith.mulf %366, %325 : vector<8x128xf32>
      %368 = vector.broadcast %191 : vector<8x1xf32> to vector<8x128xf32>
      %369 = arith.mulf %367, %368 : vector<8x128xf32>
      %370 = arith.addf %365, %369 : vector<8x128xf32>
      %c0_193 = arith.constant 0 : index
      %c0_194 = arith.constant 0 : index
      %371 = vector.load %arg37[%c0_193, %c0_194] : memref<8x128xf32, #tpu.memory_space<vmem>>, vector<8x128xf32>
      tpu.vector_store %arg37[%c0_193, %c0_194], %370 {strides = array<i32>} : memref<8x128xf32, #tpu.memory_space<vmem>>, vector<8x128xf32>,
      %c0_195 = arith.constant 0 : index
      %c0_196 = arith.constant 0 : index
      %372 = vector.load %arg32[%c0_195, %c0_196] : memref<8x1xf32, #tpu.memory_space<vmem>>, vector<8x1xf32>
      %373 = arith.addf %372, %191 : vector<8x1xf32>
      %c0_197 = arith.constant 0 : index
      %c0_198 = arith.constant 0 : index
      %374 = vector.load %arg32[%c0_197, %c0_198] : memref<8x1xf32, #tpu.memory_space<vmem>>, vector<8x1xf32>
      tpu.vector_store %arg32[%c0_197, %c0_198], %373 {strides = array<i32>} : memref<8x1xf32, #tpu.memory_space<vmem>>, vector<8x1xf32>,
      %c0_199 = arith.constant 0 : index
      %c0_200 = arith.constant 0 : index
      %375 = vector.load %arg33[%c0_199, %c0_200] : memref<8x1xf32, #tpu.memory_space<vmem>>, vector<8x1xf32>
      %cst_201 = arith.constant 1.000000e+00 : f32
      %376 = vector.broadcast %cst_201 : f32 to vector<8x1xf32>
      %377 = arith.subf %376, %343 : vector<8x1xf32>
      %cst_202 = arith.constant 3.000000e+00 : f32
      %378 = vector.broadcast %cst_202 : f32 to vector<8x1xf32>
      %379 = arith.mulf %378, %377 : vector<8x1xf32>
      %cst_203 = arith.constant 1.000000e+00 : f32
      %380 = vector.broadcast %cst_203 : f32 to vector<8x1xf32>
      %381 = arith.addf %380, %379 : vector<8x1xf32>
      %382 = arith.mulf %381, %191 : vector<8x1xf32>
      %383 = arith.addf %375, %382 : vector<8x1xf32>
      %c0_204 = arith.constant 0 : index
      %c0_205 = arith.constant 0 : index
      %384 = vector.load %arg33[%c0_204, %c0_205] : memref<8x1xf32, #tpu.memory_space<vmem>>, vector<8x1xf32>
      tpu.vector_store %arg33[%c0_204, %c0_205], %383 {strides = array<i32>} : memref<8x1xf32, #tpu.memory_space<vmem>>, vector<8x1xf32>,
      %385 = vector.shape_cast %353 : vector<8x1xf32> to vector<1x8x1xf32>
      %cst_206 = arith.constant dense<0xFF800000> : vector<1xf32>
      %386 = vector.multi_reduction <maximumf>, %385, %cst_206 [1, 2] : vector<1x8x1xf32> to vector<1xf32>
      %387 = vector.shape_cast %386 : vector<1xf32> to vector<1x1x1xf32>
      %388 = vector.extract %387[0, 0, 0] : f32 from vector<1x1x1xf32>
      %c0_207 = arith.constant 0 : index
      %389 = memref.load %arg40[%c0_207] : memref<1xf32, #tpu.memory_space<smem>>
      memref.store %388, %arg40[%c0_207] : memref<1xf32, #tpu.memory_space<smem>>
    } else {
    }
    %c0_92 = arith.constant 0 : index
    %153 = memref.load %arg40[%c0_92] : memref<1xf32, #tpu.memory_space<smem>>
    %cst_93 = arith.constant 0.000000e+00 : f32
    %154 = arith.cmpf ogt, %153, %cst_93 : f32
    %155 = arith.extui %154 : i1 to i32
    %c0_i32_94 = arith.constant 0 : i32
    %156 = arith.cmpi ne, %155, %c0_i32_94 : i32
    scf.if %156 {
      %c0_118 = arith.constant 0 : index
      %c0_119 = arith.constant 0 : index
      %191 = vector.load %arg35[%c0_118, %c0_119] : memref<8x1xf32, #tpu.memory_space<vmem>>, vector<8x1xf32>
      %c0_120 = arith.constant 0 : index
      %c0_121 = arith.constant 0 : index
      %192 = vector.load %arg34[%c0_120, %c0_121] : memref<8x1xf32, #tpu.memory_space<vmem>>, vector<8x1xf32>
      %c0_122 = arith.constant 0 : index
      %c0_123 = arith.constant 0 : index
      %193 = vector.load %arg38[%c0_122, %c0_123] : memref<8x128xf32, #tpu.memory_space<vmem>>, vector<8x128xf32>
      %c0_124 = arith.constant 0 : index
      %c0_125 = arith.constant 0 : index
      %194 = vector.load %arg39[%c0_124, %c0_125] : memref<8x128xf32, #tpu.memory_space<vmem>>, vector<8x128xf32>
      %195 = arith.truncf %193 : vector<8x128xf32> to vector<8x128xbf16>
      %c0_126 = arith.constant 0 : index
      %c0_127 = arith.constant 0 : index
      %196 = vector.load %arg14[%c0_126, %c0_127] : memref<128x128xbf16, #tpu.memory_space<vmem>>, vector<128x128xbf16>
      %cst_128 = arith.constant dense<0.000000e+00> : vector<8x128xf32>
      %197 = tpu.matmul %195, %196, %cst_128 {dimension_numbers = #tpu.dot_dimension_numbers<[1], [0], [0], [1], [0, 0, 1, 1], [], []>} : vector<8x128xbf16>, vector<128x128xbf16>, vector<8x128xf32> -> vector<8x128xf32>
      %198 = arith.addf %197, %126 : vector<8x128xf32>
      %cst_129 = arith.constant 0.000000e+00 : f32
      %199 = vector.broadcast %cst_129 : f32 to vector<8x128xf32>
      %200 = arith.maximumf %198, %199 : vector<8x128xf32>
      %201 = arith.truncf %200 : vector<8x128xf32> to vector<8x128xbf16>
      %c0_130 = arith.constant 0 : index
      %c0_131 = arith.constant 0 : index
      %202 = vector.load %arg17[%c0_130, %c0_131] : memref<128x128xbf16, #tpu.memory_space<vmem>>, vector<128x128xbf16>
      %cst_132 = arith.constant dense<0.000000e+00> : vector<8x128xf32>
      %203 = tpu.matmul %201, %202, %cst_132 {dimension_numbers = #tpu.dot_dimension_numbers<[1], [0], [0], [1], [0, 0, 1, 1], [], []>} : vector<8x128xbf16>, vector<128x128xbf16>, vector<8x128xf32> -> vector<8x128xf32>
      %204 = vector.broadcast %14 : vector<1x128xf32> to vector<8x128xf32>
      %205 = arith.addf %203, %204 : vector<8x128xf32>
      %c0_133 = arith.constant 0 : index
      %c0_134 = arith.constant 0 : index
      %c0_135 = arith.constant 0 : index
      %206 = vector.load %arg3[%c0_133, %c0_134, %c0_135] : memref<8x16x128xbf16, #tpu.memory_space<vmem>>, vector<8x16x128xbf16>
      %207 = vector.shape_cast %205 : vector<8x128xf32> to vector<8x1x128xf32>
      %208 = arith.extf %206 : vector<8x16x128xbf16> to vector<8x16x128xf32>
      %209 = vector.broadcast %207 : vector<8x1x128xf32> to vector<8x16x128xf32>
      %210 = arith.addf %208, %209 : vector<8x16x128xf32>
      %211 = math.tanh %210 : vector<8x16x128xf32>
      %212 = vector.broadcast %23 : vector<1x16x128xf32> to vector<8x16x128xf32>
      %213 = arith.mulf %211, %212 : vector<8x16x128xf32>
      %cst_136 = arith.constant dense<0.000000e+00> : vector<8x16xf32>
      %214 = vector.multi_reduction <add>, %213, %cst_136 [2] : vector<8x16x128xf32> to vector<8x16xf32>
      %215 = vector.shape_cast %214 : vector<8x16xf32> to vector<8x16x1xf32>
      %216 = vector.shape_cast %15 : vector<1x1xf32> to vector<1x1x1xf32>
      %217 = vector.broadcast %216 : vector<1x1x1xf32> to vector<8x16x1xf32>
      %218 = arith.addf %215, %217 : vector<8x16x1xf32>
      %cst_137 = arith.constant dense<0xFF800000> : vector<8x1xf32>
      %219 = vector.multi_reduction <maximumf>, %218, %cst_137 [1] : vector<8x16x1xf32> to vector<8x1xf32>
      %220 = vector.shape_cast %219 : vector<8x1xf32> to vector<8x1x1xf32>
      %221 = vector.broadcast %220 : vector<8x1x1xf32> to vector<8x16x1xf32>
      %222 = arith.subf %218, %221 : vector<8x16x1xf32>
      %223 = math.exp %222 : vector<8x16x1xf32>
      %cst_138 = arith.constant dense<0.000000e+00> : vector<8x1xf32>
      %224 = vector.multi_reduction <add>, %223, %cst_138 [1] : vector<8x16x1xf32> to vector<8x1xf32>
      %225 = vector.shape_cast %224 : vector<8x1xf32> to vector<8x1x1xf32>
      %226 = tpu.reciprocal %225 {approx = true} : vector<8x1x1xf32> -> vector<8x1x1xf32>
      %227 = vector.broadcast %226 : vector<8x1x1xf32> to vector<8x16x1xf32>
      %228 = arith.mulf %223, %227 : vector<8x16x1xf32>
      %c0_139 = arith.constant 0 : index
      %c0_140 = arith.constant 0 : index
      %c0_141 = arith.constant 0 : index
      %229 = vector.load %arg2[%c0_139, %c0_140, %c0_141] : memref<8x16x128xbf16, #tpu.memory_space<vmem>>, vector<8x16x128xbf16>
      %230 = arith.extf %229 : vector<8x16x128xbf16> to vector<8x16x128xf32>
      %231 = vector.broadcast %228 : vector<8x16x1xf32> to vector<8x16x128xf32>
      %232 = arith.mulf %231, %230 : vector<8x16x128xf32>
      %cst_142 = arith.constant dense<0.000000e+00> : vector<8x128xf32>
      %233 = vector.multi_reduction <add>, %232, %cst_142 [1] : vector<8x16x128xf32> to vector<8x128xf32>
      %234 = vector.shape_cast %233 : vector<8x128xf32> to vector<8x1x128xf32>
      %235 = vector.shape_cast %234 : vector<8x1x128xf32> to vector<8x128xf32>
      %236 = arith.truncf %235 : vector<8x128xf32> to vector<8x128xbf16>
      %c0_143 = arith.constant 0 : index
      %c0_144 = arith.constant 0 : index
      %237 = vector.load %arg21[%c0_143, %c0_144] : memref<128x512xbf16, #tpu.memory_space<vmem>>, vector<128x512xbf16>
      %cst_145 = arith.constant dense<0.000000e+00> : vector<8x512xf32>
      %238 = tpu.matmul %236, %237, %cst_145 {dimension_numbers = #tpu.dot_dimension_numbers<[1], [0], [0], [1], [0, 0, 1, 1], [], []>} : vector<8x128xbf16>, vector<128x512xbf16>, vector<8x512xf32> -> vector<8x512xf32>
      %c0_146 = arith.constant 0 : index
      %c0_147 = arith.constant 0 : index
      %239 = vector.load %arg22[%c0_146, %c0_147] : memref<128x512xbf16, #tpu.memory_space<vmem>>, vector<128x512xbf16>
      %cst_148 = arith.constant dense<0.000000e+00> : vector<8x512xf32>
      %240 = tpu.matmul %201, %239, %cst_148 {dimension_numbers = #tpu.dot_dimension_numbers<[1], [0], [0], [1], [0, 0, 1, 1], [], []>} : vector<8x128xbf16>, vector<128x512xbf16>, vector<8x512xf32> -> vector<8x512xf32>
      %241 = arith.addf %238, %240 : vector<8x512xf32>
      %242 = arith.truncf %193 : vector<8x128xf32> to vector<8x128xbf16>
      %c0_149 = arith.constant 0 : index
      %c0_150 = arith.constant 0 : index
      %243 = vector.load %arg23[%c0_149, %c0_150] : memref<128x512xbf16, #tpu.memory_space<vmem>>, vector<128x512xbf16>
      %cst_151 = arith.constant dense<0.000000e+00> : vector<8x512xf32>
      %244 = tpu.matmul %242, %243, %cst_151 {dimension_numbers = #tpu.dot_dimension_numbers<[1], [0], [0], [1], [0, 0, 1, 1], [], []>} : vector<8x128xbf16>, vector<128x512xbf16>, vector<8x512xf32> -> vector<8x512xf32>
      %245 = arith.addf %241, %244 : vector<8x512xf32>
      %c0_152 = arith.constant 0 : index
      %c0_153 = arith.constant 0 : index
      %246 = vector.load %arg24[%c0_152, %c0_153] : memref<1x512xf32, #tpu.memory_space<vmem>>, vector<1x512xf32>
      %247 = vector.broadcast %246 : vector<1x512xf32> to vector<8x512xf32>
      %248 = arith.addf %245, %247 : vector<8x512xf32>
      %249 = vector.extract_strided_slice %248 {offsets = [0, 0], sizes = [8, 128], strides = [1, 1]} : vector<8x512xf32> to vector<8x128xf32>
      %250 = arith.negf %249 : vector<8x128xf32>
      %251 = math.exp %250 : vector<8x128xf32>
      %cst_154 = arith.constant 1.000000e+00 : f32
      %252 = vector.broadcast %cst_154 : f32 to vector<8x128xf32>
      %253 = arith.addf %252, %251 : vector<8x128xf32>
      %254 = arith.divf %252, %253 : vector<8x128xf32>
      %255 = vector.extract_strided_slice %248 {offsets = [0, 128], sizes = [8, 128], strides = [1, 1]} : vector<8x512xf32> to vector<8x128xf32>
      %256 = arith.negf %255 : vector<8x128xf32>
      %257 = math.exp %256 : vector<8x128xf32>
      %cst_155 = arith.constant 1.000000e+00 : f32
      %258 = vector.broadcast %cst_155 : f32 to vector<8x128xf32>
      %259 = arith.addf %258, %257 : vector<8x128xf32>
      %260 = arith.divf %258, %259 : vector<8x128xf32>
      %261 = vector.extract_strided_slice %248 {offsets = [0, 256], sizes = [8, 128], strides = [1, 1]} : vector<8x512xf32> to vector<8x128xf32>
      %262 = math.tanh %261 : vector<8x128xf32>
      %263 = vector.extract_strided_slice %248 {offsets = [0, 384], sizes = [8, 128], strides = [1, 1]} : vector<8x512xf32> to vector<8x128xf32>
      %264 = arith.negf %263 : vector<8x128xf32>
      %265 = math.exp %264 : vector<8x128xf32>
      %cst_156 = arith.constant 1.000000e+00 : f32
      %266 = vector.broadcast %cst_156 : f32 to vector<8x128xf32>
      %267 = arith.addf %266, %265 : vector<8x128xf32>
      %268 = arith.divf %266, %267 : vector<8x128xf32>
      %269 = arith.mulf %260, %194 : vector<8x128xf32>
      %270 = arith.mulf %254, %262 : vector<8x128xf32>
      %271 = arith.addf %269, %270 : vector<8x128xf32>
      %272 = math.tanh %271 : vector<8x128xf32>
      %273 = arith.mulf %268, %272 : vector<8x128xf32>
      %cst_157 = arith.constant dense<0.000000e+00> : vector<8xf32>
      %274 = vector.multi_reduction <add>, %273, %cst_157 [1] : vector<8x128xf32> to vector<8xf32>
      %275 = vector.shape_cast %274 : vector<8xf32> to vector<8x1xf32>
      %cst_158 = arith.constant 3.125000e-02 : f32
      %276 = vector.broadcast %cst_158 : f32 to vector<8x1xf32>
      %277 = arith.mulf %275, %276 : vector<8x1xf32>
      %278 = arith.mulf %273, %273 : vector<8x128xf32>
      %cst_159 = arith.constant dense<0.000000e+00> : vector<8xf32>
      %279 = vector.multi_reduction <add>, %278, %cst_159 [1] : vector<8x128xf32> to vector<8xf32>
      %280 = vector.shape_cast %279 : vector<8xf32> to vector<8x1xf32>
      %cst_160 = arith.constant 3.200000e+01 : f32
      %281 = vector.broadcast %cst_160 : f32 to vector<8x1xf32>
      %282 = arith.mulf %281, %277 : vector<8x1xf32>
      %283 = arith.mulf %282, %277 : vector<8x1xf32>
      %284 = arith.subf %280, %283 : vector<8x1xf32>
      %cst_161 = arith.constant 0.0322580636 : f32
      %285 = vector.broadcast %cst_161 : f32 to vector<8x1xf32>
      %286 = arith.mulf %284, %285 : vector<8x1xf32>
      %cst_162 = arith.constant 0.000000e+00 : f32
      %287 = vector.broadcast %cst_162 : f32 to vector<8x1xf32>
      %288 = arith.maximumf %286, %287 : vector<8x1xf32>
      %289 = vector.broadcast %277 : vector<8x1xf32> to vector<8x128xf32>
      %290 = arith.subf %273, %289 : vector<8x128xf32>
      %291 = vector.broadcast %16 : vector<1x128xf32> to vector<8x128xf32>
      %292 = arith.mulf %291, %290 : vector<8x128xf32>
      %293 = math.sqrt %288 : vector<8x1xf32>
      %cst_163 = arith.constant 9.99999997E-7 : f32
      %294 = vector.broadcast %cst_163 : f32 to vector<8x1xf32>
      %295 = arith.addf %293, %294 : vector<8x1xf32>
      %296 = vector.broadcast %295 : vector<8x1xf32> to vector<8x128xf32>
      %297 = arith.divf %292, %296 : vector<8x128xf32>
      %298 = vector.broadcast %17 : vector<1x128xf32> to vector<8x128xf32>
      %299 = arith.addf %297, %298 : vector<8x128xf32>
      %cst_164 = arith.constant dense<0.000000e+00> : vector<8xf32>
      %300 = vector.multi_reduction <add>, %271, %cst_164 [1] : vector<8x128xf32> to vector<8xf32>
      %301 = vector.shape_cast %300 : vector<8xf32> to vector<8x1xf32>
      %cst_165 = arith.constant 3.125000e-02 : f32
      %302 = vector.broadcast %cst_165 : f32 to vector<8x1xf32>
      %303 = arith.mulf %301, %302 : vector<8x1xf32>
      %304 = arith.mulf %271, %271 : vector<8x128xf32>
      %cst_166 = arith.constant dense<0.000000e+00> : vector<8xf32>
      %305 = vector.multi_reduction <add>, %304, %cst_166 [1] : vector<8x128xf32> to vector<8xf32>
      %306 = vector.shape_cast %305 : vector<8xf32> to vector<8x1xf32>
      %cst_167 = arith.constant 3.200000e+01 : f32
      %307 = vector.broadcast %cst_167 : f32 to vector<8x1xf32>
      %308 = arith.mulf %307, %303 : vector<8x1xf32>
      %309 = arith.mulf %308, %303 : vector<8x1xf32>
      %310 = arith.subf %306, %309 : vector<8x1xf32>
      %cst_168 = arith.constant 0.0322580636 : f32
      %311 = vector.broadcast %cst_168 : f32 to vector<8x1xf32>
      %312 = arith.mulf %310, %311 : vector<8x1xf32>
      %cst_169 = arith.constant 0.000000e+00 : f32
      %313 = vector.broadcast %cst_169 : f32 to vector<8x1xf32>
      %314 = arith.maximumf %312, %313 : vector<8x1xf32>
      %315 = vector.broadcast %303 : vector<8x1xf32> to vector<8x128xf32>
      %316 = arith.subf %271, %315 : vector<8x128xf32>
      %317 = vector.broadcast %18 : vector<1x128xf32> to vector<8x128xf32>
      %318 = arith.mulf %317, %316 : vector<8x128xf32>
      %319 = math.sqrt %314 : vector<8x1xf32>
      %cst_170 = arith.constant 9.99999997E-7 : f32
      %320 = vector.broadcast %cst_170 : f32 to vector<8x1xf32>
      %321 = arith.addf %319, %320 : vector<8x1xf32>
      %322 = vector.broadcast %321 : vector<8x1xf32> to vector<8x128xf32>
      %323 = arith.divf %318, %322 : vector<8x128xf32>
      %324 = vector.broadcast %19 : vector<1x128xf32> to vector<8x128xf32>
      %325 = arith.addf %323, %324 : vector<8x128xf32>
      %326 = arith.truncf %299 : vector<8x128xf32> to vector<8x128xbf16>
      %c0_171 = arith.constant 0 : index
      %c0_172 = arith.constant 0 : index
      %327 = vector.load %arg10[%c0_171, %c0_172] : memref<128x128xbf16, #tpu.memory_space<vmem>>, vector<128x128xbf16>
      %cst_173 = arith.constant dense<0.000000e+00> : vector<8x128xf32>
      %328 = tpu.matmul %326, %327, %cst_173 {dimension_numbers = #tpu.dot_dimension_numbers<[1], [0], [0], [1], [0, 0, 1, 1], [], []>} : vector<8x128xbf16>, vector<128x128xbf16>, vector<8x128xf32> -> vector<8x128xf32>
      %329 = vector.broadcast %10 : vector<1x128xf32> to vector<8x128xf32>
      %330 = arith.addf %328, %329 : vector<8x128xf32>
      %cst_174 = arith.constant 0.000000e+00 : f32
      %331 = vector.broadcast %cst_174 : f32 to vector<8x128xf32>
      %332 = arith.maximumf %330, %331 : vector<8x128xf32>
      %333 = vector.broadcast %11 : vector<1x128xf32> to vector<8x128xf32>
      %334 = arith.mulf %332, %333 : vector<8x128xf32>
      %cst_175 = arith.constant dense<0.000000e+00> : vector<8xf32>
      %335 = vector.multi_reduction <add>, %334, %cst_175 [1] : vector<8x128xf32> to vector<8xf32>
      %336 = vector.shape_cast %335 : vector<8xf32> to vector<8x1xf32>
      %337 = vector.broadcast %12 : vector<1x1xf32> to vector<8x1xf32>
      %338 = arith.addf %336, %337 : vector<8x1xf32>
      %339 = arith.negf %338 : vector<8x1xf32>
      %340 = math.exp %339 : vector<8x1xf32>
      %cst_176 = arith.constant 1.000000e+00 : f32
      %341 = vector.broadcast %cst_176 : f32 to vector<8x1xf32>
      %342 = arith.addf %341, %340 : vector<8x1xf32>
      %343 = arith.divf %341, %342 : vector<8x1xf32>
      %cst_177 = arith.constant 1.000000e+00 : f32
      %344 = vector.broadcast %cst_177 : f32 to vector<8x1xf32>
      %345 = arith.subf %344, %192 : vector<8x1xf32>
      %346 = arith.mulf %343, %345 : vector<8x1xf32>
      %347 = arith.mulf %346, %191 : vector<8x1xf32>
      %348 = arith.addf %192, %347 : vector<8x1xf32>
      %cst_178 = arith.constant 0.899999976 : f32
      %349 = vector.broadcast %cst_178 : f32 to vector<8x1xf32>
      %350 = arith.cmpf olt, %348, %349 : vector<8x1xf32>
      %351 = arith.extui %350 : vector<8x1xi1> to vector<8x1xi32>
      %352 = arith.sitofp %351 : vector<8x1xi32> to vector<8x1xf32>
      %353 = arith.mulf %352, %191 : vector<8x1xf32>
      %c0_179 = arith.constant 0 : index
      %c0_180 = arith.constant 0 : index
      %354 = vector.load %arg38[%c0_179, %c0_180] : memref<8x128xf32, #tpu.memory_space<vmem>>, vector<8x128xf32>
      tpu.vector_store %arg38[%c0_179, %c0_180], %299 {strides = array<i32>} : memref<8x128xf32, #tpu.memory_space<vmem>>, vector<8x128xf32>,
      %c0_181 = arith.constant 0 : index
      %c0_182 = arith.constant 0 : index
      %355 = vector.load %arg39[%c0_181, %c0_182] : memref<8x128xf32, #tpu.memory_space<vmem>>, vector<8x128xf32>
      tpu.vector_store %arg39[%c0_181, %c0_182], %325 {strides = array<i32>} : memref<8x128xf32, #tpu.memory_space<vmem>>, vector<8x128xf32>,
      %c0_183 = arith.constant 0 : index
      %c0_184 = arith.constant 0 : index
      %356 = vector.load %arg34[%c0_183, %c0_184] : memref<8x1xf32, #tpu.memory_space<vmem>>, vector<8x1xf32>
      tpu.vector_store %arg34[%c0_183, %c0_184], %348 {strides = array<i32>} : memref<8x1xf32, #tpu.memory_space<vmem>>, vector<8x1xf32>,
      %c0_185 = arith.constant 0 : index
      %c0_186 = arith.constant 0 : index
      %357 = vector.load %arg35[%c0_185, %c0_186] : memref<8x1xf32, #tpu.memory_space<vmem>>, vector<8x1xf32>
      tpu.vector_store %arg35[%c0_185, %c0_186], %353 {strides = array<i32>} : memref<8x1xf32, #tpu.memory_space<vmem>>, vector<8x1xf32>,
      %c0_187 = arith.constant 0 : index
      %c0_188 = arith.constant 0 : index
      %358 = vector.load %arg36[%c0_187, %c0_188] : memref<8x128xf32, #tpu.memory_space<vmem>>, vector<8x128xf32>
      %359 = vector.broadcast %346 : vector<8x1xf32> to vector<8x128xf32>
      %360 = arith.mulf %359, %299 : vector<8x128xf32>
      %361 = vector.broadcast %191 : vector<8x1xf32> to vector<8x128xf32>
      %362 = arith.mulf %360, %361 : vector<8x128xf32>
      %363 = arith.addf %358, %362 : vector<8x128xf32>
      %c0_189 = arith.constant 0 : index
      %c0_190 = arith.constant 0 : index
      %364 = vector.load %arg36[%c0_189, %c0_190] : memref<8x128xf32, #tpu.memory_space<vmem>>, vector<8x128xf32>
      tpu.vector_store %arg36[%c0_189, %c0_190], %363 {strides = array<i32>} : memref<8x128xf32, #tpu.memory_space<vmem>>, vector<8x128xf32>,
      %c0_191 = arith.constant 0 : index
      %c0_192 = arith.constant 0 : index
      %365 = vector.load %arg37[%c0_191, %c0_192] : memref<8x128xf32, #tpu.memory_space<vmem>>, vector<8x128xf32>
      %366 = vector.broadcast %346 : vector<8x1xf32> to vector<8x128xf32>
      %367 = arith.mulf %366, %325 : vector<8x128xf32>
      %368 = vector.broadcast %191 : vector<8x1xf32> to vector<8x128xf32>
      %369 = arith.mulf %367, %368 : vector<8x128xf32>
      %370 = arith.addf %365, %369 : vector<8x128xf32>
      %c0_193 = arith.constant 0 : index
      %c0_194 = arith.constant 0 : index
      %371 = vector.load %arg37[%c0_193, %c0_194] : memref<8x128xf32, #tpu.memory_space<vmem>>, vector<8x128xf32>
      tpu.vector_store %arg37[%c0_193, %c0_194], %370 {strides = array<i32>} : memref<8x128xf32, #tpu.memory_space<vmem>>, vector<8x128xf32>,
      %c0_195 = arith.constant 0 : index
      %c0_196 = arith.constant 0 : index
      %372 = vector.load %arg32[%c0_195, %c0_196] : memref<8x1xf32, #tpu.memory_space<vmem>>, vector<8x1xf32>
      %373 = arith.addf %372, %191 : vector<8x1xf32>
      %c0_197 = arith.constant 0 : index
      %c0_198 = arith.constant 0 : index
      %374 = vector.load %arg32[%c0_197, %c0_198] : memref<8x1xf32, #tpu.memory_space<vmem>>, vector<8x1xf32>
      tpu.vector_store %arg32[%c0_197, %c0_198], %373 {strides = array<i32>} : memref<8x1xf32, #tpu.memory_space<vmem>>, vector<8x1xf32>,
      %c0_199 = arith.constant 0 : index
      %c0_200 = arith.constant 0 : index
      %375 = vector.load %arg33[%c0_199, %c0_200] : memref<8x1xf32, #tpu.memory_space<vmem>>, vector<8x1xf32>
      %cst_201 = arith.constant 1.000000e+00 : f32
      %376 = vector.broadcast %cst_201 : f32 to vector<8x1xf32>
      %377 = arith.subf %376, %343 : vector<8x1xf32>
      %cst_202 = arith.constant 4.000000e+00 : f32
      %378 = vector.broadcast %cst_202 : f32 to vector<8x1xf32>
      %379 = arith.mulf %378, %377 : vector<8x1xf32>
      %cst_203 = arith.constant 1.000000e+00 : f32
      %380 = vector.broadcast %cst_203 : f32 to vector<8x1xf32>
      %381 = arith.addf %380, %379 : vector<8x1xf32>
      %382 = arith.mulf %381, %191 : vector<8x1xf32>
      %383 = arith.addf %375, %382 : vector<8x1xf32>
      %c0_204 = arith.constant 0 : index
      %c0_205 = arith.constant 0 : index
      %384 = vector.load %arg33[%c0_204, %c0_205] : memref<8x1xf32, #tpu.memory_space<vmem>>, vector<8x1xf32>
      tpu.vector_store %arg33[%c0_204, %c0_205], %383 {strides = array<i32>} : memref<8x1xf32, #tpu.memory_space<vmem>>, vector<8x1xf32>,
      %385 = vector.shape_cast %353 : vector<8x1xf32> to vector<1x8x1xf32>
      %cst_206 = arith.constant dense<0xFF800000> : vector<1xf32>
      %386 = vector.multi_reduction <maximumf>, %385, %cst_206 [1, 2] : vector<1x8x1xf32> to vector<1xf32>
      %387 = vector.shape_cast %386 : vector<1xf32> to vector<1x1x1xf32>
      %388 = vector.extract %387[0, 0, 0] : f32 from vector<1x1x1xf32>
      %c0_207 = arith.constant 0 : index
      %389 = memref.load %arg40[%c0_207] : memref<1xf32, #tpu.memory_space<smem>>
      memref.store %388, %arg40[%c0_207] : memref<1xf32, #tpu.memory_space<smem>>
    } else {
    }
    %c0_95 = arith.constant 0 : index
    %c0_96 = arith.constant 0 : index
    %157 = vector.load %arg34[%c0_95, %c0_96] : memref<8x1xf32, #tpu.memory_space<vmem>>, vector<8x1xf32>
    %cst_97 = arith.constant 1.000000e+00 : f32
    %158 = vector.broadcast %cst_97 : f32 to vector<8x1xf32>
    %159 = arith.divf %158, %157 : vector<8x1xf32>
    %c0_98 = arith.constant 0 : index
    %c0_99 = arith.constant 0 : index
    %160 = vector.load %arg36[%c0_98, %c0_99] : memref<8x128xf32, #tpu.memory_space<vmem>>, vector<8x128xf32>
    %161 = vector.broadcast %159 : vector<8x1xf32> to vector<8x128xf32>
    %162 = arith.mulf %160, %161 : vector<8x128xf32>
    %c0_100 = arith.constant 0 : index
    %c0_101 = arith.constant 0 : index
    %163 = vector.load %arg37[%c0_100, %c0_101] : memref<8x128xf32, #tpu.memory_space<vmem>>, vector<8x128xf32>
    %164 = vector.broadcast %159 : vector<8x1xf32> to vector<8x128xf32>
    %165 = arith.mulf %163, %164 : vector<8x128xf32>
    %166 = vector.broadcast %121 : f32 to vector<8x128xf32>
    %167 = arith.mulf %166, %162 : vector<8x128xf32>
    %cst_102 = arith.constant 1.000000e+00 : f32
    %168 = arith.subf %cst_102, %121 : f32
    %169 = vector.broadcast %168 : f32 to vector<8x128xf32>
    %170 = arith.mulf %169, %89 : vector<8x128xf32>
    %171 = arith.addf %167, %170 : vector<8x128xf32>
    %172 = vector.broadcast %121 : f32 to vector<8x128xf32>
    %173 = arith.mulf %172, %165 : vector<8x128xf32>
    %cst_103 = arith.constant 1.000000e+00 : f32
    %174 = arith.subf %cst_103, %121 : f32
    %175 = vector.broadcast %174 : f32 to vector<8x128xf32>
    %176 = arith.mulf %175, %7 : vector<8x128xf32>
    %177 = arith.addf %173, %176 : vector<8x128xf32>
    %c0_104 = arith.constant 0 : index
    %c0_105 = arith.constant 0 : index
    %178 = vector.load %arg29[%c0_104, %c0_105] : memref<8x128xf32, #tpu.memory_space<vmem>>, vector<8x128xf32>
    tpu.vector_store %arg29[%c0_104, %c0_105], %171 {strides = array<i32>} : memref<8x128xf32, #tpu.memory_space<vmem>>, vector<8x128xf32>,
    %c0_106 = arith.constant 0 : index
    %c0_107 = arith.constant 0 : index
    %c0_108 = arith.constant 0 : index
    %179 = vector.load %arg30[%c0_106, %c0_107, %c0_108] : memref<2x8x128xf32, #tpu.memory_space<vmem>>, vector<1x8x128xf32>
    %180 = vector.shape_cast %179 : vector<1x8x128xf32> to vector<8x128xf32>
    %181 = vector.shape_cast %89 : vector<8x128xf32> to vector<1x8x128xf32>
    tpu.vector_store %arg30[%c0_106, %c0_107, %c0_108], %181 {strides = array<i32>} : memref<2x8x128xf32, #tpu.memory_space<vmem>>, vector<1x8x128xf32>,
    %c1_109 = arith.constant 1 : index
    %c0_110 = arith.constant 0 : index
    %c0_111 = arith.constant 0 : index
    %182 = vector.load %arg30[%c1_109, %c0_110, %c0_111] : memref<2x8x128xf32, #tpu.memory_space<vmem>>, vector<1x8x128xf32>
    %183 = vector.shape_cast %182 : vector<1x8x128xf32> to vector<8x128xf32>
    %184 = vector.shape_cast %171 : vector<8x128xf32> to vector<1x8x128xf32>
    tpu.vector_store %arg30[%c1_109, %c0_110, %c0_111], %184 {strides = array<i32>} : memref<2x8x128xf32, #tpu.memory_space<vmem>>, vector<1x8x128xf32>,
    %c0_112 = arith.constant 0 : index
    %c0_113 = arith.constant 0 : index
    %c0_114 = arith.constant 0 : index
    %185 = vector.load %arg31[%c0_112, %c0_113, %c0_114] : memref<2x8x128xf32, #tpu.memory_space<vmem>>, vector<1x8x128xf32>
    %186 = vector.shape_cast %185 : vector<1x8x128xf32> to vector<8x128xf32>
    %187 = vector.shape_cast %61 : vector<8x128xf32> to vector<1x8x128xf32>
    tpu.vector_store %arg31[%c0_112, %c0_113, %c0_114], %187 {strides = array<i32>} : memref<2x8x128xf32, #tpu.memory_space<vmem>>, vector<1x8x128xf32>,
    %c1_115 = arith.constant 1 : index
    %c0_116 = arith.constant 0 : index
    %c0_117 = arith.constant 0 : index
    %188 = vector.load %arg31[%c1_115, %c0_116, %c0_117] : memref<2x8x128xf32, #tpu.memory_space<vmem>>, vector<1x8x128xf32>
    %189 = vector.shape_cast %188 : vector<1x8x128xf32> to vector<8x128xf32>
    %190 = vector.shape_cast %177 : vector<8x128xf32> to vector<1x8x128xf32>
    tpu.vector_store %arg31[%c1_115, %c0_116, %c0_117], %190 {strides = array<i32>} : memref<2x8x128xf32, #tpu.memory_space<vmem>>, vector<1x8x128xf32>,
    return
  }
}

</mosaic_0001>

<bundles_post_ra>
// kernel: aat_core_forward.1
= control target key start
LH: loop header
LB: loop body
LE: loop exit
PB: predicated region body
PF: predicated region fallthrough
CT: control target
= control target key end

     0   :  { %s9854_s3 = smov 2   ;;  %s9855_s7 = smov 3   ;;  %s11964_s0 = inlined_call_operand.smem [shape: u32[34], index: -1, kind: input, shape index: {}] }
   0x1   :  { %s9903_s6 = sld [smem:[%s11964_s0 + %s9854_s3]]   ;;  %s9856_s11 = smov 7  }
   0x2   :  { %s9908_s10 = sld [smem:[%s11964_s0 + %s9855_s7]]   ;;  %s9857_s15 = smov 14  }
   0x3   :  { %s9913_s14 = sld [smem:[%s11964_s0 + %s9856_s11]]   ;;  %s9858_s19 = smov 17  }
   0x4   :  { %s9918_s18 = sld [smem:[%s11964_s0 + %s9857_s15]]   ;;  %s9859_s23 = smov 18  }
   0x5   :  { %s9923_s22 = sld [smem:[%s11964_s0 + %s9858_s19]]   ;;  %s9860_s27 = smov 19  }
   0x6   :  { %s6802_s26 = sld [smem:[%s11964_s0 + %s9859_s23]]   ;;  %s9861_s1 = smov 20  }
   0x7   :  { %s6803_s30 = sld [smem:[%s11964_s0 + %s9860_s27]]   ;;  %s9862_s5 = smov 21  }
   0x8   :  { %s9934_s4 = sld [smem:[%s11964_s0 + %s9861_s1]]   ;;  %s9863_s11 = smov 22  }
   0x9   :  { %s9939_s9 = sld [smem:[%s11964_s0 + %s9862_s5]]   ;;  %v6934_v0 = vld [vmem:[%s9913_s14 + $0xe0] sm:$0xf]  ;;  %v8793_v1 = vld [vmem:[%s9913_s14 + $0xec] sm:$0xf0]  ;;  %v8791_v3 = vld [vmem:[%s9913_s14 + $0xe4] sm:$0xf] }
   0xa   :  { %s9946_s15 = sld [smem:[%s11964_s0 + %s9863_s11]]   ;;  %v6935_v2 = vor.u32 %v8793_v1, %v6934_v0  ;;  %v6936_v4 = vld [vmem:[%s9913_s14 + $0xf0] sm:$0xf0]  ;;  %s9864_s16 = smov 23   ;;  %v6942_v6 = vld [vmem:[%s9913_s14 + $0xe8] sm:$0xf] }
   0xb   :  { %s9953_s20 = sld [smem:[%s11964_s0 + %s9864_s16]]   ;;  %v6939_v5 = vor.u32 %v8791_v3, %v6936_v4  ;;  %v8794_v7 = vld [vmem:[%s9913_s14 + $0xf4] sm:$0xf0]  ;;  %s9865_s21 = smov 24   ;;  %v8792_v10 = vld [vmem:[%s9913_s14 + $0xec] sm:$0xf] }
   0xc   :  { %s9960_s25 = sld [smem:[%s11964_s0 + %s9865_s21]]   ;;  %v9962_v8 = vld [vmem:[%s6802_s26] sm:$0x1]  ;;  %381 = vmatpush.bf16.msra.mxu0 %v6935_v2  ;;  %v6943_v9 = vor.u32 %v8794_v7, %v6942_v6  ;;  %s9866_s27 = smov 27   ;;  %v6944_v12 = vld [vmem:[%s9913_s14 + $0xf8] sm:$0xf0] }
   0xd   :  { %s9968_s1 = sld [smem:[%s11964_s0 + %s9866_s27]]   ;;  %v9970_v11 = vld [vmem:[%s6803_s30] sm:$0x1]  ;;  %394 = vmatpush.bf16.msra.mxu1 %v6939_v5  ;;  %s9867_s2 = smov 28   ;;  %v6947_v14 = vor.u32 %v8792_v10, %v6944_v12  ;;  %v8789_v16 = vld [vmem:[%s9913_s14 + $0xcc] sm:$0xf0] }
   0xe   :  { %s9976_s26 = sld [smem:[%s11964_s0 + %s9867_s2]]   ;;  %v75_v13 = vstv %s9934_s4  ;;  %407 = vmatpush.bf16.msra.mxu2 %v6943_v9  ;;  %v6918_v15 = vld [vmem:[%s9913_s14 + $0xc0] sm:$0xf]  ;;  %s9868_s7 = smov 29   ;;  %v8787_v18 = vld [vmem:[%s9913_s14 + $0xc4] sm:$0xf] }
   0xf   :  { %s9984_s11 = sld [smem:[%s11964_s0 + %s9868_s7]]   ;;  %76 = vst [vmem:[#allocation10] sm:$0x1] %v75_v13  ;;  %v6919_v17 = vor.u32 %v8789_v16, %v6918_v15  ;;  %s9869_s12 = smov 30   ;;  %420 = vmatpush.bf16.msra.mxu3 %v6947_v14  ;;  %v6920_v19 = vld [vmem:[%s9913_s14 + $0xd0] sm:$0xf0] }
  0x10   :  { %s9990_s16 = sld [smem:[%s11964_s0 + %s9869_s12]]   ;;  %v6926_v20 = vld [vmem:[%s9913_s14 + $0xc8] sm:$0xf]  ;;  %v8790_v21 = vld [vmem:[%s9913_s14 + $0xd4] sm:$0xf0]  ;;  %s9870_s17 = smov 31   ;;  %v6923_v22 = vor.u32 %v8787_v18, %v6920_v19 }
  0x11   :  { %s9998_s23 = sld [smem:[%s11964_s0 + %s9870_s17]]   ;;  %382 = vmatpush.bf16.msra.mxu0 %v6919_v17  ;;  %v6927_v23 = vor.u32 %v8790_v21, %v6926_v20  ;;  %v8788_v24 = vld [vmem:[%s9913_s14 + $0xcc] sm:$0xf]  ;;  %v6928_v25 = vld [vmem:[%s9913_s14 + $0xd8] sm:$0xf0]  ;;  %v6902_v26 = vld [vmem:[%s9913_s14 + $0xa0] sm:$0xf] }
  0x12   :  { %v6931_v27 = vor.u32 %v8788_v24, %v6928_v25  ;;  %v8785_v28 = vld [vmem:[%s9913_s14 + $0xac] sm:$0xf0]  ;;  %v8783_v29 = vld [vmem:[%s9913_s14 + $0xa4] sm:$0xf]  ;;  %v6904_v30 = vld [vmem:[%s9913_s14 + $0xb0] sm:$0xf0]  ;;  %395 = vmatpush.bf16.msra.mxu1 %v6923_v22  ;;  %s1_s28 = sld [smem:[%s11964_s0]]  }
  0x13   :  { %v10007_v31 = vld [vmem:[%s9968_s1] sm:$0x1]  ;;  %408 = vmatpush.bf16.msra.mxu2 %v6927_v23  ;;  %v6903_v32 = vor.u32 %v8785_v28, %v6902_v26  ;;  %v6907_v33 = vor.u32 %v8783_v29, %v6904_v30  ;;  %v6910_v34 = vld [vmem:[%s9913_s14 + $0xa8] sm:$0xf]  ;;  %v8786_v35 = vld [vmem:[%s9913_s14 + $0xb4] sm:$0xf0] }
  0x14   :  { %v10012_v36 = vld [vmem:[%s9976_s26] sm:$0x1]  ;;  %421 = vmatpush.bf16.msra.mxu3 %v6931_v27  ;;  %v6911_v37 = vor.u32 %v8786_v35, %v6910_v34  ;;  %v8784_v38 = vld [vmem:[%s9913_s14 + $0xac] sm:$0xf]  ;;  %v6912_v39 = vld [vmem:[%s9913_s14 + $0xb8] sm:$0xf0] }
  0x15   :  { %383 = vmatpush.bf16.msra.mxu0 %v6903_v32  ;;  %v6915_v40 = vor.u32 %v8784_v38, %v6912_v39  ;;  %v6886_v41 = vld [vmem:[%s9913_s14 + $0x80] sm:$0xf]  ;;  %v8781_v42 = vld [vmem:[%s9913_s14 + $0x8c] sm:$0xf0]  ;;  %v8779_v43 = vld [vmem:[%s9913_s14 + $0x84] sm:$0xf] }
  0x16   :  { %v10019_v44 = vld [vmem:[#allocation10] sm:$0x1]  ;;  %v6887_v45 = vor.u32 %v8781_v42, %v6886_v41  ;;  %v6888_v46 = vld [vmem:[%s9913_s14 + $0x90] sm:$0xf0]  ;;  %v6894_v47 = vld [vmem:[%s9913_s14 + $0x88] sm:$0xf]  ;;  %396 = vmatpush.bf16.msra.mxu1 %v6907_v33 }
  0x17   :  { %409 = vmatpush.bf16.msra.mxu2 %v6911_v37  ;;  %v6891_v48 = vor.u32 %v8779_v43, %v6888_v46  ;;  %v8782_v49 = vld [vmem:[%s9913_s14 + $0x94] sm:$0xf0]  ;;  %v8780_v50 = vld [vmem:[%s9913_s14 + $0x8c] sm:$0xf]  ;;  %v6896_v51 = vld [vmem:[%s9913_s14 + $0x98] sm:$0xf0] }
  0x18   :  { %422 = vmatpush.bf16.msra.mxu3 %v6915_v40  ;;  %v6895_v52 = vor.u32 %v8782_v49, %v6894_v47  ;;  %v6899_v53 = vor.u32 %v8780_v50, %v6896_v51  ;;  %v6870_v54 = vld [vmem:[%s9913_s14 + $0x60] sm:$0xf]  ;;  %v8777_v55 = vld [vmem:[%s9913_s14 + $0x6c] sm:$0xf0]  ;;  %v8775_v56 = vld [vmem:[%s9913_s14 + $0x64] sm:$0xf] }
  0x19   :  { %384 = vmatpush.bf16.msra.mxu0 %v6887_v45  ;;  %v6871_v57 = vor.u32 %v8777_v55, %v6870_v54  ;;  %v6872_v58 = vld [vmem:[%s9913_s14 + $0x70] sm:$0xf0]  ;;  %v6878_v59 = vld [vmem:[%s9913_s14 + $0x68] sm:$0xf]  ;;  %v8778_v60 = vld [vmem:[%s9913_s14 + $0x74] sm:$0xf0] }
  0x1a   :  { %v8776_v61 = vld [vmem:[%s9913_s14 + $0x6c] sm:$0xf]  ;;  %v6880_v62 = vld [vmem:[%s9913_s14 + $0x78] sm:$0xf0]  ;;  %v6854_v63 = vld [vmem:[%s9913_s14 + $0x40] sm:$0xf]  ;;  %397 = vmatpush.bf16.msra.mxu1 %v6891_v48  ;;  %v6875_v0 = vor.u32 %v8775_v56, %v6872_v58  ;;  %v6879_v1 = vor.u32 %v8778_v60, %v6878_v59 }
  0x1b   :  { %410 = vmatpush.bf16.msra.mxu2 %v6895_v52  ;;  %v8773_v2 = vld [vmem:[%s9913_s14 + $0x4c] sm:$0xf0]  ;;  %v8771_v3 = vld [vmem:[%s9913_s14 + $0x44] sm:$0xf]  ;;  %v6883_v4 = vor.u32 %v8776_v61, %v6880_v62  ;;  %v6856_v5 = vld [vmem:[%s9913_s14 + $0x50] sm:$0xf0] }
  0x1c   :  { %423 = vmatpush.bf16.msra.mxu3 %v6899_v53  ;;  %v6862_v6 = vld [vmem:[%s9913_s14 + $0x48] sm:$0xf]  ;;  %v8774_v7 = vld [vmem:[%s9913_s14 + $0x54] sm:$0xf0]  ;;  %v6855_v9 = vor.u32 %v8773_v2, %v6854_v63  ;;  %v8772_v10 = vld [vmem:[%s9913_s14 + $0x4c] sm:$0xf]  ;;  %v6859_v15 = vor.u32 %v8771_v3, %v6856_v5 }
  0x1d   :  { %385 = vmatpush.bf16.msra.mxu0 %v6871_v57  ;;  %v6864_v12 = vld [vmem:[%s9913_s14 + $0x58] sm:$0xf0]  ;;  %v6838_v13 = vld [vmem:[%s9913_s14 + $0x20] sm:$0xf]  ;;  %v8769_v14 = vld [vmem:[%s9913_s14 + $0x2c] sm:$0xf0]  ;;  %v6863_v16 = vor.u32 %v8774_v7, %v6862_v6 }
  0x1e   :  { %398 = vmatpush.bf16.msra.mxu1 %v6875_v0  ;;  %v8767_v17 = vld [vmem:[%s9913_s14 + $0x24] sm:$0xf]  ;;  %v6867_v18 = vor.u32 %v8772_v10, %v6864_v12  ;;  %v6840_v19 = vld [vmem:[%s9913_s14 + $0x30] sm:$0xf0]  ;;  %v6846_v20 = vld [vmem:[%s9913_s14 + $0x28] sm:$0xf]  ;;  %v6839_v22 = vor.u32 %v8769_v14, %v6838_v13 }
  0x1f   :  { %411 = vmatpush.bf16.msra.mxu2 %v6879_v1  ;;  %v8770_v21 = vld [vmem:[%s9913_s14 + $0x34] sm:$0xf0]  ;;  %v8768_v23 = vld [vmem:[%s9913_s14 + $0x2c] sm:$0xf]  ;;  %v6848_v24 = vld [vmem:[%s9913_s14 + $0x38] sm:$0xf0]  ;;  %v6843_v27 = vor.u32 %v8767_v17, %v6840_v19 }
  0x20   :  { %424 = vmatpush.bf16.msra.mxu3 %v6883_v4  ;;  %v6822_v25 = vld [vmem:[%s9913_s14] sm:$0xf]  ;;  %v8765_v26 = vld [vmem:[%s9913_s14 + $0xc] sm:$0xf0]  ;;  %v6847_v28 = vor.u32 %v8770_v21, %v6846_v20  ;;  %v8763_v29 = vld [vmem:[%s9913_s14 + $0x4] sm:$0xf]  ;;  %v6851_v30 = vor.u32 %v8768_v23, %v6848_v24 }
  0x21   :  { %386 = vmatpush.bf16.msra.mxu0 %v6855_v9  ;;  %s9871_s29 = smov 6   ;;  %v6824_v32 = vld [vmem:[%s9913_s14 + $0x10] sm:$0xf0]  ;;  %v6830_v33 = vld [vmem:[%s9913_s14 + $0x8] sm:$0xf]  ;;  %v6823_v35 = vor.u32 %v8765_v26, %v6822_v25  ;;  %v141_v42 = vld [vmem:[%s1_s28] sm:$0xff] }
  0x22   :  { %399 = vmatpush.bf16.msra.mxu1 %v6859_v15  ;;  %s10059_s3 = sld [smem:[%s11964_s0 + %s9871_s29]]   ;;  %v8766_v34 = vld [vmem:[%s9913_s14 + $0x14] sm:$0xf0]  ;;  %v8764_v37 = vld [vmem:[%s9913_s14 + $0xc] sm:$0xf]  ;;  %v6832_v38 = vld [vmem:[%s9913_s14 + $0x18] sm:$0xf0]  ;;  %v6827_v39 = vor.u32 %v8763_v29, %v6824_v32  ;;  %v188_v51 = vpack.c.bf16 %v141_v42, %v141_v42 }
  0x23   :  { %412 = vmatpush.bf16.msra.mxu2 %v6863_v16  ;;  %v6831_v40 = vor.u32 %v8766_v34, %v6830_v33  ;;  %v6835_v41 = vor.u32 %v8764_v37, %v6832_v38  ;;  %s9872_s14 = smov 1   ;;  %s9873_s8 = smov 4  }
  0x24   :  { %425 = vmatpush.bf16.msra.mxu3 %v6867_v18  ;;  %s10109_s7 = sld [smem:[%s11964_s0 + %s9872_s14]]   ;;  %s9874_s4 = smov 8  }
  0x25   :  { %387 = vmatpush.bf16.msra.mxu0 %v6839_v22  ;;  %s10117_s13 = sld [smem:[%s11964_s0 + %s9873_s8]]   ;;  %s9875_s24 = smov 25  }
  0x26   :  { %400 = vmatpush.bf16.msra.mxu1 %v6843_v27  ;;  %s10127_s21 = sld [smem:[%s11964_s0 + %s9874_s4]]   ;;  %s9876_s1 = smov 9  }
  0x27   :  { %413 = vmatpush.bf16.msra.mxu2 %v6847_v28  ;;  %s10215_s29 = sld [smem:[%s11964_s0 + %s9875_s24]]   ;;  %s9877_s5 = smov 5  }
  0x28   :  { %426 = vmatpush.bf16.msra.mxu3 %v6851_v30  ;;  %v7062_v43 = vld [vmem:[%s10059_s3 + $0xe0] sm:$0xf]  ;;  %v8761_v45 = vld [vmem:[%s10059_s3 + $0xec] sm:$0xf0]  ;;  %v8759_v46 = vld [vmem:[%s10059_s3 + $0xe4] sm:$0xf]  ;;  %s6793_s14 = sld [smem:[%s11964_s0 + %s9876_s1]]  }
  0x29   :  { %388 = vmatpush.bf16.msra.mxu0 %v6823_v35  ;;  %v7063_v47 = vor.u32 %v8761_v45, %v7062_v43  ;;  %v7064_v48 = vld [vmem:[%s10059_s3 + $0xf0] sm:$0xf0]  ;;  %v7070_v49 = vld [vmem:[%s10059_s3 + $0xe8] sm:$0xf]  ;;  %v8762_v50 = vld [vmem:[%s10059_s3 + $0xf4] sm:$0xf0]  ;;  %s10223_s8 = sld [smem:[%s11964_s0 + %s9877_s5]]  }
  0x2a   :  { %401 = vmatpush.bf16.msra.mxu1 %v6827_v39  ;;  %v7067_v52 = vor.u32 %v8759_v46, %v7064_v48  ;;  %v7071_v53 = vor.u32 %v8762_v50, %v7070_v49  ;;  %v8760_v54 = vld [vmem:[%s10059_s3 + $0xec] sm:$0xf]  ;;  %v7072_v55 = vld [vmem:[%s10059_s3 + $0xf8] sm:$0xf0]  ;;  %v7046_v56 = vld [vmem:[%s10059_s3 + $0xc0] sm:$0xf] }
  0x2b   :  { %414 = vmatpush.bf16.msra.mxu2 %v6831_v40  ;;  %v7075_v57 = vor.u32 %v8760_v54, %v7072_v55  ;;  %v8757_v58 = vld [vmem:[%s10059_s3 + $0xcc] sm:$0xf0]  ;;  %v8755_v59 = vld [vmem:[%s10059_s3 + $0xc4] sm:$0xf]  ;;  %v7048_v60 = vld [vmem:[%s10059_s3 + $0xd0] sm:$0xf0] }
  0x2c   :  { %427 = vmatpush.bf16.msra.mxu3 %v6835_v41  ;;  %v7047_v61 = vor.u32 %v8757_v58, %v7046_v56  ;;  %v7051_v62 = vor.u32 %v8755_v59, %v7048_v60  ;;  %v7054_v63 = vld [vmem:[%s10059_s3 + $0xc8] sm:$0xf]  ;;  %v8758_v0 = vld [vmem:[%s10059_s3 + $0xd4] sm:$0xf0]  ;;  %v8756_v1 = vld [vmem:[%s10059_s3 + $0xcc] sm:$0xf]  ;;  %389 = vmatmul.bf16.vlgmr.msra.gmra.mxu0 %v188_v51 }
  0x2d   :  { %593 = vmatpush.bf16.msrb.mxu0 %v7063_v47  ;;  %v7055_v2 = vor.u32 %v8758_v0, %v7054_v63  ;;  %v7056_v3 = vld [vmem:[%s10059_s3 + $0xd8] sm:$0xf0]  ;;  %v7030_v4 = vld [vmem:[%s10059_s3 + $0xa0] sm:$0xf]  ;;  %v8753_v5 = vld [vmem:[%s10059_s3 + $0xac] sm:$0xf0]  ;;  %402 = vmatmul.bf16.vlgmr.msra.gmra.mxu1 %v188_v51 }
  0x2e   :  { %606 = vmatpush.bf16.msrb.mxu1 %v7067_v52  ;;  %v7059_v6 = vor.u32 %v8756_v1, %v7056_v3  ;;  %v8751_v7 = vld [vmem:[%s10059_s3 + $0xa4] sm:$0xf]  ;;  %v7032_v9 = vld [vmem:[%s10059_s3 + $0xb0] sm:$0xf0]  ;;  %v7038_v10 = vld [vmem:[%s10059_s3 + $0xa8] sm:$0xf]  ;;  %v7031_v12 = vor.u32 %v8753_v5, %v7030_v4  ;;  %415 = vmatmul.bf16.vlgmr.msra.gmra.mxu2 %v188_v51 }
  0x2f   :  { %619 = vmatpush.bf16.msrb.mxu2 %v7071_v53  ;;  %428 = vmatmul.bf16.vlgmr.msra.gmra.mxu3 %v188_v51  ;;  %v8754_v13 = vld [vmem:[%s10059_s3 + $0xb4] sm:$0xf0]  ;;  %v8752_v14 = vld [vmem:[%s10059_s3 + $0xac] sm:$0xf]  ;;  %v7040_v15 = vld [vmem:[%s10059_s3 + $0xb8] sm:$0xf0]  ;;  %v7035_v16 = vor.u32 %v8751_v7, %v7032_v9 }
  0x30   :  { %632 = vmatpush.bf16.msrb.mxu3 %v7075_v57  ;;  %v7039_v17 = vor.u32 %v8754_v13, %v7038_v10  ;;  %v7014_v18 = vld [vmem:[%s10059_s3 + $0x80] sm:$0xf]  ;;  %v8749_v19 = vld [vmem:[%s10059_s3 + $0x8c] sm:$0xf0]  ;;  %v8747_v20 = vld [vmem:[%s10059_s3 + $0x84] sm:$0xf]  ;;  %v7043_v21 = vor.u32 %v8752_v14, %v7040_v15 }
  0x31   :  { %594 = vmatpush.bf16.msrb.mxu0 %v7047_v61  ;;  %v7016_v22 = vld [vmem:[%s10059_s3 + $0x90] sm:$0xf0]  ;;  %v7022_v23 = vld [vmem:[%s10059_s3 + $0x88] sm:$0xf]  ;;  %v8750_v24 = vld [vmem:[%s10059_s3 + $0x94] sm:$0xf0]  ;;  %v7015_v27 = vor.u32 %v8749_v19, %v7014_v18 }
  0x32   :  { %607 = vmatpush.bf16.msrb.mxu1 %v7051_v62  ;;  %v8748_v25 = vld [vmem:[%s10059_s3 + $0x8c] sm:$0xf]  ;;  %v7024_v26 = vld [vmem:[%s10059_s3 + $0x98] sm:$0xf0]  ;;  %v7019_v28 = vor.u32 %v8747_v20, %v7016_v22  ;;  %v7023_v29 = vor.u32 %v8750_v24, %v7022_v23  ;;  %v6998_v30 = vld [vmem:[%s10059_s3 + $0x60] sm:$0xf] }
  0x33   :  { %620 = vmatpush.bf16.msrb.mxu2 %v7055_v2  ;;  %v8745_v32 = vld [vmem:[%s10059_s3 + $0x6c] sm:$0xf0]  ;;  %v8743_v33 = vld [vmem:[%s10059_s3 + $0x64] sm:$0xf]  ;;  %v7027_v34 = vor.u32 %v8748_v25, %v7024_v26  ;;  %v7000_v35 = vld [vmem:[%s10059_s3 + $0x70] sm:$0xf0] }
  0x34   :  { %633 = vmatpush.bf16.msrb.mxu3 %v7059_v6  ;;  %v7006_v37 = vld [vmem:[%s10059_s3 + $0x68] sm:$0xf]  ;;  %v8746_v38 = vld [vmem:[%s10059_s3 + $0x74] sm:$0xf0]  ;;  %v8744_v39 = vld [vmem:[%s10059_s3 + $0x6c] sm:$0xf]  ;;  %v6999_v41 = vor.u32 %v8745_v32, %v6998_v30  ;;  %v7003_v42 = vor.u32 %v8743_v33, %v7000_v35 }
  0x35   :  { %595 = vmatpush.bf16.msrb.mxu0 %v7031_v12  ;;  %v7008_v40 = vld [vmem:[%s10059_s3 + $0x78] sm:$0xf0]  ;;  %v7007_v43 = vor.u32 %v8746_v38, %v7006_v37  ;;  %v6982_v45 = vld [vmem:[%s10059_s3 + $0x40] sm:$0xf]  ;;  %v8741_v46 = vld [vmem:[%s10059_s3 + $0x4c] sm:$0xf0] }
  0x36   :  { %608 = vmatpush.bf16.msrb.mxu1 %v7035_v16  ;;  %v8739_v47 = vld [vmem:[%s10059_s3 + $0x44] sm:$0xf]  ;;  %v7011_v48 = vor.u32 %v8744_v39, %v7008_v40  ;;  %v6984_v49 = vld [vmem:[%s10059_s3 + $0x50] sm:$0xf0]  ;;  %v6990_v50 = vld [vmem:[%s10059_s3 + $0x48] sm:$0xf]  ;;  %v6983_v54 = vor.u32 %v8741_v46, %v6982_v45 }
  0x37   :  { %621 = vmatpush.bf16.msrb.mxu2 %v7039_v17  ;;  %v8742_v51 = vld [vmem:[%s10059_s3 + $0x54] sm:$0xf0]  ;;  %v8740_v52 = vld [vmem:[%s10059_s3 + $0x4c] sm:$0xf]  ;;  %v6992_v53 = vld [vmem:[%s10059_s3 + $0x58] sm:$0xf0]  ;;  %v6987_v56 = vor.u32 %v8739_v47, %v6984_v49 }
  0x38   :  { %634 = vmatpush.bf16.msrb.mxu3 %v7043_v21  ;;  %v6966_v55 = vld [vmem:[%s10059_s3 + $0x20] sm:$0xf]  ;;  %v6991_v57 = vor.u32 %v8742_v51, %v6990_v50  ;;  %v8737_v58 = vld [vmem:[%s10059_s3 + $0x2c] sm:$0xf0]  ;;  %v8735_v59 = vld [vmem:[%s10059_s3 + $0x24] sm:$0xf]  ;;  %v6995_v61 = vor.u32 %v8740_v52, %v6992_v53 }
  0x39   :  { %596 = vmatpush.bf16.msrb.mxu0 %v7015_v27  ;;  %v6968_v60 = vld [vmem:[%s10059_s3 + $0x30] sm:$0xf0]  ;;  %v6974_v62 = vld [vmem:[%s10059_s3 + $0x28] sm:$0xf]  ;;  %v8738_v63 = vld [vmem:[%s10059_s3 + $0x34] sm:$0xf0]  ;;  %v6967_v4 = vor.u32 %v8737_v58, %v6966_v55 }
  0x3a   :  { %609 = vmatpush.bf16.msrb.mxu1 %v7019_v28  ;;  %v8736_v0 = vld [vmem:[%s10059_s3 + $0x2c] sm:$0xf]  ;;  %v6976_v1 = vld [vmem:[%s10059_s3 + $0x38] sm:$0xf0]  ;;  %v6950_v2 = vld [vmem:[%s10059_s3] sm:$0xf]  ;;  %v6971_v9 = vor.u32 %v8735_v59, %v6968_v60  ;;  %v6975_v10 = vor.u32 %v8738_v63, %v6974_v62 }
  0x3b   :  { %622 = vmatpush.bf16.msrb.mxu2 %v7023_v29  ;;  %v8733_v3 = vld [vmem:[%s10059_s3 + $0xc] sm:$0xf0]  ;;  %v8731_v5 = vld [vmem:[%s10059_s3 + $0x4] sm:$0xf]  ;;  %v6952_v6 = vld [vmem:[%s10059_s3 + $0x10] sm:$0xf0]  ;;  %v6979_v15 = vor.u32 %v8736_v0, %v6976_v1 }
  0x3c   :  { %635 = vmatpush.bf16.msrb.mxu3 %v7027_v34  ;;  %v6958_v7 = vld [vmem:[%s10059_s3 + $0x8] sm:$0xf]  ;;  %v8734_v12 = vld [vmem:[%s10059_s3 + $0x14] sm:$0xf0]  ;;  %v142_v14 = vld [vmem:[%s10109_s7] sm:$0xff]  ;;  %v6951_v21 = vor.u32 %v8733_v3, %v6950_v2  ;;  %v6955_v26 = vor.u32 %v8731_v5, %v6952_v6  ;;  %s9878_s30 = smov 26  }
  0x3d   :  { %597 = vmatpush.bf16.msrb.mxu0 %v6999_v41  ;;  %v6818_v13 = vld [vmem:[%s10117_s13 + $0x8] sm:$0xff]  ;;  %v6960_v17 = vld [vmem:[%s10059_s3 + $0x18] sm:$0xf0]  ;;  %v7190_v18 = vld [vmem:[%s10127_s21 + $0xe0] sm:$0xf]  ;;  %v6959_v27 = vor.u32 %v8734_v12, %v6958_v7  ;;  %s10237_s4 = sld [smem:[%s11964_s0 + %s9878_s30]]   ;;  %s9879_s17 = smov 11  }
  0x3e   :  { %610 = vmatpush.bf16.msrb.mxu1 %v7003_v42  ;;  %v8732_v16 = vld [vmem:[%s10059_s3 + $0xc] sm:$0xf]  ;;  %1241 = vst [vmem:[#allocation6] sm:$0xff] %v6818_v13  ;;  %v8825_v19 = vld [vmem:[%s10127_s21 + $0xec] sm:$0xf0]  ;;  %v154_v25 = vadd.f32 %v6818_v13, %v142_v14  ;;  %s10242_s24 = sld [smem:[%s11964_s0 + %s9879_s17]]   ;;  %s9880_s27 = smov 10  }
  0x3f   :  { %623 = vmatpush.bf16.msrb.mxu2 %v7007_v43  ;;  %v8823_v20 = vld [vmem:[%s10127_s21 + $0xe4] sm:$0xf]  ;;  %v7192_v22 = vld [vmem:[%s10127_s21 + $0xf0] sm:$0xf0]  ;;  %v7198_v23 = vld [vmem:[%s10127_s21 + $0xe8] sm:$0xf]  ;;  %v6963_v30 = vor.u32 %v8732_v16, %v6960_v17  ;;  %v7191_v32 = vor.u32 %v8825_v19, %v7190_v18  ;;  %s10247_s2 = sld [smem:[%s11964_s0 + %s9880_s27]]  }
  0x40   :  { %636 = vmatpush.bf16.msrb.mxu3 %v7011_v48  ;;  %v8826_v24 = vld [vmem:[%s10127_s21 + $0xf4] sm:$0xf0]  ;;  %v8824_v28 = vld [vmem:[%s10127_s21 + $0xec] sm:$0xf]  ;;  %v7200_v29 = vld [vmem:[%s10127_s21 + $0xf8] sm:$0xf0]  ;;  %v7195_v33 = vor.u32 %v8823_v20, %v7192_v22  ;;  %v155_v40 = vpack.c.bf16 %v154_v25, %v154_v25 }
  0x41   :  { %598 = vmatpush.bf16.msrb.mxu0 %v6983_v54  ;;  %v7199_v34 = vor.u32 %v8826_v24, %v7198_v23  ;;  %v7174_v35 = vld [vmem:[%s10127_s21 + $0xc0] sm:$0xf]  ;;  %v8821_v37 = vld [vmem:[%s10127_s21 + $0xcc] sm:$0xf0]  ;;  %v8819_v38 = vld [vmem:[%s10127_s21 + $0xc4] sm:$0xf]  ;;  %v7203_v39 = vor.u32 %v8824_v28, %v7200_v29 }
  0x42   :  { %611 = vmatpush.bf16.msrb.mxu1 %v6987_v56  ;;  %v7176_v41 = vld [vmem:[%s10127_s21 + $0xd0] sm:$0xf0]  ;;  %v7182_v42 = vld [vmem:[%s10127_s21 + $0xc8] sm:$0xf]  ;;  %v8822_v43 = vld [vmem:[%s10127_s21 + $0xd4] sm:$0xf0]  ;;  %v7175_v47 = vor.u32 %v8821_v37, %v7174_v35 }
  0x43   :  { %624 = vmatpush.bf16.msrb.mxu2 %v6991_v57  ;;  %v8820_v45 = vld [vmem:[%s10127_s21 + $0xcc] sm:$0xf]  ;;  %v7184_v46 = vld [vmem:[%s10127_s21 + $0xd8] sm:$0xf0]  ;;  %v7179_v48 = vor.u32 %v8819_v38, %v7176_v41  ;;  %v7183_v49 = vor.u32 %v8822_v43, %v7182_v42  ;;  %v7158_v50 = vld [vmem:[%s10127_s21 + $0xa0] sm:$0xf] }
  0x44   :  { %637 = vmatpush.bf16.msrb.mxu3 %v6995_v61  ;;  %v8817_v51 = vld [vmem:[%s10127_s21 + $0xac] sm:$0xf0]  ;;  %v8815_v52 = vld [vmem:[%s10127_s21 + $0xa4] sm:$0xf]  ;;  %v7187_v53 = vor.u32 %v8820_v45, %v7184_v46  ;;  %v7160_v54 = vld [vmem:[%s10127_s21 + $0xb0] sm:$0xf0] }
  0x45   :  { %599 = vmatpush.bf16.msrb.mxu0 %v6967_v4  ;;  %v7166_v55 = vld [vmem:[%s10127_s21 + $0xa8] sm:$0xf]  ;;  %v8818_v56 = vld [vmem:[%s10127_s21 + $0xb4] sm:$0xf0]  ;;  %v8816_v57 = vld [vmem:[%s10127_s21 + $0xac] sm:$0xf]  ;;  %v7159_v59 = vor.u32 %v8817_v51, %v7158_v50  ;;  %v7163_v60 = vor.u32 %v8815_v52, %v7160_v54 }
  0x46   :  { %612 = vmatpush.bf16.msrb.mxu1 %v6971_v9  ;;  %v7168_v58 = vld [vmem:[%s10127_s21 + $0xb8] sm:$0xf0]  ;;  %v7167_v61 = vor.u32 %v8818_v56, %v7166_v55  ;;  %v7142_v62 = vld [vmem:[%s10127_s21 + $0x80] sm:$0xf]  ;;  %v8813_v63 = vld [vmem:[%s10127_s21 + $0x8c] sm:$0xf0] }
  0x47   :  { %625 = vmatpush.bf16.msrb.mxu2 %v6975_v10  ;;  %v8811_v0 = vld [vmem:[%s10127_s21 + $0x84] sm:$0xf]  ;;  %v7171_v1 = vor.u32 %v8816_v57, %v7168_v58  ;;  %v7144_v2 = vld [vmem:[%s10127_s21 + $0x90] sm:$0xf0]  ;;  %v7150_v3 = vld [vmem:[%s10127_s21 + $0x88] sm:$0xf]  ;;  %v7143_v7 = vor.u32 %v8813_v63, %v7142_v62 }
  0x48   :  { %638 = vmatpush.bf16.msrb.mxu3 %v6979_v15  ;;  %v8814_v4 = vld [vmem:[%s10127_s21 + $0x94] sm:$0xf0]  ;;  %v8812_v5 = vld [vmem:[%s10127_s21 + $0x8c] sm:$0xf]  ;;  %v7152_v6 = vld [vmem:[%s10127_s21 + $0x98] sm:$0xf0]  ;;  %v7147_v9 = vor.u32 %v8811_v0, %v7144_v2 }
  0x49   :  { %600 = vmatpush.bf16.msrb.mxu0 %v6951_v21  ;;  %v7151_v10 = vor.u32 %v8814_v4, %v7150_v3  ;;  %v7126_v12 = vld [vmem:[%s10127_s21 + $0x60] sm:$0xf]  ;;  %v8809_v13 = vld [vmem:[%s10127_s21 + $0x6c] sm:$0xf0]  ;;  %v8807_v14 = vld [vmem:[%s10127_s21 + $0x64] sm:$0xf]  ;;  %v7155_v15 = vor.u32 %v8812_v5, %v7152_v6 }
  0x4a   :  { %613 = vmatpush.bf16.msrb.mxu1 %v6955_v26  ;;  %v7128_v16 = vld [vmem:[%s10127_s21 + $0x70] sm:$0xf0]  ;;  %v7134_v17 = vld [vmem:[%s10127_s21 + $0x68] sm:$0xf]  ;;  %v8810_v18 = vld [vmem:[%s10127_s21 + $0x74] sm:$0xf0]  ;;  %v7127_v21 = vor.u32 %v8809_v13, %v7126_v12 }
  0x4b   :  { %626 = vmatpush.bf16.msrb.mxu2 %v6959_v27  ;;  %v8808_v19 = vld [vmem:[%s10127_s21 + $0x6c] sm:$0xf]  ;;  %v7136_v20 = vld [vmem:[%s10127_s21 + $0x78] sm:$0xf0]  ;;  %v7131_v22 = vor.u32 %v8807_v14, %v7128_v16  ;;  %v7135_v23 = vor.u32 %v8810_v18, %v7134_v17  ;;  %v7110_v24 = vld [vmem:[%s10127_s21 + $0x40] sm:$0xf] }
  0x4c   :  { %639 = vmatpush.bf16.msrb.mxu3 %v6963_v30  ;;  %601 = vmatmul.bf16.vlgmr.msrb.gmra.mxu0 %v155_v40  ;;  %v8805_v25 = vld [vmem:[%s10127_s21 + $0x4c] sm:$0xf0]  ;;  %v8803_v26 = vld [vmem:[%s10127_s21 + $0x44] sm:$0xf]  ;;  %v7139_v27 = vor.u32 %v8808_v19, %v7136_v20  ;;  %v7112_v28 = vld [vmem:[%s10127_s21 + $0x50] sm:$0xf0] }
  0x4d   :  { %838 = vmatpush.bf16.msra.mxu0 %v7191_v32  ;;  %614 = vmatmul.bf16.vlgmr.msrb.gmra.mxu1 %v155_v40  ;;  %v7118_v29 = vld [vmem:[%s10127_s21 + $0x48] sm:$0xf]  ;;  %v8806_v30 = vld [vmem:[%s10127_s21 + $0x54] sm:$0xf0]  ;;  %v8804_v32 = vld [vmem:[%s10127_s21 + $0x4c] sm:$0xf]  ;;  %v7115_v35 = vor.u32 %v8803_v26, %v7112_v28 }
  0x4e   :  { %851 = vmatpush.bf16.msra.mxu1 %v7195_v33  ;;  %627 = vmatmul.bf16.vlgmr.msrb.gmra.mxu2 %v155_v40  ;;  %v7120_v33 = vld [vmem:[%s10127_s21 + $0x58] sm:$0xf0]  ;;  %v7119_v37 = vor.u32 %v8806_v30, %v7118_v29  ;;  %v7094_v38 = vld [vmem:[%s10127_s21 + $0x20] sm:$0xf]  ;;  %v7096_v42 = vld [vmem:[%s10127_s21 + $0x30] sm:$0xf0] }
  0x4f   :  { %864 = vmatpush.bf16.msra.mxu2 %v7199_v34  ;;  %640 = vmatmul.bf16.vlgmr.msrb.gmra.mxu3 %v155_v40  ;;  %v7111_v34 = vor.u32 %v8805_v25, %v7110_v24  ;;  %v8799_v40 = vld [vmem:[%s10127_s21 + $0x24] sm:$0xf]  ;;  %v7123_v41 = vor.u32 %v8804_v32, %v7120_v33  ;;  %v7102_v43 = vld [vmem:[%s10127_s21 + $0x28] sm:$0xf]  ;;  %v8802_v45 = vld [vmem:[%s10127_s21 + $0x34] sm:$0xf0] }
  0x50   :  { %877 = vmatpush.bf16.msra.mxu3 %v7203_v39  ;;  %v8801_v39 = vld [vmem:[%s10127_s21 + $0x2c] sm:$0xf0]  ;;  %v8800_v46 = vld [vmem:[%s10127_s21 + $0x2c] sm:$0xf]  ;;  %v7103_v50 = vor.u32 %v8802_v45, %v7102_v43  ;;  %v7078_v51 = vld [vmem:[%s10127_s21] sm:$0xf] }
  0x51   :  { %839 = vmatpush.bf16.msra.mxu0 %v7175_v47  ;;  %v7104_v47 = vld [vmem:[%s10127_s21 + $0x38] sm:$0xf0]  ;;  %v8797_v52 = vld [vmem:[%s10127_s21 + $0xc] sm:$0xf0]  ;;  %v7080_v55 = vld [vmem:[%s10127_s21 + $0x10] sm:$0xf0] }
  0x52   :  { %852 = vmatpush.bf16.msra.mxu1 %v7179_v48  ;;  %v7095_v48 = vor.u32 %v8801_v39, %v7094_v38  ;;  %v7107_v54 = vor.u32 %v8800_v46, %v7104_v47  ;;  %v7086_v56 = vld [vmem:[%s10127_s21 + $0x8] sm:$0xf]  ;;  %v8798_v57 = vld [vmem:[%s10127_s21 + $0x14] sm:$0xf0]  ;;  %v8796_v58 = vld [vmem:[%s10127_s21 + $0xc] sm:$0xf] }
  0x53   :  { %865 = vmatpush.bf16.msra.mxu2 %v7183_v49  ;;  %v7099_v49 = vor.u32 %v8799_v40, %v7096_v42  ;;  %v7087_v63 = vor.u32 %v8798_v57, %v7086_v56  ;;  %v894_v20 = vld [vmem:[%s6793_s14] sm:$0xf]  ;;  %s9881_s3 = smov 15   ;;  %s9882_s7 = smov 16  }
  0x54   :  { %878 = vmatpush.bf16.msra.mxu3 %v7187_v53  ;;  %v8795_v53 = vld [vmem:[%s10127_s21 + $0x4] sm:$0xf]  ;;  %v897_v25 = vperm.slane %v894_v20, 1  ;;  %s10252_s26 = sld [smem:[%s11964_s0 + %s9881_s3]]  }
  0x55   :  { %840 = vmatpush.bf16.msra.mxu0 %v7159_v59  ;;  %v7088_v59 = vld [vmem:[%s10127_s21 + $0x18] sm:$0xf0]  ;;  %v7083_v62 = vor.u32 %v8795_v53, %v7080_v55  ;;  %v898_v53 = vperm.slane %v894_v20, 2  ;;  %s6800_s12 = sld [smem:[%s11964_s0 + %s9882_s7]]  }
  0x56   :  { %853 = vmatpush.bf16.msra.mxu1 %v7163_v60  ;;  %v7079_v60 = vor.u32 %v8797_v52, %v7078_v51  ;;  %v7091_v0 = vor.u32 %v8796_v58, %v7088_v59 }
  0x57   :  { %866 = vmatpush.bf16.msra.mxu2 %v7167_v61  ;;  %v135_v61 = vld [vmem:[%s10117_s13] sm:$0xff]  ;;  %s9883_s13 = smov 12  }
  0x58   :  { %879 = vmatpush.bf16.msra.mxu3 %v7171_v1  ;;  %v645_v1 = vpack.c.bf16 %v135_v61, %v135_v61  ;;  %s6796_s21 = sld [smem:[%s11964_s0 + %s9883_s13]]  }
  0x59   :  { %841 = vmatpush.bf16.msra.mxu0 %v7143_v7 }
  0x5a   :  { %854 = vmatpush.bf16.msra.mxu1 %v7147_v9 }
  0x5b   :  { %867 = vmatpush.bf16.msra.mxu2 %v7151_v10 }
  0x5c   :  { %880 = vmatpush.bf16.msra.mxu3 %v7155_v15 }
  0x5d   :  { %842 = vmatpush.bf16.msra.mxu0 %v7127_v21 }
  0x5e   :  { %855 = vmatpush.bf16.msra.mxu1 %v7131_v22  ;;  %v896_v22 = vperm.slane %v894_v20, 0 }
  0x5f   :  { %868 = vmatpush.bf16.msra.mxu2 %v7135_v23 }
  0x60   :  { %881 = vmatpush.bf16.msra.mxu3 %v7139_v27 }
  0x61   :  { %843 = vmatpush.bf16.msra.mxu0 %v7111_v34 }
  0x62   :  { %856 = vmatpush.bf16.msra.mxu1 %v7115_v35 }
  0x63   :  { %869 = vmatpush.bf16.msra.mxu2 %v7119_v37  ;;  %v899_v37 = vperm.slane %v894_v20, 3 }
  0x64   :  { %882 = vmatpush.bf16.msra.mxu3 %v7123_v41 }
  0x65   :  { %844 = vmatpush.bf16.msra.mxu0 %v7095_v48 }
  0x66   :  { %857 = vmatpush.bf16.msra.mxu1 %v7099_v49 }
  0x67   :  { %870 = vmatpush.bf16.msra.mxu2 %v7103_v50 }
  0x68   :  { %883 = vmatpush.bf16.msra.mxu3 %v7107_v54 }
  0x69   :  { %845 = vmatpush.bf16.msra.mxu0 %v7079_v60 }
  0x6a   :  { %858 = vmatpush.bf16.msra.mxu1 %v7083_v62 }
  0x6b   :  { %871 = vmatpush.bf16.msra.mxu2 %v7087_v63 }
  0x6c   :  { %884 = vmatpush.bf16.msra.mxu3 %v7091_v0  ;;  %846 = vmatmul.bf16.vlgmr.msra.gmra.mxu0 %v645_v1 }
  0x6d   :  { %859 = vmatmul.bf16.vlgmr.msra.gmra.mxu1 %v645_v1 }
  0x6e   :  { %872 = vmatmul.bf16.vlgmr.msra.gmra.mxu2 %v645_v1 }
  0x6f   :  { %885 = vmatmul.bf16.vlgmr.msra.gmra.mxu3 %v645_v1 }
  0xa9   :  { %v390_v2 = vpop.f32.mrf.mxu0 }
  0xaa   :  { %v403_v3 = vpop.f32.mrf.mxu1 }
  0xb1   :  { %v392_v5 = vpop.f32.mrf.mxu0  ;;  %v416_v6 = vpop.f32.mrf.mxu2 }
  0xb2   :  { %v429_v4 = vpop.f32.mrf.mxu3  ;;  %v405_v7 = vpop.f32.mrf.mxu1 }
  0xb9   :  { %v418_v10 = vpop.f32.mrf.mxu2 }
  0xba   :  { %v431_v9 = vpop.f32.mrf.mxu3 }
  0xc9   :  { %v602_v12 = vpop.f32.mrf.mxu0 }
  0xca   :  { %v615_v13 = vpop.f32.mrf.mxu1  ;;  %v603_v21 = vadd.f32 %v602_v12, %v390_v2 }
  0xcb   :  { %v616_v23 = vadd.f32 %v615_v13, %v403_v3  ;;  %v138_v13 = vld [vmem:[%s10223_s8] sm:$0xff] }
  0xd1   :  { %v604_v15 = vpop.f32.mrf.mxu0  ;;  %v628_v16 = vpop.f32.mrf.mxu2 }
  0xd2   :  { %v641_v14 = vpop.f32.mrf.mxu3  ;;  %v617_v17 = vpop.f32.mrf.mxu1  ;;  %v629_v50 = vadd.f32 %v628_v16, %v416_v6 }
  0xd3   :  { %v642_v34 = vadd.f32 %v641_v14, %v429_v4 }
  0xd9   :  { %v630_v19 = vpop.f32.mrf.mxu2 }
  0xda   :  { %v643_v18 = vpop.f32.mrf.mxu3 }
  0xe9   :  { %v847_v24 = vpop.f32.mrf.mxu0 }
  0xea   :  { %v890_v26 = vadd.f32 %v847_v24, %v603_v21  ;;  %v860_v27 = vpop.f32.mrf.mxu1 }
  0xeb   :  { %v891_v28 = vadd.f32 %v860_v27, %v616_v23 }
  0xec   :  { %v904_v29 = vadd.f32 %v896_v22, %v890_v26 }
  0xed   :  { %v905_v30 = vadd.f32 %v897_v25, %v891_v28 }
  0xee   :  { %v7204_v32 = vmul.f32 -1.442695, %v904_v29 }
  0xef   :  { %v7205_v33 = vmul.f32 -1.442695, %v905_v30 }
  0xf0   :  { %9494 = vpow2.f32 %v7204_v32 }
  0xf1   :  { %v873_v35 = vpop.f32.mrf.mxu2  ;;  %9496 = vpow2.f32 %v7205_v33  ;;  %v849_v39 = vpop.f32.mrf.mxu0 }
  0xf2   :  { %v886_v38 = vpop.f32.mrf.mxu3  ;;  %v862_v41 = vpop.f32.mrf.mxu1  ;;  %v892_v52 = vadd.f32 %v873_v35, %v629_v50  ;;  %v8842_v35 = vld [vmem:[%s10252_s26 + $0x38] sm:$0xff]  ;;  %v8833_v39 = vld [vmem:[%s10247_s2 + $0x30] sm:$0xff] }
  0xf3   :  { %v893_v40 = vadd.f32 %v886_v38, %v642_v34  ;;  %v8834_v34 = vld [vmem:[%s10247_s2 + $0x38] sm:$0xff]  ;;  %1217 = vmatpush.bf16.msrb.mxu1 %v8842_v35  ;;  %v10303_v35 = vld [vmem:[%s6796_s21] ss:$0 sm:$0xff] }
  0xf4   :  { %v906_v56 = vadd.f32 %v898_v53, %v892_v52  ;;  %1087 = vmatpush.bf16.msrb.mxu0 %v8834_v34  ;;  %v8838_v52 = vld [vmem:[%s10252_s26 + $0x18] sm:$0xff] }
  0xf5   :  { %v907_v42 = vadd.f32 %v899_v37, %v893_v40  ;;  %v8841_v40 = vld [vmem:[%s10252_s26 + $0x30] sm:$0xff] }
  0xf6   :  { %v9495_v43 = vpop.eup %9494 }
  0xf7   :  { %v7206_v45 = vmul.f32 -1.442695, %v907_v42  ;;  %v9497_v46 = vpop.eup %9496  ;;  %v911_v47 = vadd.f32 1.0, %v9495_v43  ;;  %1218 = vmatpush.bf16.msrb.mxu1 %v8841_v40  ;;  %v8832_v42 = vld [vmem:[%s10247_s2 + $0x28] sm:$0xff] }
  0xf8   :  { %v930_v48 = vadd.f32 1.0, %v9497_v46  ;;  %1088 = vmatpush.bf16.msrb.mxu0 %v8833_v39  ;;  %v8840_v43 = vld [vmem:[%s10252_s26 + $0x28] sm:$0xff] }
  0xf9   :  { %9498 = vpow2.f32 %v7206_v45  ;;  %v875_v49 = vpop.f32.mrf.mxu2  ;;  %v923_v63 = vand.u32 2147483648, %v911_v47  ;;  %v921_v2 = vand.u32 2147483647, %v911_v47  ;;  %vm917_vm2 = vweird.f32 %v911_v47 }
  0xfa   :  { %9500 = vrcp.f32 %v911_v47  ;;  %v888_v51 = vpop.f32.mrf.mxu3  ;;  %v942_v0 = vand.u32 2147483648, %v930_v48  ;;  %v940_v4 = vand.u32 2147483647, %v930_v48  ;;  %vm936_vm3 = vweird.f32 %v930_v48 }
  0xfb   :  { %9502 = vrcp.f32 %v930_v48  ;;  %v924_v7 = vor.u32 1.1754944e-38, %v923_v63  ;;  %vm922_vm6 = vcmp.eq.f32.partialorder %v921_v2, 8.507059e+37  ;;  %1219 = vmatpush.bf16.msrb.mxu1 %v8840_v43  ;;  %v8830_v51 = vld [vmem:[%s10247_s2 + $0x18] sm:$0xff] }
  0xfc   :  { %v943_v10 = vor.u32 1.1754944e-38, %v942_v0  ;;  %vm941_vm7 = vcmp.eq.f32.partialorder %v940_v4, 8.507059e+37  ;;  %1089 = vmatpush.bf16.msrb.mxu0 %v8832_v42 }
  0xff   :  { %v9499_v54 = vpop.eup %9498 }
 0x100   :  { %v9501_v55 = vpop.eup %9500  ;;  %v950_v57 = vadd.f32 1.0, %v9499_v54  ;;  %v8829_v54 = vld [vmem:[%s10247_s2 + $0x10] sm:$0xff] }
 0x101   :  { %v9503_v58 = vpop.eup %9502  ;;  %v913_v59 = vmul.f32 %v9501_v55, %v911_v47  ;;  %vm918_vm0 = vweird.f32 %v9501_v55  ;;  %v8831_v47 = vld [vmem:[%s10247_s2 + $0x20] sm:$0xff] }
 0x102   :  { %v932_v60 = vmul.f32 %v9503_v58, %v930_v48  ;;  %9504 = vrcp.f32 %v950_v57  ;;  %vm937_vm1 = vweird.f32 %v9503_v58  ;;  %vm919_vm4 = vmor %vm917_vm2, %vm918_vm0  ;;  %v962_v25 = vand.u32 2147483648, %v950_v57  ;;  %v8839_v48 = vld [vmem:[%s10252_s26 + $0x20] sm:$0xff]  ;;  %1090 = vmatpush.bf16.msrb.mxu0 %v8831_v47 }
 0x103   :  { %v914_v61 = vsub.f32 1.0, %v913_v59  ;;  %9506 = vtanh.f32 %v906_v56  ;;  %vm938_vm5 = vmor %vm936_vm3, %vm937_vm1  ;;  %vm956_vm9 = vweird.f32 %v950_v57  ;;  %v960_v26 = vand.u32 2147483647, %v950_v57  ;;  %1220 = vmatpush.bf16.msrb.mxu1 %v8839_v48  ;;  %v8828_v56 = vld [vmem:[%s10247_s2 + $0x8] sm:$0xff] }
 0x104   :  { %v933_v62 = vsub.f32 1.0, %v932_v60  ;;  %v963_v28 = vor.u32 1.1754944e-38, %v962_v25  ;;  %vm1139_vm2 = vcmask 7168   ;;  %v10319_v48 = vld [vmem:[%s10223_s8 + $0x8] sm:$0xff]  ;;  %s9888_s8 = smov 33  }
 0x105   :  { %v915_v1 = vmul.f32 %v9501_v55, %v914_v61  ;;  %vm961_vm11 = vcmp.eq.f32.partialorder %v960_v26, 8.507059e+37  ;;  %v8827_v61 = vld [vmem:[%s10247_s2] sm:$0xff]  ;;  %1242 = vst [vmem:[#allocation7] sm:$0xff] %v10319_v48 }
 0x106   :  { %v934_v3 = vmul.f32 %v9503_v58, %v933_v62  ;;  %1091 = vmatpush.bf16.msrb.mxu0 %v8830_v51  ;;  %v8835_v62 = vld [vmem:[%s10252_s26] sm:$0xff]  ;;  %v1133_v51 = vlaneseq }
 0x107   :  { %v916_v5 = vadd.f32 %v9501_v55, %v915_v1  ;;  %1221 = vmatpush.bf16.msrb.mxu1 %v8838_v52 }
 0x108   :  { %v9505_v6 = vpop.eup %9504  ;;  %v935_v9 = vadd.f32 %v9503_v58, %v934_v3 }
 0x109   :  { %v920_v12 = vsel %vm919_vm4, %v9501_v55, %v916_v5  ;;  %v952_v14 = vmul.f32 %v9505_v6, %v950_v57  ;;  %v9507_v15 = vpop.eup %9506  ;;  %vm957_vm8 = vweird.f32 %v9505_v6  ;;  %v8837_v55 = vld [vmem:[%s10252_s26 + $0x10] sm:$0xff]  ;;  %v8836_v57 = vld [vmem:[%s10252_s26 + $0x8] sm:$0xff] }
 0x10a   :  { %v925_v16 = vsel %vm922_vm6, %v924_v7, %v920_v12  ;;  %v939_v17 = vsel %vm938_vm5, %v9503_v58, %v935_v9  ;;  %vm958_vm10 = vmor %vm956_vm9, %vm957_vm8  ;;  %1092 = vmatpush.bf16.msrb.mxu0 %v8829_v54 }
 0x10b   :  { %v967_v18 = vmul.f32 %v9507_v15, %v925_v16  ;;  %v944_v19 = vsel %vm941_vm7, %v943_v10, %v939_v17  ;;  %v953_v20 = vsub.f32 1.0, %v952_v14  ;;  %1222 = vmatpush.bf16.msrb.mxu1 %v8837_v55  ;;  %v1134_v55 = vshrl.u32 %v1133_v51, 7 }
 0x10c   :  { %v966_v21 = vmul.f32 %v944_v19, %v138_v13  ;;  %v10275_v13 = vld [vmem:[%s10215_s29] ss:$0 sm:$0xff]  ;;  %s10325_s29 = sld [smem:[%s11964_s0 + %s9888_s8]]  }
 0x10d   :  { %v954_v22 = vmul.f32 %v9505_v6, %v953_v20  ;;  %vm1135_vm5 = vcmp.lt.s32.totalorder %v1134_v55, 4 }
 0x10e   :  { %v10226_v23 = vadd.f32 %v967_v18, %v966_v21  ;;  %1093 = vmatpush.bf16.msrb.mxu0 %v8828_v56  ;;  %v10281_v21 = vld [vmem:[%s10237_s4] ss:$0 sm:$0xff]  ;;  %s9884_s4 = smov 13  }
 0x10f   :  { %v955_v24 = vadd.f32 %v9505_v6, %v954_v22  ;;  %1223 = vmatpush.bf16.msrb.mxu1 %v8836_v57  ;;  %s6797_s1 = sld [smem:[%s11964_s0 + %s9884_s4]]  }
 0x110   :  { %9508 = vtanh.f32 %v10226_v23 }
 0x111   :  { %v959_v27 = vsel %vm958_vm10, %v9505_v6, %v955_v24 }
 0x112   :  { %v964_v30 = vsel %vm961_vm11, %v963_v28, %v959_v27  ;;  %1094 = vmatpush.bf16.msrb.mxu0 %v8827_v61  ;;  %v10298_v28 = vld [vmem:[%s10242_s24] ss:$0 sm:$0xff]  ;;  %s9886_s24 = smov 32  }
 0x113   :  { %1224 = vmatpush.bf16.msrb.mxu1 %v8835_v62  ;;  %s10311_s5 = sld [smem:[%s11964_s0 + %s9886_s24]]  }
 0x115   :  { %v73_v27 = vstv %s6797_s1 }
 0x116   :  { %v9509_v29 = vpop.eup %9508  ;;  %74 = vst [vmem:[#allocation9] sm:$0x1] %v73_v27 }
 0x117   :  { %v10229_v32 = vmul.f32 %v9509_v29, %v964_v30  ;;  %v9491_v29 = vld [vmem:[%s6800_s12] ss:$0 sm:$0xff] }
 0x119   :  { %971 = vadd.xlane.f32.xlu0 %v10229_v32  ;;  %v974_v33 = vmul.f32 %v10229_v32, %v10229_v32 }
 0x11d   :  { %v10313_v42 = vld [vmem:[#allocation9] ss:$0 sm:$0xff] }
 0x121   :  { %975 = vadd.xlane.f32.xlu0 %v974_v33 }
 0x18c   :  { %v972_v37 = vpop.xlane.xlu0 %971 }
 0x18d   :  { %v10256_v38 = vmul.f32 0.03125, %v972_v37 }
 0x18f   :  { %v977_v41 = vmul.f32 32.0, %v10256_v38  ;;  %v982_v14 = vsub.f32 %v10229_v32, %v10256_v38 }
 0x191   :  { %v978_v45 = vmul.f32 %v977_v41, %v10256_v38  ;;  %v986_v19 = vmul.f32 %v10275_v13, %v982_v14  ;;  %v9885_v41 = vmov 0  }
 0x192   :  { %9486 = vset.pattern.permute.xlu2 %v9885_v41  ;;  %9487 = vset.pattern.permute.xlu0 %v9885_v41 }
 0x194   :  { %v976_v46 = vpop.xlane.xlu0 %975 }
 0x195   :  { %v979_v49 = vsub.f32 %v976_v46, %v978_v45  ;;  %v9887_v46 = vmov 0.0  }
 0x196   :  { %1243 = vst.msk [vmem:[%s10311_s5] sm:$0xff] %vm1139_vm2, %v9887_v46 }
 0x197   :  { %v980_v50 = vmul.f32 0.032258064, %v979_v49 }
 0x199   :  { %v981_v53 = vmax.f32 %v980_v50, 0.0 }
 0x19b   :  { %9510 = vrsqrt.f32 %v981_v53  ;;  %vm994_vm12 = vcmp.eq.f32.partialorder %v981_v53, inf  ;;  %v997_v3 = vand.u32 2147483648, %v981_v53  ;;  %vm996_vm13 = vcmp.eq.f32.partialorder %v981_v53, 0.0 }
 0x1a1   :  { %v9511_v58 = vpop.eup %9510 }
 0x1a2   :  { %v988_v59 = vmul.f32 %v9511_v58, %v981_v53 }
 0x1a4   :  { %v989_v60 = vmul.f32 %v9511_v58, %v988_v59 }
 0x1a6   :  { %v990_v63 = vmul.f32 0.5, %v989_v60 }
 0x1a8   :  { %v991_v0 = vsub.f32 1.5, %v990_v63  ;;  %v7241_v63 = vsel %vm1135_vm5, 1.0, %v9887_v46 }
 0x1aa   :  { %v992_v1 = vmul.f32 %v9511_v58, %v991_v0 }
 0x1ac   :  { %v993_v2 = vmul.f32 %v992_v1, %v981_v53 }
 0x1ae   :  { %v995_v4 = vsel %vm994_vm12, %v981_v53, %v993_v2 }
 0x1af   :  { %v998_v5 = vsel %vm996_vm13, %v997_v3, %v995_v4 }
 0x1b0   :  { %v999_v6 = vadd.f32 1e-06, %v998_v5 }
 0x1b2   :  { %9512 = vrcp.f32 %v999_v6  ;;  %v1011_v12 = vand.u32 2147483648, %v999_v6  ;;  %v1009_v16 = vand.u32 2147483647, %v999_v6  ;;  %vm1005_vm15 = vweird.f32 %v999_v6 }
 0x1b4   :  { %v1012_v18 = vor.u32 1.1754944e-38, %v1011_v12  ;;  %vm1010_vm1 = vcmp.eq.f32.partialorder %v1009_v16, 8.507059e+37 }
 0x1b8   :  { %v9513_v7 = vpop.eup %9512 }
 0x1b9   :  { %v1001_v9 = vmul.f32 %v9513_v7, %v999_v6  ;;  %vm1006_vm14 = vweird.f32 %v9513_v7 }
 0x1ba   :  { %vm1007_vm0 = vmor %vm1005_vm15, %vm1006_vm14 }
 0x1bb   :  { %v1002_v10 = vsub.f32 1.0, %v1001_v9 }
 0x1bd   :  { %v1003_v15 = vmul.f32 %v9513_v7, %v1002_v10 }
 0x1bf   :  { %v1004_v17 = vadd.f32 %v9513_v7, %v1003_v15 }
 0x1c1   :  { %v1008_v20 = vsel %vm1007_vm0, %v9513_v7, %v1004_v17 }
 0x1c2   :  { %v1013_v22 = vsel %vm1010_vm1, %v1012_v18, %v1008_v20 }
 0x1c3   :  { %v1014_v24 = vmul.f32 %v1013_v22, %v986_v19 }
 0x1c5   :  { %v10287_v25 = vadd.f32 %v10281_v21, %v1014_v24 }
 0x1c7   :  { %v1019_v26 = vpack.c.bf16 %v10287_v25, %v10287_v25 }
 0x1c9   :  { %1095 = vmatmul.bf16.vlgmr.msrb.gmra.mxu0 %v1019_v26  ;;  %1225 = vmatmul.bf16.vlgmr.msrb.gmra.mxu1 %v1019_v26 }
 0x246   :  { %v1096_v30 = vpop.f32.mrf.mxu0  ;;  %v1226_v32 = vpop.f32.mrf.mxu1 }
 0x247   :  { %v1097_v33 = vadd.f32 %v10298_v28, %v1096_v30  ;;  %v10301_v34 = vadd.f32 %v9491_v29, %v1226_v32 }
 0x249   :  { %v1100_v37 = vmax.f32 %v1097_v33, 0.0 }
 0x24b   :  { %v1104_v38 = vmul.f32 %v10303_v35, %v1100_v37 }
 0x24d   :  { %1105 = vadd.xlane.f32.xlu1 %v1104_v38 }
 0x24e   :  { %v1098_v39 = vpop.f32.mrf.mxu0  ;;  %v1228_v40 = vpop.f32.mrf.mxu1 }
 0x2c0   :  { %v1106_v43 = vpop.xlane.xlu1 %1105 }
 0x2c1   :  { %v1110_v45 = vadd.f32 %v10313_v42, %v1106_v43 }
 0x2c3   :  { %v7239_v47 = vmul.f32 -1.442695, %v1110_v45 }
 0x2c5   :  { %9514 = vpow2.f32 %v7239_v47 }
 0x2cb   :  { %v9515_v49 = vpop.eup %9514 }
 0x2cc   :  { %v1114_v50 = vadd.f32 1.0, %v9515_v49 }
 0x2ce   :  { %9516 = vrcp.f32 %v1114_v50  ;;  %v1126_v56 = vand.u32 2147483648, %v1114_v50  ;;  %v1124_v58 = vand.u32 2147483647, %v1114_v50  ;;  %vm1120_vm4 = vweird.f32 %v1114_v50 }
 0x2d0   :  { %v1127_v60 = vor.u32 1.1754944e-38, %v1126_v56  ;;  %vm1125_vm7 = vcmp.eq.f32.partialorder %v1124_v58, 8.507059e+37 }
 0x2d4   :  { %v9517_v52 = vpop.eup %9516 }
 0x2d5   :  { %v1116_v53 = vmul.f32 %v9517_v52, %v1114_v50  ;;  %vm1121_vm3 = vweird.f32 %v9517_v52 }
 0x2d6   :  { %vm1122_vm6 = vmor %vm1120_vm4, %vm1121_vm3 }
 0x2d7   :  { %v1117_v54 = vsub.f32 1.0, %v1116_v53 }
 0x2d9   :  { %v1118_v57 = vmul.f32 %v9517_v52, %v1117_v54 }
 0x2db   :  { %v1119_v59 = vadd.f32 %v9517_v52, %v1118_v57 }
 0x2dd   :  { %v1123_v61 = vsel %vm1122_vm6, %v9517_v52, %v1119_v59 }
 0x2de   :  { %v1128_v62 = vsel %vm1125_vm7, %v1127_v60, %v1123_v61 }
 0x2df   :  { %1234 = vperm.xlu2 %9486, %v1128_v62   ;;  %v1244_v0 = vsub.f32 1.0, %v1128_v62  ;;  %vm1130_vm8 = vcmp.lt.f32.partialorder %v1128_v62, 0.9  ;;  %1230 = vst.msk [vmem:[#allocation2] sm:$0xff] %vm1139_vm2, %v1128_v62 }
 0x2e0   :  { %v7240_v1 = vsel %vm1130_vm8, 1.0, %v9887_v46 }
 0x2e1   :  { %v1245_v2 = vadd.f32 1.0, %v1244_v0  ;;  %v1138_v3 = vmul.f32 %v7241_v63, %v7240_v1 }
 0x2e3   :  { %v1140_v4 = vsel %vm1139_vm2, %v1138_v3, -inf  ;;  %1231 = vst.msk [vmem:[#allocation3] sm:$0xff] %vm1139_vm2, %v1138_v3 }
 0x2e4   :  { %1246 = vst.msk [vmem:[%s10325_s29] sm:$0xff] %vm1139_vm2, %v1245_v2  ;;  %1141 = vmax.xlane.f32.xlu1 %v1140_v4 }
 0x339   :  { %v1235_v5 = vpop.permute.xlu2 %1234 }
 0x33a   :  { %v1237_v6 = vmul.f32 %v1235_v5, %v10287_v25  ;;  %v1239_v7 = vmul.f32 %v10319_v48, %v1235_v5 }
 0x33c   :  { %1238 = vst [vmem:[#allocation4] sm:$0xff] %v1237_v6 }
 0x33d   :  { %1240 = vst [vmem:[#allocation5] sm:$0xff] %v1239_v7 }
 0x357   :  { %v1142_v9 = vpop.xlane.xlu1 %1141 }
 0x358   :  { %v1143_v10 = vrot.slane %v1142_v9, 4 }
 0x35a   :  { %v1144_v12 = vmax.f32 %v1142_v9, %v1143_v10 }
 0x35c   :  { %v1145_v14 = vrot.slane %v1144_v12, 2 }
 0x35e   :  { %v1146_v15 = vmax.f32 %v1144_v12, %v1145_v14 }
 0x360   :  { %v1147_v16 = vrot.slane %v1146_v15, 1 }
 0x362   :  { %v1148_v17 = vmax.f32 %v1146_v15, %v1147_v16 }
 0x364   :  { %9437 = vpush %v1148_v17 }
 0x395   :  { %s10334_s0 = spop %9437 }
 0x396   :  { %1248 = sst [smem:[#allocation8]] %s10334_s0  ;;  %p1250_p0 = scmp.gt.f32.partialorder %s10334_s0, 0.0 }
 0x397   :  { %v8850_v18 = vld [vmem:[%s9918_s18 + $0x38] sm:$0xff] (%p1250_p0)  ;;  %v8849_v19 = vld [vmem:[%s9918_s18 + $0x30] sm:$0xff] (%p1250_p0)  ;;  %v7452_v22 = vld [vmem:[%s9946_s15 + $0xe0] sm:$0xf] (%p1250_p0)  ;;  %vm2276_vm9 = vcmask (%p1250_p0), 1041409   ;;  %vm2278_vm10 = vcmask (%p1250_p0), 1042434  }
 0x398   :  { %1253 = sbr.rel (!%p1250_p0) target bundleno = 2424 (0x978), region = 121  ;;  %1323 = vmatpush.bf16.msra.mxu0 (%p1250_p0), %v8850_v18  ;;  %v8858_v20 = vld [vmem:[%s9923_s22 + $0x38] sm:$0xff] (%p1250_p0)  ;;  %v8921_v24 = vld [vmem:[%s9946_s15 + $0xec] sm:$0xf0] (%p1250_p0)  ;;  %v8919_v29 = vld [vmem:[%s9946_s15 + $0xe4] sm:$0xf] (%p1250_p0) }
 0x399   :  { %1405 = vmatpush.bf16.msra.mxu1 (%p1250_p0), %v8858_v20  ;;  %v8857_v26 = vld [vmem:[%s9923_s22 + $0x30] sm:$0xff] (%p1250_p0)  ;;  %v7453_v27 = vor.u32 (%p1250_p0), %v8921_v24, %v7452_v22  ;;  %v8848_v32 = vld [vmem:[%s9918_s18 + $0x28] sm:$0xff] (%p1250_p0)  ;;  %v7436_v37 = vld [vmem:[%s9946_s15 + $0xc0] sm:$0xf] (%p1250_p0)  ;;  %vm2280_vm11 = vcmask (%p1250_p0), 1043459   ;;  %vm2282_vm12 = vcmask (%p1250_p0), 1044484  }
 0x39a   :  { %v7454_v30 = vld [vmem:[%s9946_s15 + $0xf0] sm:$0xf0] (%p1250_p0)  ;;  %v8917_v38 = vld [vmem:[%s9946_s15 + $0xcc] sm:$0xf0] (%p1250_p0)  ;;  %v8915_v39 = vld [vmem:[%s9946_s15 + $0xc4] sm:$0xf] (%p1250_p0) }
 0x39b   :  { %v7457_v33 = vor.u32 (%p1250_p0), %v8919_v29, %v7454_v30  ;;  %2208 = vmatpush.bf16.msra.mxu2 (%p1250_p0), %v7453_v27  ;;  %v7438_v40 = vld [vmem:[%s9946_s15 + $0xd0] sm:$0xf0] (%p1250_p0)  ;;  %v8856_v43 = vld [vmem:[%s9923_s22 + $0x28] sm:$0xff] (%p1250_p0)  ;;  %v7437_v45 = vor.u32 (%p1250_p0), %v8917_v38, %v7436_v37  ;;  %v7420_v47 = vld [vmem:[%s9946_s15 + $0xa0] sm:$0xf] (%p1250_p0)  ;;  %vm2284_vm13 = vcmask (%p1250_p0), 1045509  }
 0x39c   :  { %1324 = vmatpush.bf16.msra.mxu0 (%p1250_p0), %v8849_v19  ;;  %v7441_v46 = vor.u32 (%p1250_p0), %v8915_v39, %v7438_v40  ;;  %v8913_v49 = vld [vmem:[%s9946_s15 + $0xac] sm:$0xf0] (%p1250_p0)  ;;  %v8911_v50 = vld [vmem:[%s9946_s15 + $0xa4] sm:$0xf] (%p1250_p0)  ;;  %v7422_v52 = vld [vmem:[%s9946_s15 + $0xb0] sm:$0xf0] (%p1250_p0) }
 0x39d   :  { %2221 = vmatpush.bf16.msra.mxu3 %v7457_v33  ;;  %1406 = vmatpush.bf16.msra.mxu1 %v8857_v26  ;;  %v8847_v51 = vld [vmem:[%s9918_s18 + $0x20] sm:$0xff]  ;;  %v7421_v53 = vor.u32 %v8913_v49, %v7420_v47  ;;  %v7425_v54 = vor.u32 %v8911_v50, %v7422_v52  ;;  %v8909_v56 = vld [vmem:[%s9946_s15 + $0x8c] sm:$0xf0]  ;;  %v7406_v59 = vld [vmem:[%s9946_s15 + $0x90] sm:$0xf0]  ;;  %vm2286_vm14 = vcmask 1046534  }
 0x39e   :  { %v7404_v55 = vld [vmem:[%s9946_s15 + $0x80] sm:$0xf]  ;;  %v8907_v58 = vld [vmem:[%s9946_s15 + $0x84] sm:$0xf]  ;;  %v8846_v60 = vld [vmem:[%s9918_s18 + $0x18] sm:$0xff]  ;;  %vm2288_vm15 = vcmask 1047559  }
 0x39f   :  { %2209 = vmatpush.bf16.msra.mxu2 %v7437_v45  ;;  %v8855_v57 = vld [vmem:[%s9923_s22 + $0x20] sm:$0xff]  ;;  %v7405_v61 = vor.u32 %v8909_v56, %v7404_v55  ;;  %v7409_v62 = vor.u32 %v8907_v58, %v7406_v59  ;;  %v8905_v0 = vld [vmem:[%s9946_s15 + $0x6c] sm:$0xf0]  ;;  %v8854_v1 = vld [vmem:[%s9923_s22 + $0x18] sm:$0xff] }
 0x3a0   :  { %1325 = vmatpush.bf16.msra.mxu0 %v8848_v32  ;;  %v7388_v63 = vld [vmem:[%s9946_s15 + $0x60] sm:$0xf]  ;;  %v8903_v2 = vld [vmem:[%s9946_s15 + $0x64] sm:$0xf]  ;;  %v7390_v3 = vld [vmem:[%s9946_s15 + $0x70] sm:$0xf0] }
 0x3a1   :  { %2222 = vmatpush.bf16.msra.mxu3 %v7441_v46  ;;  %1407 = vmatpush.bf16.msra.mxu1 %v8856_v43  ;;  %v8845_v4 = vld [vmem:[%s9918_s18 + $0x10] sm:$0xff]  ;;  %v7389_v5 = vor.u32 %v8905_v0, %v7388_v63  ;;  %v7393_v6 = vor.u32 %v8903_v2, %v7390_v3  ;;  %v7372_v7 = vld [vmem:[%s9946_s15 + $0x40] sm:$0xf]  ;;  %v8899_v12 = vld [vmem:[%s9946_s15 + $0x44] sm:$0xf] }
 0x3a2   :  { %v8901_v9 = vld [vmem:[%s9946_s15 + $0x4c] sm:$0xf0]  ;;  %v7374_v14 = vld [vmem:[%s9946_s15 + $0x50] sm:$0xf0]  ;;  %v8844_v15 = vld [vmem:[%s9918_s18 + $0x8] sm:$0xff] }
 0x3a3   :  { %2210 = vmatpush.bf16.msra.mxu2 %v7421_v53  ;;  %v8853_v10 = vld [vmem:[%s9923_s22 + $0x10] sm:$0xff]  ;;  %v7373_v16 = vor.u32 %v8901_v9, %v7372_v7  ;;  %v7460_v17 = vld [vmem:[%s9946_s15 + $0xe8] sm:$0xf]  ;;  %v8922_v18 = vld [vmem:[%s9946_s15 + $0xf4] sm:$0xf0]  ;;  %v7377_v19 = vor.u32 %v8899_v12, %v7374_v14 }
 0x3a4   :  { %1326 = vmatpush.bf16.msra.mxu0 %v8847_v51  ;;  %v8852_v20 = vld [vmem:[%s9923_s22 + $0x8] sm:$0xff]  ;;  %v8843_v22 = vld [vmem:[%s9918_s18] sm:$0xff]  ;;  %v7461_v26 = vor.u32 %v8922_v18, %v7460_v17  ;;  %v7462_v29 = vld [vmem:[%s9946_s15 + $0xf8] sm:$0xf0] }
 0x3a5   :  { %2223 = vmatpush.bf16.msra.mxu3 %v7425_v54  ;;  %1408 = vmatpush.bf16.msra.mxu1 %v8855_v57  ;;  %v1256_v24 = vld [vmem:[#allocation6] sm:$0xff]  ;;  %v8920_v27 = vld [vmem:[%s9946_s15 + $0xec] sm:$0xf]  ;;  %v7444_v30 = vld [vmem:[%s9946_s15 + $0xc8] sm:$0xf] }
 0x3a6   :  { %v8918_v32 = vld [vmem:[%s9946_s15 + $0xd4] sm:$0xf0]  ;;  %v10383_v33 = vpack.c.bf16 %v1256_v24, %v1256_v24  ;;  %v8851_v37 = vld [vmem:[%s9923_s22] sm:$0xff]  ;;  %v7465_v38 = vor.u32 %v8920_v27, %v7462_v29  ;;  %v8916_v40 = vld [vmem:[%s9946_s15 + $0xcc] sm:$0xf] }
 0x3a7   :  { %2211 = vmatpush.bf16.msra.mxu2 %v7405_v61  ;;  %v7445_v39 = vor.u32 %v8918_v32, %v7444_v30  ;;  %v7446_v43 = vld [vmem:[%s9946_s15 + $0xd8] sm:$0xf0]  ;;  %v7428_v45 = vld [vmem:[%s9946_s15 + $0xa8] sm:$0xf]  ;;  %v8914_v46 = vld [vmem:[%s9946_s15 + $0xb4] sm:$0xf0] }
 0x3a8   :  { %1327 = vmatpush.bf16.msra.mxu0 %v8846_v60  ;;  %v7449_v47 = vor.u32 %v8916_v40, %v7446_v43  ;;  %v7429_v49 = vor.u32 %v8914_v46, %v7428_v45  ;;  %v7412_v50 = vld [vmem:[%s9946_s15 + $0x88] sm:$0xf]  ;;  %v8910_v51 = vld [vmem:[%s9946_s15 + $0x94] sm:$0xf0]  ;;  %v7356_v59 = vld [vmem:[%s9946_s15 + $0x20] sm:$0xf] }
 0x3a9   :  { %2224 = vmatpush.bf16.msra.mxu3 %v7409_v62  ;;  %1409 = vmatpush.bf16.msra.mxu1 %v8854_v1  ;;  %v7413_v52 = vor.u32 %v8910_v51, %v7412_v50  ;;  %v7396_v53 = vld [vmem:[%s9946_s15 + $0x68] sm:$0xf]  ;;  %v8906_v54 = vld [vmem:[%s9946_s15 + $0x74] sm:$0xf0]  ;;  %v8897_v60 = vld [vmem:[%s9946_s15 + $0x2c] sm:$0xf0] }
 0x3aa   :  { %v7397_v55 = vor.u32 %v8906_v54, %v7396_v53  ;;  %v7380_v56 = vld [vmem:[%s9946_s15 + $0x48] sm:$0xf]  ;;  %v8902_v57 = vld [vmem:[%s9946_s15 + $0x54] sm:$0xf0]  ;;  %v8895_v61 = vld [vmem:[%s9946_s15 + $0x24] sm:$0xf]  ;;  %v7357_v62 = vor.u32 %v8897_v60, %v7356_v59 }
 0x3ab   :  { %2212 = vmatpush.bf16.msra.mxu2 %v7389_v5  ;;  %v7381_v58 = vor.u32 %v8902_v57, %v7380_v56  ;;  %v7358_v63 = vld [vmem:[%s9946_s15 + $0x30] sm:$0xf0]  ;;  %v7364_v0 = vld [vmem:[%s9946_s15 + $0x28] sm:$0xf]  ;;  %v8898_v1 = vld [vmem:[%s9946_s15 + $0x34] sm:$0xf0] }
 0x3ac   :  { %1328 = vmatpush.bf16.msra.mxu0 %v8845_v4  ;;  %v7361_v2 = vor.u32 %v8895_v61, %v7358_v63  ;;  %v7365_v3 = vor.u32 %v8898_v1, %v7364_v0  ;;  %v8912_v4 = vld [vmem:[%s9946_s15 + $0xac] sm:$0xf]  ;;  %v7430_v5 = vld [vmem:[%s9946_s15 + $0xb8] sm:$0xf0]  ;;  %v7340_v7 = vld [vmem:[%s9946_s15] sm:$0xf] }
 0x3ad   :  { %2225 = vmatpush.bf16.msra.mxu3 %v7393_v6  ;;  %1410 = vmatpush.bf16.msra.mxu1 %v8853_v10  ;;  %v7433_v6 = vor.u32 %v8912_v4, %v7430_v5  ;;  %v8893_v9 = vld [vmem:[%s9946_s15 + $0xc] sm:$0xf0]  ;;  %v8891_v10 = vld [vmem:[%s9946_s15 + $0x4] sm:$0xf]  ;;  %v7342_v14 = vld [vmem:[%s9946_s15 + $0x10] sm:$0xf0] }
 0x3ae   :  { %v7341_v12 = vor.u32 %v8893_v9, %v7340_v7  ;;  %v7345_v17 = vor.u32 %v8891_v10, %v7342_v14  ;;  %v8904_v24 = vld [vmem:[%s9946_s15 + $0x6c] sm:$0xf]  ;;  %v7382_v30 = vld [vmem:[%s9946_s15 + $0x58] sm:$0xf0]  ;;  %v9204_v53 = vld [vmem:[%s9908_s10] sm:$0xff]  }
 0x3af   :  { %2213 = vmatpush.bf16.msra.mxu2 %v7373_v16  ;;  %v8894_v16 = vld [vmem:[%s9946_s15 + $0x14] sm:$0xf0]  ;;  %v8900_v29 = vld [vmem:[%s9946_s15 + $0x4c] sm:$0xf]  ;;  %v7350_v43 = vld [vmem:[%s9946_s15 + $0x18] sm:$0xf0]  ;;  %v9205_v59 = vunpack.c.l.bf16 %v9204_v53  ;;  %v9206_v4 = vunpack.c.h.bf16 %v9204_v53 }
 0x3b0   :  { %1329 = vmatpush.bf16.msra.mxu0 %v8844_v15  ;;  %v7348_v15 = vld [vmem:[%s9946_s15 + $0x8] sm:$0xf]  ;;  %v7385_v32 = vor.u32 %v8900_v29, %v7382_v30  ;;  %v8892_v40 = vld [vmem:[%s9946_s15 + $0xc] sm:$0xf]  ;;  %v9396_v54 = vld [vmem:[%s9908_s10 + $0x10] sm:$0xff]  }
 0x3b1   :  { %2226 = vmatpush.bf16.msra.mxu3 %v7377_v19  ;;  %1411 = vmatpush.bf16.msra.mxu1 %v8852_v20  ;;  %v7349_v18 = vor.u32 %v8894_v16, %v7348_v15  ;;  %v8908_v19 = vld [vmem:[%s9946_s15 + $0x8c] sm:$0xf]  ;;  %v7414_v20 = vld [vmem:[%s9946_s15 + $0x98] sm:$0xf0]  ;;  %v7353_v45 = vor.u32 %v8892_v40, %v7350_v43  ;;  %v9213_v60 = vunpack.c.l.bf16 %v9396_v54  ;;  %v9214_v10 = vunpack.c.h.bf16 %v9396_v54 }
 0x3b2   :  { %v9395_v56 = vld [vmem:[%s9908_s10 + $0x8] sm:$0xff]  }
 0x3b3   :  { %2214 = vmatpush.bf16.msra.mxu2 %v7357_v62  ;;  %v9209_v63 = vunpack.c.l.bf16 %v9395_v56  ;;  %v9210_v14 = vunpack.c.h.bf16 %v9395_v56  ;;  %v9399_v56 = vld [vmem:[%s9908_s10 + $0x28] sm:$0xff]  }
 0x3b4   :  { %1330 = vmatpush.bf16.msra.mxu0 %v8843_v22  ;;  %v7417_v22 = vor.u32 %v8908_v19, %v7414_v20  ;;  %v9397_v19 = vld [vmem:[%s9908_s10 + $0x18] sm:$0xff]  }
 0x3b5   :  { %1412 = vmatpush.bf16.msra.mxu1 %v8851_v37  ;;  %2227 = vmatpush.bf16.msra.mxu3 %v7361_v2  ;;  %v8896_v37 = vld [vmem:[%s9946_s15 + $0x2c] sm:$0xf]  ;;  %v9217_v29 = vunpack.c.l.bf16 %v9397_v19 }
 0x3b7   :  { %1331 = vmatmul.bf16.vlgmr.msra.gmra.mxu0 %v10383_v33  ;;  %2215 = vmatpush.bf16.msra.mxu2 %v7341_v12 }
 0x3b8   :  { %2234 = vmatpush.bf16.msrb.mxu0 %v7461_v26  ;;  %v7398_v26 = vld [vmem:[%s9946_s15 + $0x78] sm:$0xf0] }
 0x3b9   :  { %2247 = vmatpush.bf16.msrb.mxu1 %v7465_v38  ;;  %2228 = vmatpush.bf16.msra.mxu3 %v7345_v17  ;;  %v7401_v27 = vor.u32 %v8904_v24, %v7398_v26  ;;  %v7366_v38 = vld [vmem:[%s9946_s15 + $0x38] sm:$0xf0]  ;;  %v9398_v26 = vld [vmem:[%s9908_s10 + $0x20] sm:$0xff]  }
 0x3ba   :  { %v9221_v40 = vunpack.c.l.bf16 %v9398_v26 }
 0x3bc   :  { %2235 = vmatpush.bf16.msrb.mxu0 %v7445_v39  ;;  %v7369_v39 = vor.u32 %v8896_v37, %v7366_v38 }
 0x3bd   :  { %2248 = vmatpush.bf16.msrb.mxu1 %v7449_v47 }
 0x3c0   :  { %2236 = vmatpush.bf16.msrb.mxu0 %v7429_v49 }
 0x3c1   :  { %2249 = vmatpush.bf16.msrb.mxu1 %v7433_v6 }
 0x3c4   :  { %2237 = vmatpush.bf16.msrb.mxu0 %v7413_v52  ;;  %v1355_v52 = vperm.slane %v9962_v8, 0 }
 0x3c5   :  { %2250 = vmatpush.bf16.msrb.mxu1 %v7417_v22 }
 0x3c8   :  { %2238 = vmatpush.bf16.msrb.mxu0 %v7397_v55 }
 0x3c9   :  { %2251 = vmatpush.bf16.msrb.mxu1 %v7401_v27 }
 0x3cc   :  { %2239 = vmatpush.bf16.msrb.mxu0 %v7381_v58 }
 0x3cd   :  { %2252 = vmatpush.bf16.msrb.mxu1 %v7385_v32 }
 0x3d0   :  { %2240 = vmatpush.bf16.msrb.mxu0 %v7365_v3 }
 0x3d1   :  { %2253 = vmatpush.bf16.msrb.mxu1 %v7369_v39 }
 0x3d4   :  { %2241 = vmatpush.bf16.msrb.mxu0 %v7349_v18  ;;  %v10439_v18 = vperm.slane %v9970_v11, 0 }
 0x3d5   :  { %2254 = vmatpush.bf16.msrb.mxu1 %v7353_v45 }
 0x434   :  { %v1332_v46 = vpop.f32.mrf.mxu0 }
 0x435   :  { %v1333_v47 = vadd.f32 %v1332_v46, %v10301_v34 }
 0x437   :  { %v1336_v49 = vmax.f32 %v1333_v47, 0.0 }
 0x439   :  { %v1337_v50 = vpack.c.bf16 %v1336_v49, %v1336_v49  ;;  %v9218_v49 = vunpack.c.h.bf16 %v9397_v19 }
 0x43b   :  { %1413 = vmatmul.bf16.vlgmr.msra.gmra.mxu1 %v1337_v50  ;;  %2216 = vmatmul.bf16.vlgmr.msra.gmra.mxu2 %v1337_v50 }
 0x43c   :  { %2229 = vmatmul.bf16.vlgmr.msra.gmra.mxu3 %v1337_v50  ;;  %2242 = vmatmul.bf16.vlgmr.msrb.gmra.mxu0 %v1337_v50  ;;  %v1334_v51 = vpop.f32.mrf.mxu0 }
 0x44b   :  { %2255 = vmatmul.bf16.vlgmr.msrb.gmra.mxu1 %v1337_v50 }
 0x4b8   :  { %v1414_v55 = vpop.f32.mrf.mxu1 }
 0x4b9   :  { %v10426_v57 = vadd.f32 %v1414_v55, %v1355_v52  ;;  %v10428_v58 = vpop.f32.mrf.mxu0 }
 0x4bb   :  { %v1458_v61 = vperm.slane %v10426_v57, 0  ;;  %v1436_v62 = vrot.slane %v10426_v57, 2  ;;  %v1435_v0 = vrot.slane %v10426_v57, 1  ;;  %v1437_v17 = vrot.slane %v10426_v57, 3 }
 0x4bc   :  { %v1438_v22 = vrot.slane %v10426_v57, 4  ;;  %v1439_v54 = vrot.slane %v10426_v57, 5 }
 0x4bd   :  { %v1474_v1 = vadd.f32 %v9205_v59, %v1458_v61  ;;  %v1460_v2 = vperm.slane %v1436_v62, 0  ;;  %v1459_v3 = vperm.slane %v1435_v0, 0  ;;  %v1475_v16 = vadd.f32 %v9206_v4, %v1458_v61 }
 0x4be   :  { %v10433_v5 = vpop.f32.mrf.mxu2  ;;  %v1461_v30 = vperm.slane %v1437_v17, 0  ;;  %v1462_v43 = vperm.slane %v1438_v22, 0  ;;  %v1463_v0 = vperm.slane %v1439_v54, 0  ;;  %v9401_v17 = vld [vmem:[%s9908_s10 + $0x38] sm:$0xff]  }
 0x4bf   :  { %v10435_v6 = vpop.f32.mrf.mxu3  ;;  %9521 = vtanh.f32 %v1474_v1  ;;  %v1478_v7 = vadd.f32 %v9213_v60, %v1460_v2  ;;  %v1476_v9 = vadd.f32 %v9209_v63, %v1459_v3  ;;  %v1479_v20 = vadd.f32 %v9214_v10, %v1460_v2  ;;  %v9400_v10 = vld [vmem:[%s9908_s10 + $0x30] sm:$0xff]  }
 0x4c0   :  { %v1416_v12 = vpop.f32.mrf.mxu1  ;;  %v1477_v24 = vadd.f32 %v9210_v14, %v1459_v3  ;;  %v1480_v51 = vadd.f32 %v9217_v29, %v1461_v30  ;;  %v1482_v53 = vadd.f32 %v9221_v40, %v1462_v43  ;;  %v1481_v55 = vadd.f32 %v9218_v49, %v1461_v30 }
 0x4c1   :  { %v2245_v15 = vpop.f32.mrf.mxu0  ;;  %9523 = vtanh.f32 %v1478_v7  ;;  %v9222_v60 = vunpack.c.h.bf16 %v9398_v26  ;;  %v9226_v63 = vunpack.c.h.bf16 %v9399_v56  ;;  %v9225_v3 = vunpack.c.l.bf16 %v9399_v56 }
 0x4c2   :  { %9525 = vtanh.f32 %v1476_v9  ;;  %v1440_v9 = vrot.slane %v10426_v57, 6  ;;  %v1441_v15 = vrot.slane %v10426_v57, 7 }
 0x4c3   :  { %9527 = vtanh.f32 %v1475_v16  ;;  %v1483_v7 = vadd.f32 %v9222_v60, %v1462_v43  ;;  %v1485_v14 = vadd.f32 %v9226_v63, %v1463_v0  ;;  %v1484_v16 = vadd.f32 %v9225_v3, %v1463_v0 }
 0x4c4   :  { %9529 = vtanh.f32 %v1479_v20  ;;  %v9229_v20 = vunpack.c.l.bf16 %v9400_v10  ;;  %v1464_v22 = vperm.slane %v1440_v9, 0  ;;  %v1465_v29 = vperm.slane %v1441_v15, 0 }
 0x4c5   :  { %v9522_v27 = vpop.eup %9521  ;;  %9531 = vtanh.f32 %v1477_v24 }
 0x4c6   :  { %v2219_v32 = vpop.f32.mrf.mxu2  ;;  %v1509_v37 = vmul.f32 %v9522_v27, %v10439_v18  ;;  %9533 = vtanh.f32 %v1480_v51  ;;  %v9233_v27 = vunpack.c.l.bf16 %v9401_v17  ;;  %v1486_v57 = vadd.f32 %v9229_v20, %v1464_v22 }
 0x4c7   :  { %v9524_v38 = vpop.eup %9523  ;;  %v2232_v39 = vpop.f32.mrf.mxu3  ;;  %9535 = vtanh.f32 %v1482_v53  ;;  %v9230_v32 = vunpack.c.h.bf16 %v9400_v10 }
 0x4c8   :  { %v9526_v45 = vpop.eup %9525  ;;  %v10445_v46 = vpop.f32.mrf.mxu1  ;;  %1525 = vadd.xlane.f32.xlu0 %v1509_v37  ;;  %v1513_v47 = vmul.f32 %v9524_v38, %v10439_v18  ;;  %9537 = vtanh.f32 %v1481_v55  ;;  %v1488_v39 = vadd.f32 %v9233_v27, %v1465_v29 }
 0x4c9   :  { %v1511_v50 = vmul.f32 %v9526_v45, %v10439_v18  ;;  %v9528_v52 = vpop.eup %9527  ;;  %9539 = vtanh.f32 %v1483_v7  ;;  %v1487_v40 = vadd.f32 %v9230_v32, %v1464_v22  ;;  %v9234_v45 = vunpack.c.h.bf16 %v9401_v17 }
 0x4ca   :  { %1533 = vadd.xlane.f32.xlu2 %v1513_v47  ;;  %v9530_v59 = vpop.eup %9529  ;;  %v1510_v62 = vmul.f32 %v9528_v52, %v10439_v18  ;;  %9541 = vtanh.f32 %v1485_v14 }
 0x4cb   :  { %1529 = vadd.xlane.f32.xlu1 %v1511_v50  ;;  %v9532_v61 = vpop.eup %9531  ;;  %v1514_v2 = vmul.f32 %v9530_v59, %v10439_v18  ;;  %9543 = vtanh.f32 %v1484_v16  ;;  %v1489_v52 = vadd.f32 %v9234_v45, %v1465_v29 }
 0x4cc   :  { %v1512_v4 = vmul.f32 %v9532_v61, %v10439_v18  ;;  %v9534_v12 = vpop.eup %9533  ;;  %9545 = vtanh.f32 %v1486_v57 }
 0x4cd   :  { %v9536_v19 = vpop.eup %9535  ;;  %v1515_v26 = vmul.f32 %v9534_v12, %v10439_v18  ;;  %9547 = vtanh.f32 %v1488_v39 }
 0x4ce   :  { %v9538_v24 = vpop.eup %9537  ;;  %v1517_v30 = vmul.f32 %v9536_v19, %v10439_v18  ;;  %9549 = vtanh.f32 %v1487_v40 }
 0x4cf   :  { %v1516_v37 = vmul.f32 %v9538_v24, %v10439_v18  ;;  %v9540_v38 = vpop.eup %9539  ;;  %9551 = vtanh.f32 %v1489_v52 }
 0x4d0   :  { %v2258_v1 = vpop.f32.mrf.mxu1  ;;  %1527 = vadd.xlane.f32.xlu0 %v1510_v62  ;;  %v9542_v43 = vpop.eup %9541  ;;  %v1518_v49 = vmul.f32 %v9540_v38, %v10439_v18 }
 0x4d1   :  { %v9544_v47 = vpop.eup %9543  ;;  %v1520_v50 = vmul.f32 %v9542_v43, %v10439_v18  ;;  %v10469_v1 = vperm.slane %v10019_v44, 0 }
 0x4d2   :  { %1535 = vadd.xlane.f32.xlu2 %v1514_v2  ;;  %v1519_v51 = vmul.f32 %v9544_v47, %v10439_v18  ;;  %v9546_v53 = vpop.eup %9545 }
 0x4d3   :  { %1531 = vadd.xlane.f32.xlu1 %v1512_v4  ;;  %v9548_v54 = vpop.eup %9547  ;;  %v1521_v56 = vmul.f32 %v9546_v53, %v10439_v18 }
 0x4d4   :  { %v9550_v55 = vpop.eup %9549  ;;  %v1523_v59 = vmul.f32 %v9548_v54, %v10439_v18 }
 0x4d5   :  { %v1522_v60 = vmul.f32 %v9550_v55, %v10439_v18  ;;  %v9552_v61 = vpop.eup %9551 }
 0x4d6   :  { %v1524_v62 = vmul.f32 %v9552_v61, %v10439_v18 }
 0x4d8   :  { %1537 = vadd.xlane.f32.xlu0 %v1515_v26 }
 0x4da   :  { %1541 = vadd.xlane.f32.xlu2 %v1517_v30 }
 0x4db   :  { %1539 = vadd.xlane.f32.xlu1 %v1516_v37 }
 0x4e0   :  { %1543 = vadd.xlane.f32.xlu0 %v1518_v49 }
 0x4e2   :  { %1547 = vadd.xlane.f32.xlu2 %v1520_v50 }
 0x4e3   :  { %1545 = vadd.xlane.f32.xlu1 %v1519_v51 }
 0x4e8   :  { %1549 = vadd.xlane.f32.xlu0 %v1521_v56 }
 0x4ea   :  { %1553 = vadd.xlane.f32.xlu2 %v1523_v59 }
 0x4eb   :  { %1551 = vadd.xlane.f32.xlu1 %v1522_v60 }
 0x4f0   :  { %1555 = vadd.xlane.f32.xlu0 %v1524_v62 }
 0x53b   :  { %v1526_v63 = vpop.xlane.xlu0 %1525 }
 0x53c   :  { %v1560_v3 = vadd.f32 %v10469_v1, %v1526_v63 }
 0x53d   :  { %v1534_v0 = vpop.xlane.xlu2 %1533 }
 0x53e   :  { %v1530_v2 = vpop.xlane.xlu1 %1529  ;;  %v10473_v7 = vadd.f32 %v10469_v1, %v1534_v0  ;;  %v1576_v18 = vsel %vm1139_vm2, %v1560_v3, -inf }
 0x53f   :  { %v10477_v10 = vadd.f32 %v10469_v1, %v1530_v2 }
 0x540   :  { %v1594_v20 = vsel %vm1139_vm2, %v10473_v7, -inf }
 0x541   :  { %v1585_v24 = vsel %vm1139_vm2, %v10477_v10, -inf }
 0x543   :  { %v1528_v4 = vpop.xlane.xlu0 %1527 }
 0x544   :  { %v1561_v9 = vadd.f32 %v10469_v1, %v1528_v4 }
 0x545   :  { %v1536_v12 = vpop.xlane.xlu2 %1535 }
 0x546   :  { %v1577_v14 = vsel %vm1139_vm2, %v1561_v9, -inf  ;;  %v1565_v15 = vadd.f32 %v10469_v1, %v1536_v12  ;;  %v1532_v16 = vpop.xlane.xlu1 %1531 }
 0x547   :  { %v1578_v17 = vmax.f32 %v1576_v18, %v1577_v14  ;;  %v1563_v19 = vadd.f32 %v10469_v1, %v1532_v16 }
 0x548   :  { %v1595_v22 = vsel %vm1139_vm2, %v1565_v15, -inf }
 0x549   :  { %v1579_v26 = vrot.slane %v1578_v17, 4  ;;  %v1596_v27 = vmax.f32 %v1594_v20, %v1595_v22  ;;  %v1586_v29 = vsel %vm1139_vm2, %v1563_v19, -inf }
 0x54a   :  { %v1587_v30 = vmax.f32 %v1585_v24, %v1586_v29 }
 0x54b   :  { %v1580_v32 = vmax.f32 %v1578_v17, %v1579_v26  ;;  %v1597_v37 = vrot.slane %v1596_v27, 4  ;;  %v1538_v57 = vpop.xlane.xlu0 %1537 }
 0x54c   :  { %v1588_v38 = vrot.slane %v1587_v30, 4  ;;  %v10490_v39 = vadd.f32 %v10469_v1, %v1538_v57 }
 0x54d   :  { %v1581_v40 = vrot.slane %v1580_v32, 2  ;;  %v1598_v43 = vmax.f32 %v1596_v27, %v1597_v37  ;;  %v1542_v45 = vpop.xlane.xlu2 %1541 }
 0x54e   :  { %v1589_v47 = vmax.f32 %v1587_v30, %v1588_v38  ;;  %v1540_v49 = vpop.xlane.xlu1 %1539  ;;  %v1603_v54 = vsel %vm1139_vm2, %v10490_v39, -inf  ;;  %v10498_v59 = vadd.f32 %v10469_v1, %v1542_v45 }
 0x54f   :  { %v1582_v50 = vmax.f32 %v1580_v32, %v1581_v40  ;;  %v1599_v51 = vrot.slane %v1598_v43, 2  ;;  %v10493_v52 = vadd.f32 %v10469_v1, %v1540_v49 }
 0x550   :  { %v1590_v53 = vrot.slane %v1589_v47, 2  ;;  %v1612_v20 = vsel %vm1139_vm2, %v10498_v59, -inf }
 0x551   :  { %v1583_v55 = vrot.slane %v1582_v50, 1  ;;  %v1600_v56 = vmax.f32 %v1598_v43, %v1599_v51  ;;  %v1604_v60 = vsel %vm1139_vm2, %v10493_v52, -inf }
 0x552   :  { %v1591_v61 = vmax.f32 %v1589_v47, %v1590_v53  ;;  %v1605_v62 = vmax.f32 %v1603_v54, %v1604_v60 }
 0x553   :  { %v1584_v63 = vmax.f32 %v1582_v50, %v1583_v55  ;;  %v1601_v0 = vrot.slane %v1600_v56, 1  ;;  %v1544_v2 = vpop.xlane.xlu0 %1543 }
 0x554   :  { %v1592_v4 = vrot.slane %v1591_v61, 1  ;;  %v1606_v12 = vrot.slane %v1605_v62, 4  ;;  %v10503_v18 = vadd.f32 %v10469_v1, %v1544_v2 }
 0x555   :  { %v1648_v14 = vsub.f32 %v1560_v3, %v1584_v63  ;;  %v1649_v16 = vsub.f32 %v1561_v9, %v1584_v63  ;;  %v1602_v17 = vmax.f32 %v1600_v56, %v1601_v0  ;;  %v1548_v22 = vpop.xlane.xlu2 %1547 }
 0x556   :  { %v1593_v24 = vmax.f32 %v1591_v61, %v1592_v4  ;;  %v1607_v26 = vmax.f32 %v1605_v62, %v1606_v12  ;;  %v1613_v27 = vsel %vm1139_vm2, %v10503_v18, -inf  ;;  %v10510_v29 = vadd.f32 %v10469_v1, %v1548_v22  ;;  %v1546_v30 = vpop.xlane.xlu1 %1545 }
 0x557   :  { %v1664_v32 = vmul.f32 1.442695, %v1648_v14  ;;  %v1666_v37 = vmul.f32 1.442695, %v1649_v16  ;;  %v1652_v57 = vsub.f32 %v10473_v7, %v1602_v17  ;;  %v1653_v3 = vsub.f32 %v1565_v15, %v1602_v17 }
 0x558   :  { %v1650_v9 = vsub.f32 %v10477_v10, %v1593_v24  ;;  %v1651_v38 = vsub.f32 %v1563_v19, %v1593_v24  ;;  %v1608_v40 = vrot.slane %v1607_v26, 2  ;;  %v1614_v43 = vmax.f32 %v1612_v20, %v1613_v27 }
 0x559   :  { %9553 = vpow2.f32 %v1664_v32  ;;  %v1672_v45 = vmul.f32 1.442695, %v1652_v57  ;;  %v1674_v47 = vmul.f32 1.442695, %v1653_v3  ;;  %v1622_v54 = vsel %vm1139_vm2, %v10510_v29, -inf }
 0x55a   :  { %9555 = vpow2.f32 %v1666_v37  ;;  %v1668_v49 = vmul.f32 1.442695, %v1650_v9  ;;  %v1670_v50 = vmul.f32 1.442695, %v1651_v38  ;;  %v1609_v51 = vmax.f32 %v1607_v26, %v1608_v40 }
 0x55b   :  { %9557 = vpow2.f32 %v1672_v45  ;;  %v1615_v53 = vrot.slane %v1614_v43, 4  ;;  %v10517_v7 = vadd.f32 %v10469_v1, %v1546_v30  ;;  %v1550_v15 = vpop.xlane.xlu0 %1549 }
 0x55c   :  { %9559 = vpow2.f32 %v1674_v47  ;;  %v1610_v10 = vrot.slane %v1609_v51, 1  ;;  %v10520_v19 = vadd.f32 %v10469_v1, %v1550_v15 }
 0x55d   :  { %9561 = vpow2.f32 %v1668_v49  ;;  %v1616_v55 = vmax.f32 %v1614_v43, %v1615_v53  ;;  %v1621_v56 = vsel %vm1139_vm2, %v10517_v7, -inf  ;;  %v1554_v60 = vpop.xlane.xlu2 %1553 }
 0x55e   :  { %9563 = vpow2.f32 %v1670_v50  ;;  %v1611_v61 = vmax.f32 %v1609_v51, %v1610_v10  ;;  %v1623_v62 = vmax.f32 %v1621_v56, %v1622_v54  ;;  %v1552_v63 = vpop.xlane.xlu1 %1551  ;;  %v1630_v4 = vsel %vm1139_vm2, %v10520_v19, -inf }
 0x55f   :  { %v10524_v0 = vpop.eup %9553  ;;  %v1617_v2 = vrot.slane %v1616_v55, 2  ;;  %v10529_v12 = vadd.f32 %v10469_v1, %v1554_v60  ;;  %v10532_v14 = vadd.f32 %v10469_v1, %v1552_v63 }
 0x560   :  { %v10534_v16 = vpop.eup %9555  ;;  %v1696_v17 = vsel %vm1139_vm2, %v10524_v0, 0.0  ;;  %v1654_v20 = vsub.f32 %v10490_v39, %v1611_v61  ;;  %v1655_v22 = vsub.f32 %v10493_v52, %v1611_v61  ;;  %v1624_v24 = vrot.slane %v1623_v62, 4 }
 0x561   :  { %v10540_v26 = vpop.eup %9557  ;;  %v1697_v27 = vsel %vm1139_vm2, %v10534_v16, 0.0  ;;  %v1618_v30 = vmax.f32 %v1616_v55, %v1617_v2  ;;  %v1639_v32 = vsel %vm1139_vm2, %v10529_v12, -inf  ;;  %v1631_v37 = vsel %vm1139_vm2, %v10532_v14, -inf }
 0x562   :  { %v10548_v57 = vpop.eup %9559  ;;  %v1698_v3 = vadd.f32 %v1697_v27, %v1696_v17  ;;  %v1714_v39 = vsel %vm1139_vm2, %v10540_v26, 0.0  ;;  %v1676_v52 = vmul.f32 1.442695, %v1654_v20  ;;  %v1678_v9 = vmul.f32 1.442695, %v1655_v22 }
 0x563   :  { %v10552_v38 = vpop.eup %9561  ;;  %v1715_v40 = vsel %vm1139_vm2, %v10548_v57, 0.0  ;;  %v1619_v43 = vrot.slane %v1618_v30, 1  ;;  %v1625_v45 = vmax.f32 %v1623_v62, %v1624_v24  ;;  %v1632_v47 = vmax.f32 %v1630_v4, %v1631_v37  ;;  %v1556_v54 = vpop.xlane.xlu0 %1555 }
 0x564   :  { %v10556_v49 = vpop.eup %9563  ;;  %v1699_v50 = vrot.slane %v1698_v3, 4  ;;  %v1716_v51 = vadd.f32 %v1715_v40, %v1714_v39  ;;  %v1705_v53 = vsel %vm1139_vm2, %v10552_v38, 0.0  ;;  %9565 = vpow2.f32 %v1676_v52 }
 0x565   :  { %v1706_v15 = vsel %vm1139_vm2, %v10556_v49, 0.0  ;;  %9567 = vpow2.f32 %v1678_v9  ;;  %v1620_v10 = vmax.f32 %v1618_v30, %v1619_v43  ;;  %v1626_v55 = vrot.slane %v1625_v45, 2 }
 0x566   :  { %v1700_v56 = vadd.f32 %v1699_v50, %v1698_v3  ;;  %v1717_v60 = vrot.slane %v1716_v51, 4  ;;  %v1707_v61 = vadd.f32 %v1706_v15, %v1705_v53  ;;  %v1633_v62 = vrot.slane %v1632_v47, 4 }
 0x567   :  { %v1656_v63 = vsub.f32 %v10498_v59, %v1620_v10  ;;  %v1657_v2 = vsub.f32 %v10503_v18, %v1620_v10  ;;  %v1627_v4 = vmax.f32 %v1625_v45, %v1626_v55  ;;  %v10565_v17 = vadd.f32 %v10469_v1, %v1556_v54 }
 0x568   :  { %v1718_v20 = vadd.f32 %v1717_v60, %v1716_v51  ;;  %v1708_v22 = vrot.slane %v1707_v61, 4  ;;  %v1634_v24 = vmax.f32 %v1632_v47, %v1633_v62  ;;  %v9889_v3 = vmov 0  }
 0x569   :  { %v1680_v27 = vmul.f32 1.442695, %v1656_v63  ;;  %v1682_v37 = vmul.f32 1.442695, %v1657_v2  ;;  %v1628_v39 = vrot.slane %v1627_v4, 1  ;;  %v1640_v30 = vsel %vm1139_vm2, %v10565_v17, -inf  ;;  %9519 = vset.pattern.permute.xlu2 %v9889_v3  ;;  %9518 = vset.pattern.permute.xlu1 %v9889_v3 }
 0x56a   :  { %v10569_v52 = vpop.eup %9565  ;;  %v1709_v59 = vadd.f32 %v1708_v22, %v1707_v61  ;;  %v1635_v18 = vrot.slane %v1634_v24, 2  ;;  %v1641_v9 = vmax.f32 %v1639_v32, %v1640_v30  ;;  %v1701_v40 = vrot.slane %v1700_v56, 2  ;;  %9520 = vset.pattern.permute.xlu0 %v9889_v3 }
 0x56b   :  { %v10571_v1 = vpop.eup %9567  ;;  %v1723_v43 = vsel %vm1139_vm2, %v10569_v52, 0.0  ;;  %9569 = vpow2.f32 %v1680_v27  ;;  %v1629_v45 = vmax.f32 %v1627_v4, %v1628_v39  ;;  %v1719_v47 = vrot.slane %v1718_v20, 2 }
 0x56c   :  { %v1724_v50 = vsel %vm1139_vm2, %v10571_v1, 0.0  ;;  %9571 = vpow2.f32 %v1682_v37  ;;  %v1636_v51 = vmax.f32 %v1634_v24, %v1635_v18  ;;  %v1642_v53 = vrot.slane %v1641_v9, 4 }
 0x56d   :  { %v1725_v54 = vadd.f32 %v1724_v50, %v1723_v43  ;;  %v1658_v15 = vsub.f32 %v10517_v7, %v1629_v45  ;;  %v1659_v32 = vsub.f32 %v10510_v29, %v1629_v45  ;;  %v1702_v10 = vadd.f32 %v1701_v40, %v1700_v56 }
 0x56e   :  { %v1637_v55 = vrot.slane %v1636_v51, 1  ;;  %v1643_v60 = vmax.f32 %v1641_v9, %v1642_v53  ;;  %v1710_v61 = vrot.slane %v1709_v59, 2  ;;  %v1720_v62 = vadd.f32 %v1719_v47, %v1718_v20 }
 0x56f   :  { %v1726_v63 = vrot.slane %v1725_v54, 4  ;;  %v1684_v2 = vmul.f32 1.442695, %v1658_v15  ;;  %v1686_v4 = vmul.f32 1.442695, %v1659_v32  ;;  %v1703_v22 = vrot.slane %v1702_v10, 1 }
 0x570   :  { %v1638_v27 = vmax.f32 %v1636_v51, %v1637_v55  ;;  %v1644_v39 = vrot.slane %v1643_v60, 2  ;;  %v1711_v30 = vadd.f32 %v1710_v61, %v1709_v59  ;;  %v1721_v7 = vrot.slane %v1720_v62, 1 }
 0x571   :  { %v10579_v37 = vpop.eup %9569  ;;  %v1727_v24 = vadd.f32 %v1726_v63, %v1725_v54  ;;  %9573 = vpow2.f32 %v1684_v2  ;;  %v1704_v3 = vadd.f32 %v1703_v22, %v1702_v10 }
 0x572   :  { %v10581_v18 = vpop.eup %9571  ;;  %v1732_v29 = vsel %vm1139_vm2, %v10579_v37, 0.0  ;;  %9575 = vpow2.f32 %v1686_v4  ;;  %v1660_v56 = vsub.f32 %v10520_v19, %v1638_v27  ;;  %v1661_v20 = vsub.f32 %v10532_v14, %v1638_v27 }
 0x573   :  { %v1733_v9 = vsel %vm1139_vm2, %v10581_v18, 0.0  ;;  %v1645_v59 = vmax.f32 %v1643_v60, %v1644_v39  ;;  %9577 = vrcp.f32 %v1704_v3  ;;  %v1712_v40 = vrot.slane %v1711_v30, 1 }
 0x574   :  { %v1734_v43 = vadd.f32 %v1733_v9, %v1732_v29  ;;  %v1688_v45 = vmul.f32 1.442695, %v1660_v56  ;;  %v1690_v47 = vmul.f32 1.442695, %v1661_v20  ;;  %v1722_v53 = vadd.f32 %v1721_v7, %v1720_v62 }
 0x575   :  { %v1646_v50 = vrot.slane %v1645_v59, 1  ;;  %v1713_v51 = vadd.f32 %v1712_v40, %v1711_v30  ;;  %v1728_v54 = vrot.slane %v1727_v24, 2 }
 0x576   :  { %v1735_v15 = vrot.slane %v1734_v43, 4  ;;  %9579 = vpow2.f32 %v1688_v45 }
 0x577   :  { %v10589_v32 = vpop.eup %9573  ;;  %9581 = vpow2.f32 %v1690_v47  ;;  %v1647_v19 = vmax.f32 %v1645_v59, %v1646_v50  ;;  %v1729_v14 = vadd.f32 %v1728_v54, %v1727_v24 }
 0x578   :  { %v10591_v10 = vpop.eup %9575  ;;  %v1736_v55 = vadd.f32 %v1735_v15, %v1734_v43  ;;  %v1741_v60 = vsel %vm1139_vm2, %v10589_v32, 0.0  ;;  %9583 = vrcp.f32 %v1713_v51 }
 0x579   :  { %v9578_v61 = vpop.eup %9577  ;;  %v1742_v63 = vsel %vm1139_vm2, %v10591_v10, 0.0  ;;  %v1662_v62 = vsub.f32 %v10529_v12, %v1647_v19  ;;  %v1663_v2 = vsub.f32 %v10565_v17, %v1647_v19  ;;  %9585 = vrcp.f32 %v1722_v53 }
 0x57a   :  { %v1743_v4 = vadd.f32 %v1742_v63, %v1741_v60  ;;  %v1777_v22 = vmul.f32 %v9578_v61, %v10534_v16  ;;  %v1776_v27 = vmul.f32 %v9578_v61, %v10524_v0  ;;  %v1737_v39 = vrot.slane %v1736_v55, 2 }
 0x57b   :  { %v1692_v30 = vmul.f32 1.442695, %v1662_v62  ;;  %v1694_v24 = vmul.f32 1.442695, %v1663_v2  ;;  %v1730_v3 = vrot.slane %v1729_v14, 1 }
 0x57c   :  { %v9580_v7 = vpop.eup %9579  ;;  %v1744_v29 = vrot.slane %v1743_v4, 4  ;;  %1831 = vperm.xlu2 %9519, %v1777_v22   ;;  %1826 = vperm.xlu1 %9518, %v1776_v27   ;;  %v1738_v56 = vadd.f32 %v1737_v39, %v1736_v55 }
 0x57d   :  { %v10601_v20 = vpop.eup %9581  ;;  %v1750_v12 = vsel %vm1139_vm2, %v9580_v7, 0.0  ;;  %9587 = vpow2.f32 %v1692_v30  ;;  %v1731_v17 = vadd.f32 %v1730_v3, %v1729_v14 }
 0x57e   :  { %v9584_v9 = vpop.eup %9583  ;;  %v1745_v59 = vadd.f32 %v1744_v29, %v1743_v4  ;;  %v1751_v0 = vsel %vm1139_vm2, %v10601_v20, 0.0  ;;  %9589 = vpow2.f32 %v1694_v24  ;;  %v1739_v16 = vrot.slane %v1738_v56, 1 }
 0x57f   :  { %v9586_v40 = vpop.eup %9585  ;;  %v1752_v43 = vadd.f32 %v1751_v0, %v1750_v12  ;;  %v1778_v45 = vmul.f32 %v9584_v9, %v10552_v38  ;;  %9591 = vrcp.f32 %v1731_v17  ;;  %v1779_v54 = vmul.f32 %v9584_v9, %v10556_v49 }
 0x580   :  { %v1740_v47 = vadd.f32 %v1739_v16, %v1738_v56  ;;  %v1746_v51 = vrot.slane %v1745_v59, 2  ;;  %v1780_v53 = vmul.f32 %v9586_v40, %v10540_v26  ;;  %v1781_v30 = vmul.f32 %v9586_v40, %v10548_v57 }
 0x581   :  { %v1753_v50 = vrot.slane %v1752_v43, 4  ;;  %1836 = vperm.xlu0 %9520, %v1778_v45  }
 0x582   :  { %9593 = vrcp.f32 %v1740_v47  ;;  %v1747_v61 = vadd.f32 %v1746_v51, %v1745_v59 }
 0x583   :  { %v9588_v15 = vpop.eup %9587  ;;  %v1754_v19 = vadd.f32 %v1753_v50, %v1752_v43  ;;  %v8889_v50 = vld [vmem:[%s9939_s9 + $0xec] sm:$0xf0] }
 0x584   :  { %v9590_v14 = vpop.eup %9589  ;;  %v1759_v55 = vsel %vm1139_vm2, %v9588_v15, 0.0  ;;  %1846 = vperm.xlu1 %9518, %v1780_v53   ;;  %1841 = vperm.xlu2 %9519, %v1779_v54   ;;  %v1748_v27 = vrot.slane %v1747_v61, 1  ;;  %v8887_v53 = vld [vmem:[%s9939_s9 + $0xe4] sm:$0xf]  ;;  %v7582_v54 = vld [vmem:[%s9939_s9 + $0xf0] sm:$0xf0] }
 0x585   :  { %v1760_v60 = vsel %vm1139_vm2, %v9590_v14, 0.0  ;;  %v1755_v38 = vrot.slane %v1754_v19, 2  ;;  %v9592_v62 = vpop.eup %9591 }
 0x586   :  { %v1761_v63 = vadd.f32 %v1760_v60, %v1759_v55  ;;  %v1782_v24 = vmul.f32 %v9592_v62, %v10569_v52  ;;  %v1749_v56 = vadd.f32 %v1748_v27, %v1747_v61  ;;  %v1783_v9 = vmul.f32 %v9592_v62, %v10571_v1  ;;  %v7590_v55 = vld [vmem:[%s9939_s9 + $0xf8] sm:$0xf0]  ;;  %v9236_v60 = vld [vmem:[%s9903_s6] sm:$0xff]   ;;  %v7572_v27 = vld [vmem:[%s9939_s9 + $0xc8] sm:$0xf] }
 0x587   :  { %v1756_v2 = vadd.f32 %v1755_v38, %v1754_v19  ;;  %v7585_v19 = vor.u32 %v8887_v53, %v7582_v54  ;;  %v9402_v38 = vld [vmem:[%s9903_s6 + $0x8] sm:$0xff]   ;;  %v9237_v62 = vunpack.c.l.bf16 %v9236_v60  ;;  %v7558_v54 = vld [vmem:[%s9939_s9 + $0xb8] sm:$0xf0] }
 0x588   :  { %v9594_v4 = vpop.eup %9593  ;;  %v1762_v22 = vrot.slane %v1761_v63, 4  ;;  %v8880_v53 = vld [vmem:[%s9939_s9 + $0xac] sm:$0xf] }
 0x589   :  { %v1785_v26 = vmul.f32 %v9594_v4, %v10581_v18  ;;  %v1757_v49 = vrot.slane %v1756_v2, 1  ;;  %v1784_v18 = vmul.f32 %v9594_v4, %v10579_v37  ;;  %2465 = vmatpush.bf16.msrb.mxu3 %v7585_v19  ;;  %v8885_v4 = vld [vmem:[%s9939_s9 + $0xcc] sm:$0xf0] }
 0x58a   :  { %v1763_v39 = vadd.f32 %v1762_v22, %v1761_v63  ;;  %v8883_v22 = vld [vmem:[%s9939_s9 + $0xc4] sm:$0xf] }
 0x58b   :  { %1871 = vperm.xlu0 %9520, %v1785_v26   ;;  %v1758_v3 = vadd.f32 %v1757_v49, %v1756_v2  ;;  %v7564_v2 = vld [vmem:[%s9939_s9 + $0xc0] sm:$0xf]  ;;  %v7566_v49 = vld [vmem:[%s9939_s9 + $0xd0] sm:$0xf0] }
 0x58c   :  { %1851 = vperm.xlu2 %9519, %v1781_v30   ;;  %1856 = vperm.xlu1 %9518, %v1782_v24   ;;  %v1764_v29 = vrot.slane %v1763_v39, 2  ;;  %v7565_v26 = vor.u32 %v8885_v4, %v7564_v2  ;;  %v9238_v30 = vunpack.c.h.bf16 %v9236_v60  ;;  %v7534_v2 = vld [vmem:[%s9939_s9 + $0x90] sm:$0xf0]  ;;  %v7540_v4 = vld [vmem:[%s9939_s9 + $0x88] sm:$0xf] }
 0x58d   :  { %9595 = vrcp.f32 %v1758_v3  ;;  %v7569_v3 = vor.u32 %v8883_v22, %v7566_v49  ;;  %v8878_v22 = vld [vmem:[%s9939_s9 + $0x94] sm:$0xf0] }
 0x58e   :  { %v1765_v12 = vadd.f32 %v1764_v29, %v1763_v39  ;;  %9597 = vrcp.f32 %v1749_v56  ;;  %v8886_v39 = vld [vmem:[%s9939_s9 + $0xd4] sm:$0xf0]  ;;  %v8884_v56 = vld [vmem:[%s9939_s9 + $0xcc] sm:$0xf] }
 0x58f   :  { %v7573_v29 = vor.u32 %v8886_v39, %v7572_v27  ;;  %2466 = vmatpush.bf16.msrb.mxu3 %v7569_v3  ;;  %v7541_v27 = vor.u32 %v8878_v22, %v7540_v4  ;;  %v8876_v39 = vld [vmem:[%s9939_s9 + $0x8c] sm:$0xf] }
 0x590   :  { %v1766_v17 = vrot.slane %v1765_v12, 1 }
 0x592   :  { %v1767_v59 = vadd.f32 %v1766_v17, %v1765_v12  ;;  %v7574_v12 = vld [vmem:[%s9939_s9 + $0xd8] sm:$0xf0] }
 0x593   :  { %v9596_v0 = vpop.eup %9595  ;;  %v7577_v17 = vor.u32 %v8884_v56, %v7574_v12 }
 0x594   :  { %1861 = vperm.xlu2 %9519, %v1783_v9   ;;  %1866 = vperm.xlu1 %9518, %v1784_v18   ;;  %v1788_v57 = vmul.f32 %v9596_v0, %v9580_v7  ;;  %9599 = vrcp.f32 %v1767_v59  ;;  %v9598_v52 = vpop.eup %9597  ;;  %v1789_v7 = vmul.f32 %v9596_v0, %v10601_v20  ;;  %v8888_v20 = vld [vmem:[%s9939_s9 + $0xec] sm:$0xf]  ;;  %v9242_v9 = vunpack.c.h.bf16 %v9402_v38  ;;  %v7548_v0 = vld [vmem:[%s9939_s9 + $0xa0] sm:$0xf] }
 0x595   :  { %v1787_v40 = vmul.f32 %v9598_v52, %v10591_v10  ;;  %v1786_v43 = vmul.f32 %v9598_v52, %v10589_v32  ;;  %v7580_v32 = vld [vmem:[%s9939_s9 + $0xe0] sm:$0xf]  ;;  %v7593_v63 = vor.u32 %v8888_v20, %v7590_v55  ;;  %v9241_v59 = vunpack.c.l.bf16 %v9402_v38  ;;  %v8879_v52 = vld [vmem:[%s9939_s9 + $0xa4] sm:$0xf]  ;;  %v8877_v38 = vld [vmem:[%s9939_s9 + $0x8c] sm:$0xf0] }
 0x596   :  { %1886 = vperm.xlu0 %9520, %v1788_v57   ;;  %v7581_v51 = vor.u32 %v8889_v50, %v7580_v32  ;;  %v8881_v57 = vld [vmem:[%s9939_s9 + $0xac] sm:$0xf0] }
 0x597   :  { %2491 = vmatpush.bf16.msra.mxu1 %v7593_v63 }
 0x598   :  { %2452 = vmatpush.bf16.msrb.mxu2 %v7581_v51 }
 0x59a   :  { %v9600_v16 = vpop.eup %9599 }
 0x59b   :  { %v1791_v1 = vmul.f32 %v9600_v16, %v9590_v14  ;;  %v1790_v37 = vmul.f32 %v9600_v16, %v9588_v15  ;;  %v7588_v15 = vld [vmem:[%s9939_s9 + $0xe8] sm:$0xf]  ;;  %v8890_v14 = vld [vmem:[%s9939_s9 + $0xf4] sm:$0xf0]  ;;  %2492 = vmatpush.bf16.msra.mxu1 %v7577_v17  ;;  %v7549_v16 = vor.u32 %v8881_v57, %v7548_v0  ;;  %v7516_v17 = vld [vmem:[%s9939_s9 + $0x60] sm:$0xf] }
 0x59c   :  { %1881 = vperm.xlu1 %9518, %v1787_v40   ;;  %1876 = vperm.xlu2 %9519, %v1786_v43   ;;  %v7589_v61 = vor.u32 %v8890_v14, %v7588_v15  ;;  %v7550_v40 = vld [vmem:[%s9939_s9 + $0xb0] sm:$0xf0]  ;;  %v7556_v43 = vld [vmem:[%s9939_s9 + $0xa8] sm:$0xf]  ;;  %v7561_v14 = vor.u32 %v8880_v53, %v7558_v54  ;;  %v8871_v0 = vld [vmem:[%s9939_s9 + $0x64] sm:$0xf] }
 0x59d   :  { %2453 = vmatpush.bf16.msrb.mxu2 %v7565_v26  ;;  %v7553_v50 = vor.u32 %v8879_v52, %v7550_v40  ;;  %v7518_v57 = vld [vmem:[%s9939_s9 + $0x70] sm:$0xf0]  ;;  %v7524_v52 = vld [vmem:[%s9939_s9 + $0x68] sm:$0xf] }
 0x59e   :  { %1901 = vperm.xlu0 %9520, %v1791_v1   ;;  %2478 = vmatpush.bf16.msra.mxu0 %v7589_v61  ;;  %v8882_v1 = vld [vmem:[%s9939_s9 + $0xb4] sm:$0xf0]  ;;  %v8875_v61 = vld [vmem:[%s9939_s9 + $0x84] sm:$0xf]  ;;  %v7521_v40 = vor.u32 %v8871_v0, %v7518_v57 }
 0x59f   :  { %v7557_v51 = vor.u32 %v8882_v1, %v7556_v43  ;;  %2467 = vmatpush.bf16.msrb.mxu3 %v7553_v50  ;;  %2493 = vmatpush.bf16.msra.mxu1 %v7561_v14  ;;  %v7537_v49 = vor.u32 %v8875_v61, %v7534_v2  ;;  %v8874_v43 = vld [vmem:[%s9939_s9 + $0x74] sm:$0xf0]  ;;  %v8872_v1 = vld [vmem:[%s9939_s9 + $0x6c] sm:$0xf]  ;;  %v8869_v14 = vld [vmem:[%s9939_s9 + $0x4c] sm:$0xf0] }
 0x5a0   :  { %v7510_v2 = vld [vmem:[%s9939_s9 + $0x58] sm:$0xf0] }
 0x5a1   :  { %2454 = vmatpush.bf16.msrb.mxu2 %v7549_v16 }
 0x5a2   :  { %2479 = vmatpush.bf16.msra.mxu0 %v7573_v29 }
 0x5a3   :  { %2468 = vmatpush.bf16.msrb.mxu3 %v7537_v49 }
 0x5a4   :  { %1896 = vperm.xlu1 %9518, %v1790_v37   ;;  %1891 = vperm.xlu2 %9519, %v1789_v7   ;;  %v9403_v7 = vld [vmem:[%s9903_s6 + $0x10] sm:$0xff]  }
 0x5a5   :  { %v9245_v19 = vunpack.c.l.bf16 %v9403_v7  ;;  %v9246_v63 = vunpack.c.h.bf16 %v9403_v7 }
 0x5a6   :  { %2480 = vmatpush.bf16.msra.mxu0 %v7557_v51 }
 0x5a7   :  { %2469 = vmatpush.bf16.msrb.mxu3 %v7521_v40  ;;  %v7494_v40 = vld [vmem:[%s9939_s9 + $0x38] sm:$0xf0] }
 0x5aa   :  { %2481 = vmatpush.bf16.msra.mxu0 %v7541_v27 }
 0x5d6   :  { %v1832_v10 = vpop.permute.xlu2 %1831 }
 0x5d7   :  { %v1905_v37 = vmul.f32 %v9238_v30, %v1832_v10  ;;  %v7532_v10 = vld [vmem:[%s9939_s9 + $0x80] sm:$0xf]  ;;  %v7542_v30 = vld [vmem:[%s9939_s9 + $0x98] sm:$0xf0] }
 0x5d8   :  { %v7545_v29 = vor.u32 %v8876_v39, %v7542_v30  ;;  %v10687_v30 = vld [vmem:[%s9903_s6 + $0x30] sm:$0xff]  }
 0x5da   :  { %2494 = vmatpush.bf16.msra.mxu1 %v7545_v29  ;;  %v8865_v29 = vld [vmem:[%s9939_s9 + $0x2c] sm:$0xf0] }
 0x5de   :  { %v1842_v45 = vpop.permute.xlu2 %1841 }
 0x5df   :  { %v1907_v20 = vmul.f32 %v9242_v9, %v1842_v45  ;;  %v8873_v9 = vld [vmem:[%s9939_s9 + $0x6c] sm:$0xf0] }
 0x5e6   :  { %v10619_v47 = vpop.permute.xlu2 %1851 }
 0x5ee   :  { %v1827_v24 = vpop.permute.xlu1 %1826  ;;  %v10646_v32 = vpop.permute.xlu2 %1861 }
 0x5ef   :  { %v1904_v18 = vmul.f32 %v9237_v62, %v1827_v24  ;;  %v7533_v62 = vor.u32 %v8877_v38, %v7532_v10  ;;  %v9404_v24 = vld [vmem:[%s9903_s6 + $0x18] sm:$0xff]   ;;  %v7502_v10 = vld [vmem:[%s9939_s9 + $0x50] sm:$0xf0]  ;;  %v7508_v38 = vld [vmem:[%s9939_s9 + $0x48] sm:$0xf] }
 0x5f0   :  { %v9250_v16 = vunpack.c.h.bf16 %v9404_v24  ;;  %v9249_v50 = vunpack.c.l.bf16 %v9404_v24 }
 0x5f1   :  { %v1920_v55 = vadd.f32 %v1905_v37, %v1904_v18  ;;  %2455 = vmatpush.bf16.msrb.mxu2 %v7533_v62  ;;  %v1909_v18 = vmul.f32 %v9246_v63, %v10619_v47  ;;  %v7526_v37 = vld [vmem:[%s9939_s9 + $0x78] sm:$0xf0]  ;;  %v7525_v47 = vor.u32 %v8874_v43, %v7524_v52  ;;  %v8868_v62 = vld [vmem:[%s9939_s9 + $0x4c] sm:$0xf]  ;;  %v8866_v52 = vld [vmem:[%s9939_s9 + $0x34] sm:$0xf0] }
 0x5f2   :  { %v7529_v51 = vor.u32 %v8872_v1, %v7526_v37  ;;  %v1911_v4 = vmul.f32 %v9250_v16, %v10646_v32  ;;  %v7513_v32 = vor.u32 %v8868_v62, %v7510_v2  ;;  %v8864_v16 = vld [vmem:[%s9939_s9 + $0x2c] sm:$0xf] }
 0x5f3   :  { %v1837_v15 = vpop.permute.xlu0 %1836  ;;  %v1921_v56 = vrot.slane %v1920_v55, 4  ;;  %2482 = vmatpush.bf16.msra.mxu0 %v7525_v47  ;;  %v10698_v43 = vld [vmem:[%s9903_s6 + $0x28] sm:$0xff]   ;;  %v7497_v47 = vor.u32 %v8864_v16, %v7494_v40 }
 0x5f4   :  { %v1906_v60 = vmul.f32 %v9241_v59, %v1837_v15  ;;  %v7517_v59 = vor.u32 %v8873_v9, %v7516_v17  ;;  %2495 = vmatpush.bf16.msra.mxu1 %v7529_v51  ;;  %v8863_v17 = vld [vmem:[%s9939_s9 + $0x24] sm:$0xf]  ;;  %v7486_v9 = vld [vmem:[%s9939_s9 + $0x30] sm:$0xf0]  ;;  %v7468_v51 = vld [vmem:[%s9939_s9] sm:$0xf] }
 0x5f5   :  { %v10668_v53 = vadd.f32 %v1921_v56, %v1920_v55  ;;  %v8870_v55 = vld [vmem:[%s9939_s9 + $0x54] sm:$0xf0]  ;;  %v7489_v57 = vor.u32 %v8863_v17, %v7486_v9 }
 0x5f6   :  { %v1927_v26 = vadd.f32 %v1907_v20, %v1906_v60  ;;  %v1847_v45 = vpop.permute.xlu1 %1846  ;;  %2456 = vmatpush.bf16.msrb.mxu2 %v7517_v59  ;;  %v10672_v15 = vpop.permute.xlu2 %1876  ;;  %v8867_v60 = vld [vmem:[%s9939_s9 + $0x44] sm:$0xf]  ;;  %v7509_v24 = vor.u32 %v8870_v55, %v7508_v38 }
 0x5f7   :  { %v1908_v3 = vmul.f32 %v9245_v19, %v1847_v45  ;;  %v7500_v19 = vld [vmem:[%s9939_s9 + $0x40] sm:$0xf]  ;;  %v7505_v63 = vor.u32 %v8867_v60, %v7502_v10  ;;  %v1923_v49 = vrot.slane %v10668_v53, 2  ;;  %v9261_v10 = vunpack.c.l.bf16 %v10687_v30 }
 0x5f8   :  { %v1928_v12 = vrot.slane %v1927_v26, 4  ;;  %v7501_v20 = vor.u32 %v8869_v14, %v7500_v19  ;;  %2483 = vmatpush.bf16.msra.mxu0 %v7509_v24  ;;  %2496 = vmatpush.bf16.msra.mxu1 %v7513_v32  ;;  %v8861_v19 = vld [vmem:[%s9939_s9 + $0xc] sm:$0xf0]  ;;  %v8859_v14 = vld [vmem:[%s9939_s9 + $0x4] sm:$0xf] }
 0x5f9   :  { %v1934_v7 = vadd.f32 %v1909_v18, %v1908_v3  ;;  %2470 = vmatpush.bf16.msrb.mxu3 %v7505_v63  ;;  %v7484_v3 = vld [vmem:[%s9939_s9 + $0x20] sm:$0xf]  ;;  %v7492_v18 = vld [vmem:[%s9939_s9 + $0x28] sm:$0xf]  ;;  %v7469_v38 = vor.u32 %v8861_v19, %v7468_v51  ;;  %v8862_v63 = vld [vmem:[%s9939_s9 + $0x14] sm:$0xf0]  ;;  %v9258_v51 = vunpack.c.h.bf16 %v10698_v43 }
 0x5fa   :  { %v10670_v54 = vadd.f32 %v1928_v12, %v1927_v26  ;;  %v9405_v26 = vld [vmem:[%s9903_s6 + $0x20] sm:$0xff]   ;;  %2457 = vmatpush.bf16.msrb.mxu2 %v7501_v20  ;;  %v7485_v12 = vor.u32 %v8865_v29, %v7484_v3  ;;  %v9262_v20 = vunpack.c.h.bf16 %v10687_v30  ;;  %v8953_v29 = vld [vmem:[%s9953_s20 + $0xec] sm:$0xf0] }
 0x5fb   :  { %v1935_v22 = vrot.slane %v1934_v7, 4  ;;  %v9254_v59 = vunpack.c.h.bf16 %v9405_v26  ;;  %v9253_v0 = vunpack.c.l.bf16 %v9405_v26  ;;  %v8860_v26 = vld [vmem:[%s9939_s9 + $0xc] sm:$0xf]  ;;  %v7708_v24 = vld [vmem:[%s9953_s20 + $0xe0] sm:$0xf] }
 0x5fc   :  { %v1930_v27 = vrot.slane %v10670_v54, 2  ;;  %2497 = vmatpush.bf16.msra.mxu1 %v7497_v47  ;;  %v7709_v9 = vor.u32 %v8953_v29, %v7708_v24  ;;  %v7692_v47 = vld [vmem:[%s9953_s20 + $0xc0] sm:$0xf] }
 0x5fd   :  { %v1872_v39 = vpop.permute.xlu0 %1871  ;;  %v1936_v1 = vadd.f32 %v1935_v22, %v1934_v7  ;;  %2471 = vmatpush.bf16.msrb.mxu3 %v7489_v57  ;;  %v7476_v7 = vld [vmem:[%s9939_s9 + $0x8] sm:$0xf]  ;;  %v8954_v57 = vld [vmem:[%s9953_s20 + $0xf4] sm:$0xf0] }
 0x5fe   :  { %v1857_v61 = vpop.permute.xlu1 %1856  ;;  %2458 = vmatpush.bf16.msrb.mxu2 %v7485_v12  ;;  %v1913_v55 = vmul.f32 %v9254_v59, %v1872_v39  ;;  %v1892_v62 = vpop.permute.xlu2 %1891  ;;  %v7477_v22 = vor.u32 %v8862_v63, %v7476_v7  ;;  %v9257_v12 = vunpack.c.l.bf16 %v10698_v43  ;;  %v7716_v59 = vld [vmem:[%s9953_s20 + $0xe8] sm:$0xf] }
 0x5ff   :  { %v1910_v45 = vmul.f32 %v9249_v50, %v1857_v61  ;;  %v7493_v50 = vor.u32 %v8866_v52, %v7492_v18  ;;  %v7470_v61 = vld [vmem:[%s9939_s9 + $0x10] sm:$0xf0]  ;;  %v1937_v30 = vrot.slane %v1936_v1, 2  ;;  %v1917_v52 = vmul.f32 %v9262_v20, %v1892_v62  ;;  %v7700_v63 = vld [vmem:[%s9953_s20 + $0xc8] sm:$0xf] }
 0x600   :  { %v7710_v18 = vld [vmem:[%s9953_s20 + $0xf0] sm:$0xf0]  ;;  %v10735_v20 = vadd.f32 %v1930_v27, %v10670_v54  ;;  %v7702_v54 = vld [vmem:[%s9953_s20 + $0xd8] sm:$0xf0]  ;;  %v7676_v27 = vld [vmem:[%s9953_s20 + $0xa0] sm:$0xf] }
 0x601   :  { %v1941_v56 = vadd.f32 %v1911_v4, %v1910_v45  ;;  %2484 = vmatpush.bf16.msra.mxu0 %v7493_v50  ;;  %v7473_v4 = vor.u32 %v8859_v14, %v7470_v61  ;;  %v7478_v45 = vld [vmem:[%s9939_s9 + $0x18] sm:$0xf0]  ;;  %v7717_v14 = vor.u32 %v8954_v57, %v7716_v59  ;;  %v8949_v61 = vld [vmem:[%s9953_s20 + $0xcc] sm:$0xf0] }
 0x602   :  { %2459 = vmatpush.bf16.msrb.mxu2 %v7469_v38  ;;  %v7481_v39 = vor.u32 %v8860_v26, %v7478_v45  ;;  %v7718_v50 = vld [vmem:[%s9953_s20 + $0xf8] sm:$0xf0]  ;;  %v7693_v62 = vor.u32 %v8949_v61, %v7692_v47  ;;  %v7660_v47 = vld [vmem:[%s9953_s20 + $0x80] sm:$0xf]  ;;  %v7662_v61 = vld [vmem:[%s9953_s20 + $0x90] sm:$0xf0] }
 0x603   :  { %v1942_v37 = vrot.slane %v1941_v56, 4  ;;  %2472 = vmatpush.bf16.msrb.mxu3 %v7473_v4 }
 0x604   :  { %2498 = vmatpush.bf16.msra.mxu1 %v7481_v39  ;;  %v1914_v39 = vmul.f32 %v9257_v12, %v10672_v15  ;;  %v7686_v15 = vld [vmem:[%s9953_s20 + $0xb8] sm:$0xf0] }
 0x605   :  { %v10704_v60 = vadd.f32 %v1942_v37, %v1941_v56  ;;  %v8951_v56 = vld [vmem:[%s9953_s20 + $0xe4] sm:$0xf]  ;;  %v8952_v37 = vld [vmem:[%s9953_s20 + $0xec] sm:$0xf]  ;;  %2485 = vmatpush.bf16.msra.mxu0 %v7477_v22 }
 0x606   :  { %v1867_v2 = vpop.permute.xlu1 %1866  ;;  %v7713_v19 = vor.u32 %v8951_v56, %v7710_v18  ;;  %v7721_v38 = vor.u32 %v8952_v37, %v7718_v50  ;;  %2696 = vmatpush.bf16.msra.mxu2 %v7709_v9  ;;  %v8948_v22 = vld [vmem:[%s9953_s20 + $0xcc] sm:$0xf]  ;;  %v7684_v9 = vld [vmem:[%s9953_s20 + $0xa8] sm:$0xf]  ;;  %v8946_v18 = vld [vmem:[%s9953_s20 + $0xb4] sm:$0xf0] }
 0x607   :  { %v1944_v32 = vrot.slane %v10704_v60, 2  ;;  %v1912_v3 = vmul.f32 %v9253_v0, %v1867_v2  ;;  %v10723_v0 = vadd.f32 %v1923_v49, %v10668_v53  ;;  %v8947_v53 = vld [vmem:[%s9953_s20 + $0xc4] sm:$0xf]  ;;  %v7694_v49 = vld [vmem:[%s9953_s20 + $0xd0] sm:$0xf0]  ;;  %v7705_v24 = vor.u32 %v8948_v22, %v7702_v54 }
 0x608   :  { %v1887_v17 = vpop.permute.xlu0 %1886  ;;  %2709 = vmatpush.bf16.msra.mxu3 %v7713_v19  ;;  %v7697_v2 = vor.u32 %v8947_v53, %v7694_v49  ;;  %2735 = vmatpush.bf16.msrb.mxu1 %v7721_v38  ;;  %v8944_v37 = vld [vmem:[%s9953_s20 + $0xac] sm:$0xf]  ;;  %v7685_v50 = vor.u32 %v8946_v18, %v7684_v9  ;;  %v8939_v38 = vld [vmem:[%s9953_s20 + $0x84] sm:$0xf]  ;;  %v7668_v53 = vld [vmem:[%s9953_s20 + $0x88] sm:$0xf] }
 0x609   :  { %v1948_v16 = vadd.f32 %v1913_v55, %v1912_v3  ;;  %v1916_v40 = vmul.f32 %v9261_v10, %v1887_v17  ;;  %v10737_v10 = vadd.f32 %v1937_v30, %v1936_v1  ;;  %v8950_v55 = vld [vmem:[%s9953_s20 + $0xd4] sm:$0xf0]  ;;  %2722 = vmatpush.bf16.msrb.mxu0 %v7717_v14  ;;  %v1925_v1 = vrot.slane %v10723_v0, 1  ;;  %v8945_v30 = vld [vmem:[%s9953_s20 + $0xac] sm:$0xf0] }
 0x60a   :  { %v7701_v4 = vor.u32 %v8950_v55, %v7700_v63  ;;  %v8943_v3 = vld [vmem:[%s9953_s20 + $0xa4] sm:$0xf]  ;;  %v10749_v29 = vadd.f32 %v1944_v32, %v10704_v60  ;;  %v7678_v17 = vld [vmem:[%s9953_s20 + $0xb0] sm:$0xf0]  ;;  %2697 = vmatpush.bf16.msra.mxu2 %v7693_v62  ;;  %v1932_v60 = vrot.slane %v10735_v20, 1  ;;  %v7689_v14 = vor.u32 %v8944_v37, %v7686_v15 }
 0x60b   :  { %v1949_v7 = vrot.slane %v1948_v16, 4  ;;  %v1962_v43 = vadd.f32 %v1917_v52, %v1916_v40  ;;  %v7677_v40 = vor.u32 %v8945_v30, %v7676_v27  ;;  %v1939_v32 = vrot.slane %v10737_v10, 1  ;;  %v8942_v63 = vld [vmem:[%s9953_s20 + $0x94] sm:$0xf0]  ;;  %v8940_v55 = vld [vmem:[%s9953_s20 + $0x8c] sm:$0xf] }
 0x60c   :  { %2710 = vmatpush.bf16.msra.mxu3 %v7697_v2  ;;  %v7681_v12 = vor.u32 %v8943_v3, %v7678_v17  ;;  %2736 = vmatpush.bf16.msrb.mxu1 %v7705_v24  ;;  %v7670_v62 = vld [vmem:[%s9953_s20 + $0x98] sm:$0xf0]  ;;  %v1946_v2 = vrot.slane %v10749_v29, 1  ;;  %v7644_v24 = vld [vmem:[%s9953_s20 + $0x60] sm:$0xf] }
 0x60d   :  { %v1950_v26 = vadd.f32 %v1949_v7, %v1948_v16  ;;  %v1963_v45 = vrot.slane %v1962_v43, 4  ;;  %v9408_v16 = vld [vmem:[%s9903_s6 + $0x38] sm:$0xff]   ;;  %2723 = vmatpush.bf16.msrb.mxu0 %v7701_v4  ;;  %v8937_v30 = vld [vmem:[%s9953_s20 + $0x6c] sm:$0xf0]  ;;  %v8935_v3 = vld [vmem:[%s9953_s20 + $0x64] sm:$0xf] }
 0x60e   :  { %v1882_v56 = vpop.permute.xlu1 %1881  ;;  %v9266_v7 = vunpack.c.h.bf16 %v9408_v16  ;;  %2698 = vmatpush.bf16.msra.mxu2 %v7677_v40  ;;  %v7646_v17 = vld [vmem:[%s9953_s20 + $0x70] sm:$0xf0]  ;;  %v7652_v9 = vld [vmem:[%s9953_s20 + $0x68] sm:$0xf]  ;;  %v8938_v18 = vld [vmem:[%s9953_s20 + $0x74] sm:$0xf0] }
 0x60f   :  { %v1951_v59 = vrot.slane %v1950_v26, 2  ;;  %v1964_v57 = vadd.f32 %v1963_v45, %v1962_v43  ;;  %v1915_v52 = vmul.f32 %v9258_v51, %v1882_v56  ;;  %v8941_v51 = vld [vmem:[%s9953_s20 + $0x8c] sm:$0xf0]  ;;  %v9265_v43 = vunpack.c.l.bf16 %v9408_v16  ;;  %v8936_v15 = vld [vmem:[%s9953_s20 + $0x6c] sm:$0xf] }
 0x610   :  { %v1902_v54 = vpop.permute.xlu0 %1901  ;;  %v7661_v27 = vor.u32 %v8941_v51, %v7660_v47  ;;  %2711 = vmatpush.bf16.msra.mxu3 %v7681_v12  ;;  %v7669_v45 = vor.u32 %v8942_v63, %v7668_v53  ;;  %2737 = vmatpush.bf16.msrb.mxu1 %v7689_v14  ;;  %v7673_v56 = vor.u32 %v8940_v55, %v7670_v62  ;;  %v7654_v12 = vld [vmem:[%s9953_s20 + $0x78] sm:$0xf0]  ;;  %v8933_v14 = vld [vmem:[%s9953_s20 + $0x4c] sm:$0xf0]  ;;  %v7636_v63 = vld [vmem:[%s9953_s20 + $0x48] sm:$0xf] }
 0x611   :  { %v1955_v19 = vadd.f32 %v1915_v52, %v1914_v39  ;;  %v1952_v49 = vadd.f32 %v1951_v59, %v1950_v26  ;;  %v1965_v4 = vrot.slane %v1964_v57, 2  ;;  %2724 = vmatpush.bf16.msrb.mxu0 %v7685_v50  ;;  %v7665_v26 = vor.u32 %v8939_v38, %v7662_v61  ;;  %v8934_v55 = vld [vmem:[%s9953_s20 + $0x54] sm:$0xf0] }
 0x612   :  { %v1933_v59 = vadd.f32 %v1932_v60, %v10735_v20  ;;  %v1940_v52 = vadd.f32 %v1939_v32, %v10737_v10  ;;  %v1919_v40 = vmul.f32 %v9266_v7, %v1902_v54  ;;  %2699 = vmatpush.bf16.msra.mxu2 %v7661_v27  ;;  %v1926_v20 = vadd.f32 %v1925_v1, %v10723_v0  ;;  %v7628_v32 = vld [vmem:[%s9953_s20 + $0x40] sm:$0xf] }
 0x613   :  { %v1956_v22 = vrot.slane %v1955_v19, 4  ;;  %v1953_v16 = vrot.slane %v1952_v49, 1  ;;  %v1966_v50 = vadd.f32 %v1965_v4, %v1964_v57  ;;  %v7649_v10 = vor.u32 %v8935_v3, %v7646_v17  ;;  %v8931_v57 = vld [vmem:[%s9953_s20 + $0x44] sm:$0xf]  ;;  %v8932_v4 = vld [vmem:[%s9953_s20 + $0x4c] sm:$0xf] }
 0x614   :  { %2712 = vmatpush.bf16.msra.mxu3 %v7665_v26  ;;  %v7653_v60 = vor.u32 %v8938_v18, %v7652_v9  ;;  %v1947_v38 = vadd.f32 %v1946_v2, %v10749_v29  ;;  %2738 = vmatpush.bf16.msrb.mxu1 %v7673_v56  ;;  %v7657_v7 = vor.u32 %v8936_v15, %v7654_v12  ;;  %v8929_v3 = vld [vmem:[%s9953_s20 + $0x2c] sm:$0xf0]  ;;  %v7614_v18 = vld [vmem:[%s9953_s20 + $0x30] sm:$0xf0]  ;;  %v7622_v15 = vld [vmem:[%s9953_s20 + $0x38] sm:$0xf0] }
 0x615   :  { %v1957_v39 = vadd.f32 %v1956_v22, %v1955_v19  ;;  %v7645_v19 = vor.u32 %v8937_v30, %v7644_v24  ;;  %2725 = vmatpush.bf16.msrb.mxu0 %v7669_v45  ;;  %v1977_v0 = vpack.c.bf16 %v1933_v59, %v1933_v59  ;;  %v1978_v1 = vpack.c.bf16 %v1940_v52, %v1940_v52  ;;  %v7638_v22 = vld [vmem:[%s9953_s20 + $0x58] sm:$0xf0]  ;;  %v7612_v30 = vld [vmem:[%s9953_s20 + $0x20] sm:$0xf]  ;;  %v7620_v59 = vld [vmem:[%s9953_s20 + $0x28] sm:$0xf] }
 0x616   :  { %v1897_v37 = vpop.permute.xlu1 %1896  ;;  %v1954_v62 = vadd.f32 %v1953_v16, %v1952_v49  ;;  %v1967_v54 = vrot.slane %v1966_v50, 1  ;;  %v7629_v29 = vor.u32 %v8933_v14, %v7628_v32  ;;  %v1976_v2 = vpack.c.bf16 %v1926_v20, %v1926_v20  ;;  %v8927_v49 = vld [vmem:[%s9953_s20 + $0x24] sm:$0xf]  ;;  %v8930_v52 = vld [vmem:[%s9953_s20 + $0x34] sm:$0xf0] }
 0x617   :  { %v1958_v47 = vrot.slane %v1957_v39, 2  ;;  %v1918_v51 = vmul.f32 %v9265_v43, %v1897_v37  ;;  %v7630_v43 = vld [vmem:[%s9953_s20 + $0x50] sm:$0xf0]  ;;  %2700 = vmatpush.bf16.msra.mxu2 %v7645_v19  ;;  %v7637_v24 = vor.u32 %v8934_v55, %v7636_v63  ;;  %v7641_v9 = vor.u32 %v8932_v4, %v7638_v22  ;;  %v8928_v37 = vld [vmem:[%s9953_s20 + $0x2c] sm:$0xf] }
 0x618   :  { %2713 = vmatpush.bf16.msra.mxu3 %v7649_v10  ;;  %v7633_v45 = vor.u32 %v8931_v57, %v7630_v43  ;;  %2739 = vmatpush.bf16.msrb.mxu1 %v7657_v7  ;;  %v2269_v16 = vunpack.c.l.b16 %v1977_v0  ;;  %v2270_v12 = vunpack.c.l.b16 %v1978_v1  ;;  %v7613_v19 = vor.u32 %v8929_v3, %v7612_v30  ;;  %v7596_v14 = vld [vmem:[%s9953_s20] sm:$0xf]  ;;  %v8925_v57 = vld [vmem:[%s9953_s20 + $0xc] sm:$0xf0]  ;;  %v7598_v43 = vld [vmem:[%s9953_s20 + $0x10] sm:$0xf0] }
 0x619   :  { %v1959_v61 = vadd.f32 %v1958_v47, %v1957_v39  ;;  %v1969_v53 = vadd.f32 %v1919_v40, %v1918_v51  ;;  %2726 = vmatpush.bf16.msrb.mxu0 %v7653_v60  ;;  %v1979_v39 = vpack.c.bf16 %v1947_v38, %v1947_v38  ;;  %v1980_v40 = vpack.c.bf16 %v1954_v62, %v1954_v62  ;;  %v8923_v38 = vld [vmem:[%s9953_s20 + $0x4] sm:$0xf]  ;;  %v7604_v63 = vld [vmem:[%s9953_s20 + $0x8] sm:$0xf]  ;;  %v8926_v55 = vld [vmem:[%s9953_s20 + $0x14] sm:$0xf0] }
 0x61a   :  { %v2268_v20 = vunpack.c.l.b16 %v1976_v2  ;;  %v1968_v10 = vadd.f32 %v1967_v54, %v1966_v50  ;;  %v7617_v60 = vor.u32 %v8927_v49, %v7614_v18  ;;  %v7621_v32 = vor.u32 %v8930_v52, %v7620_v59  ;;  %v8924_v1 = vld [vmem:[%s9953_s20 + $0xc] sm:$0xf]  ;;  %v7606_v62 = vld [vmem:[%s9953_s20 + $0x18] sm:$0xf0] }
 0x61b   :  { %v1960_v27 = vrot.slane %v1959_v61, 1  ;;  %v1970_v26 = vrot.slane %v1969_v53, 4  ;;  %2701 = vmatpush.bf16.msra.mxu2 %v7629_v29  ;;  %v7625_v7 = vor.u32 %v8928_v37, %v7622_v15  ;;  %v2272_v50 = vunpack.c.l.b16 %v1980_v40 }
 0x61c   :  { %2714 = vmatpush.bf16.msra.mxu3 %v7633_v45  ;;  %2740 = vmatpush.bf16.msrb.mxu1 %v7641_v9  ;;  %v2277_v0 = vsel %vm2276_vm9, %v2269_v16, %v2268_v20  ;;  %v7601_v29 = vor.u32 %v8923_v38, %v7598_v43  ;;  %v7605_v2 = vor.u32 %v8926_v55, %v7604_v63 }
 0x61d   :  { %v1961_v56 = vadd.f32 %v1960_v27, %v1959_v61  ;;  %v1971_v17 = vadd.f32 %v1970_v26, %v1969_v53  ;;  %2727 = vmatpush.bf16.msrb.mxu0 %v7637_v24  ;;  %v2271_v61 = vunpack.c.l.b16 %v1979_v39  ;;  %v2279_v4 = vsel %vm2278_vm10, %v2270_v12, %v2277_v0 }
 0x61e   :  { %v7597_v27 = vor.u32 %v8925_v57, %v7596_v14  ;;  %v1982_v26 = vpack.c.bf16 %v1968_v10, %v1968_v10  ;;  %v7609_v30 = vor.u32 %v8924_v1, %v7606_v62 }
 0x61f   :  { %v1981_v47 = vpack.c.bf16 %v1961_v56, %v1961_v56  ;;  %v1972_v51 = vrot.slane %v1971_v17, 2  ;;  %2702 = vmatpush.bf16.msra.mxu2 %v7613_v19  ;;  %v2281_v45 = vsel %vm2280_vm11, %v2271_v61, %v2279_v4 }
 0x620   :  { %2715 = vmatpush.bf16.msra.mxu3 %v7617_v60  ;;  %2741 = vmatpush.bf16.msrb.mxu1 %v7625_v7  ;;  %v2283_v3 = vsel %vm2282_vm12, %v2272_v50, %v2281_v45  ;;  %v2274_v56 = vunpack.c.l.b16 %v1982_v26 }
 0x621   :  { %v1973_v53 = vadd.f32 %v1972_v51, %v1971_v17  ;;  %v2273_v22 = vunpack.c.l.b16 %v1981_v47  ;;  %2728 = vmatpush.bf16.msrb.mxu0 %v7621_v32  ;;  %v2752_v47 = vld [vmem:[%s9960_s25] sm:$0xf] }
 0x622   :  { %v2757_v10 = vperm.slane %v2752_v47, 3  ;;  %v2754_v61 = vperm.slane %v2752_v47, 0 }
 0x623   :  { %v1974_v54 = vrot.slane %v1973_v53, 1  ;;  %v2285_v39 = vsel %vm2284_vm13, %v2273_v22, %v2283_v3  ;;  %2703 = vmatpush.bf16.msra.mxu2 %v7597_v27  ;;  %v2756_v3 = vperm.slane %v2752_v47, 2 }
 0x624   :  { %2716 = vmatpush.bf16.msra.mxu3 %v7601_v29  ;;  %2742 = vmatpush.bf16.msrb.mxu1 %v7609_v30  ;;  %v2287_v9 = vsel %vm2286_vm14, %v2274_v56, %v2285_v39 }
 0x625   :  { %v1975_v24 = vadd.f32 %v1974_v54, %v1973_v53  ;;  %2729 = vmatpush.bf16.msrb.mxu0 %v7605_v2  ;;  %v2755_v53 = vperm.slane %v2752_v47, 1 }
 0x627   :  { %v1983_v49 = vpack.c.bf16 %v1975_v24, %v1975_v24 }
 0x629   :  { %v2275_v17 = vunpack.c.l.b16 %v1983_v49 }
 0x62b   :  { %v2289_v18 = vsel %vm2288_vm15, %v2275_v17, %v2287_v9 }
 0x62c   :  { %v2290_v59 = vpack.c.b16 %v2289_v18, %v2289_v18 }
 0x62e   :  { %2460 = vmatmul.bf16.vlgmr.msrb.gmra.mxu2 %v2290_v59  ;;  %2473 = vmatmul.bf16.vlgmr.msrb.gmra.mxu3 %v2290_v59 }
 0x62f   :  { %2486 = vmatmul.bf16.vlgmr.msra.gmra.mxu0 %v2290_v59  ;;  %2499 = vmatmul.bf16.vlgmr.msra.gmra.mxu1 %v2290_v59 }
 0x63e   :  { %2704 = vmatmul.bf16.vlgmr.msra.gmra.mxu2 %v10383_v33  ;;  %2717 = vmatmul.bf16.vlgmr.msra.gmra.mxu3 %v10383_v33 }
 0x63f   :  { %2730 = vmatmul.bf16.vlgmr.msrb.gmra.mxu0 %v10383_v33  ;;  %2743 = vmatmul.bf16.vlgmr.msrb.gmra.mxu1 %v10383_v33 }
 0x6ac   :  { %v2487_v52 = vpop.f32.mrf.mxu0  ;;  %v2500_v16 = vpop.f32.mrf.mxu1 }
 0x6ad   :  { %v2501_v20 = vadd.f32 %v2500_v16, %v10445_v46  ;;  %v2488_v24 = vadd.f32 %v2487_v52, %v10428_v58 }
 0x6b1   :  { %v2461_v40 = vpop.f32.mrf.mxu2  ;;  %v2474_v37 = vpop.f32.mrf.mxu3 }
 0x6b2   :  { %v2462_v38 = vadd.f32 %v2461_v40, %v10433_v5  ;;  %v2475_v33 = vadd.f32 %v2474_v37, %v10435_v6 }
 0x6b4   :  { %v2489_v15 = vpop.f32.mrf.mxu0  ;;  %v2502_v12 = vpop.f32.mrf.mxu1 }
 0x6b9   :  { %v2463_v51 = vpop.f32.mrf.mxu2  ;;  %v2476_v19 = vpop.f32.mrf.mxu3 }
 0x6bc   :  { %v2731_v60 = vpop.f32.mrf.mxu0  ;;  %v2744_v32 = vpop.f32.mrf.mxu1 }
 0x6bd   :  { %v2751_v14 = vadd.f32 %v2744_v32, %v2501_v20  ;;  %v2750_v30 = vadd.f32 %v2731_v60, %v2488_v24  ;;  %v8961_v24 = vld [vmem:[%s10247_s2 + $0x30] sm:$0xff] }
 0x6bf   :  { %v2765_v57 = vadd.f32 %v2757_v10, %v2751_v14  ;;  %v2764_v56 = vadd.f32 %v2756_v3, %v2750_v30  ;;  %v1257_v14 = vld [vmem:[#allocation7] sm:$0xff] }
 0x6c1   :  { %v7724_v7 = vmul.f32 -1.442695, %v2765_v57  ;;  %v2705_v43 = vpop.f32.mrf.mxu2  ;;  %v2718_v63 = vpop.f32.mrf.mxu3 }
 0x6c2   :  { %v2748_v55 = vadd.f32 %v2705_v43, %v2462_v38  ;;  %v2749_v0 = vadd.f32 %v2718_v63, %v2475_v33 }
 0x6c3   :  { %9601 = vpow2.f32 %v7724_v7 }
 0x6c4   :  { %v2762_v50 = vadd.f32 %v2754_v61, %v2748_v55  ;;  %v2763_v1 = vadd.f32 %v2755_v53, %v2749_v0  ;;  %v2746_v46 = vpop.f32.mrf.mxu1  ;;  %v2733_v62 = vpop.f32.mrf.mxu0 }
 0x6c6   :  { %v7722_v4 = vmul.f32 -1.442695, %v2762_v50  ;;  %v7723_v22 = vmul.f32 -1.442695, %v2763_v1 }
 0x6c8   :  { %9603 = vpow2.f32 %v7722_v4 }
 0x6c9   :  { %v9602_v54 = vpop.eup %9601  ;;  %9605 = vpow2.f32 %v7723_v22  ;;  %v2707_v5 = vpop.f32.mrf.mxu2 }
 0x6ca   :  { %v2720_v27 = vpop.f32.mrf.mxu3  ;;  %v2808_v6 = vadd.f32 1.0, %v9602_v54 }
 0x6cc   :  { %9607 = vrcp.f32 %v2808_v6  ;;  %v2820_v0 = vand.u32 2147483648, %v2808_v6  ;;  %vm2814_vm10 = vweird.f32 %v2808_v6  ;;  %v2818_v50 = vand.u32 2147483647, %v2808_v6 }
 0x6ce   :  { %v9604_v26 = vpop.eup %9603  ;;  %v2821_v46 = vor.u32 1.1754944e-38, %v2820_v0  ;;  %vm2819_vm12 = vcmp.eq.f32.partialorder %v2818_v50, 8.507059e+37 }
 0x6cf   :  { %v9606_v29 = vpop.eup %9605  ;;  %v2769_v2 = vadd.f32 1.0, %v9604_v26  ;;  %v8962_v26 = vld [vmem:[%s10247_s2 + $0x38] sm:$0xff] }
 0x6d0   :  { %v2788_v45 = vadd.f32 1.0, %v9606_v29  ;;  %2984 = vmatpush.bf16.msrb.mxu2 %v8962_v26 }
 0x6d1   :  { %9609 = vrcp.f32 %v2769_v2  ;;  %v2781_v40 = vand.u32 2147483648, %v2769_v2  ;;  %v2779_v12 = vand.u32 2147483647, %v2769_v2  ;;  %vm2775_vm3 = vweird.f32 %v2769_v2 }
 0x6d2   :  { %9611 = vrcp.f32 %v2788_v45  ;;  %v9608_v49 = vpop.eup %9607  ;;  %v2800_v51 = vand.u32 2147483648, %v2788_v45  ;;  %v2798_v52 = vand.u32 2147483647, %v2788_v45  ;;  %vm2794_vm5 = vweird.f32 %v2788_v45 }
 0x6d3   :  { %v2810_v16 = vmul.f32 %v9608_v49, %v2808_v6  ;;  %9613 = vtanh.f32 %v2764_v56  ;;  %v2782_v20 = vor.u32 1.1754944e-38, %v2781_v40  ;;  %vm2780_vm6 = vcmp.eq.f32.partialorder %v2779_v12, 8.507059e+37  ;;  %v8958_v40 = vld [vmem:[%s10247_s2 + $0x18] sm:$0xff] }
 0x6d4   :  { %v2801_v32 = vor.u32 1.1754944e-38, %v2800_v51  ;;  %vm2799_vm8 = vcmp.eq.f32.partialorder %v2798_v52, 8.507059e+37  ;;  %vm2815_vm9 = vweird.f32 %v9608_v49  ;;  %2985 = vmatpush.bf16.msrb.mxu2 %v8961_v24 }
 0x6d5   :  { %v2811_v47 = vsub.f32 1.0, %v2810_v16  ;;  %vm2816_vm11 = vmor %vm2814_vm10, %vm2815_vm9 }
 0x6d7   :  { %v9610_v39 = vpop.eup %9609  ;;  %v2812_v53 = vmul.f32 %v9608_v49, %v2811_v47 }
 0x6d8   :  { %v9612_v17 = vpop.eup %9611  ;;  %v2771_v9 = vmul.f32 %v9610_v39, %v2769_v2  ;;  %vm2776_vm0 = vweird.f32 %v9610_v39 }
 0x6d9   :  { %v2790_v18 = vmul.f32 %v9612_v17, %v2788_v45  ;;  %vm2795_vm1 = vweird.f32 %v9612_v17  ;;  %vm2777_vm4 = vmor %vm2775_vm3, %vm2776_vm0  ;;  %v9614_v57 = vpop.eup %9613  ;;  %v2813_v55 = vadd.f32 %v9608_v49, %v2812_v53 }
 0x6da   :  { %v2772_v59 = vsub.f32 1.0, %v2771_v9  ;;  %vm2796_vm7 = vmor %vm2794_vm5, %vm2795_vm1 }
 0x6db   :  { %v2791_v37 = vsub.f32 1.0, %v2790_v18  ;;  %v2817_v1 = vsel %vm2816_vm11, %v9608_v49, %v2813_v55  ;;  %v8960_v49 = vld [vmem:[%s10247_s2 + $0x28] sm:$0xff]  ;;  %v8959_v18 = vld [vmem:[%s10247_s2 + $0x20] sm:$0xff] }
 0x6dc   :  { %v2773_v15 = vmul.f32 %v9610_v39, %v2772_v59  ;;  %v2822_v4 = vsel %vm2819_vm12, %v2821_v46, %v2817_v1  ;;  %2986 = vmatpush.bf16.msrb.mxu2 %v8960_v49 }
 0x6dd   :  { %v2792_v58 = vmul.f32 %v9612_v17, %v2791_v37 }
 0x6de   :  { %v2774_v19 = vadd.f32 %v9610_v39, %v2773_v15 }
 0x6df   :  { %v2793_v10 = vadd.f32 %v9612_v17, %v2792_v58  ;;  %v8957_v58 = vld [vmem:[%s10247_s2 + $0x10] sm:$0xff] }
 0x6e0   :  { %v2778_v60 = vsel %vm2777_vm4, %v9610_v39, %v2774_v19  ;;  %2987 = vmatpush.bf16.msrb.mxu2 %v8959_v18 }
 0x6e1   :  { %v2783_v38 = vsel %vm2780_vm6, %v2782_v20, %v2778_v60  ;;  %v2797_v33 = vsel %vm2796_vm7, %v9612_v17, %v2793_v10  ;;  %v8956_v20 = vld [vmem:[%s10247_s2 + $0x8] sm:$0xff] }
 0x6e2   :  { %v2802_v61 = vsel %vm2799_vm8, %v2801_v32, %v2797_v33  ;;  %v2825_v7 = vmul.f32 %v9614_v57, %v2783_v38  ;;  %v8955_v32 = vld [vmem:[%s10247_s2] sm:$0xff] }
 0x6e3   :  { %v2824_v43 = vmul.f32 %v2802_v61, %v1257_v14 }
 0x6e4   :  { %2988 = vmatpush.bf16.msrb.mxu2 %v8958_v40 }
 0x6e5   :  { %v10819_v63 = vadd.f32 %v2825_v7, %v2824_v43 }
 0x6e7   :  { %9615 = vtanh.f32 %v10819_v63  ;;  %v2874_v5 = vmul.f32 %v10819_v63, %v10819_v63 }
 0x6e8   :  { %2989 = vmatpush.bf16.msrb.mxu2 %v8957_v58 }
 0x6ec   :  { %2990 = vmatpush.bf16.msrb.mxu2 %v8956_v20 }
 0x6ed   :  { %v9616_v62 = vpop.eup %9615 }
 0x6ee   :  { %v10822_v22 = vmul.f32 %v9616_v62, %v2822_v4 }
 0x6f0   :  { %2829 = vadd.xlane.f32.xlu2 %v10822_v22  ;;  %v2832_v54 = vmul.f32 %v10822_v22, %v10822_v22  ;;  %2991 = vmatpush.bf16.msrb.mxu2 %v8955_v32 }
 0x6f2   :  { %2833 = vadd.xlane.f32.xlu1 %v2832_v54 }
 0x6f8   :  { %2871 = vadd.xlane.f32.xlu2 %v10819_v63 }
 0x700   :  { %2875 = vadd.xlane.f32.xlu2 %v2874_v5 }
 0x763   :  { %v2830_v27 = vpop.xlane.xlu2 %2829 }
 0x764   :  { %v10830_v6 = vmul.f32 0.03125, %v2830_v27 }
 0x765   :  { %v2834_v45 = vpop.xlane.xlu1 %2833 }
 0x766   :  { %v2835_v29 = vmul.f32 32.0, %v10830_v6 }
 0x768   :  { %v2836_v2 = vmul.f32 %v2835_v29, %v10830_v6 }
 0x76a   :  { %v2837_v30 = vsub.f32 %v2834_v45, %v2836_v2  ;;  %v2840_v2 = vsub.f32 %v10822_v22, %v10830_v6  ;;  %v2884_v6 = vperm.slane %v10007_v31, 0 }
 0x76b   :  { %v2872_v3 = vpop.xlane.xlu2 %2871 }
 0x76c   :  { %v2838_v39 = vmul.f32 0.032258064, %v2837_v30  ;;  %v10837_v56 = vmul.f32 0.03125, %v2872_v3  ;;  %v2841_v49 = vmul.f32 %v10275_v13, %v2840_v2 }
 0x76e   :  { %v2839_v17 = vmax.f32 %v2838_v39, 0.0  ;;  %v2877_v9 = vmul.f32 32.0, %v10837_v56  ;;  %v2882_v22 = vsub.f32 %v10819_v63, %v10837_v56  ;;  %v2916_v63 = vperm.slane %v10012_v36, 0 }
 0x770   :  { %9617 = vrsqrt.f32 %v2839_v17  ;;  %v2878_v59 = vmul.f32 %v2877_v9, %v10837_v56  ;;  %vm2849_vm13 = vcmp.eq.f32.partialorder %v2839_v17, inf  ;;  %v2852_v33 = vand.u32 2147483648, %v2839_v17 }
 0x771   :  { %vm2851_vm14 = vcmp.eq.f32.partialorder %v2839_v17, 0.0 }
 0x773   :  { %v2876_v16 = vpop.xlane.xlu2 %2875 }
 0x774   :  { %v2879_v37 = vsub.f32 %v2876_v16, %v2878_v59 }
 0x776   :  { %v9618_v15 = vpop.eup %9617  ;;  %v2880_v12 = vmul.f32 0.032258064, %v2879_v37 }
 0x777   :  { %v2843_v51 = vmul.f32 %v9618_v15, %v2839_v17 }
 0x778   :  { %v2881_v52 = vmax.f32 %v2880_v12, 0.0 }
 0x779   :  { %v2844_v19 = vmul.f32 %v9618_v15, %v2843_v51 }
 0x77a   :  { %9619 = vrsqrt.f32 %v2881_v52  ;;  %vm2894_vm15 = vcmp.eq.f32.partialorder %v2881_v52, inf  ;;  %v2897_v46 = vand.u32 2147483648, %v2881_v52  ;;  %vm2896_vm0 = vcmp.eq.f32.partialorder %v2881_v52, 0.0 }
 0x77b   :  { %v2845_v47 = vmul.f32 0.5, %v2844_v19  ;;  %v2886_v19 = vmul.f32 %v2884_v6, %v2882_v22 }
 0x77d   :  { %v2846_v10 = vsub.f32 1.5, %v2845_v47 }
 0x77f   :  { %v2847_v60 = vmul.f32 %v9618_v15, %v2846_v10 }
 0x780   :  { %v9620_v14 = vpop.eup %9619 }
 0x781   :  { %v2848_v57 = vmul.f32 %v2847_v60, %v2839_v17  ;;  %v2888_v38 = vmul.f32 %v9620_v14, %v2881_v52 }
 0x783   :  { %v2850_v61 = vsel %vm2849_vm13, %v2839_v17, %v2848_v57  ;;  %v2889_v53 = vmul.f32 %v9620_v14, %v2888_v38 }
 0x784   :  { %v2853_v7 = vsel %vm2851_vm14, %v2852_v33, %v2850_v61 }
 0x785   :  { %v2854_v43 = vadd.f32 1e-06, %v2853_v7  ;;  %v2890_v55 = vmul.f32 0.5, %v2889_v53  ;;  %v3053_v53 = vld [vmem:[%s10311_s5] sm:$0xff] }
 0x787   :  { %9621 = vrcp.f32 %v2854_v43  ;;  %v2891_v0 = vsub.f32 1.5, %v2890_v55  ;;  %v2866_v29 = vand.u32 2147483648, %v2854_v43  ;;  %v2864_v24 = vand.u32 2147483647, %v2854_v43 }
 0x788   :  { %vm2860_vm3 = vweird.f32 %v2854_v43 }
 0x789   :  { %v2892_v50 = vmul.f32 %v9620_v14, %v2891_v0  ;;  %v2867_v3 = vor.u32 1.1754944e-38, %v2866_v29  ;;  %vm2865_vm5 = vcmp.eq.f32.partialorder %v2864_v24, 8.507059e+37 }
 0x78b   :  { %v2893_v1 = vmul.f32 %v2892_v50, %v2881_v52 }
 0x78d   :  { %v9622_v62 = vpop.eup %9621  ;;  %v2895_v4 = vsel %vm2894_vm15, %v2881_v52, %v2893_v1 }
 0x78e   :  { %v2856_v54 = vmul.f32 %v9622_v62, %v2854_v43  ;;  %v2898_v5 = vsel %vm2896_vm0, %v2897_v46, %v2895_v4  ;;  %vm2861_vm1 = vweird.f32 %v9622_v62  ;;  %v1254_v43 = vld [vmem:[#allocation3] sm:$0xff]  ;;  %v1255_v4 = vld [vmem:[#allocation2] sm:$0xff] }
 0x78f   :  { %v2899_v27 = vadd.f32 1e-06, %v2898_v5  ;;  %vm2862_vm4 = vmor %vm2860_vm3, %vm2861_vm1  ;;  %v3054_v55 = vadd.f32 %v3053_v53, %v1254_v43  ;;  %v3021_v29 = vsub.f32 1.0, %v1255_v4 }
 0x790   :  { %v2857_v26 = vsub.f32 1.0, %v2856_v54 }
 0x791   :  { %9623 = vrcp.f32 %v2899_v27  ;;  %v2911_v37 = vand.u32 2147483648, %v2899_v27  ;;  %v2909_v51 = vand.u32 2147483647, %v2899_v27  ;;  %vm2905_vm7 = vweird.f32 %v2899_v27  ;;  %3055 = vst.msk [vmem:[%s10311_s5] sm:$0xff] %vm1139_vm2, %v3054_v55 }
 0x792   :  { %v2858_v45 = vmul.f32 %v9622_v62, %v2857_v26 }
 0x793   :  { %v2912_v52 = vor.u32 1.1754944e-38, %v2911_v37  ;;  %vm2910_vm9 = vcmp.eq.f32.partialorder %v2909_v51, 8.507059e+37 }
 0x794   :  { %v2859_v30 = vadd.f32 %v9622_v62, %v2858_v45 }
 0x796   :  { %v2863_v39 = vsel %vm2862_vm4, %v9622_v62, %v2859_v30 }
 0x797   :  { %v9624_v17 = vpop.eup %9623  ;;  %v2868_v9 = vsel %vm2865_vm5, %v2867_v3, %v2863_v39 }
 0x798   :  { %v2869_v18 = vmul.f32 %v2868_v9, %v2841_v49  ;;  %v2901_v59 = vmul.f32 %v9624_v17, %v2899_v27  ;;  %vm2906_vm6 = vweird.f32 %v9624_v17 }
 0x799   :  { %vm2907_vm8 = vmor %vm2905_vm7, %vm2906_vm6 }
 0x79a   :  { %v10850_v16 = vadd.f32 %v10281_v21, %v2869_v18  ;;  %v2902_v40 = vsub.f32 1.0, %v2901_v59  ;;  %v3056_v18 = vld [vmem:[%s10325_s29] sm:$0xff] }
 0x79c   :  { %v2919_v15 = vpack.c.bf16 %v10850_v16, %v10850_v16  ;;  %3029 = vst [vmem:[#allocation6] sm:$0xff] %v10850_v16  ;;  %v2903_v12 = vmul.f32 %v9624_v17, %v2902_v40  ;;  %v9890_v40 = vmov 0.0  }
 0x79e   :  { %2992 = vmatmul.bf16.vlgmr.msrb.gmra.mxu2 %v2919_v15  ;;  %v2904_v58 = vadd.f32 %v9624_v17, %v2903_v12 }
 0x7a0   :  { %v2908_v47 = vsel %vm2907_vm8, %v9624_v17, %v2904_v58 }
 0x7a1   :  { %v2913_v56 = vsel %vm2910_vm9, %v2912_v52, %v2908_v47 }
 0x7a2   :  { %v2914_v20 = vmul.f32 %v2913_v56, %v2886_v19 }
 0x7a4   :  { %v10859_v10 = vadd.f32 %v2916_v63, %v2914_v20 }
 0x7a6   :  { %3030 = vst [vmem:[#allocation7] sm:$0xff] %v10859_v10 }
 0x821   :  { %v2993_v60 = vpop.f32.mrf.mxu2 }
 0x822   :  { %v2994_v32 = vadd.f32 %v10298_v28, %v2993_v60 }
 0x824   :  { %v2997_v14 = vmax.f32 %v2994_v32, 0.0  ;;  %v3033_v32 = vld [vmem:[#allocation4] sm:$0xff] }
 0x826   :  { %v2998_v57 = vmul.f32 %v10303_v35, %v2997_v14  ;;  %v3048_v14 = vld [vmem:[#allocation5] sm:$0xff] }
 0x828   :  { %2999 = vadd.xlane.f32.xlu0 %v2998_v57 }
 0x829   :  { %v2995_v38 = vpop.f32.mrf.mxu2 }
 0x89b   :  { %v3000_v33 = vpop.xlane.xlu0 %2999 }
 0x89c   :  { %v3001_v61 = vadd.f32 %v10313_v42, %v3000_v33 }
 0x89e   :  { %v7757_v7 = vmul.f32 -1.442695, %v3001_v61 }
 0x8a0   :  { %9625 = vpow2.f32 %v7757_v7 }
 0x8a6   :  { %v9626_v0 = vpop.eup %9625 }
 0x8a7   :  { %v3005_v50 = vadd.f32 1.0, %v9626_v0 }
 0x8a9   :  { %9627 = vrcp.f32 %v3005_v50  ;;  %v3017_v54 = vand.u32 2147483648, %v3005_v50  ;;  %v3015_v27 = vand.u32 2147483647, %v3005_v50  ;;  %vm3011_vm11 = vweird.f32 %v3005_v50 }
 0x8ab   :  { %v3018_v2 = vor.u32 1.1754944e-38, %v3017_v54  ;;  %vm3016_vm13 = vcmp.eq.f32.partialorder %v3015_v27, 8.507059e+37 }
 0x8af   :  { %v9628_v1 = vpop.eup %9627 }
 0x8b0   :  { %v3007_v46 = vmul.f32 %v9628_v1, %v3005_v50  ;;  %vm3012_vm10 = vweird.f32 %v9628_v1 }
 0x8b1   :  { %vm3013_vm12 = vmor %vm3011_vm11, %vm3012_vm10 }
 0x8b2   :  { %v3008_v62 = vsub.f32 1.0, %v3007_v46 }
 0x8b4   :  { %v3009_v5 = vmul.f32 %v9628_v1, %v3008_v62 }
 0x8b6   :  { %v3010_v26 = vadd.f32 %v9628_v1, %v3009_v5 }
 0x8b8   :  { %v3014_v45 = vsel %vm3013_vm12, %v9628_v1, %v3010_v26 }
 0x8b9   :  { %v3019_v24 = vsel %vm3016_vm13, %v3018_v2, %v3014_v45 }
 0x8ba   :  { %v3022_v30 = vmul.f32 %v3021_v29, %v3019_v24  ;;  %v3057_v3 = vsub.f32 1.0, %v3019_v24 }
 0x8bc   :  { %v3058_v49 = vmul.f32 2.0, %v3057_v3  ;;  %3036 = vperm.xlu0 %9520, %v3022_v30   ;;  %v3023_v39 = vmul.f32 %v3022_v30, %v1254_v43 }
 0x8be   :  { %v3059_v17 = vadd.f32 1.0, %v3058_v49  ;;  %v3024_v9 = vadd.f32 %v3023_v39, %v1255_v4 }
 0x8c0   :  { %v3060_v59 = vmul.f32 %v3059_v17, %v1254_v43  ;;  %vm3025_vm14 = vcmp.lt.f32.partialorder %v3024_v9, 0.9  ;;  %3031 = vst.msk [vmem:[#allocation2] sm:$0xff] %vm1139_vm2, %v3024_v9 }
 0x8c1   :  { %v7758_v22 = vsel %vm3025_vm14, 1.0, %v9890_v40 }
 0x8c2   :  { %v3061_v6 = vadd.f32 %v3060_v59, %v3056_v18  ;;  %v3028_v37 = vmul.f32 %v7758_v22, %v1254_v43 }
 0x8c4   :  { %3062 = vst.msk [vmem:[%s10325_s29] sm:$0xff] %vm1139_vm2, %v3061_v6  ;;  %v3063_v15 = vsel %vm1139_vm2, %v3028_v37, -inf }
 0x8c5   :  { %3064 = vmax.xlane.f32.xlu1 %v3063_v15  ;;  %3032 = vst.msk [vmem:[#allocation3] sm:$0xff] %vm1139_vm2, %v3028_v37 }
 0x8de   :  { %3042 = vperm.xlu1 %9518, %v1254_v43  }
 0x92e   :  { %v3037_v56 = vpop.permute.xlu0 %3036 }
 0x92f   :  { %v3039_v20 = vmul.f32 %v3037_v56, %v10850_v16  ;;  %v3049_v60 = vmul.f32 %v3037_v56, %v10859_v10 }
 0x938   :  { %v3065_v12 = vpop.xlane.xlu1 %3064 }
 0x939   :  { %v3066_v51 = vrot.slane %v3065_v12, 4 }
 0x93b   :  { %v3067_v58 = vmax.f32 %v3065_v12, %v3066_v51 }
 0x93d   :  { %v3068_v52 = vrot.slane %v3067_v58, 2 }
 0x93f   :  { %v3069_v19 = vmax.f32 %v3067_v58, %v3068_v52 }
 0x941   :  { %v3070_v47 = vrot.slane %v3069_v19, 1 }
 0x943   :  { %v3071_v63 = vmax.f32 %v3069_v19, %v3070_v47 }
 0x945   :  { %9439 = vpush %v3071_v63 }
 0x950   :  { %v3043_v57 = vpop.permute.xlu1 %3042 }
 0x951   :  { %v3045_v38 = vmul.f32 %v3043_v57, %v3039_v20  ;;  %v3050_v33 = vmul.f32 %v3049_v60, %v3043_v57 }
 0x953   :  { %v3046_v61 = vadd.f32 %v3045_v38, %v3033_v32  ;;  %v3051_v53 = vadd.f32 %v3050_v33, %v3048_v14 }
 0x955   :  { %3047 = vst [vmem:[#allocation4] sm:$0xff] %v3046_v61 }
 0x956   :  { %3052 = vst [vmem:[#allocation5] sm:$0xff] %v3051_v53 }
 0x976   :  { %s9440_s30 = spop %9439 }
 0x977   :  { %3073 = sst [smem:[#allocation8]] %s9440_s30 }
 0x978 PF:  { %s3074_s12 = sld [smem:[#allocation8]] }
 0x97e   :  { %p3075_p1 = scmp.gt.f32.partialorder %s3074_s12, 0.0 }
 0x97f   :  { %v8970_v16 = vld [vmem:[%s9918_s18 + $0x38] sm:$0xff] (%p3075_p1)  ;;  %v8969_v10 = vld [vmem:[%s9918_s18 + $0x30] sm:$0xff] (%p3075_p1)  ;;  %v7937_v43 = vld [vmem:[%s9946_s15 + $0xe0] sm:$0xf] (%p3075_p1)  ;;  %vm4101_vm15 = vcmask (%p3075_p1), 1041409   ;;  %vm4103_vm0 = vcmask (%p3075_p1), 1042434  }
 0x980   :  { %3078 = sbr.rel (!%p3075_p1) target bundleno = 3936 (0xf60), region = 125  ;;  %3148 = vmatpush.bf16.msra.mxu0 (%p3075_p1), %v8970_v16  ;;  %v8978_v7 = vld [vmem:[%s9923_s22 + $0x38] sm:$0xff] (%p3075_p1)  ;;  %v9041_v55 = vld [vmem:[%s9946_s15 + $0xec] sm:$0xf0] (%p3075_p1)  ;;  %v9039_v1 = vld [vmem:[%s9946_s15 + $0xe4] sm:$0xf] (%p3075_p1) }
 0x981   :  { %3230 = vmatpush.bf16.msra.mxu1 (%p3075_p1), %v8978_v7  ;;  %v8977_v0 = vld [vmem:[%s9923_s22 + $0x30] sm:$0xff] (%p3075_p1)  ;;  %v7938_v50 = vor.u32 (%p3075_p1), %v9041_v55, %v7937_v43  ;;  %v8968_v62 = vld [vmem:[%s9918_s18 + $0x28] sm:$0xff] (%p3075_p1)  ;;  %v7921_v54 = vld [vmem:[%s9946_s15 + $0xc0] sm:$0xf] (%p3075_p1)  ;;  %vm4105_vm1 = vcmask (%p3075_p1), 1043459   ;;  %vm4107_vm3 = vcmask (%p3075_p1), 1044484  }
 0x982   :  { %v7939_v46 = vld [vmem:[%s9946_s15 + $0xf0] sm:$0xf0] (%p3075_p1)  ;;  %v9037_v5 = vld [vmem:[%s9946_s15 + $0xcc] sm:$0xf0] (%p3075_p1)  ;;  %v9035_v27 = vld [vmem:[%s9946_s15 + $0xc4] sm:$0xf] (%p3075_p1) }
 0x983   :  { %v7942_v4 = vor.u32 (%p3075_p1), %v9039_v1, %v7939_v46  ;;  %4033 = vmatpush.bf16.msra.mxu2 (%p3075_p1), %v7938_v50  ;;  %v7923_v26 = vld [vmem:[%s9946_s15 + $0xd0] sm:$0xf0] (%p3075_p1)  ;;  %v8976_v29 = vld [vmem:[%s9923_s22 + $0x28] sm:$0xff] (%p3075_p1)  ;;  %v7922_v2 = vor.u32 (%p3075_p1), %v9037_v5, %v7921_v54  ;;  %v7905_v24 = vld [vmem:[%s9946_s15 + $0xa0] sm:$0xf] (%p3075_p1)  ;;  %vm4109_vm4 = vcmask (%p3075_p1), 1045509  }
 0x984   :  { %3149 = vmatpush.bf16.msra.mxu0 (%p3075_p1), %v8969_v10  ;;  %v7926_v45 = vor.u32 (%p3075_p1), %v9035_v27, %v7923_v26  ;;  %v9033_v30 = vld [vmem:[%s9946_s15 + $0xac] sm:$0xf0] (%p3075_p1)  ;;  %v9031_v3 = vld [vmem:[%s9946_s15 + $0xa4] sm:$0xf] (%p3075_p1)  ;;  %v7907_v39 = vld [vmem:[%s9946_s15 + $0xb0] sm:$0xf0] (%p3075_p1) }
 0x985   :  { %4046 = vmatpush.bf16.msra.mxu3 %v7942_v4  ;;  %3231 = vmatpush.bf16.msra.mxu1 %v8977_v0  ;;  %v8967_v49 = vld [vmem:[%s9918_s18 + $0x20] sm:$0xff]  ;;  %v7906_v17 = vor.u32 %v9033_v30, %v7905_v24  ;;  %v7910_v9 = vor.u32 %v9031_v3, %v7907_v39  ;;  %v9029_v59 = vld [vmem:[%s9946_s15 + $0x8c] sm:$0xf0]  ;;  %v7891_v6 = vld [vmem:[%s9946_s15 + $0x90] sm:$0xf0]  ;;  %vm4111_vm5 = vcmask 1046534  }
 0x986   :  { %v7889_v18 = vld [vmem:[%s9946_s15 + $0x80] sm:$0xf]  ;;  %v9027_v22 = vld [vmem:[%s9946_s15 + $0x84] sm:$0xf]  ;;  %v8966_v37 = vld [vmem:[%s9918_s18 + $0x18] sm:$0xff]  ;;  %vm4113_vm6 = vcmask 1047559  }
 0x987   :  { %4034 = vmatpush.bf16.msra.mxu2 %v7922_v2  ;;  %v8975_v40 = vld [vmem:[%s9923_s22 + $0x20] sm:$0xff]  ;;  %v7890_v15 = vor.u32 %v9029_v59, %v7889_v18  ;;  %v7894_v12 = vor.u32 %v9027_v22, %v7891_v6  ;;  %v9025_v58 = vld [vmem:[%s9946_s15 + $0x6c] sm:$0xf0]  ;;  %v8974_v52 = vld [vmem:[%s9923_s22 + $0x18] sm:$0xff] }
 0x988   :  { %3150 = vmatpush.bf16.msra.mxu0 %v8968_v62  ;;  %v7873_v51 = vld [vmem:[%s9946_s15 + $0x60] sm:$0xf]  ;;  %v9023_v19 = vld [vmem:[%s9946_s15 + $0x64] sm:$0xf]  ;;  %v7875_v47 = vld [vmem:[%s9946_s15 + $0x70] sm:$0xf0] }
 0x989   :  { %4047 = vmatpush.bf16.msra.mxu3 %v7926_v45  ;;  %3232 = vmatpush.bf16.msra.mxu1 %v8976_v29  ;;  %v8965_v63 = vld [vmem:[%s9918_s18 + $0x10] sm:$0xff]  ;;  %v7874_v56 = vor.u32 %v9025_v58, %v7873_v51  ;;  %v7878_v20 = vor.u32 %v9023_v19, %v7875_v47  ;;  %v7857_v60 = vld [vmem:[%s9946_s15 + $0x40] sm:$0xf]  ;;  %v9019_v57 = vld [vmem:[%s9946_s15 + $0x44] sm:$0xf] }
 0x98a   :  { %v9021_v32 = vld [vmem:[%s9946_s15 + $0x4c] sm:$0xf0]  ;;  %v7859_v38 = vld [vmem:[%s9946_s15 + $0x50] sm:$0xf0]  ;;  %v8964_v33 = vld [vmem:[%s9918_s18 + $0x8] sm:$0xff] }
 0x98b   :  { %4035 = vmatpush.bf16.msra.mxu2 %v7906_v17  ;;  %v8973_v14 = vld [vmem:[%s9923_s22 + $0x10] sm:$0xff]  ;;  %v7858_v61 = vor.u32 %v9021_v32, %v7857_v60  ;;  %v7945_v53 = vld [vmem:[%s9946_s15 + $0xe8] sm:$0xf]  ;;  %v9042_v16 = vld [vmem:[%s9946_s15 + $0xf4] sm:$0xf0]  ;;  %v7862_v10 = vor.u32 %v9019_v57, %v7859_v38 }
 0x98c   :  { %3151 = vmatpush.bf16.msra.mxu0 %v8967_v49  ;;  %v8972_v7 = vld [vmem:[%s9923_s22 + $0x8] sm:$0xff]  ;;  %v8963_v43 = vld [vmem:[%s9918_s18] sm:$0xff]  ;;  %v7946_v0 = vor.u32 %v9042_v16, %v7945_v53  ;;  %v7947_v1 = vld [vmem:[%s9946_s15 + $0xf8] sm:$0xf0] }
 0x98d   :  { %4048 = vmatpush.bf16.msra.mxu3 %v7910_v9  ;;  %3233 = vmatpush.bf16.msra.mxu1 %v8975_v40  ;;  %v3081_v55 = vld [vmem:[#allocation6] sm:$0xff]  ;;  %v9040_v50 = vld [vmem:[%s9946_s15 + $0xec] sm:$0xf]  ;;  %v7929_v46 = vld [vmem:[%s9946_s15 + $0xc8] sm:$0xf] }
 0x98e   :  { %v9038_v62 = vld [vmem:[%s9946_s15 + $0xd4] sm:$0xf0]  ;;  %v10921_v4 = vpack.c.bf16 %v3081_v55, %v3081_v55  ;;  %v8971_v54 = vld [vmem:[%s9923_s22] sm:$0xff]  ;;  %v7950_v5 = vor.u32 %v9040_v50, %v7947_v1  ;;  %v9036_v26 = vld [vmem:[%s9946_s15 + $0xcc] sm:$0xf] }
 0x98f   :  { %4036 = vmatpush.bf16.msra.mxu2 %v7890_v15  ;;  %v7930_v27 = vor.u32 %v9038_v62, %v7929_v46  ;;  %v7931_v29 = vld [vmem:[%s9946_s15 + $0xd8] sm:$0xf0]  ;;  %v7913_v2 = vld [vmem:[%s9946_s15 + $0xa8] sm:$0xf]  ;;  %v9034_v45 = vld [vmem:[%s9946_s15 + $0xb4] sm:$0xf0] }
 0x990   :  { %3152 = vmatpush.bf16.msra.mxu0 %v8966_v37  ;;  %v7934_v24 = vor.u32 %v9036_v26, %v7931_v29  ;;  %v7914_v30 = vor.u32 %v9034_v45, %v7913_v2  ;;  %v7897_v3 = vld [vmem:[%s9946_s15 + $0x88] sm:$0xf]  ;;  %v9030_v49 = vld [vmem:[%s9946_s15 + $0x94] sm:$0xf0]  ;;  %v7841_v6 = vld [vmem:[%s9946_s15 + $0x20] sm:$0xf] }
 0x991   :  { %4049 = vmatpush.bf16.msra.mxu3 %v7894_v12  ;;  %3234 = vmatpush.bf16.msra.mxu1 %v8974_v52  ;;  %v7898_v39 = vor.u32 %v9030_v49, %v7897_v3  ;;  %v7881_v17 = vld [vmem:[%s9946_s15 + $0x68] sm:$0xf]  ;;  %v9026_v9 = vld [vmem:[%s9946_s15 + $0x74] sm:$0xf0]  ;;  %v9017_v37 = vld [vmem:[%s9946_s15 + $0x2c] sm:$0xf0] }
 0x992   :  { %v7882_v18 = vor.u32 %v9026_v9, %v7881_v17  ;;  %v7865_v59 = vld [vmem:[%s9946_s15 + $0x48] sm:$0xf]  ;;  %v9022_v40 = vld [vmem:[%s9946_s15 + $0x54] sm:$0xf0]  ;;  %v9015_v15 = vld [vmem:[%s9946_s15 + $0x24] sm:$0xf]  ;;  %v7842_v12 = vor.u32 %v9017_v37, %v7841_v6 }
 0x993   :  { %4037 = vmatpush.bf16.msra.mxu2 %v7874_v56  ;;  %v7866_v22 = vor.u32 %v9022_v40, %v7865_v59  ;;  %v7843_v51 = vld [vmem:[%s9946_s15 + $0x30] sm:$0xf0]  ;;  %v7849_v58 = vld [vmem:[%s9946_s15 + $0x28] sm:$0xf]  ;;  %v9018_v52 = vld [vmem:[%s9946_s15 + $0x34] sm:$0xf0] }
 0x994   :  { %3153 = vmatpush.bf16.msra.mxu0 %v8965_v63  ;;  %v7846_v19 = vor.u32 %v9015_v15, %v7843_v51  ;;  %v7850_v47 = vor.u32 %v9018_v52, %v7849_v58  ;;  %v9032_v63 = vld [vmem:[%s9946_s15 + $0xac] sm:$0xf]  ;;  %v7915_v56 = vld [vmem:[%s9946_s15 + $0xb8] sm:$0xf0]  ;;  %v7825_v60 = vld [vmem:[%s9946_s15] sm:$0xf] }
 0x995   :  { %4050 = vmatpush.bf16.msra.mxu3 %v7878_v20  ;;  %3235 = vmatpush.bf16.msra.mxu1 %v8973_v14  ;;  %v7918_v20 = vor.u32 %v9032_v63, %v7915_v56  ;;  %v9013_v32 = vld [vmem:[%s9946_s15 + $0xc] sm:$0xf0]  ;;  %v9011_v14 = vld [vmem:[%s9946_s15 + $0x4] sm:$0xf]  ;;  %v7827_v38 = vld [vmem:[%s9946_s15 + $0x10] sm:$0xf0] }
 0x996   :  { %v7826_v57 = vor.u32 %v9013_v32, %v7825_v60  ;;  %v7830_v53 = vor.u32 %v9011_v14, %v7827_v38  ;;  %v9024_v55 = vld [vmem:[%s9946_s15 + $0x6c] sm:$0xf]  ;;  %v7867_v46 = vld [vmem:[%s9946_s15 + $0x58] sm:$0xf0]  ;;  %v9268_v17 = vld [vmem:[%s9908_s10] sm:$0xff]  }
 0x997   :  { %4038 = vmatpush.bf16.msra.mxu2 %v7858_v61  ;;  %v9014_v61 = vld [vmem:[%s9946_s15 + $0x14] sm:$0xf0]  ;;  %v9020_v1 = vld [vmem:[%s9946_s15 + $0x4c] sm:$0xf]  ;;  %v7835_v29 = vld [vmem:[%s9946_s15 + $0x18] sm:$0xf0]  ;;  %v9269_v6 = vunpack.c.l.bf16 %v9268_v17  ;;  %v9270_v63 = vunpack.c.h.bf16 %v9268_v17 }
 0x998   :  { %3154 = vmatpush.bf16.msra.mxu0 %v8964_v33  ;;  %v7833_v33 = vld [vmem:[%s9946_s15 + $0x8] sm:$0xf]  ;;  %v7870_v62 = vor.u32 %v9020_v1, %v7867_v46  ;;  %v9012_v26 = vld [vmem:[%s9946_s15 + $0xc] sm:$0xf]  ;;  %v9410_v9 = vld [vmem:[%s9908_s10 + $0x10] sm:$0xff]  }
 0x999   :  { %4051 = vmatpush.bf16.msra.mxu3 %v7862_v10  ;;  %3236 = vmatpush.bf16.msra.mxu1 %v8972_v7  ;;  %v7834_v16 = vor.u32 %v9014_v61, %v7833_v33  ;;  %v9028_v10 = vld [vmem:[%s9946_s15 + $0x8c] sm:$0xf]  ;;  %v7899_v7 = vld [vmem:[%s9946_s15 + $0x98] sm:$0xf0]  ;;  %v7838_v2 = vor.u32 %v9012_v26, %v7835_v29  ;;  %v9277_v37 = vunpack.c.l.bf16 %v9410_v9  ;;  %v9278_v14 = vunpack.c.h.bf16 %v9410_v9 }
 0x99a   :  { %v9409_v59 = vld [vmem:[%s9908_s10 + $0x8] sm:$0xff]  }
 0x99b   :  { %4039 = vmatpush.bf16.msra.mxu2 %v7842_v12  ;;  %v9273_v51 = vunpack.c.l.bf16 %v9409_v59  ;;  %v9274_v38 = vunpack.c.h.bf16 %v9409_v59  ;;  %v9413_v59 = vld [vmem:[%s9908_s10 + $0x28] sm:$0xff]  }
 0x99c   :  { %3155 = vmatpush.bf16.msra.mxu0 %v8963_v43  ;;  %v7902_v43 = vor.u32 %v9028_v10, %v7899_v7  ;;  %v9411_v10 = vld [vmem:[%s9908_s10 + $0x18] sm:$0xff]  }
 0x99d   :  { %3237 = vmatpush.bf16.msra.mxu1 %v8971_v54  ;;  %4052 = vmatpush.bf16.msra.mxu3 %v7846_v19  ;;  %v9016_v54 = vld [vmem:[%s9946_s15 + $0x2c] sm:$0xf]  ;;  %v9281_v1 = vunpack.c.l.bf16 %v9411_v10 }
 0x99f   :  { %3156 = vmatmul.bf16.vlgmr.msra.gmra.mxu0 %v10921_v4  ;;  %4040 = vmatpush.bf16.msra.mxu2 %v7826_v57 }
 0x9a0   :  { %4059 = vmatpush.bf16.msrb.mxu0 %v7946_v0  ;;  %v7883_v0 = vld [vmem:[%s9946_s15 + $0x78] sm:$0xf0] }
 0x9a1   :  { %4072 = vmatpush.bf16.msrb.mxu1 %v7950_v5  ;;  %4053 = vmatpush.bf16.msra.mxu3 %v7830_v53  ;;  %v7886_v50 = vor.u32 %v9024_v55, %v7883_v0  ;;  %v7851_v5 = vld [vmem:[%s9946_s15 + $0x38] sm:$0xf0]  ;;  %v9412_v0 = vld [vmem:[%s9908_s10 + $0x20] sm:$0xff]  }
 0x9a2   :  { %v9285_v26 = vunpack.c.l.bf16 %v9412_v0 }
 0x9a4   :  { %4060 = vmatpush.bf16.msrb.mxu0 %v7930_v27  ;;  %v7854_v27 = vor.u32 %v9016_v54, %v7851_v5 }
 0x9a5   :  { %4073 = vmatpush.bf16.msrb.mxu1 %v7934_v24 }
 0x9a8   :  { %4061 = vmatpush.bf16.msrb.mxu0 %v7914_v30 }
 0x9a9   :  { %4074 = vmatpush.bf16.msrb.mxu1 %v7918_v20 }
 0x9ac   :  { %4062 = vmatpush.bf16.msrb.mxu0 %v7898_v39  ;;  %v3180_v39 = vperm.slane %v9962_v8, 0 }
 0x9ad   :  { %4075 = vmatpush.bf16.msrb.mxu1 %v7902_v43 }
 0x9b0   :  { %4063 = vmatpush.bf16.msrb.mxu0 %v7882_v18 }
 0x9b1   :  { %4076 = vmatpush.bf16.msrb.mxu1 %v7886_v50 }
 0x9b4   :  { %4064 = vmatpush.bf16.msrb.mxu0 %v7866_v22 }
 0x9b5   :  { %4077 = vmatpush.bf16.msrb.mxu1 %v7870_v62 }
 0x9b8   :  { %4065 = vmatpush.bf16.msrb.mxu0 %v7850_v47 }
 0x9b9   :  { %4078 = vmatpush.bf16.msrb.mxu1 %v7854_v27 }
 0x9bc   :  { %4066 = vmatpush.bf16.msrb.mxu0 %v7834_v16  ;;  %v10977_v16 = vperm.slane %v9970_v11, 0 }
 0x9bd   :  { %4079 = vmatpush.bf16.msrb.mxu1 %v7838_v2 }
 0xa1c   :  { %v3157_v45 = vpop.f32.mrf.mxu0 }
 0xa1d   :  { %v3158_v24 = vadd.f32 %v3157_v45, %v10301_v34 }
 0xa1f   :  { %v3161_v30 = vmax.f32 %v3158_v24, 0.0 }
 0xa21   :  { %v3162_v3 = vpack.c.bf16 %v3161_v30, %v3161_v30  ;;  %v9282_v30 = vunpack.c.h.bf16 %v9411_v10 }
 0xa23   :  { %3238 = vmatmul.bf16.vlgmr.msra.gmra.mxu1 %v3162_v3  ;;  %4041 = vmatmul.bf16.vlgmr.msra.gmra.mxu2 %v3162_v3 }
 0xa24   :  { %4054 = vmatmul.bf16.vlgmr.msra.gmra.mxu3 %v3162_v3  ;;  %4067 = vmatmul.bf16.vlgmr.msrb.gmra.mxu0 %v3162_v3  ;;  %v3159_v49 = vpop.f32.mrf.mxu0 }
 0xa33   :  { %4080 = vmatmul.bf16.vlgmr.msrb.gmra.mxu1 %v3162_v3 }
 0xaa0   :  { %v3239_v18 = vpop.f32.mrf.mxu1 }
 0xaa1   :  { %v10964_v40 = vadd.f32 %v3239_v18, %v3180_v39  ;;  %v10966_v22 = vpop.f32.mrf.mxu0 }
 0xaa3   :  { %v3283_v15 = vperm.slane %v10964_v40, 0  ;;  %v3261_v12 = vrot.slane %v10964_v40, 2  ;;  %v3260_v58 = vrot.slane %v10964_v40, 1  ;;  %v3262_v53 = vrot.slane %v10964_v40, 3 }
 0xaa4   :  { %v3263_v43 = vrot.slane %v10964_v40, 4  ;;  %v3264_v9 = vrot.slane %v10964_v40, 5 }
 0xaa5   :  { %v3299_v52 = vadd.f32 %v9269_v6, %v3283_v15  ;;  %v3285_v19 = vperm.slane %v3261_v12, 0  ;;  %v3284_v47 = vperm.slane %v3260_v58, 0  ;;  %v3300_v61 = vadd.f32 %v9270_v63, %v3283_v15 }
 0xaa6   :  { %v10971_v56 = vpop.f32.mrf.mxu2  ;;  %v3286_v46 = vperm.slane %v3262_v53, 0  ;;  %v3287_v29 = vperm.slane %v3263_v43, 0  ;;  %v3288_v58 = vperm.slane %v3264_v9, 0  ;;  %v9415_v53 = vld [vmem:[%s9908_s10 + $0x38] sm:$0xff]  }
 0xaa7   :  { %v10973_v20 = vpop.f32.mrf.mxu3  ;;  %9632 = vtanh.f32 %v3299_v52  ;;  %v3303_v60 = vadd.f32 %v9277_v37, %v3285_v19  ;;  %v3301_v32 = vadd.f32 %v9273_v51, %v3284_v47  ;;  %v3304_v7 = vadd.f32 %v9278_v14, %v3285_v19  ;;  %v9414_v14 = vld [vmem:[%s9908_s10 + $0x30] sm:$0xff]  }
 0xaa8   :  { %v3241_v57 = vpop.f32.mrf.mxu1  ;;  %v3302_v55 = vadd.f32 %v9274_v38, %v3284_v47  ;;  %v3305_v49 = vadd.f32 %v9281_v1, %v3286_v46  ;;  %v3307_v17 = vadd.f32 %v9285_v26, %v3287_v29  ;;  %v3306_v18 = vadd.f32 %v9282_v30, %v3286_v46 }
 0xaa9   :  { %v4070_v33 = vpop.f32.mrf.mxu0  ;;  %9634 = vtanh.f32 %v3303_v60  ;;  %v9286_v37 = vunpack.c.h.bf16 %v9412_v0  ;;  %v9290_v51 = vunpack.c.h.bf16 %v9413_v59  ;;  %v9289_v47 = vunpack.c.l.bf16 %v9413_v59 }
 0xaaa   :  { %9636 = vtanh.f32 %v3301_v32  ;;  %v3265_v32 = vrot.slane %v10964_v40, 6  ;;  %v3266_v33 = vrot.slane %v10964_v40, 7 }
 0xaab   :  { %9638 = vtanh.f32 %v3300_v61  ;;  %v3308_v60 = vadd.f32 %v9286_v37, %v3287_v29  ;;  %v3310_v38 = vadd.f32 %v9290_v51, %v3288_v58  ;;  %v3309_v61 = vadd.f32 %v9289_v47, %v3288_v58 }
 0xaac   :  { %9640 = vtanh.f32 %v3304_v7  ;;  %v9293_v7 = vunpack.c.l.bf16 %v9414_v14  ;;  %v3289_v43 = vperm.slane %v3265_v32, 0  ;;  %v3290_v1 = vperm.slane %v3266_v33, 0 }
 0xaad   :  { %v9633_v50 = vpop.eup %9632  ;;  %9642 = vtanh.f32 %v3302_v55 }
 0xaae   :  { %v4044_v62 = vpop.f32.mrf.mxu2  ;;  %v3334_v54 = vmul.f32 %v9633_v50, %v10977_v16  ;;  %9644 = vtanh.f32 %v3305_v49  ;;  %v9297_v50 = vunpack.c.l.bf16 %v9415_v53  ;;  %v3311_v40 = vadd.f32 %v9293_v7, %v3289_v43 }
 0xaaf   :  { %v9635_v5 = vpop.eup %9634  ;;  %v4057_v27 = vpop.f32.mrf.mxu3  ;;  %9646 = vtanh.f32 %v3307_v17  ;;  %v9294_v62 = vunpack.c.h.bf16 %v9414_v14 }
 0xab0   :  { %v9637_v2 = vpop.eup %9636  ;;  %v10983_v45 = vpop.f32.mrf.mxu1  ;;  %3350 = vadd.xlane.f32.xlu0 %v3334_v54  ;;  %v3338_v24 = vmul.f32 %v9635_v5, %v10977_v16  ;;  %9648 = vtanh.f32 %v3306_v18  ;;  %v3313_v27 = vadd.f32 %v9297_v50, %v3290_v1 }
 0xab1   :  { %v3336_v3 = vmul.f32 %v9637_v2, %v10977_v16  ;;  %v9639_v39 = vpop.eup %9638  ;;  %9650 = vtanh.f32 %v3308_v60  ;;  %v3312_v26 = vadd.f32 %v9294_v62, %v3289_v43  ;;  %v9298_v2 = vunpack.c.h.bf16 %v9415_v53 }
 0xab2   :  { %3358 = vadd.xlane.f32.xlu2 %v3338_v24  ;;  %v9641_v6 = vpop.eup %9640  ;;  %v3335_v12 = vmul.f32 %v9639_v39, %v10977_v16  ;;  %9652 = vtanh.f32 %v3310_v38 }
 0xab3   :  { %3354 = vadd.xlane.f32.xlu1 %v3336_v3  ;;  %v9643_v15 = vpop.eup %9642  ;;  %v3339_v19 = vmul.f32 %v9641_v6, %v10977_v16  ;;  %9654 = vtanh.f32 %v3309_v61  ;;  %v3314_v39 = vadd.f32 %v9298_v2, %v3290_v1 }
 0xab4   :  { %v3337_v63 = vmul.f32 %v9643_v15, %v10977_v16  ;;  %v9645_v57 = vpop.eup %9644  ;;  %9656 = vtanh.f32 %v3311_v40 }
 0xab5   :  { %v9647_v10 = vpop.eup %9646  ;;  %v3340_v0 = vmul.f32 %v9645_v57, %v10977_v16  ;;  %9658 = vtanh.f32 %v3313_v27 }
 0xab6   :  { %v9649_v55 = vpop.eup %9648  ;;  %v3342_v46 = vmul.f32 %v9647_v10, %v10977_v16  ;;  %9660 = vtanh.f32 %v3312_v26 }
 0xab7   :  { %v3341_v54 = vmul.f32 %v9649_v55, %v10977_v16  ;;  %v9651_v5 = vpop.eup %9650  ;;  %9662 = vtanh.f32 %v3314_v39 }
 0xab8   :  { %v4083_v52 = vpop.f32.mrf.mxu1  ;;  %3352 = vadd.xlane.f32.xlu0 %v3335_v12  ;;  %v9653_v29 = vpop.eup %9652  ;;  %v3343_v30 = vmul.f32 %v9651_v5, %v10977_v16 }
 0xab9   :  { %v9655_v24 = vpop.eup %9654  ;;  %v3345_v3 = vmul.f32 %v9653_v29, %v10977_v16  ;;  %v11007_v52 = vperm.slane %v10019_v44, 0 }
 0xaba   :  { %3360 = vadd.xlane.f32.xlu2 %v3339_v19  ;;  %v3344_v49 = vmul.f32 %v9655_v24, %v10977_v16  ;;  %v9657_v17 = vpop.eup %9656 }
 0xabb   :  { %3356 = vadd.xlane.f32.xlu1 %v3337_v63  ;;  %v9659_v9 = vpop.eup %9658  ;;  %v3346_v59 = vmul.f32 %v9657_v17, %v10977_v16 }
 0xabc   :  { %v9661_v18 = vpop.eup %9660  ;;  %v3348_v6 = vmul.f32 %v9659_v9, %v10977_v16 }
 0xabd   :  { %v3347_v37 = vmul.f32 %v9661_v18, %v10977_v16  ;;  %v9663_v15 = vpop.eup %9662 }
 0xabe   :  { %v3349_v12 = vmul.f32 %v9663_v15, %v10977_v16 }
 0xac0   :  { %3362 = vadd.xlane.f32.xlu0 %v3340_v0 }
 0xac2   :  { %3366 = vadd.xlane.f32.xlu2 %v3342_v46 }
 0xac3   :  { %3364 = vadd.xlane.f32.xlu1 %v3341_v54 }
 0xac8   :  { %3368 = vadd.xlane.f32.xlu0 %v3343_v30 }
 0xaca   :  { %3372 = vadd.xlane.f32.xlu2 %v3345_v3 }
 0xacb   :  { %3370 = vadd.xlane.f32.xlu1 %v3344_v49 }
 0xad0   :  { %3374 = vadd.xlane.f32.xlu0 %v3346_v59 }
 0xad2   :  { %3378 = vadd.xlane.f32.xlu2 %v3348_v6 }
 0xad3   :  { %3376 = vadd.xlane.f32.xlu1 %v3347_v37 }
 0xad8   :  { %3380 = vadd.xlane.f32.xlu0 %v3349_v12 }
 0xb23   :  { %v3351_v51 = vpop.xlane.xlu0 %3350 }
 0xb24   :  { %v3385_v47 = vadd.f32 %v11007_v52, %v3351_v51 }
 0xb25   :  { %v3359_v58 = vpop.xlane.xlu2 %3358 }
 0xb26   :  { %v3355_v19 = vpop.xlane.xlu1 %3354  ;;  %v11011_v60 = vadd.f32 %v11007_v52, %v3359_v58  ;;  %v3401_v16 = vsel %vm1139_vm2, %v3385_v47, -inf }
 0xb27   :  { %v11015_v14 = vadd.f32 %v11007_v52, %v3355_v19 }
 0xb28   :  { %v3419_v7 = vsel %vm1139_vm2, %v11011_v60, -inf }
 0xb29   :  { %v3410_v55 = vsel %vm1139_vm2, %v11015_v14, -inf }
 0xb2b   :  { %v3353_v63 = vpop.xlane.xlu0 %3352 }
 0xb2c   :  { %v3386_v32 = vadd.f32 %v11007_v52, %v3353_v63 }
 0xb2d   :  { %v3361_v57 = vpop.xlane.xlu2 %3360 }
 0xb2e   :  { %v3402_v38 = vsel %vm1139_vm2, %v3386_v32, -inf  ;;  %v3390_v33 = vadd.f32 %v11007_v52, %v3361_v57  ;;  %v3357_v61 = vpop.xlane.xlu1 %3356 }
 0xb2f   :  { %v3403_v53 = vmax.f32 %v3401_v16, %v3402_v38  ;;  %v3388_v10 = vadd.f32 %v11007_v52, %v3357_v61 }
 0xb30   :  { %v3420_v43 = vsel %vm1139_vm2, %v3390_v33, -inf }
 0xb31   :  { %v3404_v0 = vrot.slane %v3403_v53, 4  ;;  %v3421_v50 = vmax.f32 %v3419_v7, %v3420_v43  ;;  %v3411_v1 = vsel %vm1139_vm2, %v3388_v10, -inf }
 0xb32   :  { %v3412_v46 = vmax.f32 %v3410_v55, %v3411_v1 }
 0xb33   :  { %v3405_v62 = vmax.f32 %v3403_v53, %v3404_v0  ;;  %v3422_v54 = vrot.slane %v3421_v50, 4  ;;  %v3363_v40 = vpop.xlane.xlu0 %3362 }
 0xb34   :  { %v3413_v5 = vrot.slane %v3412_v46, 4  ;;  %v11028_v27 = vadd.f32 %v11007_v52, %v3363_v40 }
 0xb35   :  { %v3406_v26 = vrot.slane %v3405_v62, 2  ;;  %v3423_v29 = vmax.f32 %v3421_v50, %v3422_v54  ;;  %v3367_v2 = vpop.xlane.xlu2 %3366 }
 0xb36   :  { %v3414_v24 = vmax.f32 %v3412_v46, %v3413_v5  ;;  %v3365_v30 = vpop.xlane.xlu1 %3364  ;;  %v3428_v9 = vsel %vm1139_vm2, %v11028_v27, -inf  ;;  %v11036_v6 = vadd.f32 %v11007_v52, %v3367_v2 }
 0xb37   :  { %v3407_v3 = vmax.f32 %v3405_v62, %v3406_v26  ;;  %v3424_v49 = vrot.slane %v3423_v29, 2  ;;  %v11031_v39 = vadd.f32 %v11007_v52, %v3365_v30 }
 0xb38   :  { %v3415_v17 = vrot.slane %v3414_v24, 2  ;;  %v3437_v7 = vsel %vm1139_vm2, %v11036_v6, -inf }
 0xb39   :  { %v3408_v18 = vrot.slane %v3407_v3, 1  ;;  %v3425_v59 = vmax.f32 %v3423_v29, %v3424_v49  ;;  %v3429_v37 = vsel %vm1139_vm2, %v11031_v39, -inf }
 0xb3a   :  { %v3416_v15 = vmax.f32 %v3414_v24, %v3415_v17  ;;  %v3430_v12 = vmax.f32 %v3428_v9, %v3429_v37 }
 0xb3b   :  { %v3409_v51 = vmax.f32 %v3407_v3, %v3408_v18  ;;  %v3426_v58 = vrot.slane %v3425_v59, 1  ;;  %v3369_v19 = vpop.xlane.xlu0 %3368 }
 0xb3c   :  { %v3417_v63 = vrot.slane %v3416_v15, 1  ;;  %v3431_v57 = vrot.slane %v3430_v12, 4  ;;  %v11041_v16 = vadd.f32 %v11007_v52, %v3369_v19 }
 0xb3d   :  { %v3473_v38 = vsub.f32 %v3385_v47, %v3409_v51  ;;  %v3474_v61 = vsub.f32 %v3386_v32, %v3409_v51  ;;  %v3427_v53 = vmax.f32 %v3425_v59, %v3426_v58  ;;  %v3373_v43 = vpop.xlane.xlu2 %3372 }
 0xb3e   :  { %v3418_v55 = vmax.f32 %v3416_v15, %v3417_v63  ;;  %v3432_v0 = vmax.f32 %v3430_v12, %v3431_v57  ;;  %v3438_v50 = vsel %vm1139_vm2, %v11041_v16, -inf  ;;  %v11048_v1 = vadd.f32 %v11007_v52, %v3373_v43  ;;  %v3371_v46 = vpop.xlane.xlu1 %3370 }
 0xb3f   :  { %v3489_v62 = vmul.f32 1.442695, %v3473_v38  ;;  %v3491_v54 = vmul.f32 1.442695, %v3474_v61  ;;  %v3477_v40 = vsub.f32 %v11011_v60, %v3427_v53  ;;  %v3478_v47 = vsub.f32 %v3390_v33, %v3427_v53 }
 0xb40   :  { %v3475_v32 = vsub.f32 %v11015_v14, %v3418_v55  ;;  %v3476_v5 = vsub.f32 %v3388_v10, %v3418_v55  ;;  %v3433_v26 = vrot.slane %v3432_v0, 2  ;;  %v3439_v29 = vmax.f32 %v3437_v7, %v3438_v50 }
 0xb41   :  { %9664 = vpow2.f32 %v3489_v62  ;;  %v3497_v2 = vmul.f32 1.442695, %v3477_v40  ;;  %v3499_v24 = vmul.f32 1.442695, %v3478_v47  ;;  %v3447_v9 = vsel %vm1139_vm2, %v11048_v1, -inf }
 0xb42   :  { %9666 = vpow2.f32 %v3491_v54  ;;  %v3493_v30 = vmul.f32 1.442695, %v3475_v32  ;;  %v3495_v3 = vmul.f32 1.442695, %v3476_v5  ;;  %v3434_v49 = vmax.f32 %v3432_v0, %v3433_v26 }
 0xb43   :  { %9668 = vpow2.f32 %v3497_v2  ;;  %v3440_v17 = vrot.slane %v3439_v29, 4  ;;  %v11055_v60 = vadd.f32 %v11007_v52, %v3371_v46  ;;  %v3375_v33 = vpop.xlane.xlu0 %3374 }
 0xb44   :  { %9670 = vpow2.f32 %v3499_v24  ;;  %v3435_v14 = vrot.slane %v3434_v49, 1  ;;  %v11058_v10 = vadd.f32 %v11007_v52, %v3375_v33 }
 0xb45   :  { %9672 = vpow2.f32 %v3493_v30  ;;  %v3441_v18 = vmax.f32 %v3439_v29, %v3440_v17  ;;  %v3446_v59 = vsel %vm1139_vm2, %v11055_v60, -inf  ;;  %v3379_v37 = vpop.xlane.xlu2 %3378 }
 0xb46   :  { %9674 = vpow2.f32 %v3495_v3  ;;  %v3436_v15 = vmax.f32 %v3434_v49, %v3435_v14  ;;  %v3448_v12 = vmax.f32 %v3446_v59, %v3447_v9  ;;  %v3377_v51 = vpop.xlane.xlu1 %3376  ;;  %v3455_v63 = vsel %vm1139_vm2, %v11058_v10, -inf }
 0xb47   :  { %v11062_v58 = vpop.eup %9664  ;;  %v3442_v19 = vrot.slane %v3441_v18, 2  ;;  %v11067_v57 = vadd.f32 %v11007_v52, %v3379_v37  ;;  %v11070_v38 = vadd.f32 %v11007_v52, %v3377_v51 }
 0xb48   :  { %v11072_v61 = vpop.eup %9666  ;;  %v3521_v53 = vsel %vm1139_vm2, %v11062_v58, 0.0  ;;  %v3479_v7 = vsub.f32 %v11028_v27, %v3436_v15  ;;  %v3480_v43 = vsub.f32 %v11031_v39, %v3436_v15  ;;  %v3449_v55 = vrot.slane %v3448_v12, 4 }
 0xb49   :  { %v11078_v0 = vpop.eup %9668  ;;  %v3522_v50 = vsel %vm1139_vm2, %v11072_v61, 0.0  ;;  %v3443_v46 = vmax.f32 %v3441_v18, %v3442_v19  ;;  %v3464_v62 = vsel %vm1139_vm2, %v11067_v57, -inf  ;;  %v3456_v54 = vsel %vm1139_vm2, %v11070_v38, -inf }
 0xb4a   :  { %v11086_v40 = vpop.eup %9670  ;;  %v3523_v47 = vadd.f32 %v3522_v50, %v3521_v53  ;;  %v3539_v27 = vsel %vm1139_vm2, %v11078_v0, 0.0  ;;  %v3501_v39 = vmul.f32 1.442695, %v3479_v7  ;;  %v3503_v32 = vmul.f32 1.442695, %v3480_v43 }
 0xb4b   :  { %v11090_v5 = vpop.eup %9672  ;;  %v3540_v26 = vsel %vm1139_vm2, %v11086_v40, 0.0  ;;  %v3444_v29 = vrot.slane %v3443_v46, 1  ;;  %v3450_v2 = vmax.f32 %v3448_v12, %v3449_v55  ;;  %v3457_v24 = vmax.f32 %v3455_v63, %v3456_v54  ;;  %v3381_v9 = vpop.xlane.xlu0 %3380 }
 0xb4c   :  { %v11094_v30 = vpop.eup %9674  ;;  %v3524_v3 = vrot.slane %v3523_v47, 4  ;;  %v3541_v49 = vadd.f32 %v3540_v26, %v3539_v27  ;;  %v3530_v17 = vsel %vm1139_vm2, %v11090_v5, 0.0  ;;  %9676 = vpow2.f32 %v3501_v39 }
 0xb4d   :  { %v3531_v33 = vsel %vm1139_vm2, %v11094_v30, 0.0  ;;  %9678 = vpow2.f32 %v3503_v32  ;;  %v3445_v14 = vmax.f32 %v3443_v46, %v3444_v29  ;;  %v3451_v18 = vrot.slane %v3450_v2, 2 }
 0xb4e   :  { %v3525_v59 = vadd.f32 %v3524_v3, %v3523_v47  ;;  %v3542_v37 = vrot.slane %v3541_v49, 4  ;;  %v3532_v15 = vadd.f32 %v3531_v33, %v3530_v17  ;;  %v3458_v12 = vrot.slane %v3457_v24, 4 }
 0xb4f   :  { %v3481_v51 = vsub.f32 %v11036_v6, %v3445_v14  ;;  %v3482_v19 = vsub.f32 %v11041_v16, %v3445_v14  ;;  %v3452_v63 = vmax.f32 %v3450_v2, %v3451_v18  ;;  %v11103_v53 = vadd.f32 %v11007_v52, %v3381_v9 }
 0xb50   :  { %v3543_v7 = vadd.f32 %v3542_v37, %v3541_v49  ;;  %v3533_v43 = vrot.slane %v3532_v15, 4  ;;  %v3459_v55 = vmax.f32 %v3457_v24, %v3458_v12  ;;  %v9891_v47 = vmov 0  }
 0xb51   :  { %v3505_v50 = vmul.f32 1.442695, %v3481_v51  ;;  %v3507_v54 = vmul.f32 1.442695, %v3482_v19  ;;  %v3453_v27 = vrot.slane %v3452_v63, 1  ;;  %v3465_v46 = vsel %vm1139_vm2, %v11103_v53, -inf  ;;  %9630 = vset.pattern.permute.xlu2 %v9891_v47  ;;  %9629 = vset.pattern.permute.xlu1 %v9891_v47 }
 0xb52   :  { %v11107_v39 = vpop.eup %9676  ;;  %v3534_v6 = vadd.f32 %v3533_v43, %v3532_v15  ;;  %v3460_v16 = vrot.slane %v3459_v55, 2  ;;  %v3466_v32 = vmax.f32 %v3464_v62, %v3465_v46  ;;  %v3526_v26 = vrot.slane %v3525_v59, 2  ;;  %9631 = vset.pattern.permute.xlu0 %v9891_v47 }
 0xb53   :  { %v11109_v52 = vpop.eup %9678  ;;  %v3548_v29 = vsel %vm1139_vm2, %v11107_v39, 0.0  ;;  %9680 = vpow2.f32 %v3505_v50  ;;  %v3454_v2 = vmax.f32 %v3452_v63, %v3453_v27  ;;  %v3544_v24 = vrot.slane %v3543_v7, 2 }
 0xb54   :  { %v3549_v3 = vsel %vm1139_vm2, %v11109_v52, 0.0  ;;  %9682 = vpow2.f32 %v3507_v54  ;;  %v3461_v49 = vmax.f32 %v3459_v55, %v3460_v16  ;;  %v3467_v17 = vrot.slane %v3466_v32, 4 }
 0xb55   :  { %v3550_v9 = vadd.f32 %v3549_v3, %v3548_v29  ;;  %v3483_v33 = vsub.f32 %v11055_v60, %v3454_v2  ;;  %v3484_v62 = vsub.f32 %v11048_v1, %v3454_v2  ;;  %v3527_v14 = vadd.f32 %v3526_v26, %v3525_v59 }
 0xb56   :  { %v3462_v18 = vrot.slane %v3461_v49, 1  ;;  %v3468_v37 = vmax.f32 %v3466_v32, %v3467_v17  ;;  %v3535_v15 = vrot.slane %v3534_v6, 2  ;;  %v3545_v12 = vadd.f32 %v3544_v24, %v3543_v7 }
 0xb57   :  { %v3551_v51 = vrot.slane %v3550_v9, 4  ;;  %v3509_v19 = vmul.f32 1.442695, %v3483_v33  ;;  %v3511_v63 = vmul.f32 1.442695, %v3484_v62  ;;  %v3528_v43 = vrot.slane %v3527_v14, 1 }
 0xb58   :  { %v3463_v50 = vmax.f32 %v3461_v49, %v3462_v18  ;;  %v3469_v27 = vrot.slane %v3468_v37, 2  ;;  %v3536_v46 = vadd.f32 %v3535_v15, %v3534_v6  ;;  %v3546_v60 = vrot.slane %v3545_v12, 1 }
 0xb59   :  { %v11117_v54 = vpop.eup %9680  ;;  %v3552_v55 = vadd.f32 %v3551_v51, %v3550_v9  ;;  %9684 = vpow2.f32 %v3509_v19  ;;  %v3529_v47 = vadd.f32 %v3528_v43, %v3527_v14 }
 0xb5a   :  { %v11119_v16 = vpop.eup %9682  ;;  %v3557_v1 = vsel %vm1139_vm2, %v11117_v54, 0.0  ;;  %9686 = vpow2.f32 %v3511_v63  ;;  %v3485_v59 = vsub.f32 %v11058_v10, %v3463_v50  ;;  %v3486_v7 = vsub.f32 %v11070_v38, %v3463_v50 }
 0xb5b   :  { %v3558_v32 = vsel %vm1139_vm2, %v11119_v16, 0.0  ;;  %v3470_v6 = vmax.f32 %v3468_v37, %v3469_v27  ;;  %9688 = vrcp.f32 %v3529_v47  ;;  %v3537_v26 = vrot.slane %v3536_v46, 1 }
 0xb5c   :  { %v3559_v29 = vadd.f32 %v3558_v32, %v3557_v1  ;;  %v3513_v2 = vmul.f32 1.442695, %v3485_v59  ;;  %v3515_v24 = vmul.f32 1.442695, %v3486_v7  ;;  %v3547_v17 = vadd.f32 %v3546_v60, %v3545_v12 }
 0xb5d   :  { %v3471_v3 = vrot.slane %v3470_v6, 1  ;;  %v3538_v49 = vadd.f32 %v3537_v26, %v3536_v46  ;;  %v3553_v9 = vrot.slane %v3552_v55, 2 }
 0xb5e   :  { %v3560_v33 = vrot.slane %v3559_v29, 4  ;;  %9690 = vpow2.f32 %v3513_v2 }
 0xb5f   :  { %v11127_v62 = vpop.eup %9684  ;;  %9692 = vpow2.f32 %v3515_v24  ;;  %v3472_v10 = vmax.f32 %v3470_v6, %v3471_v3  ;;  %v3554_v38 = vadd.f32 %v3553_v9, %v3552_v55 }
 0xb60   :  { %v11129_v14 = vpop.eup %9686  ;;  %v3561_v18 = vadd.f32 %v3560_v33, %v3559_v29  ;;  %v3566_v37 = vsel %vm1139_vm2, %v11127_v62, 0.0  ;;  %9694 = vrcp.f32 %v3538_v49 }
 0xb61   :  { %v9689_v15 = vpop.eup %9688  ;;  %v3567_v51 = vsel %vm1139_vm2, %v11129_v14, 0.0  ;;  %v3487_v12 = vsub.f32 %v11067_v57, %v3472_v10  ;;  %v3488_v19 = vsub.f32 %v11103_v53, %v3472_v10  ;;  %9696 = vrcp.f32 %v3547_v17 }
 0xb62   :  { %v3568_v63 = vadd.f32 %v3567_v51, %v3566_v37  ;;  %v3602_v43 = vmul.f32 %v9689_v15, %v11072_v61  ;;  %v3601_v50 = vmul.f32 %v9689_v15, %v11062_v58  ;;  %v3562_v27 = vrot.slane %v3561_v18, 2 }
 0xb63   :  { %v3517_v46 = vmul.f32 1.442695, %v3487_v12  ;;  %v3519_v55 = vmul.f32 1.442695, %v3488_v19  ;;  %v3555_v47 = vrot.slane %v3554_v38, 1 }
 0xb64   :  { %v9691_v60 = vpop.eup %9690  ;;  %v3569_v1 = vrot.slane %v3568_v63, 4  ;;  %3656 = vperm.xlu2 %9630, %v3602_v43   ;;  %3651 = vperm.xlu1 %9629, %v3601_v50   ;;  %v3563_v59 = vadd.f32 %v3562_v27, %v3561_v18 }
 0xb65   :  { %v11139_v7 = vpop.eup %9692  ;;  %v3575_v57 = vsel %vm1139_vm2, %v9691_v60, 0.0  ;;  %9698 = vpow2.f32 %v3517_v46  ;;  %v3556_v53 = vadd.f32 %v3555_v47, %v3554_v38 }
 0xb66   :  { %v9695_v32 = vpop.eup %9694  ;;  %v3570_v6 = vadd.f32 %v3569_v1, %v3568_v63  ;;  %v3576_v58 = vsel %vm1139_vm2, %v11139_v7, 0.0  ;;  %9700 = vpow2.f32 %v3519_v55  ;;  %v3564_v61 = vrot.slane %v3563_v59, 1 }
 0xb67   :  { %v9697_v26 = vpop.eup %9696  ;;  %v3577_v29 = vadd.f32 %v3576_v58, %v3575_v57  ;;  %v3603_v2 = vmul.f32 %v9695_v32, %v11090_v5  ;;  %9702 = vrcp.f32 %v3556_v53  ;;  %v3604_v9 = vmul.f32 %v9695_v32, %v11094_v30 }
 0xb68   :  { %v3565_v24 = vadd.f32 %v3564_v61, %v3563_v59  ;;  %v3571_v49 = vrot.slane %v3570_v6, 2  ;;  %v3605_v17 = vmul.f32 %v9697_v26, %v11078_v0  ;;  %v3606_v46 = vmul.f32 %v9697_v26, %v11086_v40 }
 0xb69   :  { %v3578_v3 = vrot.slane %v3577_v29, 4  ;;  %3661 = vperm.xlu0 %9631, %v3603_v2  }
 0xb6a   :  { %9704 = vrcp.f32 %v3565_v24  ;;  %v3572_v15 = vadd.f32 %v3571_v49, %v3570_v6 }
 0xb6b   :  { %v9699_v33 = vpop.eup %9698  ;;  %v3579_v10 = vadd.f32 %v3578_v3, %v3577_v29  ;;  %v9009_v3 = vld [vmem:[%s9939_s9 + $0xec] sm:$0xf0] }
 0xb6c   :  { %v9701_v38 = vpop.eup %9700  ;;  %v3584_v18 = vsel %vm1139_vm2, %v9699_v33, 0.0  ;;  %3671 = vperm.xlu1 %9629, %v3605_v17   ;;  %3666 = vperm.xlu2 %9630, %v3604_v9   ;;  %v3573_v50 = vrot.slane %v3572_v15, 1  ;;  %v9007_v17 = vld [vmem:[%s9939_s9 + $0xe4] sm:$0xf]  ;;  %v8067_v9 = vld [vmem:[%s9939_s9 + $0xf0] sm:$0xf0] }
 0xb6d   :  { %v3585_v37 = vsel %vm1139_vm2, %v9701_v38, 0.0  ;;  %v3580_v5 = vrot.slane %v3579_v10, 2  ;;  %v9703_v12 = vpop.eup %9702 }
 0xb6e   :  { %v3586_v51 = vadd.f32 %v3585_v37, %v3584_v18  ;;  %v3607_v55 = vmul.f32 %v9703_v12, %v11107_v39  ;;  %v3574_v59 = vadd.f32 %v3573_v50, %v3572_v15  ;;  %v3608_v32 = vmul.f32 %v9703_v12, %v11109_v52  ;;  %v8075_v18 = vld [vmem:[%s9939_s9 + $0xf8] sm:$0xf0]  ;;  %v9300_v37 = vld [vmem:[%s9903_s6] sm:$0xff]   ;;  %v8057_v50 = vld [vmem:[%s9939_s9 + $0xc8] sm:$0xf] }
 0xb6f   :  { %v3581_v19 = vadd.f32 %v3580_v5, %v3579_v10  ;;  %v8070_v10 = vor.u32 %v9007_v17, %v8067_v9  ;;  %v9416_v5 = vld [vmem:[%s9903_s6 + $0x8] sm:$0xff]   ;;  %v9301_v12 = vunpack.c.l.bf16 %v9300_v37  ;;  %v8043_v9 = vld [vmem:[%s9939_s9 + $0xb8] sm:$0xf0] }
 0xb70   :  { %v9705_v63 = vpop.eup %9704  ;;  %v3587_v43 = vrot.slane %v3586_v51, 4  ;;  %v9000_v17 = vld [vmem:[%s9939_s9 + $0xac] sm:$0xf] }
 0xb71   :  { %v3610_v0 = vmul.f32 %v9705_v63, %v11119_v16  ;;  %v3582_v30 = vrot.slane %v3581_v19, 1  ;;  %v3609_v16 = vmul.f32 %v9705_v63, %v11117_v54  ;;  %4290 = vmatpush.bf16.msrb.mxu3 %v8070_v10  ;;  %v9005_v63 = vld [vmem:[%s9939_s9 + $0xcc] sm:$0xf0] }
 0xb72   :  { %v3588_v27 = vadd.f32 %v3587_v43, %v3586_v51  ;;  %v9003_v43 = vld [vmem:[%s9939_s9 + $0xc4] sm:$0xf] }
 0xb73   :  { %3696 = vperm.xlu0 %9631, %v3610_v0   ;;  %v3583_v47 = vadd.f32 %v3582_v30, %v3581_v19  ;;  %v8049_v19 = vld [vmem:[%s9939_s9 + $0xc0] sm:$0xf]  ;;  %v8051_v30 = vld [vmem:[%s9939_s9 + $0xd0] sm:$0xf0] }
 0xb74   :  { %3676 = vperm.xlu2 %9630, %v3606_v46   ;;  %3681 = vperm.xlu1 %9629, %v3607_v55   ;;  %v3589_v1 = vrot.slane %v3588_v27, 2  ;;  %v8050_v0 = vor.u32 %v9005_v63, %v8049_v19  ;;  %v9302_v46 = vunpack.c.h.bf16 %v9300_v37  ;;  %v8019_v19 = vld [vmem:[%s9939_s9 + $0x90] sm:$0xf0]  ;;  %v8025_v63 = vld [vmem:[%s9939_s9 + $0x88] sm:$0xf] }
 0xb75   :  { %9706 = vrcp.f32 %v3583_v47  ;;  %v8054_v47 = vor.u32 %v9003_v43, %v8051_v30  ;;  %v8998_v43 = vld [vmem:[%s9939_s9 + $0x94] sm:$0xf0] }
 0xb76   :  { %v3590_v57 = vadd.f32 %v3589_v1, %v3588_v27  ;;  %9708 = vrcp.f32 %v3574_v59  ;;  %v9006_v27 = vld [vmem:[%s9939_s9 + $0xd4] sm:$0xf0]  ;;  %v9004_v59 = vld [vmem:[%s9939_s9 + $0xcc] sm:$0xf] }
 0xb77   :  { %v8058_v1 = vor.u32 %v9006_v27, %v8057_v50  ;;  %4291 = vmatpush.bf16.msrb.mxu3 %v8054_v47  ;;  %v8026_v50 = vor.u32 %v8998_v43, %v8025_v63  ;;  %v8996_v27 = vld [vmem:[%s9939_s9 + $0x8c] sm:$0xf] }
 0xb78   :  { %v3591_v53 = vrot.slane %v3590_v57, 1 }
 0xb7a   :  { %v3592_v6 = vadd.f32 %v3591_v53, %v3590_v57  ;;  %v8059_v57 = vld [vmem:[%s9939_s9 + $0xd8] sm:$0xf0] }
 0xb7b   :  { %v9707_v58 = vpop.eup %9706  ;;  %v8062_v53 = vor.u32 %v9004_v59, %v8059_v57 }
 0xb7c   :  { %3686 = vperm.xlu2 %9630, %v3608_v32   ;;  %3691 = vperm.xlu1 %9629, %v3609_v16   ;;  %v3613_v40 = vmul.f32 %v9707_v58, %v9691_v60  ;;  %9710 = vrcp.f32 %v3592_v6  ;;  %v9709_v39 = vpop.eup %9708  ;;  %v3614_v60 = vmul.f32 %v9707_v58, %v11139_v7  ;;  %v9008_v7 = vld [vmem:[%s9939_s9 + $0xec] sm:$0xf]  ;;  %v9306_v32 = vunpack.c.h.bf16 %v9416_v5  ;;  %v8033_v58 = vld [vmem:[%s9939_s9 + $0xa0] sm:$0xf] }
 0xb7d   :  { %v3612_v26 = vmul.f32 %v9709_v39, %v11129_v14  ;;  %v3611_v29 = vmul.f32 %v9709_v39, %v11127_v62  ;;  %v8065_v62 = vld [vmem:[%s9939_s9 + $0xe0] sm:$0xf]  ;;  %v8078_v51 = vor.u32 %v9008_v7, %v8075_v18  ;;  %v9305_v6 = vunpack.c.l.bf16 %v9416_v5  ;;  %v8999_v39 = vld [vmem:[%s9939_s9 + $0xa4] sm:$0xf]  ;;  %v8997_v5 = vld [vmem:[%s9939_s9 + $0x8c] sm:$0xf0] }
 0xb7e   :  { %3711 = vperm.xlu0 %9631, %v3613_v40   ;;  %v8066_v49 = vor.u32 %v9009_v3, %v8065_v62  ;;  %v9001_v40 = vld [vmem:[%s9939_s9 + $0xac] sm:$0xf0] }
 0xb7f   :  { %4316 = vmatpush.bf16.msra.mxu1 %v8078_v51 }
 0xb80   :  { %4277 = vmatpush.bf16.msrb.mxu2 %v8066_v49 }
 0xb82   :  { %v9711_v61 = vpop.eup %9710 }
 0xb83   :  { %v3616_v52 = vmul.f32 %v9711_v61, %v9701_v38  ;;  %v3615_v54 = vmul.f32 %v9711_v61, %v9699_v33  ;;  %v8073_v33 = vld [vmem:[%s9939_s9 + $0xe8] sm:$0xf]  ;;  %v9010_v38 = vld [vmem:[%s9939_s9 + $0xf4] sm:$0xf0]  ;;  %4317 = vmatpush.bf16.msra.mxu1 %v8062_v53  ;;  %v8034_v61 = vor.u32 %v9001_v40, %v8033_v58  ;;  %v8001_v53 = vld [vmem:[%s9939_s9 + $0x60] sm:$0xf] }
 0xb84   :  { %3706 = vperm.xlu1 %9629, %v3612_v26   ;;  %3701 = vperm.xlu2 %9630, %v3611_v29   ;;  %v8074_v15 = vor.u32 %v9010_v38, %v8073_v33  ;;  %v8035_v26 = vld [vmem:[%s9939_s9 + $0xb0] sm:$0xf0]  ;;  %v8041_v29 = vld [vmem:[%s9939_s9 + $0xa8] sm:$0xf]  ;;  %v8046_v38 = vor.u32 %v9000_v17, %v8043_v9  ;;  %v8991_v58 = vld [vmem:[%s9939_s9 + $0x64] sm:$0xf] }
 0xb85   :  { %4278 = vmatpush.bf16.msrb.mxu2 %v8050_v0  ;;  %v8038_v3 = vor.u32 %v8999_v39, %v8035_v26  ;;  %v8003_v40 = vld [vmem:[%s9939_s9 + $0x70] sm:$0xf0]  ;;  %v8009_v39 = vld [vmem:[%s9939_s9 + $0x68] sm:$0xf] }
 0xb86   :  { %3726 = vperm.xlu0 %9631, %v3616_v52   ;;  %4303 = vmatpush.bf16.msra.mxu0 %v8074_v15  ;;  %v9002_v52 = vld [vmem:[%s9939_s9 + $0xb4] sm:$0xf0]  ;;  %v8995_v15 = vld [vmem:[%s9939_s9 + $0x84] sm:$0xf]  ;;  %v8006_v26 = vor.u32 %v8991_v58, %v8003_v40 }
 0xb87   :  { %v8042_v49 = vor.u32 %v9002_v52, %v8041_v29  ;;  %4292 = vmatpush.bf16.msrb.mxu3 %v8038_v3  ;;  %4318 = vmatpush.bf16.msra.mxu1 %v8046_v38  ;;  %v8022_v30 = vor.u32 %v8995_v15, %v8019_v19  ;;  %v8994_v29 = vld [vmem:[%s9939_s9 + $0x74] sm:$0xf0]  ;;  %v8992_v52 = vld [vmem:[%s9939_s9 + $0x6c] sm:$0xf]  ;;  %v8989_v38 = vld [vmem:[%s9939_s9 + $0x4c] sm:$0xf0] }
 0xb88   :  { %v7995_v19 = vld [vmem:[%s9939_s9 + $0x58] sm:$0xf0] }
 0xb89   :  { %4279 = vmatpush.bf16.msrb.mxu2 %v8034_v61 }
 0xb8a   :  { %4304 = vmatpush.bf16.msra.mxu0 %v8058_v1 }
 0xb8b   :  { %4293 = vmatpush.bf16.msrb.mxu3 %v8022_v30 }
 0xb8c   :  { %3721 = vperm.xlu1 %9629, %v3615_v54   ;;  %3716 = vperm.xlu2 %9630, %v3614_v60   ;;  %v9417_v60 = vld [vmem:[%s9903_s6 + $0x10] sm:$0xff]  }
 0xb8d   :  { %v9309_v10 = vunpack.c.l.bf16 %v9417_v60  ;;  %v9310_v51 = vunpack.c.h.bf16 %v9417_v60 }
 0xb8e   :  { %4305 = vmatpush.bf16.msra.mxu0 %v8042_v49 }
 0xb8f   :  { %4294 = vmatpush.bf16.msrb.mxu3 %v8006_v26  ;;  %v7979_v26 = vld [vmem:[%s9939_s9 + $0x38] sm:$0xf0] }
 0xb92   :  { %4306 = vmatpush.bf16.msra.mxu0 %v8026_v50 }
 0xbbe   :  { %v3657_v14 = vpop.permute.xlu2 %3656 }
 0xbbf   :  { %v3730_v54 = vmul.f32 %v9302_v46, %v3657_v14  ;;  %v8017_v14 = vld [vmem:[%s9939_s9 + $0x80] sm:$0xf]  ;;  %v8027_v46 = vld [vmem:[%s9939_s9 + $0x98] sm:$0xf0] }
 0xbc0   :  { %v8030_v1 = vor.u32 %v8996_v27, %v8027_v46  ;;  %v11225_v46 = vld [vmem:[%s9903_s6 + $0x30] sm:$0xff]  }
 0xbc2   :  { %4319 = vmatpush.bf16.msra.mxu1 %v8030_v1  ;;  %v8985_v1 = vld [vmem:[%s9939_s9 + $0x2c] sm:$0xf0] }
 0xbc6   :  { %v3667_v2 = vpop.permute.xlu2 %3666 }
 0xbc7   :  { %v3732_v7 = vmul.f32 %v9306_v32, %v3667_v2  ;;  %v8993_v32 = vld [vmem:[%s9939_s9 + $0x6c] sm:$0xf0] }
 0xbce   :  { %v11157_v24 = vpop.permute.xlu2 %3676 }
 0xbd6   :  { %v3652_v55 = vpop.permute.xlu1 %3651  ;;  %v11184_v62 = vpop.permute.xlu2 %3686 }
 0xbd7   :  { %v3729_v16 = vmul.f32 %v9301_v12, %v3652_v55  ;;  %v8018_v12 = vor.u32 %v8997_v5, %v8017_v14  ;;  %v9418_v55 = vld [vmem:[%s9903_s6 + $0x18] sm:$0xff]   ;;  %v7987_v14 = vld [vmem:[%s9939_s9 + $0x50] sm:$0xf0]  ;;  %v7993_v5 = vld [vmem:[%s9939_s9 + $0x48] sm:$0xf] }
 0xbd8   :  { %v9314_v61 = vunpack.c.h.bf16 %v9418_v55  ;;  %v9313_v3 = vunpack.c.l.bf16 %v9418_v55 }
 0xbd9   :  { %v3745_v18 = vadd.f32 %v3730_v54, %v3729_v16  ;;  %4280 = vmatpush.bf16.msrb.mxu2 %v8018_v12  ;;  %v3734_v16 = vmul.f32 %v9310_v51, %v11157_v24  ;;  %v8011_v54 = vld [vmem:[%s9939_s9 + $0x78] sm:$0xf0]  ;;  %v8010_v24 = vor.u32 %v8994_v29, %v8009_v39  ;;  %v8988_v12 = vld [vmem:[%s9939_s9 + $0x4c] sm:$0xf]  ;;  %v8986_v39 = vld [vmem:[%s9939_s9 + $0x34] sm:$0xf0] }
 0xbda   :  { %v8014_v49 = vor.u32 %v8992_v52, %v8011_v54  ;;  %v3736_v63 = vmul.f32 %v9314_v61, %v11184_v62  ;;  %v7998_v62 = vor.u32 %v8988_v12, %v7995_v19  ;;  %v8984_v61 = vld [vmem:[%s9939_s9 + $0x2c] sm:$0xf] }
 0xbdb   :  { %v3662_v33 = vpop.permute.xlu0 %3661  ;;  %v3746_v59 = vrot.slane %v3745_v18, 4  ;;  %4307 = vmatpush.bf16.msra.mxu0 %v8010_v24  ;;  %v11236_v29 = vld [vmem:[%s9903_s6 + $0x28] sm:$0xff]   ;;  %v7982_v24 = vor.u32 %v8984_v61, %v7979_v26 }
 0xbdc   :  { %v3731_v37 = vmul.f32 %v9305_v6, %v3662_v33  ;;  %v8002_v6 = vor.u32 %v8993_v32, %v8001_v53  ;;  %4320 = vmatpush.bf16.msra.mxu1 %v8014_v49  ;;  %v8983_v53 = vld [vmem:[%s9939_s9 + $0x24] sm:$0xf]  ;;  %v7971_v32 = vld [vmem:[%s9939_s9 + $0x30] sm:$0xf0]  ;;  %v7953_v49 = vld [vmem:[%s9939_s9] sm:$0xf] }
 0xbdd   :  { %v11206_v17 = vadd.f32 %v3746_v59, %v3745_v18  ;;  %v8990_v18 = vld [vmem:[%s9939_s9 + $0x54] sm:$0xf0]  ;;  %v7974_v40 = vor.u32 %v8983_v53, %v7971_v32 }
 0xbde   :  { %v3752_v0 = vadd.f32 %v3732_v7, %v3731_v37  ;;  %v3672_v2 = vpop.permute.xlu1 %3671  ;;  %4281 = vmatpush.bf16.msrb.mxu2 %v8002_v6  ;;  %v11210_v33 = vpop.permute.xlu2 %3701  ;;  %v8987_v37 = vld [vmem:[%s9939_s9 + $0x44] sm:$0xf]  ;;  %v7994_v55 = vor.u32 %v8990_v18, %v7993_v5 }
 0xbdf   :  { %v3733_v47 = vmul.f32 %v9309_v10, %v3672_v2  ;;  %v7985_v10 = vld [vmem:[%s9939_s9 + $0x40] sm:$0xf]  ;;  %v7990_v51 = vor.u32 %v8987_v37, %v7987_v14  ;;  %v3748_v30 = vrot.slane %v11206_v17, 2  ;;  %v9325_v14 = vunpack.c.l.bf16 %v11225_v46 }
 0xbe0   :  { %v3753_v57 = vrot.slane %v3752_v0, 4  ;;  %v7986_v7 = vor.u32 %v8989_v38, %v7985_v10  ;;  %4308 = vmatpush.bf16.msra.mxu0 %v7994_v55  ;;  %4321 = vmatpush.bf16.msra.mxu1 %v7998_v62  ;;  %v8981_v10 = vld [vmem:[%s9939_s9 + $0xc] sm:$0xf0]  ;;  %v8979_v38 = vld [vmem:[%s9939_s9 + $0x4] sm:$0xf] }
 0xbe1   :  { %v3759_v60 = vadd.f32 %v3734_v16, %v3733_v47  ;;  %4295 = vmatpush.bf16.msrb.mxu3 %v7990_v51  ;;  %v7969_v47 = vld [vmem:[%s9939_s9 + $0x20] sm:$0xf]  ;;  %v7977_v16 = vld [vmem:[%s9939_s9 + $0x28] sm:$0xf]  ;;  %v7954_v5 = vor.u32 %v8981_v10, %v7953_v49  ;;  %v8982_v51 = vld [vmem:[%s9939_s9 + $0x14] sm:$0xf0]  ;;  %v9322_v49 = vunpack.c.h.bf16 %v11236_v29 }
 0xbe2   :  { %v11208_v9 = vadd.f32 %v3753_v57, %v3752_v0  ;;  %v9419_v0 = vld [vmem:[%s9903_s6 + $0x20] sm:$0xff]   ;;  %4282 = vmatpush.bf16.msrb.mxu2 %v7986_v7  ;;  %v7970_v57 = vor.u32 %v8985_v1, %v7969_v47  ;;  %v9326_v7 = vunpack.c.h.bf16 %v11225_v46  ;;  %v9073_v1 = vld [vmem:[%s9953_s20 + $0xec] sm:$0xf0] }
 0xbe3   :  { %v3760_v43 = vrot.slane %v3759_v60, 4  ;;  %v9318_v6 = vunpack.c.h.bf16 %v9419_v0  ;;  %v9317_v58 = vunpack.c.l.bf16 %v9419_v0  ;;  %v8980_v0 = vld [vmem:[%s9939_s9 + $0xc] sm:$0xf]  ;;  %v8193_v55 = vld [vmem:[%s9953_s20 + $0xe0] sm:$0xf] }
 0xbe4   :  { %v3755_v50 = vrot.slane %v11208_v9, 2  ;;  %4322 = vmatpush.bf16.msra.mxu1 %v7982_v24  ;;  %v8194_v32 = vor.u32 %v9073_v1, %v8193_v55  ;;  %v8177_v24 = vld [vmem:[%s9953_s20 + $0xc0] sm:$0xf] }
 0xbe5   :  { %v3697_v27 = vpop.permute.xlu0 %3696  ;;  %v3761_v52 = vadd.f32 %v3760_v43, %v3759_v60  ;;  %4296 = vmatpush.bf16.msrb.mxu3 %v7974_v40  ;;  %v7961_v60 = vld [vmem:[%s9939_s9 + $0x8] sm:$0xf]  ;;  %v9074_v40 = vld [vmem:[%s9953_s20 + $0xf4] sm:$0xf0] }
 0xbe6   :  { %v3682_v15 = vpop.permute.xlu1 %3681  ;;  %4283 = vmatpush.bf16.msrb.mxu2 %v7970_v57  ;;  %v3738_v18 = vmul.f32 %v9318_v6, %v3697_v27  ;;  %v3717_v12 = vpop.permute.xlu2 %3716  ;;  %v7962_v43 = vor.u32 %v8982_v51, %v7961_v60  ;;  %v9321_v57 = vunpack.c.l.bf16 %v11236_v29  ;;  %v8201_v6 = vld [vmem:[%s9953_s20 + $0xe8] sm:$0xf] }
 0xbe7   :  { %v3735_v2 = vmul.f32 %v9313_v3, %v3682_v15  ;;  %v7978_v3 = vor.u32 %v8986_v39, %v7977_v16  ;;  %v7955_v15 = vld [vmem:[%s9939_s9 + $0x10] sm:$0xf0]  ;;  %v3762_v46 = vrot.slane %v3761_v52, 2  ;;  %v3742_v39 = vmul.f32 %v9326_v7, %v3717_v12  ;;  %v8185_v51 = vld [vmem:[%s9953_s20 + $0xc8] sm:$0xf] }
 0xbe8   :  { %v8195_v16 = vld [vmem:[%s9953_s20 + $0xf0] sm:$0xf0]  ;;  %v11273_v7 = vadd.f32 %v3755_v50, %v11208_v9  ;;  %v8187_v9 = vld [vmem:[%s9953_s20 + $0xd8] sm:$0xf0]  ;;  %v8161_v50 = vld [vmem:[%s9953_s20 + $0xa0] sm:$0xf] }
 0xbe9   :  { %v3766_v59 = vadd.f32 %v3736_v63, %v3735_v2  ;;  %4309 = vmatpush.bf16.msra.mxu0 %v7978_v3  ;;  %v7958_v63 = vor.u32 %v8979_v38, %v7955_v15  ;;  %v7963_v2 = vld [vmem:[%s9939_s9 + $0x18] sm:$0xf0]  ;;  %v8202_v38 = vor.u32 %v9074_v40, %v8201_v6  ;;  %v9069_v15 = vld [vmem:[%s9953_s20 + $0xcc] sm:$0xf0] }
 0xbea   :  { %4284 = vmatpush.bf16.msrb.mxu2 %v7954_v5  ;;  %v7966_v27 = vor.u32 %v8980_v0, %v7963_v2  ;;  %v8203_v3 = vld [vmem:[%s9953_s20 + $0xf8] sm:$0xf0]  ;;  %v8178_v12 = vor.u32 %v9069_v15, %v8177_v24  ;;  %v8145_v24 = vld [vmem:[%s9953_s20 + $0x80] sm:$0xf]  ;;  %v8147_v15 = vld [vmem:[%s9953_s20 + $0x90] sm:$0xf0] }
 0xbeb   :  { %v3767_v54 = vrot.slane %v3766_v59, 4  ;;  %4297 = vmatpush.bf16.msrb.mxu3 %v7958_v63 }
 0xbec   :  { %4323 = vmatpush.bf16.msra.mxu1 %v7966_v27  ;;  %v3739_v27 = vmul.f32 %v9321_v57, %v11210_v33  ;;  %v8171_v33 = vld [vmem:[%s9953_s20 + $0xb8] sm:$0xf0] }
 0xbed   :  { %v11242_v37 = vadd.f32 %v3767_v54, %v3766_v59  ;;  %v9071_v59 = vld [vmem:[%s9953_s20 + $0xe4] sm:$0xf]  ;;  %v9072_v54 = vld [vmem:[%s9953_s20 + $0xec] sm:$0xf]  ;;  %4310 = vmatpush.bf16.msra.mxu0 %v7962_v43 }
 0xbee   :  { %v3692_v19 = vpop.permute.xlu1 %3691  ;;  %v8198_v10 = vor.u32 %v9071_v59, %v8195_v16  ;;  %v8206_v5 = vor.u32 %v9072_v54, %v8203_v3  ;;  %4521 = vmatpush.bf16.msra.mxu2 %v8194_v32  ;;  %v9068_v43 = vld [vmem:[%s9953_s20 + $0xcc] sm:$0xf]  ;;  %v8169_v32 = vld [vmem:[%s9953_s20 + $0xa8] sm:$0xf]  ;;  %v9066_v16 = vld [vmem:[%s9953_s20 + $0xb4] sm:$0xf0] }
 0xbef   :  { %v3769_v62 = vrot.slane %v11242_v37, 2  ;;  %v3737_v47 = vmul.f32 %v9317_v58, %v3692_v19  ;;  %v11261_v58 = vadd.f32 %v3748_v30, %v11206_v17  ;;  %v9067_v17 = vld [vmem:[%s9953_s20 + $0xc4] sm:$0xf]  ;;  %v8179_v30 = vld [vmem:[%s9953_s20 + $0xd0] sm:$0xf0]  ;;  %v8190_v55 = vor.u32 %v9068_v43, %v8187_v9 }
 0xbf0   :  { %v3712_v53 = vpop.permute.xlu0 %3711  ;;  %4534 = vmatpush.bf16.msra.mxu3 %v8198_v10  ;;  %v8182_v19 = vor.u32 %v9067_v17, %v8179_v30  ;;  %4560 = vmatpush.bf16.msrb.mxu1 %v8206_v5  ;;  %v9064_v54 = vld [vmem:[%s9953_s20 + $0xac] sm:$0xf]  ;;  %v8170_v3 = vor.u32 %v9066_v16, %v8169_v32  ;;  %v9059_v5 = vld [vmem:[%s9953_s20 + $0x84] sm:$0xf]  ;;  %v8153_v17 = vld [vmem:[%s9953_s20 + $0x88] sm:$0xf] }
 0xbf1   :  { %v3773_v61 = vadd.f32 %v3738_v18, %v3737_v47  ;;  %v3741_v26 = vmul.f32 %v9325_v14, %v3712_v53  ;;  %v11275_v14 = vadd.f32 %v3762_v46, %v3761_v52  ;;  %v9070_v18 = vld [vmem:[%s9953_s20 + $0xd4] sm:$0xf0]  ;;  %4547 = vmatpush.bf16.msrb.mxu0 %v8202_v38  ;;  %v3750_v52 = vrot.slane %v11261_v58, 1  ;;  %v9065_v46 = vld [vmem:[%s9953_s20 + $0xac] sm:$0xf0] }
 0xbf2   :  { %v8186_v63 = vor.u32 %v9070_v18, %v8185_v51  ;;  %v9063_v47 = vld [vmem:[%s9953_s20 + $0xa4] sm:$0xf]  ;;  %v11287_v1 = vadd.f32 %v3769_v62, %v11242_v37  ;;  %v8163_v53 = vld [vmem:[%s9953_s20 + $0xb0] sm:$0xf0]  ;;  %4522 = vmatpush.bf16.msra.mxu2 %v8178_v12  ;;  %v3757_v37 = vrot.slane %v11273_v7, 1  ;;  %v8174_v38 = vor.u32 %v9064_v54, %v8171_v33 }
 0xbf3   :  { %v3774_v60 = vrot.slane %v3773_v61, 4  ;;  %v3787_v29 = vadd.f32 %v3742_v39, %v3741_v26  ;;  %v8162_v26 = vor.u32 %v9065_v46, %v8161_v50  ;;  %v3764_v62 = vrot.slane %v11275_v14, 1  ;;  %v9062_v51 = vld [vmem:[%s9953_s20 + $0x94] sm:$0xf0]  ;;  %v9060_v18 = vld [vmem:[%s9953_s20 + $0x8c] sm:$0xf] }
 0xbf4   :  { %4535 = vmatpush.bf16.msra.mxu3 %v8182_v19  ;;  %v8166_v57 = vor.u32 %v9063_v47, %v8163_v53  ;;  %4561 = vmatpush.bf16.msrb.mxu1 %v8190_v55  ;;  %v8155_v12 = vld [vmem:[%s9953_s20 + $0x98] sm:$0xf0]  ;;  %v3771_v19 = vrot.slane %v11287_v1, 1  ;;  %v8129_v55 = vld [vmem:[%s9953_s20 + $0x60] sm:$0xf] }
 0xbf5   :  { %v3775_v0 = vadd.f32 %v3774_v60, %v3773_v61  ;;  %v3788_v2 = vrot.slane %v3787_v29, 4  ;;  %v9422_v61 = vld [vmem:[%s9903_s6 + $0x38] sm:$0xff]   ;;  %4548 = vmatpush.bf16.msrb.mxu0 %v8186_v63  ;;  %v9057_v46 = vld [vmem:[%s9953_s20 + $0x6c] sm:$0xf0]  ;;  %v9055_v47 = vld [vmem:[%s9953_s20 + $0x64] sm:$0xf] }
 0xbf6   :  { %v3707_v59 = vpop.permute.xlu1 %3706  ;;  %v9330_v60 = vunpack.c.h.bf16 %v9422_v61  ;;  %4523 = vmatpush.bf16.msra.mxu2 %v8162_v26  ;;  %v8131_v53 = vld [vmem:[%s9953_s20 + $0x70] sm:$0xf0]  ;;  %v8137_v32 = vld [vmem:[%s9953_s20 + $0x68] sm:$0xf]  ;;  %v9058_v16 = vld [vmem:[%s9953_s20 + $0x74] sm:$0xf0] }
 0xbf7   :  { %v3776_v6 = vrot.slane %v3775_v0, 2  ;;  %v3789_v40 = vadd.f32 %v3788_v2, %v3787_v29  ;;  %v3740_v39 = vmul.f32 %v9322_v49, %v3707_v59  ;;  %v9061_v49 = vld [vmem:[%s9953_s20 + $0x8c] sm:$0xf0]  ;;  %v9329_v29 = vunpack.c.l.bf16 %v9422_v61  ;;  %v9056_v33 = vld [vmem:[%s9953_s20 + $0x6c] sm:$0xf] }
 0xbf8   :  { %v3727_v9 = vpop.permute.xlu0 %3726  ;;  %v8146_v50 = vor.u32 %v9061_v49, %v8145_v24  ;;  %4536 = vmatpush.bf16.msra.mxu3 %v8166_v57  ;;  %v8154_v2 = vor.u32 %v9062_v51, %v8153_v17  ;;  %4562 = vmatpush.bf16.msrb.mxu1 %v8174_v38  ;;  %v8158_v59 = vor.u32 %v9060_v18, %v8155_v12  ;;  %v8139_v57 = vld [vmem:[%s9953_s20 + $0x78] sm:$0xf0]  ;;  %v9053_v38 = vld [vmem:[%s9953_s20 + $0x4c] sm:$0xf0]  ;;  %v8121_v51 = vld [vmem:[%s9953_s20 + $0x48] sm:$0xf] }
 0xbf9   :  { %v3780_v10 = vadd.f32 %v3740_v39, %v3739_v27  ;;  %v3777_v30 = vadd.f32 %v3776_v6, %v3775_v0  ;;  %v3790_v63 = vrot.slane %v3789_v40, 2  ;;  %4549 = vmatpush.bf16.msrb.mxu0 %v8170_v3  ;;  %v8150_v0 = vor.u32 %v9059_v5, %v8147_v15  ;;  %v9054_v18 = vld [vmem:[%s9953_s20 + $0x54] sm:$0xf0] }
 0xbfa   :  { %v3758_v6 = vadd.f32 %v3757_v37, %v11273_v7  ;;  %v3765_v39 = vadd.f32 %v3764_v62, %v11275_v14  ;;  %v3744_v26 = vmul.f32 %v9330_v60, %v3727_v9  ;;  %4524 = vmatpush.bf16.msra.mxu2 %v8146_v50  ;;  %v3751_v7 = vadd.f32 %v3750_v52, %v11261_v58  ;;  %v8113_v62 = vld [vmem:[%s9953_s20 + $0x40] sm:$0xf] }
 0xbfb   :  { %v3781_v43 = vrot.slane %v3780_v10, 4  ;;  %v3778_v61 = vrot.slane %v3777_v30, 1  ;;  %v3791_v3 = vadd.f32 %v3790_v63, %v3789_v40  ;;  %v8134_v14 = vor.u32 %v9055_v47, %v8131_v53  ;;  %v9051_v40 = vld [vmem:[%s9953_s20 + $0x44] sm:$0xf]  ;;  %v9052_v63 = vld [vmem:[%s9953_s20 + $0x4c] sm:$0xf] }
 0xbfc   :  { %4537 = vmatpush.bf16.msra.mxu3 %v8150_v0  ;;  %v8138_v37 = vor.u32 %v9058_v16, %v8137_v32  ;;  %v3772_v5 = vadd.f32 %v3771_v19, %v11287_v1  ;;  %4563 = vmatpush.bf16.msrb.mxu1 %v8158_v59  ;;  %v8142_v60 = vor.u32 %v9056_v33, %v8139_v57  ;;  %v9049_v47 = vld [vmem:[%s9953_s20 + $0x2c] sm:$0xf0]  ;;  %v8099_v16 = vld [vmem:[%s9953_s20 + $0x30] sm:$0xf0]  ;;  %v8107_v33 = vld [vmem:[%s9953_s20 + $0x38] sm:$0xf0] }
 0xbfd   :  { %v3782_v27 = vadd.f32 %v3781_v43, %v3780_v10  ;;  %v8130_v10 = vor.u32 %v9057_v46, %v8129_v55  ;;  %4550 = vmatpush.bf16.msrb.mxu0 %v8154_v2  ;;  %v3802_v58 = vpack.c.bf16 %v3758_v6, %v3758_v6  ;;  %v3803_v52 = vpack.c.bf16 %v3765_v39, %v3765_v39  ;;  %v8123_v43 = vld [vmem:[%s9953_s20 + $0x58] sm:$0xf0]  ;;  %v8097_v46 = vld [vmem:[%s9953_s20 + $0x20] sm:$0xf]  ;;  %v8105_v6 = vld [vmem:[%s9953_s20 + $0x28] sm:$0xf] }
 0xbfe   :  { %v3722_v54 = vpop.permute.xlu1 %3721  ;;  %v3779_v12 = vadd.f32 %v3778_v61, %v3777_v30  ;;  %v3792_v9 = vrot.slane %v3791_v3, 1  ;;  %v8114_v1 = vor.u32 %v9053_v38, %v8113_v62  ;;  %v3801_v19 = vpack.c.bf16 %v3751_v7, %v3751_v7  ;;  %v9047_v30 = vld [vmem:[%s9953_s20 + $0x24] sm:$0xf]  ;;  %v9050_v39 = vld [vmem:[%s9953_s20 + $0x34] sm:$0xf0] }
 0xbff   :  { %v3783_v24 = vrot.slane %v3782_v27, 2  ;;  %v3743_v49 = vmul.f32 %v9329_v29, %v3722_v54  ;;  %v8115_v29 = vld [vmem:[%s9953_s20 + $0x50] sm:$0xf0]  ;;  %4525 = vmatpush.bf16.msra.mxu2 %v8130_v10  ;;  %v8122_v55 = vor.u32 %v9054_v18, %v8121_v51  ;;  %v8126_v32 = vor.u32 %v9052_v63, %v8123_v43  ;;  %v9048_v54 = vld [vmem:[%s9953_s20 + $0x2c] sm:$0xf] }
 0xc00   :  { %4538 = vmatpush.bf16.msra.mxu3 %v8134_v14  ;;  %v8118_v2 = vor.u32 %v9051_v40, %v8115_v29  ;;  %4564 = vmatpush.bf16.msrb.mxu1 %v8142_v60  ;;  %v4094_v61 = vunpack.c.l.b16 %v3802_v58  ;;  %v4095_v57 = vunpack.c.l.b16 %v3803_v52  ;;  %v8098_v10 = vor.u32 %v9049_v47, %v8097_v46  ;;  %v8081_v38 = vld [vmem:[%s9953_s20] sm:$0xf]  ;;  %v9045_v40 = vld [vmem:[%s9953_s20 + $0xc] sm:$0xf0]  ;;  %v8083_v29 = vld [vmem:[%s9953_s20 + $0x10] sm:$0xf0] }
 0xc01   :  { %v3784_v15 = vadd.f32 %v3783_v24, %v3782_v27  ;;  %v3794_v17 = vadd.f32 %v3744_v26, %v3743_v49  ;;  %4551 = vmatpush.bf16.msrb.mxu0 %v8138_v37  ;;  %v3804_v27 = vpack.c.bf16 %v3772_v5, %v3772_v5  ;;  %v3805_v26 = vpack.c.bf16 %v3779_v12, %v3779_v12  ;;  %v9043_v5 = vld [vmem:[%s9953_s20 + $0x4] sm:$0xf]  ;;  %v8089_v51 = vld [vmem:[%s9953_s20 + $0x8] sm:$0xf]  ;;  %v9046_v18 = vld [vmem:[%s9953_s20 + $0x14] sm:$0xf0] }
 0xc02   :  { %v4093_v7 = vunpack.c.l.b16 %v3801_v19  ;;  %v3793_v14 = vadd.f32 %v3792_v9, %v3791_v3  ;;  %v8102_v37 = vor.u32 %v9047_v30, %v8099_v16  ;;  %v8106_v62 = vor.u32 %v9050_v39, %v8105_v6  ;;  %v9044_v52 = vld [vmem:[%s9953_s20 + $0xc] sm:$0xf]  ;;  %v8091_v12 = vld [vmem:[%s9953_s20 + $0x18] sm:$0xf0] }
 0xc03   :  { %v3785_v50 = vrot.slane %v3784_v15, 1  ;;  %v3795_v0 = vrot.slane %v3794_v17, 4  ;;  %4526 = vmatpush.bf16.msra.mxu2 %v8114_v1  ;;  %v8110_v60 = vor.u32 %v9048_v54, %v8107_v33  ;;  %v4097_v3 = vunpack.c.l.b16 %v3805_v26 }
 0xc04   :  { %4539 = vmatpush.bf16.msra.mxu3 %v8118_v2  ;;  %4565 = vmatpush.bf16.msrb.mxu1 %v8126_v32  ;;  %v4102_v58 = vsel %vm4101_vm15, %v4094_v61, %v4093_v7  ;;  %v8086_v1 = vor.u32 %v9043_v5, %v8083_v29  ;;  %v8090_v19 = vor.u32 %v9046_v18, %v8089_v51 }
 0xc05   :  { %v3786_v59 = vadd.f32 %v3785_v50, %v3784_v15  ;;  %v3796_v53 = vadd.f32 %v3795_v0, %v3794_v17  ;;  %4552 = vmatpush.bf16.msrb.mxu0 %v8122_v55  ;;  %v4096_v15 = vunpack.c.l.b16 %v3804_v27  ;;  %v4104_v63 = vsel %vm4103_vm0, %v4095_v57, %v4102_v58 }
 0xc06   :  { %v8082_v50 = vor.u32 %v9045_v40, %v8081_v38  ;;  %v3807_v0 = vpack.c.bf16 %v3793_v14, %v3793_v14  ;;  %v8094_v46 = vor.u32 %v9044_v52, %v8091_v12 }
 0xc07   :  { %v3806_v24 = vpack.c.bf16 %v3786_v59, %v3786_v59  ;;  %v3797_v49 = vrot.slane %v3796_v53, 2  ;;  %4527 = vmatpush.bf16.msra.mxu2 %v8098_v10  ;;  %v4106_v2 = vsel %vm4105_vm1, %v4096_v15, %v4104_v63 }
 0xc08   :  { %4540 = vmatpush.bf16.msra.mxu3 %v8102_v37  ;;  %4566 = vmatpush.bf16.msrb.mxu1 %v8110_v60  ;;  %v4108_v47 = vsel %vm4107_vm3, %v4097_v3, %v4106_v2  ;;  %v4099_v59 = vunpack.c.l.b16 %v3807_v0 }
 0xc09   :  { %v3798_v17 = vadd.f32 %v3797_v49, %v3796_v53  ;;  %v4098_v43 = vunpack.c.l.b16 %v3806_v24  ;;  %4553 = vmatpush.bf16.msrb.mxu0 %v8106_v62  ;;  %v4577_v24 = vld [vmem:[%s9960_s25] sm:$0xf] }
 0xc0a   :  { %v4582_v14 = vperm.slane %v4577_v24, 3  ;;  %v4579_v15 = vperm.slane %v4577_v24, 0 }
 0xc0b   :  { %v3799_v9 = vrot.slane %v3798_v17, 1  ;;  %v4110_v27 = vsel %vm4109_vm4, %v4098_v43, %v4108_v47  ;;  %4528 = vmatpush.bf16.msra.mxu2 %v8082_v50  ;;  %v4581_v47 = vperm.slane %v4577_v24, 2 }
 0xc0c   :  { %4541 = vmatpush.bf16.msra.mxu3 %v8086_v1  ;;  %4567 = vmatpush.bf16.msrb.mxu1 %v8094_v46  ;;  %v4112_v32 = vsel %vm4111_vm5, %v4099_v59, %v4110_v27 }
 0xc0d   :  { %v3800_v55 = vadd.f32 %v3799_v9, %v3798_v17  ;;  %4554 = vmatpush.bf16.msrb.mxu0 %v8090_v19  ;;  %v4580_v17 = vperm.slane %v4577_v24, 1 }
 0xc0f   :  { %v3808_v30 = vpack.c.bf16 %v3800_v55, %v3800_v55 }
 0xc11   :  { %v4100_v53 = vunpack.c.l.b16 %v3808_v30 }
 0xc13   :  { %v4114_v16 = vsel %vm4113_vm6, %v4100_v53, %v4112_v32 }
 0xc14   :  { %v4115_v6 = vpack.c.b16 %v4114_v16, %v4114_v16 }
 0xc16   :  { %4285 = vmatmul.bf16.vlgmr.msrb.gmra.mxu2 %v4115_v6  ;;  %4298 = vmatmul.bf16.vlgmr.msrb.gmra.mxu3 %v4115_v6 }
 0xc17   :  { %4311 = vmatmul.bf16.vlgmr.msra.gmra.mxu0 %v4115_v6  ;;  %4324 = vmatmul.bf16.vlgmr.msra.gmra.mxu1 %v4115_v6 }
 0xc26   :  { %4529 = vmatmul.bf16.vlgmr.msra.gmra.mxu2 %v10921_v4  ;;  %4542 = vmatmul.bf16.vlgmr.msra.gmra.mxu3 %v10921_v4 }
 0xc27   :  { %4555 = vmatmul.bf16.vlgmr.msrb.gmra.mxu0 %v10921_v4  ;;  %4568 = vmatmul.bf16.vlgmr.msrb.gmra.mxu1 %v10921_v4 }
 0xc94   :  { %v4312_v39 = vpop.f32.mrf.mxu0  ;;  %v4325_v61 = vpop.f32.mrf.mxu1 }
 0xc95   :  { %v4326_v7 = vadd.f32 %v4325_v61, %v10983_v45  ;;  %v4313_v55 = vadd.f32 %v4312_v39, %v10966_v22 }
 0xc99   :  { %v4286_v26 = vpop.f32.mrf.mxu2  ;;  %v4299_v54 = vpop.f32.mrf.mxu3 }
 0xc9a   :  { %v4287_v5 = vadd.f32 %v4286_v26, %v10971_v56  ;;  %v4300_v4 = vadd.f32 %v4299_v54, %v10973_v20 }
 0xc9c   :  { %v4314_v33 = vpop.f32.mrf.mxu0  ;;  %v4327_v57 = vpop.f32.mrf.mxu1 }
 0xca1   :  { %v4288_v49 = vpop.f32.mrf.mxu2  ;;  %v4301_v10 = vpop.f32.mrf.mxu3 }
 0xca4   :  { %v4556_v37 = vpop.f32.mrf.mxu0  ;;  %v4569_v62 = vpop.f32.mrf.mxu1 }
 0xca5   :  { %v4576_v38 = vadd.f32 %v4569_v62, %v4326_v7  ;;  %v4575_v46 = vadd.f32 %v4556_v37, %v4313_v55  ;;  %v9081_v55 = vld [vmem:[%s10247_s2 + $0x30] sm:$0xff] }
 0xca7   :  { %v4590_v40 = vadd.f32 %v4582_v14, %v4576_v38  ;;  %v4589_v59 = vadd.f32 %v4581_v47, %v4575_v46  ;;  %v3082_v38 = vld [vmem:[#allocation7] sm:$0xff] }
 0xca9   :  { %v8209_v60 = vmul.f32 -1.442695, %v4590_v40  ;;  %v4530_v29 = vpop.f32.mrf.mxu2  ;;  %v4543_v51 = vpop.f32.mrf.mxu3 }
 0xcaa   :  { %v4573_v18 = vadd.f32 %v4530_v29, %v4287_v5  ;;  %v4574_v58 = vadd.f32 %v4543_v51, %v4300_v4 }
 0xcab   :  { %9712 = vpow2.f32 %v8209_v60 }
 0xcac   :  { %v4587_v3 = vadd.f32 %v4579_v15, %v4573_v18  ;;  %v4588_v52 = vadd.f32 %v4580_v17, %v4574_v58  ;;  %v4571_v45 = vpop.f32.mrf.mxu1  ;;  %v4558_v12 = vpop.f32.mrf.mxu0 }
 0xcae   :  { %v8207_v63 = vmul.f32 -1.442695, %v4587_v3  ;;  %v8208_v43 = vmul.f32 -1.442695, %v4588_v52 }
 0xcb0   :  { %9714 = vpow2.f32 %v8207_v63 }
 0xcb1   :  { %v9713_v9 = vpop.eup %9712  ;;  %9716 = vpow2.f32 %v8208_v43  ;;  %v4532_v56 = vpop.f32.mrf.mxu2 }
 0xcb2   :  { %v4545_v50 = vpop.f32.mrf.mxu3  ;;  %v4633_v20 = vadd.f32 1.0, %v9713_v9 }
 0xcb4   :  { %9718 = vrcp.f32 %v4633_v20  ;;  %v4645_v58 = vand.u32 2147483648, %v4633_v20  ;;  %vm4639_vm0 = vweird.f32 %v4633_v20  ;;  %v4643_v3 = vand.u32 2147483647, %v4633_v20 }
 0xcb6   :  { %v9715_v0 = vpop.eup %9714  ;;  %v4646_v45 = vor.u32 1.1754944e-38, %v4645_v58  ;;  %vm4644_vm3 = vcmp.eq.f32.partialorder %v4643_v3, 8.507059e+37 }
 0xcb7   :  { %v9717_v1 = vpop.eup %9716  ;;  %v4594_v19 = vadd.f32 1.0, %v9715_v0  ;;  %v9082_v0 = vld [vmem:[%s10247_s2 + $0x38] sm:$0xff] }
 0xcb8   :  { %v4613_v2 = vadd.f32 1.0, %v9717_v1  ;;  %4809 = vmatpush.bf16.msrb.mxu2 %v9082_v0 }
 0xcb9   :  { %9720 = vrcp.f32 %v4594_v19  ;;  %v4606_v26 = vand.u32 2147483648, %v4594_v19  ;;  %v4604_v57 = vand.u32 2147483647, %v4594_v19  ;;  %vm4600_vm9 = vweird.f32 %v4594_v19 }
 0xcba   :  { %9722 = vrcp.f32 %v4613_v2  ;;  %v9719_v30 = vpop.eup %9718  ;;  %v4625_v49 = vand.u32 2147483648, %v4613_v2  ;;  %v4623_v39 = vand.u32 2147483647, %v4613_v2  ;;  %vm4619_vm11 = vweird.f32 %v4613_v2 }
 0xcbb   :  { %v4635_v61 = vmul.f32 %v9719_v30, %v4633_v20  ;;  %9724 = vtanh.f32 %v4589_v59  ;;  %v4607_v7 = vor.u32 1.1754944e-38, %v4606_v26  ;;  %vm4605_vm12 = vcmp.eq.f32.partialorder %v4604_v57, 8.507059e+37  ;;  %v9078_v26 = vld [vmem:[%s10247_s2 + $0x18] sm:$0xff] }
 0xcbc   :  { %v4626_v62 = vor.u32 1.1754944e-38, %v4625_v49  ;;  %vm4624_vm14 = vcmp.eq.f32.partialorder %v4623_v39, 8.507059e+37  ;;  %vm4640_vm15 = vweird.f32 %v9719_v30  ;;  %4810 = vmatpush.bf16.msrb.mxu2 %v9081_v55 }
 0xcbd   :  { %v4636_v24 = vsub.f32 1.0, %v4635_v61  ;;  %vm4641_vm1 = vmor %vm4639_vm0, %vm4640_vm15 }
 0xcbf   :  { %v9721_v27 = vpop.eup %9720  ;;  %v4637_v17 = vmul.f32 %v9719_v30, %v4636_v24 }
 0xcc0   :  { %v9723_v53 = vpop.eup %9722  ;;  %v4596_v32 = vmul.f32 %v9721_v27, %v4594_v19  ;;  %vm4601_vm7 = vweird.f32 %v9721_v27 }
 0xcc1   :  { %v4615_v16 = vmul.f32 %v9723_v53, %v4613_v2  ;;  %vm4620_vm8 = vweird.f32 %v9723_v53  ;;  %vm4602_vm10 = vmor %vm4600_vm9, %vm4601_vm7  ;;  %v9725_v40 = vpop.eup %9724  ;;  %v4638_v18 = vadd.f32 %v9719_v30, %v4637_v17 }
 0xcc2   :  { %v4597_v6 = vsub.f32 1.0, %v4596_v32  ;;  %vm4621_vm13 = vmor %vm4619_vm11, %vm4620_vm8 }
 0xcc3   :  { %v4616_v54 = vsub.f32 1.0, %v4615_v16  ;;  %v4642_v52 = vsel %vm4641_vm1, %v9719_v30, %v4638_v18  ;;  %v9080_v30 = vld [vmem:[%s10247_s2 + $0x28] sm:$0xff]  ;;  %v9079_v16 = vld [vmem:[%s10247_s2 + $0x20] sm:$0xff] }
 0xcc4   :  { %v4598_v33 = vmul.f32 %v9721_v27, %v4597_v6  ;;  %v4647_v63 = vsel %vm4644_vm3, %v4646_v45, %v4642_v52  ;;  %4811 = vmatpush.bf16.msrb.mxu2 %v9080_v30 }
 0xcc5   :  { %v4617_v22 = vmul.f32 %v9723_v53, %v4616_v54 }
 0xcc6   :  { %v4599_v10 = vadd.f32 %v9721_v27, %v4598_v33 }
 0xcc7   :  { %v4618_v14 = vadd.f32 %v9723_v53, %v4617_v22  ;;  %v9077_v22 = vld [vmem:[%s10247_s2 + $0x10] sm:$0xff] }
 0xcc8   :  { %v4603_v37 = vsel %vm4602_vm10, %v9721_v27, %v4599_v10  ;;  %4812 = vmatpush.bf16.msrb.mxu2 %v9079_v16 }
 0xcc9   :  { %v4608_v5 = vsel %vm4605_vm12, %v4607_v7, %v4603_v37  ;;  %v4622_v4 = vsel %vm4621_vm13, %v9723_v53, %v4618_v14  ;;  %v9076_v7 = vld [vmem:[%s10247_s2 + $0x8] sm:$0xff] }
 0xcca   :  { %v4627_v15 = vsel %vm4624_vm14, %v4626_v62, %v4622_v4  ;;  %v4650_v60 = vmul.f32 %v9725_v40, %v4608_v5  ;;  %v9075_v62 = vld [vmem:[%s10247_s2] sm:$0xff] }
 0xccb   :  { %v4649_v29 = vmul.f32 %v4627_v15, %v3082_v38 }
 0xccc   :  { %4813 = vmatpush.bf16.msrb.mxu2 %v9078_v26 }
 0xccd   :  { %v11357_v51 = vadd.f32 %v4650_v60, %v4649_v29 }
 0xccf   :  { %9726 = vtanh.f32 %v11357_v51  ;;  %v4699_v56 = vmul.f32 %v11357_v51, %v11357_v51 }
 0xcd0   :  { %4814 = vmatpush.bf16.msrb.mxu2 %v9077_v22 }
 0xcd4   :  { %4815 = vmatpush.bf16.msrb.mxu2 %v9076_v7 }
 0xcd5   :  { %v9727_v12 = vpop.eup %9726 }
 0xcd6   :  { %v11360_v43 = vmul.f32 %v9727_v12, %v4647_v63 }
 0xcd8   :  { %4654 = vadd.xlane.f32.xlu2 %v11360_v43  ;;  %v4657_v9 = vmul.f32 %v11360_v43, %v11360_v43  ;;  %4816 = vmatpush.bf16.msrb.mxu2 %v9075_v62 }
 0xcda   :  { %4658 = vadd.xlane.f32.xlu1 %v4657_v9 }
 0xce0   :  { %4696 = vadd.xlane.f32.xlu2 %v11357_v51 }
 0xce8   :  { %4700 = vadd.xlane.f32.xlu2 %v4699_v56 }
 0xd4b   :  { %v4655_v50 = vpop.xlane.xlu2 %4654 }
 0xd4c   :  { %v11368_v20 = vmul.f32 0.03125, %v4655_v50 }
 0xd4d   :  { %v4659_v2 = vpop.xlane.xlu1 %4658 }
 0xd4e   :  { %v4660_v1 = vmul.f32 32.0, %v11368_v20 }
 0xd50   :  { %v4661_v19 = vmul.f32 %v4660_v1, %v11368_v20 }
 0xd52   :  { %v4662_v46 = vsub.f32 %v4659_v2, %v4661_v19  ;;  %v4665_v19 = vsub.f32 %v11360_v43, %v11368_v20  ;;  %v4709_v20 = vperm.slane %v10007_v31, 0 }
 0xd53   :  { %v4697_v47 = vpop.xlane.xlu2 %4696 }
 0xd54   :  { %v4663_v27 = vmul.f32 0.032258064, %v4662_v46  ;;  %v11375_v59 = vmul.f32 0.03125, %v4697_v47  ;;  %v4666_v30 = vmul.f32 %v10275_v13, %v4665_v19 }
 0xd56   :  { %v4664_v53 = vmax.f32 %v4663_v27, 0.0  ;;  %v4702_v32 = vmul.f32 32.0, %v11375_v59  ;;  %v4707_v43 = vsub.f32 %v11357_v51, %v11375_v59  ;;  %v4741_v51 = vperm.slane %v10012_v36, 0 }
 0xd58   :  { %9728 = vrsqrt.f32 %v4664_v53  ;;  %v4703_v6 = vmul.f32 %v4702_v32, %v11375_v59  ;;  %vm4674_vm4 = vcmp.eq.f32.partialorder %v4664_v53, inf  ;;  %v4677_v4 = vand.u32 2147483648, %v4664_v53 }
 0xd59   :  { %vm4676_vm5 = vcmp.eq.f32.partialorder %v4664_v53, 0.0 }
 0xd5b   :  { %v4701_v61 = vpop.xlane.xlu2 %4700 }
 0xd5c   :  { %v4704_v54 = vsub.f32 %v4701_v61, %v4703_v6 }
 0xd5e   :  { %v9729_v33 = vpop.eup %9728  ;;  %v4705_v57 = vmul.f32 0.032258064, %v4704_v54 }
 0xd5f   :  { %v4668_v49 = vmul.f32 %v9729_v33, %v4664_v53 }
 0xd60   :  { %v4706_v39 = vmax.f32 %v4705_v57, 0.0 }
 0xd61   :  { %v4669_v10 = vmul.f32 %v9729_v33, %v4668_v49 }
 0xd62   :  { %9730 = vrsqrt.f32 %v4706_v39  ;;  %vm4719_vm6 = vcmp.eq.f32.partialorder %v4706_v39, inf  ;;  %v4722_v45 = vand.u32 2147483648, %v4706_v39  ;;  %vm4721_vm7 = vcmp.eq.f32.partialorder %v4706_v39, 0.0 }
 0xd63   :  { %v4670_v24 = vmul.f32 0.5, %v4669_v10  ;;  %v4711_v10 = vmul.f32 %v4709_v20, %v4707_v43 }
 0xd65   :  { %v4671_v14 = vsub.f32 1.5, %v4670_v24 }
 0xd67   :  { %v4672_v37 = vmul.f32 %v9729_v33, %v4671_v14 }
 0xd68   :  { %v9731_v38 = vpop.eup %9730 }
 0xd69   :  { %v4673_v40 = vmul.f32 %v4672_v37, %v4664_v53  ;;  %v4713_v5 = vmul.f32 %v9731_v38, %v4706_v39 }
 0xd6b   :  { %v4675_v15 = vsel %vm4674_vm4, %v4664_v53, %v4673_v40  ;;  %v4714_v17 = vmul.f32 %v9731_v38, %v4713_v5 }
 0xd6c   :  { %v4678_v60 = vsel %vm4676_vm5, %v4677_v4, %v4675_v15 }
 0xd6d   :  { %v4679_v29 = vadd.f32 1e-06, %v4678_v60  ;;  %v4715_v18 = vmul.f32 0.5, %v4714_v17  ;;  %v4878_v17 = vld [vmem:[%s10311_s5] sm:$0xff] }
 0xd6f   :  { %9732 = vrcp.f32 %v4679_v29  ;;  %v4716_v58 = vsub.f32 1.5, %v4715_v18  ;;  %v4691_v1 = vand.u32 2147483648, %v4679_v29  ;;  %v4689_v55 = vand.u32 2147483647, %v4679_v29 }
 0xd70   :  { %vm4685_vm9 = vweird.f32 %v4679_v29 }
 0xd71   :  { %v4717_v3 = vmul.f32 %v9731_v38, %v4716_v58  ;;  %v4692_v47 = vor.u32 1.1754944e-38, %v4691_v1  ;;  %vm4690_vm11 = vcmp.eq.f32.partialorder %v4689_v55, 8.507059e+37 }
 0xd73   :  { %v4718_v52 = vmul.f32 %v4717_v3, %v4706_v39 }
 0xd75   :  { %v9733_v12 = vpop.eup %9732  ;;  %v4720_v63 = vsel %vm4719_vm6, %v4706_v39, %v4718_v52 }
 0xd76   :  { %v4681_v9 = vmul.f32 %v9733_v12, %v4679_v29  ;;  %v4723_v56 = vsel %vm4721_vm7, %v4722_v45, %v4720_v63  ;;  %vm4686_vm8 = vweird.f32 %v9733_v12  ;;  %v3079_v29 = vld [vmem:[#allocation3] sm:$0xff]  ;;  %v3080_v63 = vld [vmem:[#allocation2] sm:$0xff] }
 0xd77   :  { %v4724_v50 = vadd.f32 1e-06, %v4723_v56  ;;  %vm4687_vm10 = vmor %vm4685_vm9, %vm4686_vm8  ;;  %v4879_v18 = vadd.f32 %v4878_v17, %v3079_v29  ;;  %v4846_v1 = vsub.f32 1.0, %v3080_v63 }
 0xd78   :  { %v4682_v0 = vsub.f32 1.0, %v4681_v9 }
 0xd79   :  { %9734 = vrcp.f32 %v4724_v50  ;;  %v4736_v54 = vand.u32 2147483648, %v4724_v50  ;;  %v4734_v49 = vand.u32 2147483647, %v4724_v50  ;;  %vm4730_vm13 = vweird.f32 %v4724_v50  ;;  %4880 = vst.msk [vmem:[%s10311_s5] sm:$0xff] %vm1139_vm2, %v4879_v18 }
 0xd7a   :  { %v4683_v2 = vmul.f32 %v9733_v12, %v4682_v0 }
 0xd7b   :  { %v4737_v39 = vor.u32 1.1754944e-38, %v4736_v54  ;;  %vm4735_vm15 = vcmp.eq.f32.partialorder %v4734_v49, 8.507059e+37 }
 0xd7c   :  { %v4684_v46 = vadd.f32 %v9733_v12, %v4683_v2 }
 0xd7e   :  { %v4688_v27 = vsel %vm4687_vm10, %v9733_v12, %v4684_v46 }
 0xd7f   :  { %v9735_v53 = vpop.eup %9734  ;;  %v4693_v32 = vsel %vm4690_vm11, %v4692_v47, %v4688_v27 }
 0xd80   :  { %v4694_v16 = vmul.f32 %v4693_v32, %v4666_v30  ;;  %v4726_v6 = vmul.f32 %v9735_v53, %v4724_v50  ;;  %vm4731_vm12 = vweird.f32 %v9735_v53 }
 0xd81   :  { %vm4732_vm14 = vmor %vm4730_vm13, %vm4731_vm12 }
 0xd82   :  { %v11388_v61 = vadd.f32 %v10281_v21, %v4694_v16  ;;  %v4727_v26 = vsub.f32 1.0, %v4726_v6  ;;  %v4881_v16 = vld [vmem:[%s10325_s29] sm:$0xff] }
 0xd84   :  { %v4744_v33 = vpack.c.bf16 %v11388_v61, %v11388_v61  ;;  %4854 = vst [vmem:[#allocation6] sm:$0xff] %v11388_v61  ;;  %v4728_v57 = vmul.f32 %v9735_v53, %v4727_v26  ;;  %v9892_v26 = vmov 0.0  }
 0xd86   :  { %4817 = vmatmul.bf16.vlgmr.msrb.gmra.mxu2 %v4744_v33  ;;  %v4729_v22 = vadd.f32 %v9735_v53, %v4728_v57 }
 0xd88   :  { %v4733_v24 = vsel %vm4732_vm14, %v9735_v53, %v4729_v22 }
 0xd89   :  { %v4738_v59 = vsel %vm4735_vm15, %v4737_v39, %v4733_v24 }
 0xd8a   :  { %v4739_v7 = vmul.f32 %v4738_v59, %v4711_v10 }
 0xd8c   :  { %v11397_v14 = vadd.f32 %v4741_v51, %v4739_v7 }
 0xd8e   :  { %4855 = vst [vmem:[#allocation7] sm:$0xff] %v11397_v14 }
 0xe09   :  { %v4818_v37 = vpop.f32.mrf.mxu2 }
 0xe0a   :  { %v4819_v62 = vadd.f32 %v10298_v28, %v4818_v37 }
 0xe0c   :  { %v4822_v38 = vmax.f32 %v4819_v62, 0.0  ;;  %v4858_v62 = vld [vmem:[#allocation4] sm:$0xff] }
 0xe0e   :  { %v4823_v40 = vmul.f32 %v10303_v35, %v4822_v38  ;;  %v4873_v38 = vld [vmem:[#allocation5] sm:$0xff] }
 0xe10   :  { %4824 = vadd.xlane.f32.xlu0 %v4823_v40 }
 0xe11   :  { %v4820_v5 = vpop.f32.mrf.mxu2 }
 0xe83   :  { %v4825_v4 = vpop.xlane.xlu0 %4824 }
 0xe84   :  { %v4826_v15 = vadd.f32 %v10313_v42, %v4825_v4 }
 0xe86   :  { %v8242_v60 = vmul.f32 -1.442695, %v4826_v15 }
 0xe88   :  { %9736 = vpow2.f32 %v8242_v60 }
 0xe8e   :  { %v9737_v58 = vpop.eup %9736 }
 0xe8f   :  { %v4830_v3 = vadd.f32 1.0, %v9737_v58 }
 0xe91   :  { %9738 = vrcp.f32 %v4830_v3  ;;  %v4842_v9 = vand.u32 2147483648, %v4830_v3  ;;  %v4840_v50 = vand.u32 2147483647, %v4830_v3  ;;  %vm4836_vm1 = vweird.f32 %v4830_v3 }
 0xe93   :  { %v4843_v19 = vor.u32 1.1754944e-38, %v4842_v9  ;;  %vm4841_vm4 = vcmp.eq.f32.partialorder %v4840_v50, 8.507059e+37 }
 0xe97   :  { %v9739_v52 = vpop.eup %9738 }
 0xe98   :  { %v4832_v45 = vmul.f32 %v9739_v52, %v4830_v3  ;;  %vm4837_vm0 = vweird.f32 %v9739_v52 }
 0xe99   :  { %vm4838_vm3 = vmor %vm4836_vm1, %vm4837_vm0 }
 0xe9a   :  { %v4833_v12 = vsub.f32 1.0, %v4832_v45 }
 0xe9c   :  { %v4834_v56 = vmul.f32 %v9739_v52, %v4833_v12 }
 0xe9e   :  { %v4835_v0 = vadd.f32 %v9739_v52, %v4834_v56 }
 0xea0   :  { %v4839_v2 = vsel %vm4838_vm3, %v9739_v52, %v4835_v0 }
 0xea1   :  { %v4844_v55 = vsel %vm4841_vm4, %v4843_v19, %v4839_v2 }
 0xea2   :  { %v4847_v46 = vmul.f32 %v4846_v1, %v4844_v55  ;;  %v4882_v47 = vsub.f32 1.0, %v4844_v55 }
 0xea4   :  { %v4883_v30 = vmul.f32 3.0, %v4882_v47  ;;  %4861 = vperm.xlu0 %9631, %v4847_v46   ;;  %v4848_v27 = vmul.f32 %v4847_v46, %v3079_v29 }
 0xea6   :  { %v4884_v53 = vadd.f32 1.0, %v4883_v30  ;;  %v4849_v32 = vadd.f32 %v4848_v27, %v3080_v63 }
 0xea8   :  { %v4885_v6 = vmul.f32 %v4884_v53, %v3079_v29  ;;  %vm4850_vm5 = vcmp.lt.f32.partialorder %v4849_v32, 0.9  ;;  %4856 = vst.msk [vmem:[#allocation2] sm:$0xff] %vm1139_vm2, %v4849_v32 }
 0xea9   :  { %v8243_v43 = vsel %vm4850_vm5, 1.0, %v9892_v26 }
 0xeaa   :  { %v4886_v20 = vadd.f32 %v4885_v6, %v4881_v16  ;;  %v4853_v54 = vmul.f32 %v8243_v43, %v3079_v29 }
 0xeac   :  { %4887 = vst.msk [vmem:[%s10325_s29] sm:$0xff] %vm1139_vm2, %v4886_v20  ;;  %v4888_v33 = vsel %vm1139_vm2, %v4853_v54, -inf }
 0xead   :  { %4889 = vmax.xlane.f32.xlu1 %v4888_v33  ;;  %4857 = vst.msk [vmem:[#allocation3] sm:$0xff] %vm1139_vm2, %v4853_v54 }
 0xec6   :  { %4867 = vperm.xlu1 %9629, %v3079_v29  }
 0xf16   :  { %v4862_v59 = vpop.permute.xlu0 %4861 }
 0xf17   :  { %v4864_v7 = vmul.f32 %v4862_v59, %v11388_v61  ;;  %v4874_v37 = vmul.f32 %v4862_v59, %v11397_v14 }
 0xf20   :  { %v4890_v57 = vpop.xlane.xlu1 %4889 }
 0xf21   :  { %v4891_v49 = vrot.slane %v4890_v57, 4 }
 0xf23   :  { %v4892_v22 = vmax.f32 %v4890_v57, %v4891_v49 }
 0xf25   :  { %v4893_v39 = vrot.slane %v4892_v22, 2 }
 0xf27   :  { %v4894_v10 = vmax.f32 %v4892_v22, %v4893_v39 }
 0xf29   :  { %v4895_v24 = vrot.slane %v4894_v10, 1 }
 0xf2b   :  { %v4896_v51 = vmax.f32 %v4894_v10, %v4895_v24 }
 0xf2d   :  { %9441 = vpush %v4896_v51 }
 0xf38   :  { %v4868_v40 = vpop.permute.xlu1 %4867 }
 0xf39   :  { %v4870_v5 = vmul.f32 %v4868_v40, %v4864_v7  ;;  %v4875_v4 = vmul.f32 %v4874_v37, %v4868_v40 }
 0xf3b   :  { %v4871_v15 = vadd.f32 %v4870_v5, %v4858_v62  ;;  %v4876_v17 = vadd.f32 %v4875_v4, %v4873_v38 }
 0xf3d   :  { %4872 = vst [vmem:[#allocation4] sm:$0xff] %v4871_v15 }
 0xf3e   :  { %4877 = vst [vmem:[#allocation5] sm:$0xff] %v4876_v17 }
 0xf5e   :  { %s9442_s13 = spop %9441 }
 0xf5f   :  { %4898 = sst [smem:[#allocation8]] %s9442_s13 }
 0xf60 PF:  { %s4899_s17 = sld [smem:[#allocation8]] }
 0xf66   :  { %p4900_p2 = scmp.gt.f32.partialorder %s4899_s17, 0.0 }
 0xf67   :  { %v9090_v61 = vld [vmem:[%s9918_s18 + $0x38] sm:$0xff] (%p4900_p2)  ;;  %v9089_v14 = vld [vmem:[%s9918_s18 + $0x30] sm:$0xff] (%p4900_p2)  ;;  %v8422_v29 = vld [vmem:[%s9946_s15 + $0xe0] sm:$0xf] (%p4900_p2)  ;;  %vm5926_vm6 = vcmask (%p4900_p2), 1041409   ;;  %vm5928_vm7 = vcmask (%p4900_p2), 1042434  }
 0xf68   :  { %4903 = sbr.rel (!%p4900_p2) target bundleno = 5448 (0x1548), region = 129  ;;  %4973 = vmatpush.bf16.msra.mxu0 (%p4900_p2), %v9090_v61  ;;  %v9098_v60 = vld [vmem:[%s9923_s22 + $0x38] sm:$0xff] (%p4900_p2)  ;;  %v9161_v18 = vld [vmem:[%s9946_s15 + $0xec] sm:$0xf0] (%p4900_p2)  ;;  %v9159_v52 = vld [vmem:[%s9946_s15 + $0xe4] sm:$0xf] (%p4900_p2) }
 0xf69   :  { %5055 = vmatpush.bf16.msra.mxu1 (%p4900_p2), %v9098_v60  ;;  %v9097_v58 = vld [vmem:[%s9923_s22 + $0x30] sm:$0xff] (%p4900_p2)  ;;  %v8423_v3 = vor.u32 (%p4900_p2), %v9161_v18, %v8422_v29  ;;  %v9088_v12 = vld [vmem:[%s9918_s18 + $0x28] sm:$0xff] (%p4900_p2)  ;;  %v8406_v9 = vld [vmem:[%s9946_s15 + $0xc0] sm:$0xf] (%p4900_p2)  ;;  %vm5930_vm8 = vcmask (%p4900_p2), 1043459   ;;  %vm5932_vm9 = vcmask (%p4900_p2), 1044484  }
 0xf6a   :  { %v8424_v45 = vld [vmem:[%s9946_s15 + $0xf0] sm:$0xf0] (%p4900_p2)  ;;  %v9157_v56 = vld [vmem:[%s9946_s15 + $0xcc] sm:$0xf0] (%p4900_p2)  ;;  %v9155_v50 = vld [vmem:[%s9946_s15 + $0xc4] sm:$0xf] (%p4900_p2) }
 0xf6b   :  { %v8427_v63 = vor.u32 (%p4900_p2), %v9159_v52, %v8424_v45  ;;  %5858 = vmatpush.bf16.msra.mxu2 (%p4900_p2), %v8423_v3  ;;  %v8408_v0 = vld [vmem:[%s9946_s15 + $0xd0] sm:$0xf0] (%p4900_p2)  ;;  %v9096_v1 = vld [vmem:[%s9923_s22 + $0x28] sm:$0xff] (%p4900_p2)  ;;  %v8407_v19 = vor.u32 (%p4900_p2), %v9157_v56, %v8406_v9  ;;  %v8390_v55 = vld [vmem:[%s9946_s15 + $0xa0] sm:$0xf] (%p4900_p2)  ;;  %vm5934_vm10 = vcmask (%p4900_p2), 1045509  }
 0xf6c   :  { %4974 = vmatpush.bf16.msra.mxu0 (%p4900_p2), %v9089_v14  ;;  %v8411_v2 = vor.u32 (%p4900_p2), %v9155_v50, %v8408_v0  ;;  %v9153_v46 = vld [vmem:[%s9946_s15 + $0xac] sm:$0xf0] (%p4900_p2)  ;;  %v9151_v47 = vld [vmem:[%s9946_s15 + $0xa4] sm:$0xf] (%p4900_p2)  ;;  %v8392_v27 = vld [vmem:[%s9946_s15 + $0xb0] sm:$0xf0] (%p4900_p2) }
 0xf6d   :  { %5871 = vmatpush.bf16.msra.mxu3 %v8427_v63  ;;  %5056 = vmatpush.bf16.msra.mxu1 %v9097_v58  ;;  %v9087_v30 = vld [vmem:[%s9918_s18 + $0x20] sm:$0xff]  ;;  %v8391_v53 = vor.u32 %v9153_v46, %v8390_v55  ;;  %v8395_v32 = vor.u32 %v9151_v47, %v8392_v27  ;;  %v9149_v6 = vld [vmem:[%s9946_s15 + $0x8c] sm:$0xf0]  ;;  %v8376_v20 = vld [vmem:[%s9946_s15 + $0x90] sm:$0xf0]  ;;  %vm5936_vm11 = vcmask 1046534  }
 0xf6e   :  { %v8374_v16 = vld [vmem:[%s9946_s15 + $0x80] sm:$0xf]  ;;  %v9147_v43 = vld [vmem:[%s9946_s15 + $0x84] sm:$0xf]  ;;  %v9086_v54 = vld [vmem:[%s9918_s18 + $0x18] sm:$0xff]  ;;  %vm5938_vm12 = vcmask 1047559  }
 0xf6f   :  { %5859 = vmatpush.bf16.msra.mxu2 %v8407_v19  ;;  %v9095_v26 = vld [vmem:[%s9923_s22 + $0x20] sm:$0xff]  ;;  %v8375_v33 = vor.u32 %v9149_v6, %v8374_v16  ;;  %v8379_v57 = vor.u32 %v9147_v43, %v8376_v20  ;;  %v9145_v22 = vld [vmem:[%s9946_s15 + $0x6c] sm:$0xf0]  ;;  %v9094_v39 = vld [vmem:[%s9923_s22 + $0x18] sm:$0xff] }
 0xf70   :  { %4975 = vmatpush.bf16.msra.mxu0 %v9088_v12  ;;  %v8358_v49 = vld [vmem:[%s9946_s15 + $0x60] sm:$0xf]  ;;  %v9143_v10 = vld [vmem:[%s9946_s15 + $0x64] sm:$0xf]  ;;  %v8360_v24 = vld [vmem:[%s9946_s15 + $0x70] sm:$0xf0] }
 0xf71   :  { %5872 = vmatpush.bf16.msra.mxu3 %v8411_v2  ;;  %5057 = vmatpush.bf16.msra.mxu1 %v9096_v1  ;;  %v9085_v51 = vld [vmem:[%s9918_s18 + $0x10] sm:$0xff]  ;;  %v8359_v59 = vor.u32 %v9145_v22, %v8358_v49  ;;  %v8363_v7 = vor.u32 %v9143_v10, %v8360_v24  ;;  %v8342_v37 = vld [vmem:[%s9946_s15 + $0x40] sm:$0xf]  ;;  %v9139_v40 = vld [vmem:[%s9946_s15 + $0x44] sm:$0xf] }
 0xf72   :  { %v9141_v62 = vld [vmem:[%s9946_s15 + $0x4c] sm:$0xf0]  ;;  %v8344_v5 = vld [vmem:[%s9946_s15 + $0x50] sm:$0xf0]  ;;  %v9084_v4 = vld [vmem:[%s9918_s18 + $0x8] sm:$0xff] }
 0xf73   :  { %5860 = vmatpush.bf16.msra.mxu2 %v8391_v53  ;;  %v9093_v38 = vld [vmem:[%s9923_s22 + $0x10] sm:$0xff]  ;;  %v8343_v15 = vor.u32 %v9141_v62, %v8342_v37  ;;  %v8430_v17 = vld [vmem:[%s9946_s15 + $0xe8] sm:$0xf]  ;;  %v9162_v61 = vld [vmem:[%s9946_s15 + $0xf4] sm:$0xf0]  ;;  %v8347_v14 = vor.u32 %v9139_v40, %v8344_v5 }
 0xf74   :  { %4976 = vmatpush.bf16.msra.mxu0 %v9087_v30  ;;  %v9092_v60 = vld [vmem:[%s9923_s22 + $0x8] sm:$0xff]  ;;  %v9083_v29 = vld [vmem:[%s9918_s18] sm:$0xff]  ;;  %v8431_v58 = vor.u32 %v9162_v61, %v8430_v17  ;;  %v8432_v52 = vld [vmem:[%s9946_s15 + $0xf8] sm:$0xf0] }
 0xf75   :  { %5873 = vmatpush.bf16.msra.mxu3 %v8395_v32  ;;  %5058 = vmatpush.bf16.msra.mxu1 %v9095_v26  ;;  %v4906_v18 = vld [vmem:[#allocation6] sm:$0xff]  ;;  %v9160_v3 = vld [vmem:[%s9946_s15 + $0xec] sm:$0xf]  ;;  %v8414_v45 = vld [vmem:[%s9946_s15 + $0xc8] sm:$0xf] }
 0xf76   :  { %v9158_v12 = vld [vmem:[%s9946_s15 + $0xd4] sm:$0xf0]  ;;  %v11459_v63 = vpack.c.bf16 %v4906_v18, %v4906_v18  ;;  %v9091_v9 = vld [vmem:[%s9923_s22] sm:$0xff]  ;;  %v8435_v56 = vor.u32 %v9160_v3, %v8432_v52  ;;  %v9156_v0 = vld [vmem:[%s9946_s15 + $0xcc] sm:$0xf] }
 0xf77   :  { %5861 = vmatpush.bf16.msra.mxu2 %v8375_v33  ;;  %v8415_v50 = vor.u32 %v9158_v12, %v8414_v45  ;;  %v8416_v1 = vld [vmem:[%s9946_s15 + $0xd8] sm:$0xf0]  ;;  %v8398_v19 = vld [vmem:[%s9946_s15 + $0xa8] sm:$0xf]  ;;  %v9154_v2 = vld [vmem:[%s9946_s15 + $0xb4] sm:$0xf0] }
 0xf78   :  { %4977 = vmatpush.bf16.msra.mxu0 %v9086_v54  ;;  %v8419_v55 = vor.u32 %v9156_v0, %v8416_v1  ;;  %v8399_v46 = vor.u32 %v9154_v2, %v8398_v19  ;;  %v8382_v47 = vld [vmem:[%s9946_s15 + $0x88] sm:$0xf]  ;;  %v9150_v30 = vld [vmem:[%s9946_s15 + $0x94] sm:$0xf0]  ;;  %v8326_v20 = vld [vmem:[%s9946_s15 + $0x20] sm:$0xf] }
 0xf79   :  { %5874 = vmatpush.bf16.msra.mxu3 %v8379_v57  ;;  %5059 = vmatpush.bf16.msra.mxu1 %v9094_v39  ;;  %v8383_v27 = vor.u32 %v9150_v30, %v8382_v47  ;;  %v8366_v53 = vld [vmem:[%s9946_s15 + $0x68] sm:$0xf]  ;;  %v9146_v32 = vld [vmem:[%s9946_s15 + $0x74] sm:$0xf0]  ;;  %v9137_v54 = vld [vmem:[%s9946_s15 + $0x2c] sm:$0xf0] }
 0xf7a   :  { %v8367_v16 = vor.u32 %v9146_v32, %v8366_v53  ;;  %v8350_v6 = vld [vmem:[%s9946_s15 + $0x48] sm:$0xf]  ;;  %v9142_v26 = vld [vmem:[%s9946_s15 + $0x54] sm:$0xf0]  ;;  %v9135_v33 = vld [vmem:[%s9946_s15 + $0x24] sm:$0xf]  ;;  %v8327_v57 = vor.u32 %v9137_v54, %v8326_v20 }
 0xf7b   :  { %5862 = vmatpush.bf16.msra.mxu2 %v8359_v59  ;;  %v8351_v43 = vor.u32 %v9142_v26, %v8350_v6  ;;  %v8328_v49 = vld [vmem:[%s9946_s15 + $0x30] sm:$0xf0]  ;;  %v8334_v22 = vld [vmem:[%s9946_s15 + $0x28] sm:$0xf]  ;;  %v9138_v39 = vld [vmem:[%s9946_s15 + $0x34] sm:$0xf0] }
 0xf7c   :  { %4978 = vmatpush.bf16.msra.mxu0 %v9085_v51  ;;  %v8331_v10 = vor.u32 %v9135_v33, %v8328_v49  ;;  %v8335_v24 = vor.u32 %v9138_v39, %v8334_v22  ;;  %v9152_v51 = vld [vmem:[%s9946_s15 + $0xac] sm:$0xf]  ;;  %v8400_v59 = vld [vmem:[%s9946_s15 + $0xb8] sm:$0xf0]  ;;  %v8310_v37 = vld [vmem:[%s9946_s15] sm:$0xf] }
 0xf7d   :  { %5875 = vmatpush.bf16.msra.mxu3 %v8363_v7  ;;  %5060 = vmatpush.bf16.msra.mxu1 %v9093_v38  ;;  %v8403_v7 = vor.u32 %v9152_v51, %v8400_v59  ;;  %v9133_v62 = vld [vmem:[%s9946_s15 + $0xc] sm:$0xf0]  ;;  %v9131_v38 = vld [vmem:[%s9946_s15 + $0x4] sm:$0xf]  ;;  %v8312_v5 = vld [vmem:[%s9946_s15 + $0x10] sm:$0xf0] }
 0xf7e   :  { %v8311_v40 = vor.u32 %v9133_v62, %v8310_v37  ;;  %v8315_v17 = vor.u32 %v9131_v38, %v8312_v5  ;;  %v9144_v18 = vld [vmem:[%s9946_s15 + $0x6c] sm:$0xf]  ;;  %v8352_v45 = vld [vmem:[%s9946_s15 + $0x58] sm:$0xf0]  ;;  %v9332_v53 = vld [vmem:[%s9908_s10] sm:$0xff]  }
 0xf7f   :  { %5863 = vmatpush.bf16.msra.mxu2 %v8343_v15  ;;  %v9134_v15 = vld [vmem:[%s9946_s15 + $0x14] sm:$0xf0]  ;;  %v9140_v52 = vld [vmem:[%s9946_s15 + $0x4c] sm:$0xf]  ;;  %v8320_v1 = vld [vmem:[%s9946_s15 + $0x18] sm:$0xf0]  ;;  %v9333_v20 = vunpack.c.l.bf16 %v9332_v53 }
 0xf80   :  { %4979 = vmatpush.bf16.msra.mxu0 %v9084_v4  ;;  %v8318_v4 = vld [vmem:[%s9946_s15 + $0x8] sm:$0xf]  ;;  %v8355_v12 = vor.u32 %v9140_v52, %v8352_v45  ;;  %v9132_v0 = vld [vmem:[%s9946_s15 + $0xc] sm:$0xf]  ;;  %v9424_v32 = vld [vmem:[%s9908_s10 + $0x10] sm:$0xff]  }
 0xf81   :  { %5876 = vmatpush.bf16.msra.mxu3 %v8347_v14  ;;  %5061 = vmatpush.bf16.msra.mxu1 %v9092_v60  ;;  %v8319_v61 = vor.u32 %v9134_v15, %v8318_v4  ;;  %v9148_v14 = vld [vmem:[%s9946_s15 + $0x8c] sm:$0xf]  ;;  %v8384_v60 = vld [vmem:[%s9946_s15 + $0x98] sm:$0xf0]  ;;  %v8323_v19 = vor.u32 %v9132_v0, %v8320_v1  ;;  %v9342_v37 = vunpack.c.h.bf16 %v9424_v32  ;;  %v11515_v15 = vperm.slane %v9970_v11, 0 }
 0xf82   :  { %v9423_v6 = vld [vmem:[%s9908_s10 + $0x8] sm:$0xff]  }
 0xf83   :  { %5864 = vmatpush.bf16.msra.mxu2 %v8327_v57  ;;  %v9337_v57 = vunpack.c.l.bf16 %v9423_v6  ;;  %v9338_v38 = vunpack.c.h.bf16 %v9423_v6 }
 0xf84   :  { %4980 = vmatpush.bf16.msra.mxu0 %v9083_v29  ;;  %v8387_v29 = vor.u32 %v9148_v14, %v8384_v60 }
 0xf85   :  { %5062 = vmatpush.bf16.msra.mxu1 %v9091_v9  ;;  %5877 = vmatpush.bf16.msra.mxu3 %v8331_v10  ;;  %v9136_v9 = vld [vmem:[%s9946_s15 + $0x2c] sm:$0xf]  ;;  %v9334_v10 = vunpack.c.h.bf16 %v9332_v53 }
 0xf86   :  { %v9427_v53 = vld [vmem:[%s9908_s10 + $0x28] sm:$0xff]  }
 0xf87   :  { %4981 = vmatmul.bf16.vlgmr.msra.gmra.mxu0 %v11459_v63  ;;  %5865 = vmatpush.bf16.msra.mxu2 %v8311_v40 }
 0xf88   :  { %5884 = vmatpush.bf16.msrb.mxu0 %v8431_v58  ;;  %v8368_v58 = vld [vmem:[%s9946_s15 + $0x78] sm:$0xf0] }
 0xf89   :  { %5897 = vmatpush.bf16.msrb.mxu1 %v8435_v56  ;;  %5878 = vmatpush.bf16.msra.mxu3 %v8315_v17  ;;  %v8371_v3 = vor.u32 %v9144_v18, %v8368_v58  ;;  %v8336_v56 = vld [vmem:[%s9946_s15 + $0x38] sm:$0xf0] }
 0xf8a   :  { %v9425_v17 = vld [vmem:[%s9908_s10 + $0x18] sm:$0xff]  }
 0xf8b   :  { %v9345_v58 = vunpack.c.l.bf16 %v9425_v17 }
 0xf8c   :  { %5885 = vmatpush.bf16.msrb.mxu0 %v8415_v50  ;;  %v8339_v50 = vor.u32 %v9136_v9, %v8336_v56 }
 0xf8d   :  { %5898 = vmatpush.bf16.msrb.mxu1 %v8419_v55 }
 0xf90   :  { %5886 = vmatpush.bf16.msrb.mxu0 %v8399_v46 }
 0xf91   :  { %5899 = vmatpush.bf16.msrb.mxu1 %v8403_v7 }
 0xf94   :  { %5887 = vmatpush.bf16.msrb.mxu0 %v8383_v27  ;;  %v5005_v27 = vperm.slane %v9962_v8, 0 }
 0xf95   :  { %5900 = vmatpush.bf16.msrb.mxu1 %v8387_v29  ;;  %v9426_v29 = vld [vmem:[%s9908_s10 + $0x20] sm:$0xff]  }
 0xf96   :  { %v9349_v56 = vunpack.c.l.bf16 %v9426_v29 }
 0xf98   :  { %5888 = vmatpush.bf16.msrb.mxu0 %v8367_v16 }
 0xf99   :  { %5901 = vmatpush.bf16.msrb.mxu1 %v8371_v3 }
 0xf9c   :  { %5889 = vmatpush.bf16.msrb.mxu0 %v8351_v43 }
 0xf9d   :  { %5902 = vmatpush.bf16.msrb.mxu1 %v8355_v12 }
 0xfa0   :  { %5890 = vmatpush.bf16.msrb.mxu0 %v8335_v24 }
 0xfa1   :  { %5903 = vmatpush.bf16.msrb.mxu1 %v8339_v50 }
 0xfa4   :  { %5891 = vmatpush.bf16.msrb.mxu0 %v8319_v61 }
 0xfa5   :  { %5904 = vmatpush.bf16.msrb.mxu1 %v8323_v19  ;;  %v9346_v19 = vunpack.c.h.bf16 %v9425_v17 }
0x1004   :  { %v4982_v2 = vpop.f32.mrf.mxu0 }
0x1005   :  { %v4983_v55 = vadd.f32 %v4982_v2, %v10301_v34  ;;  %v9341_v34 = vunpack.c.l.bf16 %v9424_v32 }
0x1007   :  { %v4986_v46 = vmax.f32 %v4983_v55, 0.0 }
0x1009   :  { %v4987_v47 = vpack.c.bf16 %v4986_v46, %v4986_v46 }
0x100b   :  { %5063 = vmatmul.bf16.vlgmr.msra.gmra.mxu1 %v4987_v47  ;;  %5866 = vmatmul.bf16.vlgmr.msra.gmra.mxu2 %v4987_v47 }
0x100c   :  { %5879 = vmatmul.bf16.vlgmr.msra.gmra.mxu3 %v4987_v47  ;;  %5892 = vmatmul.bf16.vlgmr.msrb.gmra.mxu0 %v4987_v47  ;;  %v4984_v30 = vpop.f32.mrf.mxu0 }
0x101b   :  { %5905 = vmatmul.bf16.vlgmr.msrb.gmra.mxu1 %v4987_v47 }
0x1088   :  { %v5064_v16 = vpop.f32.mrf.mxu1 }
0x1089   :  { %v11502_v26 = vadd.f32 %v5064_v16, %v5005_v27  ;;  %v11504_v43 = vpop.f32.mrf.mxu0  ;;  %v9350_v16 = vunpack.c.h.bf16 %v9426_v29 }
0x108b   :  { %v5108_v54 = vperm.slane %v11502_v26, 0  ;;  %v5086_v33 = vrot.slane %v11502_v26, 2  ;;  %v5085_v49 = vrot.slane %v11502_v26, 1  ;;  %v5087_v4 = vrot.slane %v11502_v26, 3 }
0x108c   :  { %v5088_v14 = vrot.slane %v11502_v26, 4  ;;  %v5089_v30 = vrot.slane %v11502_v26, 5 }
0x108d   :  { %v5124_v22 = vadd.f32 %v9333_v20, %v5108_v54  ;;  %v5110_v39 = vperm.slane %v5086_v33, 0  ;;  %v5109_v8 = vperm.slane %v5085_v49, 0  ;;  %v5125_v5 = vadd.f32 %v9334_v10, %v5108_v54  ;;  %v9428_v10 = vld [vmem:[%s9908_s10 + $0x30] sm:$0xff]  }
0x108e   :  { %v11509_v24 = vpop.f32.mrf.mxu2  ;;  %v5111_v3 = vperm.slane %v5087_v4, 0  ;;  %v5112_v11 = vperm.slane %v5088_v14, 0  ;;  %v5113_v54 = vperm.slane %v5089_v30, 0  ;;  %v9353_v49 = vunpack.c.l.bf16 %v9427_v53 }
0x108f   :  { %v11511_v51 = vpop.f32.mrf.mxu3  ;;  %9743 = vtanh.f32 %v5124_v22  ;;  %v5128_v59 = vadd.f32 %v9341_v34, %v5110_v39  ;;  %v5126_v7 = vadd.f32 %v9337_v57, %v5109_v8  ;;  %v5129_v61 = vadd.f32 %v9342_v37, %v5110_v39 }
0x1090   :  { %v5066_v62 = vpop.f32.mrf.mxu1  ;;  %v5127_v60 = vadd.f32 %v9338_v38, %v5109_v8  ;;  %v5130_v55 = vadd.f32 %v9345_v58, %v5111_v3  ;;  %v5132_v47 = vadd.f32 %v9349_v56, %v5112_v11  ;;  %v5131_v27 = vadd.f32 %v9346_v19, %v5111_v3  ;;  %v9429_v38 = vld [vmem:[%s9908_s10 + $0x38] sm:$0xff]  }
0x1091   :  { %v5895_v40 = vpop.f32.mrf.mxu0  ;;  %9745 = vtanh.f32 %v5128_v59  ;;  %v9354_v34 = vunpack.c.h.bf16 %v9427_v53  ;;  %v5133_v39 = vadd.f32 %v9350_v16, %v5112_v11  ;;  %v5090_v8 = vrot.slane %v11502_v26, 6 }
0x1092   :  { %9747 = vtanh.f32 %v5126_v7  ;;  %v5091_v37 = vrot.slane %v11502_v26, 7  ;;  %v5134_v62 = vadd.f32 %v9353_v49, %v5113_v54  ;;  %v9361_v14 = vunpack.c.l.bf16 %v9429_v38 }
0x1093   :  { %9749 = vtanh.f32 %v5125_v5  ;;  %v5135_v7 = vadd.f32 %v9354_v34, %v5113_v54  ;;  %v9357_v5 = vunpack.c.l.bf16 %v9428_v10  ;;  %v5114_v4 = vperm.slane %v5090_v8, 0 }
0x1094   :  { %9751 = vtanh.f32 %v5129_v61 }
0x1095   :  { %v9744_v18 = vpop.eup %9743  ;;  %9753 = vtanh.f32 %v5127_v60  ;;  %v5115_v60 = vperm.slane %v5091_v37, 0  ;;  %v5136_v26 = vadd.f32 %v9357_v5, %v5114_v4 }
0x1096   :  { %v5869_v52 = vpop.f32.mrf.mxu2  ;;  %v5159_v45 = vmul.f32 %v9744_v18, %v11515_v15  ;;  %9755 = vtanh.f32 %v5130_v55  ;;  %v9358_v18 = vunpack.c.h.bf16 %v9428_v10 }
0x1097   :  { %v9746_v12 = vpop.eup %9745  ;;  %v5882_v9 = vpop.f32.mrf.mxu3  ;;  %9757 = vtanh.f32 %v5132_v47  ;;  %v5138_v52 = vadd.f32 %v9361_v14, %v5115_v60 }
0x1098   :  { %v9748_v50 = vpop.eup %9747  ;;  %v11521_v0 = vpop.f32.mrf.mxu1  ;;  %5175 = vadd.xlane.f32.xlu0 %v5159_v45  ;;  %v5163_v1 = vmul.f32 %v9746_v12, %v11515_v15  ;;  %9759 = vtanh.f32 %v5131_v27  ;;  %v5137_v45 = vadd.f32 %v9358_v18, %v5114_v4  ;;  %v9362_v9 = vunpack.c.h.bf16 %v9429_v38 }
0x1099   :  { %v5161_v2 = vmul.f32 %v9748_v50, %v11515_v15  ;;  %v9750_v46 = vpop.eup %9749  ;;  %9761 = vtanh.f32 %v5133_v39 }
0x109a   :  { %5183 = vadd.xlane.f32.xlu2 %v5163_v1  ;;  %v9752_v32 = vpop.eup %9751  ;;  %v5160_v20 = vmul.f32 %v9750_v46, %v11515_v15  ;;  %9763 = vtanh.f32 %v5135_v7  ;;  %v5139_v19 = vadd.f32 %v9362_v9, %v5115_v60 }
0x109b   :  { %5179 = vadd.xlane.f32.xlu1 %v5161_v2  ;;  %v9754_v6 = vpop.eup %9753  ;;  %v5164_v57 = vmul.f32 %v9752_v32, %v11515_v15  ;;  %9765 = vtanh.f32 %v5134_v62 }
0x109c   :  { %v5162_v22 = vmul.f32 %v9754_v6, %v11515_v15  ;;  %v9756_v59 = vpop.eup %9755  ;;  %9767 = vtanh.f32 %v5136_v26 }
0x109d   :  { %v9758_v40 = vpop.eup %9757  ;;  %v5165_v61 = vmul.f32 %v9756_v59, %v11515_v15  ;;  %9769 = vtanh.f32 %v5138_v52 }
0x109e   :  { %v9760_v17 = vpop.eup %9759  ;;  %v5167_v29 = vmul.f32 %v9758_v40, %v11515_v15  ;;  %9771 = vtanh.f32 %v5137_v45 }
0x109f   :  { %v5166_v58 = vmul.f32 %v9760_v17, %v11515_v15  ;;  %v9762_v3 = vpop.eup %9761  ;;  %9773 = vtanh.f32 %v5139_v19 }
0x10a0   :  { %v5908_v33 = vpop.f32.mrf.mxu1  ;;  %5177 = vadd.xlane.f32.xlu0 %v5160_v20  ;;  %v9764_v12 = vpop.eup %9763  ;;  %v5168_v11 = vmul.f32 %v9762_v3, %v11515_v15  ;;  %v11545_v20 = vperm.slane %v10019_v44, 0 }
0x10a1   :  { %v9766_v56 = vpop.eup %9765  ;;  %v5170_v50 = vmul.f32 %v9764_v12, %v11515_v15 }
0x10a2   :  { %5185 = vadd.xlane.f32.xlu2 %v5164_v57  ;;  %v5169_v1 = vmul.f32 %v9766_v56, %v11515_v15  ;;  %v9768_v2 = vpop.eup %9767 }
0x10a3   :  { %5181 = vadd.xlane.f32.xlu1 %v5162_v22  ;;  %v9770_v55 = vpop.eup %9769  ;;  %v5171_v47 = vmul.f32 %v9768_v2, %v11515_v15 }
0x10a4   :  { %v9772_v46 = vpop.eup %9771  ;;  %v5173_v30 = vmul.f32 %v9770_v55, %v11515_v15 }
0x10a5   :  { %v5172_v27 = vmul.f32 %v9772_v46, %v11515_v15  ;;  %v9774_v53 = vpop.eup %9773 }
0x10a6   :  { %v5174_v32 = vmul.f32 %v9774_v53, %v11515_v15 }
0x10a8   :  { %5187 = vadd.xlane.f32.xlu0 %v5165_v61 }
0x10aa   :  { %5191 = vadd.xlane.f32.xlu2 %v5167_v29 }
0x10ab   :  { %5189 = vadd.xlane.f32.xlu1 %v5166_v58 }
0x10b0   :  { %5193 = vadd.xlane.f32.xlu0 %v5168_v11 }
0x10b2   :  { %5197 = vadd.xlane.f32.xlu2 %v5170_v50 }
0x10b3   :  { %5195 = vadd.xlane.f32.xlu1 %v5169_v1 }
0x10b8   :  { %5199 = vadd.xlane.f32.xlu0 %v5171_v47 }
0x10ba   :  { %5203 = vadd.xlane.f32.xlu2 %v5173_v30 }
0x10bb   :  { %5201 = vadd.xlane.f32.xlu1 %v5172_v27 }
0x10c0   :  { %5205 = vadd.xlane.f32.xlu0 %v5174_v32 }
0x110b   :  { %v5176_v16 = vpop.xlane.xlu0 %5175 }
0x110c   :  { %v5210_v54 = vadd.f32 %v11545_v20, %v5176_v16 }
0x110d   :  { %v5184_v6 = vpop.xlane.xlu2 %5183 }
0x110e   :  { %v5180_v34 = vpop.xlane.xlu1 %5179  ;;  %v11549_v57 = vadd.f32 %v11545_v20, %v5184_v6  ;;  %v5226_v15 = vsel %vm1139_vm2, %v5210_v54, -inf }
0x110f   :  { %v11553_v22 = vadd.f32 %v11545_v20, %v5180_v34 }
0x1110   :  { %v5244_v37 = vsel %vm1139_vm2, %v11549_v57, -inf }
0x1111   :  { %v5235_v38 = vsel %vm1139_vm2, %v11553_v22, -inf }
0x1113   :  { %v5178_v33 = vpop.xlane.xlu0 %5177 }
0x1114   :  { %v5211_v49 = vadd.f32 %v11545_v20, %v5178_v33 }
0x1115   :  { %v5186_v39 = vpop.xlane.xlu2 %5185 }
0x1116   :  { %v5227_v8 = vsel %vm1139_vm2, %v5211_v49, -inf  ;;  %v5215_v44 = vadd.f32 %v11545_v20, %v5186_v39  ;;  %v5182_v10 = vpop.xlane.xlu1 %5181 }
0x1117   :  { %v5228_v59 = vmax.f32 %v5226_v15, %v5227_v8  ;;  %v5213_v7 = vadd.f32 %v11545_v20, %v5182_v10 }
0x1118   :  { %v5245_v62 = vsel %vm1139_vm2, %v5215_v44, -inf }
0x1119   :  { %v5229_v40 = vrot.slane %v5228_v59, 4  ;;  %v5246_v5 = vmax.f32 %v5244_v37, %v5245_v62  ;;  %v5236_v4 = vsel %vm1139_vm2, %v5213_v7, -inf }
0x111a   :  { %v5237_v17 = vmax.f32 %v5235_v38, %v5236_v4 }
0x111b   :  { %v5230_v61 = vmax.f32 %v5228_v59, %v5229_v40  ;;  %v5247_v14 = vrot.slane %v5246_v5, 4  ;;  %v5188_v60 = vpop.xlane.xlu0 %5187 }
0x111c   :  { %v5238_v29 = vrot.slane %v5237_v17, 4  ;;  %v11566_v18 = vadd.f32 %v11545_v20, %v5188_v60 }
0x111d   :  { %v5231_v58 = vrot.slane %v5230_v61, 2  ;;  %v5248_v26 = vmax.f32 %v5246_v5, %v5247_v14  ;;  %v5192_v3 = vpop.xlane.xlu2 %5191 }
0x111e   :  { %v5239_v52 = vmax.f32 %v5237_v17, %v5238_v29  ;;  %v5190_v45 = vpop.xlane.xlu1 %5189  ;;  %v5253_v50 = vsel %vm1139_vm2, %v11566_v18, -inf  ;;  %v11574_v2 = vadd.f32 %v11545_v20, %v5192_v3 }
0x111f   :  { %v5232_v12 = vmax.f32 %v5230_v61, %v5231_v58  ;;  %v5249_v9 = vrot.slane %v5248_v26, 2  ;;  %v11569_v56 = vadd.f32 %v11545_v20, %v5190_v45 }
0x1120   :  { %v5240_v11 = vrot.slane %v5239_v52, 2  ;;  %v5262_v15 = vsel %vm1139_vm2, %v11574_v2, -inf }
0x1121   :  { %v5233_v1 = vrot.slane %v5232_v12, 1  ;;  %v5250_v19 = vmax.f32 %v5248_v26, %v5249_v9  ;;  %v5254_v55 = vsel %vm1139_vm2, %v11569_v56, -inf }
0x1122   :  { %v5241_v46 = vmax.f32 %v5239_v52, %v5240_v11  ;;  %v5255_v47 = vmax.f32 %v5253_v50, %v5254_v55 }
0x1123   :  { %v5234_v30 = vmax.f32 %v5232_v12, %v5233_v1  ;;  %v5251_v27 = vrot.slane %v5250_v19, 1  ;;  %v5194_v53 = vpop.xlane.xlu0 %5193 }
0x1124   :  { %v5242_v32 = vrot.slane %v5241_v46, 1  ;;  %v5256_v16 = vrot.slane %v5255_v47, 4  ;;  %v11579_v6 = vadd.f32 %v11545_v20, %v5194_v53 }
0x1125   :  { %v5298_v34 = vsub.f32 %v5210_v54, %v5234_v30  ;;  %v5299_v33 = vsub.f32 %v5211_v49, %v5234_v30  ;;  %v5252_v39 = vmax.f32 %v5250_v19, %v5251_v27  ;;  %v5198_v8 = vpop.xlane.xlu2 %5197 }
0x1126   :  { %v5243_v10 = vmax.f32 %v5241_v46, %v5242_v32  ;;  %v5257_v59 = vmax.f32 %v5255_v47, %v5256_v16  ;;  %v5263_v37 = vsel %vm1139_vm2, %v11579_v6, -inf  ;;  %v11586_v62 = vadd.f32 %v11545_v20, %v5198_v8  ;;  %v5196_v38 = vpop.xlane.xlu1 %5195 }
0x1127   :  { %v5314_v40 = vmul.f32 1.442695, %v5298_v34  ;;  %v5316_v5 = vmul.f32 1.442695, %v5299_v33  ;;  %v5302_v4 = vsub.f32 %v11549_v57, %v5252_v39  ;;  %v5303_v54 = vsub.f32 %v5215_v44, %v5252_v39 }
0x1128   :  { %v5300_v49 = vsub.f32 %v11553_v22, %v5243_v10  ;;  %v5301_v17 = vsub.f32 %v5213_v7, %v5243_v10  ;;  %v5258_v61 = vrot.slane %v5257_v59, 2  ;;  %v5264_v14 = vmax.f32 %v5262_v15, %v5263_v37 }
0x1129   :  { %9775 = vpow2.f32 %v5314_v40  ;;  %v5322_v60 = vmul.f32 1.442695, %v5302_v4  ;;  %v5324_v29 = vmul.f32 1.442695, %v5303_v54  ;;  %v5272_v45 = vsel %vm1139_vm2, %v11586_v62, -inf }
0x112a   :  { %9777 = vpow2.f32 %v5316_v5  ;;  %v5318_v58 = vmul.f32 1.442695, %v5300_v49  ;;  %v5320_v26 = vmul.f32 1.442695, %v5301_v17  ;;  %v5259_v3 = vmax.f32 %v5257_v59, %v5258_v61 }
0x112b   :  { %9779 = vpow2.f32 %v5322_v60  ;;  %v5265_v52 = vrot.slane %v5264_v14, 4  ;;  %v11593_v57 = vadd.f32 %v11545_v20, %v5196_v38  ;;  %v5200_v44 = vpop.xlane.xlu0 %5199 }
0x112c   :  { %9781 = vpow2.f32 %v5324_v29  ;;  %v5260_v22 = vrot.slane %v5259_v3, 1  ;;  %v11596_v7 = vadd.f32 %v11545_v20, %v5200_v44 }
0x112d   :  { %9783 = vpow2.f32 %v5318_v58  ;;  %v5266_v12 = vmax.f32 %v5264_v14, %v5265_v52  ;;  %v5271_v9 = vsel %vm1139_vm2, %v11593_v57, -inf  ;;  %v5204_v11 = vpop.xlane.xlu2 %5203 }
0x112e   :  { %9785 = vpow2.f32 %v5320_v26  ;;  %v5261_v50 = vmax.f32 %v5259_v3, %v5260_v22  ;;  %v5273_v1 = vmax.f32 %v5271_v9, %v5272_v45  ;;  %v5202_v19 = vpop.xlane.xlu1 %5201  ;;  %v5280_v47 = vsel %vm1139_vm2, %v11596_v7, -inf }
0x112f   :  { %v11600_v55 = vpop.eup %9775  ;;  %v5267_v46 = vrot.slane %v5266_v12, 2  ;;  %v11605_v30 = vadd.f32 %v11545_v20, %v5204_v11  ;;  %v11608_v27 = vadd.f32 %v11545_v20, %v5202_v19 }
0x1130   :  { %v11610_v53 = vpop.eup %9777  ;;  %v5346_v32 = vsel %vm1139_vm2, %v11600_v55, 0.0  ;;  %v5304_v16 = vsub.f32 %v11566_v18, %v5261_v50  ;;  %v5305_v34 = vsub.f32 %v11569_v56, %v5261_v50  ;;  %v5274_v33 = vrot.slane %v5273_v1, 4 }
0x1131   :  { %v11616_v39 = vpop.eup %9779  ;;  %v5347_v15 = vsel %vm1139_vm2, %v11610_v53, 0.0  ;;  %v5268_v8 = vmax.f32 %v5266_v12, %v5267_v46  ;;  %v5289_v10 = vsel %vm1139_vm2, %v11605_v30, -inf  ;;  %v5281_v59 = vsel %vm1139_vm2, %v11608_v27, -inf }
0x1132   :  { %v11624_v37 = vpop.eup %9781  ;;  %v5348_v38 = vadd.f32 %v5347_v15, %v5346_v32  ;;  %v5364_v18 = vsel %vm1139_vm2, %v11616_v39, 0.0  ;;  %v5326_v56 = vmul.f32 1.442695, %v5304_v16  ;;  %v5328_v40 = vmul.f32 1.442695, %v5305_v34 }
0x1133   :  { %v11628_v5 = vpop.eup %9783  ;;  %v5365_v4 = vsel %vm1139_vm2, %v11624_v37, 0.0  ;;  %v5269_v54 = vrot.slane %v5268_v8, 1  ;;  %v5275_v49 = vmax.f32 %v5273_v1, %v5274_v33  ;;  %v5282_v17 = vmax.f32 %v5280_v47, %v5281_v59  ;;  %v5206_v58 = vpop.xlane.xlu0 %5205 }
0x1134   :  { %v11632_v61 = vpop.eup %9785  ;;  %v5349_v14 = vrot.slane %v5348_v38, 4  ;;  %v5366_v60 = vadd.f32 %v5365_v4, %v5364_v18  ;;  %v5355_v29 = vsel %vm1139_vm2, %v11628_v5, 0.0  ;;  %9787 = vpow2.f32 %v5326_v56 }
0x1135   :  { %v5356_v26 = vsel %vm1139_vm2, %v11632_v61, 0.0  ;;  %9789 = vpow2.f32 %v5328_v40  ;;  %v5270_v3 = vmax.f32 %v5268_v8, %v5269_v54  ;;  %v5276_v52 = vrot.slane %v5275_v49, 2 }
0x1136   :  { %v5350_v45 = vadd.f32 %v5349_v14, %v5348_v38  ;;  %v5367_v44 = vrot.slane %v5366_v60, 4  ;;  %v5357_v22 = vadd.f32 %v5356_v26, %v5355_v29  ;;  %v5283_v12 = vrot.slane %v5282_v17, 4 }
0x1137   :  { %v5306_v9 = vsub.f32 %v11574_v2, %v5270_v3  ;;  %v5307_v11 = vsub.f32 %v11579_v6, %v5270_v3  ;;  %v5277_v50 = vmax.f32 %v5275_v49, %v5276_v52  ;;  %v11641_v1 = vadd.f32 %v11545_v20, %v5206_v58 }
0x1138   :  { %v5368_v19 = vadd.f32 %v5367_v44, %v5366_v60  ;;  %v5358_v46 = vrot.slane %v5357_v22, 4  ;;  %v5284_v47 = vmax.f32 %v5282_v17, %v5283_v12  ;;  %v9893_v15 = vmov 0  }
0x1139   :  { %v5330_v32 = vmul.f32 1.442695, %v5306_v9  ;;  %v5332_v16 = vmul.f32 1.442695, %v5307_v11  ;;  %v5278_v34 = vrot.slane %v5277_v50, 1  ;;  %v5290_v33 = vsel %vm1139_vm2, %v11641_v1, -inf  ;;  %9741 = vset.pattern.permute.xlu2 %v9893_v15  ;;  %9740 = vset.pattern.permute.xlu1 %v9893_v15 }
0x113a   :  { %v11645_v8 = vpop.eup %9787  ;;  %v5359_v2 = vadd.f32 %v5358_v46, %v5357_v22  ;;  %v5285_v6 = vrot.slane %v5284_v47, 2  ;;  %v5291_v59 = vmax.f32 %v5289_v10, %v5290_v33  ;;  %v5351_v38 = vrot.slane %v5350_v45, 2  ;;  %9742 = vset.pattern.permute.xlu0 %v9893_v15 }
0x113b   :  { %v11647_v20 = vpop.eup %9789  ;;  %v5373_v18 = vsel %vm1139_vm2, %v11645_v8, 0.0  ;;  %9791 = vpow2.f32 %v5330_v32  ;;  %v5279_v56 = vmax.f32 %v5277_v50, %v5278_v34  ;;  %v5369_v40 = vrot.slane %v5368_v19, 2 }
0x113c   :  { %v5374_v4 = vsel %vm1139_vm2, %v11647_v20, 0.0  ;;  %9793 = vpow2.f32 %v5332_v16  ;;  %v5286_v54 = vmax.f32 %v5284_v47, %v5285_v6  ;;  %v5292_v49 = vrot.slane %v5291_v59, 4 }
0x113d   :  { %v5375_v17 = vadd.f32 %v5374_v4, %v5373_v18  ;;  %v5308_v14 = vsub.f32 %v11593_v57, %v5279_v56  ;;  %v5309_v10 = vsub.f32 %v11586_v62, %v5279_v56  ;;  %v5352_v60 = vadd.f32 %v5351_v38, %v5350_v45 }
0x113e   :  { %v5287_v29 = vrot.slane %v5286_v54, 1  ;;  %v5293_v58 = vmax.f32 %v5291_v59, %v5292_v49  ;;  %v5360_v26 = vrot.slane %v5359_v2, 2  ;;  %v5370_v3 = vadd.f32 %v5369_v40, %v5368_v19 }
0x113f   :  { %v5376_v52 = vrot.slane %v5375_v17, 4  ;;  %v5334_v44 = vmul.f32 1.442695, %v5308_v14  ;;  %v5336_v22 = vmul.f32 1.442695, %v5309_v10  ;;  %v5353_v12 = vrot.slane %v5352_v60, 1 }
0x1140   :  { %v5288_v9 = vmax.f32 %v5286_v54, %v5287_v29  ;;  %v5294_v11 = vrot.slane %v5293_v58, 2  ;;  %v5361_v50 = vadd.f32 %v5360_v26, %v5359_v2  ;;  %v5371_v57 = vrot.slane %v5370_v3, 1 }
0x1141   :  { %v11655_v46 = vpop.eup %9791  ;;  %v5377_v47 = vadd.f32 %v5376_v52, %v5375_v17  ;;  %9795 = vpow2.f32 %v5334_v44  ;;  %v5354_v32 = vadd.f32 %v5353_v12, %v5352_v60 }
0x1142   :  { %v11657_v16 = vpop.eup %9793  ;;  %v5382_v62 = vsel %vm1139_vm2, %v11655_v46, 0.0  ;;  %9797 = vpow2.f32 %v5336_v22  ;;  %v5310_v45 = vsub.f32 %v11596_v7, %v5288_v9  ;;  %v5311_v19 = vsub.f32 %v11608_v27, %v5288_v9 }
0x1143   :  { %v5383_v34 = vsel %vm1139_vm2, %v11657_v16, 0.0  ;;  %v5295_v33 = vmax.f32 %v5293_v58, %v5294_v11  ;;  %9799 = vrcp.f32 %v5354_v32  ;;  %v5362_v15 = vrot.slane %v5361_v50, 1 }
0x1144   :  { %v5384_v2 = vadd.f32 %v5383_v34, %v5382_v62  ;;  %v5338_v6 = vmul.f32 1.442695, %v5310_v45  ;;  %v5340_v59 = vmul.f32 1.442695, %v5311_v19  ;;  %v5372_v56 = vadd.f32 %v5371_v57, %v5370_v3 }
0x1145   :  { %v5296_v38 = vrot.slane %v5295_v33, 1  ;;  %v5363_v18 = vadd.f32 %v5362_v15, %v5361_v50  ;;  %v5378_v40 = vrot.slane %v5377_v47, 2 }
0x1146   :  { %v5385_v4 = vrot.slane %v5384_v2, 4  ;;  %9801 = vpow2.f32 %v5338_v6 }
0x1147   :  { %v11665_v54 = vpop.eup %9795  ;;  %9803 = vpow2.f32 %v5340_v59  ;;  %v5297_v7 = vmax.f32 %v5295_v33, %v5296_v38  ;;  %v5379_v27 = vadd.f32 %v5378_v40, %v5377_v47 }
0x1148   :  { %v11667_v49 = vpop.eup %9797  ;;  %v5386_v17 = vadd.f32 %v5385_v4, %v5384_v2  ;;  %v5391_v14 = vsel %vm1139_vm2, %v11665_v54, 0.0  ;;  %9805 = vrcp.f32 %v5363_v18 }
0x1149   :  { %v9800_v10 = vpop.eup %9799  ;;  %v5392_v60 = vsel %vm1139_vm2, %v11667_v49, 0.0  ;;  %v5312_v29 = vsub.f32 %v11605_v30, %v5297_v7  ;;  %v5313_v58 = vsub.f32 %v11641_v1, %v5297_v7  ;;  %9807 = vrcp.f32 %v5372_v56 }
0x114a   :  { %v5393_v26 = vadd.f32 %v5392_v60, %v5391_v14  ;;  %v5427_v3 = vmul.f32 %v9800_v10, %v11610_v53  ;;  %v5426_v52 = vmul.f32 %v9800_v10, %v11600_v55  ;;  %v5387_v44 = vrot.slane %v5386_v17, 2 }
0x114b   :  { %v5342_v22 = vmul.f32 1.442695, %v5312_v29  ;;  %v5344_v12 = vmul.f32 1.442695, %v5313_v58  ;;  %v5380_v9 = vrot.slane %v5379_v27, 1 }
0x114c   :  { %v9802_v11 = vpop.eup %9801  ;;  %v5394_v50 = vrot.slane %v5393_v26, 4  ;;  %5481 = vperm.xlu2 %9741, %v5427_v3   ;;  %5476 = vperm.xlu1 %9740, %v5426_v52   ;;  %v5388_v47 = vadd.f32 %v5387_v44, %v5386_v17 }
0x114d   :  { %v11677_v32 = vpop.eup %9803  ;;  %v5400_v30 = vsel %vm1139_vm2, %v9802_v11, 0.0  ;;  %9809 = vpow2.f32 %v5342_v22  ;;  %v5381_v1 = vadd.f32 %v5380_v9, %v5379_v27 }
0x114e   :  { %v9806_v57 = vpop.eup %9805  ;;  %v5395_v62 = vadd.f32 %v5394_v50, %v5393_v26  ;;  %v5401_v55 = vsel %vm1139_vm2, %v11677_v32, 0.0  ;;  %9811 = vpow2.f32 %v5344_v12  ;;  %v5389_v53 = vrot.slane %v5388_v47, 1 }
0x114f   :  { %v9808_v45 = vpop.eup %9807  ;;  %v5402_v19 = vadd.f32 %v5401_v55, %v5400_v30  ;;  %v5428_v34 = vmul.f32 %v9806_v57, %v11628_v5  ;;  %9813 = vrcp.f32 %v5381_v1  ;;  %v5429_v59 = vmul.f32 %v9806_v57, %v11632_v61 }
0x1150   :  { %v5390_v33 = vadd.f32 %v5389_v53, %v5388_v47  ;;  %v5396_v2 = vrot.slane %v5395_v62, 2  ;;  %v5430_v6 = vmul.f32 %v9808_v45, %v11616_v39  ;;  %v5431_v26 = vmul.f32 %v9808_v45, %v11624_v37  ;;  %v9129_v45 = vld [vmem:[%s9939_s9 + $0xec] sm:$0xf0] }
0x1151   :  { %v5403_v15 = vrot.slane %v5402_v19, 4  ;;  %5486 = vperm.xlu0 %9742, %v5428_v34   ;;  %v9127_v34 = vld [vmem:[%s9939_s9 + $0xe4] sm:$0xf] }
0x1152   :  { %9815 = vrcp.f32 %v5390_v33  ;;  %v5397_v7 = vadd.f32 %v5396_v2, %v5395_v62  ;;  %v8552_v33 = vld [vmem:[%s9939_s9 + $0xf0] sm:$0xf0] }
0x1153   :  { %v9810_v38 = vpop.eup %9809  ;;  %v5404_v18 = vadd.f32 %v5403_v15, %v5402_v19  ;;  %v8558_v15 = vld [vmem:[%s9939_s9 + $0xe8] sm:$0xf]  ;;  %v8555_v2 = vor.u32 %v9127_v34, %v8552_v33 }
0x1154   :  { %v9812_v56 = vpop.eup %9811  ;;  %v5409_v40 = vsel %vm1139_vm2, %v9810_v38, 0.0  ;;  %5496 = vperm.xlu1 %9740, %v5430_v6   ;;  %5491 = vperm.xlu2 %9741, %v5429_v59   ;;  %v5398_v29 = vrot.slane %v5397_v7, 1  ;;  %v9130_v6 = vld [vmem:[%s9939_s9 + $0xf4] sm:$0xf0]  ;;  %v8560_v59 = vld [vmem:[%s9939_s9 + $0xf8] sm:$0xf0] }
0x1155   :  { %v5410_v4 = vsel %vm1139_vm2, %v9812_v56, 0.0  ;;  %v5405_v5 = vrot.slane %v5404_v18, 2  ;;  %v9814_v17 = vpop.eup %9813  ;;  %6115 = vmatpush.bf16.msrb.mxu3 %v8555_v2 }
0x1156   :  { %v5411_v27 = vadd.f32 %v5410_v4, %v5409_v40  ;;  %v5432_v3 = vmul.f32 %v9814_v17, %v11645_v8  ;;  %v5399_v22 = vadd.f32 %v5398_v29, %v5397_v7  ;;  %v5433_v50 = vmul.f32 %v9814_v17, %v11647_v20  ;;  %v9125_v7 = vld [vmem:[%s9939_s9 + $0xcc] sm:$0xf0] }
0x1157   :  { %v5406_v14 = vadd.f32 %v5405_v5, %v5404_v18  ;;  %v9430_v18 = vld [vmem:[%s9903_s6 + $0x8] sm:$0xff]   ;;  %v8534_v5 = vld [vmem:[%s9939_s9 + $0xc0] sm:$0xf] }
0x1158   :  { %v9816_v10 = vpop.eup %9815  ;;  %v5412_v60 = vrot.slane %v5411_v27, 4  ;;  %v8535_v17 = vor.u32 %v9125_v7, %v8534_v5 }
0x1159   :  { %v5435_v39 = vmul.f32 %v9816_v10, %v11657_v16  ;;  %v5407_v61 = vrot.slane %v5406_v14, 1  ;;  %v5434_v16 = vmul.f32 %v9816_v10, %v11655_v46  ;;  %v8542_v10 = vld [vmem:[%s9939_s9 + $0xc8] sm:$0xf] }
0x115a   :  { %v5413_v58 = vadd.f32 %v5412_v60, %v5411_v27  ;;  %v9123_v27 = vld [vmem:[%s9939_s9 + $0xc4] sm:$0xf]  ;;  %v9126_v60 = vld [vmem:[%s9939_s9 + $0xd4] sm:$0xf0] }
0x115b   :  { %5521 = vperm.xlu0 %9742, %v5435_v39   ;;  %v5408_v52 = vadd.f32 %v5407_v61, %v5406_v14  ;;  %v8536_v14 = vld [vmem:[%s9939_s9 + $0xd0] sm:$0xf0] }
0x115c   :  { %5501 = vperm.xlu2 %9741, %v5431_v26   ;;  %5506 = vperm.xlu1 %9740, %v5432_v3   ;;  %v5414_v44 = vrot.slane %v5413_v58, 2  ;;  %v8539_v29 = vor.u32 %v9123_v27, %v8536_v14  ;;  %v9124_v26 = vld [vmem:[%s9939_s9 + $0xcc] sm:$0xf]  ;;  %v8544_v3 = vld [vmem:[%s9939_s9 + $0xd8] sm:$0xf0] }
0x115d   :  { %9817 = vrcp.f32 %v5408_v52  ;;  %v8547_v52 = vor.u32 %v9124_v26, %v8544_v3  ;;  %v9116_v27 = vld [vmem:[%s9939_s9 + $0x8c] sm:$0xf]  ;;  %v9432_v14 = vld [vmem:[%s9903_s6 + $0x18] sm:$0xff]  }
0x115e   :  { %v5415_v12 = vadd.f32 %v5414_v44, %v5413_v58  ;;  %9819 = vrcp.f32 %v5399_v22  ;;  %v8543_v58 = vor.u32 %v9126_v60, %v8542_v10  ;;  %v9370_v44 = vunpack.c.h.bf16 %v9430_v18  ;;  %6116 = vmatpush.bf16.msrb.mxu3 %v8539_v29  ;;  %v8486_v29 = vld [vmem:[%s9939_s9 + $0x60] sm:$0xf] }
0x1160   :  { %v5416_v9 = vrot.slane %v5415_v12, 1 }
0x1162   :  { %v5417_v47 = vadd.f32 %v5416_v9, %v5415_v12  ;;  %v9369_v12 = vunpack.c.l.bf16 %v9430_v18  ;;  %v8518_v9 = vld [vmem:[%s9939_s9 + $0xa0] sm:$0xf]  ;;  %v8504_v18 = vld [vmem:[%s9939_s9 + $0x90] sm:$0xf0] }
0x1163   :  { %v9818_v30 = vpop.eup %9817 }
0x1164   :  { %5511 = vperm.xlu2 %9741, %v5433_v50   ;;  %5516 = vperm.xlu1 %9740, %v5434_v16   ;;  %v5438_v37 = vmul.f32 %v9818_v30, %v9802_v11  ;;  %9821 = vrcp.f32 %v5417_v47  ;;  %v9820_v8 = vpop.eup %9819  ;;  %v5439_v11 = vmul.f32 %v9818_v30, %v11677_v32  ;;  %v9128_v32 = vld [vmem:[%s9939_s9 + $0xec] sm:$0xf]  ;;  %v9121_v50 = vld [vmem:[%s9939_s9 + $0xac] sm:$0xf0]  ;;  %v9119_v16 = vld [vmem:[%s9939_s9 + $0xa4] sm:$0xf] }
0x1165   :  { %v5437_v57 = vmul.f32 %v9820_v8, %v11667_v49  ;;  %v5436_v62 = vmul.f32 %v9820_v8, %v11665_v54  ;;  %v8550_v54 = vld [vmem:[%s9939_s9 + $0xe0] sm:$0xf]  ;;  %v8563_v40 = vor.u32 %v9128_v32, %v8560_v59  ;;  %v8519_v47 = vor.u32 %v9121_v50, %v8518_v9  ;;  %v8520_v30 = vld [vmem:[%s9939_s9 + $0xb0] sm:$0xf0]  ;;  %v9122_v8 = vld [vmem:[%s9939_s9 + $0xb4] sm:$0xf0] }
0x1166   :  { %5536 = vperm.xlu0 %9742, %v5438_v37   ;;  %v8551_v19 = vor.u32 %v9129_v45, %v8550_v54  ;;  %v8526_v37 = vld [vmem:[%s9939_s9 + $0xa8] sm:$0xf]  ;;  %v8528_v54 = vld [vmem:[%s9939_s9 + $0xb8] sm:$0xf0]  ;;  %v9115_v32 = vld [vmem:[%s9939_s9 + $0x84] sm:$0xf] }
0x1167   :  { %6141 = vmatpush.bf16.msra.mxu1 %v8563_v40  ;;  %v9118_v40 = vld [vmem:[%s9939_s9 + $0x94] sm:$0xf0]  ;;  %v8507_v5 = vor.u32 %v9115_v32, %v8504_v18 }
0x1168   :  { %6102 = vmatpush.bf16.msrb.mxu2 %v8551_v19  ;;  %v9114_v50 = vld [vmem:[%s9939_s9 + $0x74] sm:$0xf0] }
0x116a   :  { %v9822_v1 = vpop.eup %9821 }
0x116b   :  { %v5441_v20 = vmul.f32 %v9822_v1, %v9812_v56  ;;  %v5440_v46 = vmul.f32 %v9822_v1, %v9810_v38  ;;  %v9364_v38 = vld [vmem:[%s9903_s6] sm:$0xff]   ;;  %v8559_v56 = vor.u32 %v9130_v6, %v8558_v15  ;;  %6142 = vmatpush.bf16.msra.mxu1 %v8547_v52  ;;  %v9117_v6 = vld [vmem:[%s9939_s9 + $0x8c] sm:$0xf0] }
0x116c   :  { %5531 = vperm.xlu1 %9740, %v5437_v57   ;;  %5526 = vperm.xlu2 %9741, %v5436_v62   ;;  %v9365_v4 = vunpack.c.l.bf16 %v9364_v38  ;;  %v9366_v39 = vunpack.c.h.bf16 %v9364_v38  ;;  %v9431_v57 = vld [vmem:[%s9903_s6 + $0x10] sm:$0xff]   ;;  %v9111_v52 = vld [vmem:[%s9939_s9 + $0x64] sm:$0xf] }
0x116d   :  { %6128 = vmatpush.bf16.msra.mxu0 %v8559_v56  ;;  %6103 = vmatpush.bf16.msrb.mxu2 %v8535_v17  ;;  %v9373_v19 = vunpack.c.l.bf16 %v9431_v57  ;;  %v9374_v59 = vunpack.c.h.bf16 %v9431_v57  ;;  %v8510_v56 = vld [vmem:[%s9939_s9 + $0x88] sm:$0xf]  ;;  %v8512_v17 = vld [vmem:[%s9939_s9 + $0x98] sm:$0xf0] }
0x116e   :  { %5551 = vperm.xlu0 %9742, %v5441_v20   ;;  %v8523_v20 = vor.u32 %v9119_v16, %v8520_v30  ;;  %v8511_v7 = vor.u32 %v9118_v40, %v8510_v56  ;;  %v8515_v60 = vor.u32 %v9116_v27, %v8512_v17  ;;  %v9112_v16 = vld [vmem:[%s9939_s9 + $0x6c] sm:$0xf]  ;;  %v9105_v27 = vld [vmem:[%s9939_s9 + $0x2c] sm:$0xf0] }
0x1170   :  { %6117 = vmatpush.bf16.msrb.mxu3 %v8523_v20 }
0x1171   :  { %6129 = vmatpush.bf16.msra.mxu0 %v8543_v58  ;;  %6104 = vmatpush.bf16.msrb.mxu2 %v8519_v47  ;;  %v9113_v58 = vld [vmem:[%s9939_s9 + $0x6c] sm:$0xf0]  ;;  %v8496_v47 = vld [vmem:[%s9939_s9 + $0x78] sm:$0xf0] }
0x1172   :  { %v8487_v3 = vor.u32 %v9113_v58, %v8486_v29 }
0x1174   :  { %5546 = vperm.xlu1 %9740, %v5440_v46   ;;  %5541 = vperm.xlu2 %9741, %v5439_v11   ;;  %v8527_v46 = vor.u32 %v9122_v8, %v8526_v37  ;;  %v9120_v11 = vld [vmem:[%s9939_s9 + $0xac] sm:$0xf]  ;;  %v9377_v37 = vunpack.c.l.bf16 %v9432_v14  ;;  %v8499_v8 = vor.u32 %v9112_v16, %v8496_v47  ;;  %v8438_v16 = vld [vmem:[%s9939_s9] sm:$0xf]  ;;  %v9101_v47 = vld [vmem:[%s9939_s9 + $0xc] sm:$0xf0] }
0x1175   :  { %v8531_v34 = vor.u32 %v9120_v11, %v8528_v54  ;;  %6118 = vmatpush.bf16.msrb.mxu3 %v8507_v5  ;;  %v9109_v11 = vld [vmem:[%s9939_s9 + $0x4c] sm:$0xf0] }
0x1176   :  { %6130 = vmatpush.bf16.msra.mxu0 %v8527_v46  ;;  %v8470_v46 = vld [vmem:[%s9939_s9 + $0x40] sm:$0xf] }
0x1177   :  { %6143 = vmatpush.bf16.msra.mxu1 %v8531_v34  ;;  %v8471_v54 = vor.u32 %v9109_v11, %v8470_v46  ;;  %v8478_v34 = vld [vmem:[%s9939_s9 + $0x48] sm:$0xf]  ;;  %v8439_v11 = vor.u32 %v9101_v47, %v8438_v16  ;;  %v9189_v16 = vld [vmem:[%s9953_s20 + $0xcc] sm:$0xf0] }
0x117a   :  { %6131 = vmatpush.bf16.msra.mxu0 %v8511_v7  ;;  %v8454_v7 = vld [vmem:[%s9939_s9 + $0x20] sm:$0xf] }
0x117b   :  { %6144 = vmatpush.bf16.msra.mxu1 %v8515_v60  ;;  %v8456_v60 = vld [vmem:[%s9939_s9 + $0x30] sm:$0xf0] }
0x117f   :  { %6145 = vmatpush.bf16.msra.mxu1 %v8499_v8 }
0x11a6   :  { %v5482_v49 = vpop.permute.xlu2 %5481 }
0x11a7   :  { %v5555_v1 = vmul.f32 %v9366_v39, %v5482_v49  ;;  %v8502_v49 = vld [vmem:[%s9939_s9 + $0x80] sm:$0xf] }
0x11a8   :  { %v8503_v38 = vor.u32 %v9117_v6, %v8502_v49  ;;  %v9108_v49 = vld [vmem:[%s9939_s9 + $0x4c] sm:$0xf]  ;;  %v8480_v6 = vld [vmem:[%s9939_s9 + $0x58] sm:$0xf0] }
0x11aa   :  { %6105 = vmatpush.bf16.msrb.mxu2 %v8503_v38  ;;  %v9433_v38 = vld [vmem:[%s9903_s6 + $0x20] sm:$0xff]  }
0x11ab   :  { %v9381_v29 = vunpack.c.l.bf16 %v9433_v38 }
0x11ae   :  { %v5492_v55 = vpop.permute.xlu2 %5491  ;;  %6106 = vmatpush.bf16.msrb.mxu2 %v8487_v3  ;;  %v9104_v3 = vld [vmem:[%s9939_s9 + $0x2c] sm:$0xf] }
0x11af   :  { %v5557_v33 = vmul.f32 %v9370_v44, %v5492_v55  ;;  %v8488_v44 = vld [vmem:[%s9939_s9 + $0x70] sm:$0xf0] }
0x11b0   :  { %v8491_v9 = vor.u32 %v9111_v52, %v8488_v44  ;;  %v8464_v52 = vld [vmem:[%s9939_s9 + $0x38] sm:$0xf0]  ;;  %v11774_v44 = vld [vmem:[%s9903_s6 + $0x28] sm:$0xff]  }
0x11b2   :  { %6119 = vmatpush.bf16.msrb.mxu3 %v8491_v9  ;;  %6107 = vmatpush.bf16.msrb.mxu2 %v8471_v54  ;;  %v8440_v54 = vld [vmem:[%s9939_s9 + $0x10] sm:$0xf0] }
0x11b6   :  { %v11695_v53 = vpop.permute.xlu2 %5501 }
0x11b7   :  { %v5559_v26 = vmul.f32 %v9374_v59, %v11695_v53 }
0x11be   :  { %v5477_v61 = vpop.permute.xlu1 %5476  ;;  %v11722_v62 = vpop.permute.xlu2 %5511 }
0x11bf   :  { %v5554_v22 = vmul.f32 %v9365_v4, %v5477_v61 }
0x11c1   :  { %v5570_v15 = vadd.f32 %v5555_v1, %v5554_v22  ;;  %v8494_v22 = vld [vmem:[%s9939_s9 + $0x68] sm:$0xf] }
0x11c2   :  { %v8495_v53 = vor.u32 %v9114_v50, %v8494_v22  ;;  %v8467_v50 = vor.u32 %v9104_v3, %v8464_v52  ;;  %v8662_v3 = vld [vmem:[%s9953_s20 + $0xc0] sm:$0xf]  ;;  %v9386_v52 = vunpack.c.h.bf16 %v11774_v44 }
0x11c3   :  { %v5487_v45 = vpop.permute.xlu0 %5486  ;;  %v5571_v39 = vrot.slane %v5570_v15, 4 }
0x11c4   :  { %v5556_v2 = vmul.f32 %v9369_v12, %v5487_v45  ;;  %v9378_v12 = vunpack.c.h.bf16 %v9432_v14  ;;  %6132 = vmatpush.bf16.msra.mxu0 %v8495_v53  ;;  %v9107_v45 = vld [vmem:[%s9939_s9 + $0x44] sm:$0xf]  ;;  %v8455_v14 = vor.u32 %v9105_v27, %v8454_v7 }
0x11c5   :  { %v11744_v1 = vadd.f32 %v5571_v39, %v5570_v15  ;;  %v9110_v15 = vld [vmem:[%s9939_s9 + $0x54] sm:$0xf0]  ;;  %v8462_v39 = vld [vmem:[%s9939_s9 + $0x28] sm:$0xf] }
0x11c6   :  { %v5577_v4 = vadd.f32 %v5557_v33, %v5556_v2  ;;  %v5497_v55 = vpop.permute.xlu1 %5496  ;;  %v11748_v20 = vpop.permute.xlu2 %5526  ;;  %v5561_v32 = vmul.f32 %v9378_v12, %v11722_v62  ;;  %v8479_v5 = vor.u32 %v9110_v15, %v8478_v34  ;;  %v8483_v62 = vor.u32 %v9108_v49, %v8480_v6  ;;  %6108 = vmatpush.bf16.msrb.mxu2 %v8455_v14  ;;  %v9100_v49 = vld [vmem:[%s9939_s9 + $0xc] sm:$0xf]  ;;  %v8448_v6 = vld [vmem:[%s9939_s9 + $0x18] sm:$0xf0]  ;;  %v8686_v14 = vld [vmem:[%s9953_s20 + $0xe8] sm:$0xf] }
0x11c7   :  { %v5558_v10 = vmul.f32 %v9373_v19, %v5497_v55  ;;  %v8472_v19 = vld [vmem:[%s9939_s9 + $0x50] sm:$0xf0]  ;;  %v5573_v56 = vrot.slane %v11744_v1, 2 }
0x11c8   :  { %v5578_v61 = vrot.slane %v5577_v4, 4  ;;  %v8475_v2 = vor.u32 %v9107_v45, %v8472_v19  ;;  %v11763_v55 = vld [vmem:[%s9903_s6 + $0x30] sm:$0xff]   ;;  %6133 = vmatpush.bf16.msra.mxu0 %v8479_v5  ;;  %6146 = vmatpush.bf16.msra.mxu1 %v8483_v62  ;;  %v9102_v45 = vld [vmem:[%s9939_s9 + $0x14] sm:$0xf0]  ;;  %v9191_v5 = vld [vmem:[%s9953_s20 + $0xe4] sm:$0xf]  ;;  %v9385_v62 = vunpack.c.l.bf16 %v11774_v44 }
0x11c9   :  { %v5584_v30 = vadd.f32 %v5559_v26, %v5558_v10  ;;  %v9103_v10 = vld [vmem:[%s9939_s9 + $0x24] sm:$0xf]  ;;  %v9106_v26 = vld [vmem:[%s9939_s9 + $0x34] sm:$0xf0]  ;;  %v9390_v53 = vunpack.c.h.bf16 %v11763_v55  ;;  %v9389_v46 = vunpack.c.l.bf16 %v11763_v55  ;;  %v9193_v55 = vld [vmem:[%s9953_s20 + $0xec] sm:$0xf0] }
0x11ca   :  { %v11746_v57 = vadd.f32 %v5578_v61, %v5577_v4  ;;  %6120 = vmatpush.bf16.msrb.mxu3 %v8475_v2  ;;  %v9382_v61 = vunpack.c.h.bf16 %v9433_v38  ;;  %v8459_v58 = vor.u32 %v9103_v10, %v8456_v60  ;;  %v8463_v9 = vor.u32 %v9106_v26, %v8462_v39  ;;  %6109 = vmatpush.bf16.msrb.mxu2 %v8439_v11  ;;  %v9194_v10 = vld [vmem:[%s9953_s20 + $0xf4] sm:$0xf0]  ;;  %v8688_v26 = vld [vmem:[%s9953_s20 + $0xf8] sm:$0xf0] }
0x11cb   :  { %v5585_v59 = vrot.slane %v5584_v30, 4  ;;  %v11799_v60 = vadd.f32 %v5573_v56, %v11744_v1  ;;  %v9187_v1 = vld [vmem:[%s9953_s20 + $0xc4] sm:$0xf]  ;;  %v8664_v56 = vld [vmem:[%s9953_s20 + $0xd0] sm:$0xf0] }
0x11cc   :  { %v5580_v40 = vrot.slane %v11746_v57, 2  ;;  %6134 = vmatpush.bf16.msra.mxu0 %v8463_v9  ;;  %6147 = vmatpush.bf16.msra.mxu1 %v8467_v50  ;;  %v8687_v9 = vor.u32 %v9194_v10, %v8686_v14  ;;  %v9190_v11 = vld [vmem:[%s9953_s20 + $0xd4] sm:$0xf0]  ;;  %v9184_v10 = vld [vmem:[%s9953_s20 + $0xac] sm:$0xf] }
0x11cd   :  { %v5522_v4 = vpop.permute.xlu0 %5521  ;;  %v5586_v22 = vadd.f32 %v5585_v59, %v5584_v30  ;;  %v8446_v30 = vld [vmem:[%s9939_s9 + $0x8] sm:$0xf] }
0x11ce   :  { %v5507_v33 = vpop.permute.xlu1 %5506  ;;  %6121 = vmatpush.bf16.msrb.mxu3 %v8459_v58  ;;  %v5563_v19 = vmul.f32 %v9382_v61, %v5522_v4  ;;  %v5542_v34 = vpop.permute.xlu2 %5541  ;;  %v8447_v15 = vor.u32 %v9102_v45, %v8446_v30  ;;  %v8451_v4 = vor.u32 %v9100_v49, %v8448_v6  ;;  %v9192_v58 = vld [vmem:[%s9953_s20 + $0xec] sm:$0xf]  ;;  %v11811_v47 = vadd.f32 %v5580_v40, %v11746_v57  ;;  %v8672_v57 = vld [vmem:[%s9953_s20 + $0xd8] sm:$0xf0]  ;;  %v8646_v40 = vld [vmem:[%s9953_s20 + $0xa0] sm:$0xf] }
0x11cf   :  { %v5560_v18 = vmul.f32 %v9377_v37, %v5507_v33  ;;  %v9099_v37 = vld [vmem:[%s9939_s9 + $0x4] sm:$0xf]  ;;  %v5587_v59 = vrot.slane %v5586_v22, 2  ;;  %v5567_v39 = vmul.f32 %v9390_v53, %v5542_v34  ;;  %v8691_v50 = vor.u32 %v9192_v58, %v8688_v26 }
0x11d0   :  { %v8443_v2 = vor.u32 %v9099_v37, %v8440_v54  ;;  %6135 = vmatpush.bf16.msra.mxu0 %v8447_v15  ;;  %6148 = vmatpush.bf16.msra.mxu1 %v8451_v4  ;;  %v8663_v54 = vor.u32 %v9189_v16, %v8662_v3  ;;  %v8667_v30 = vor.u32 %v9187_v1, %v8664_v56  ;;  %v9185_v15 = vld [vmem:[%s9953_s20 + $0xac] sm:$0xf0]  ;;  %v9183_v49 = vld [vmem:[%s9953_s20 + $0xa4] sm:$0xf]  ;;  %v8654_v4 = vld [vmem:[%s9953_s20 + $0xa8] sm:$0xf] }
0x11d1   :  { %v5591_v17 = vadd.f32 %v5561_v32, %v5560_v18  ;;  %v8678_v32 = vld [vmem:[%s9953_s20 + $0xe0] sm:$0xf]  ;;  %v11813_v37 = vadd.f32 %v5587_v59, %v5586_v22  ;;  %v5575_v22 = vrot.slane %v11799_v60, 1  ;;  %v5564_v6 = vmul.f32 %v9385_v62, %v11748_v20  ;;  %v8656_v20 = vld [vmem:[%s9953_s20 + $0xb8] sm:$0xf0] }
0x11d2   :  { %6122 = vmatpush.bf16.msrb.mxu3 %v8443_v2  ;;  %v8679_v27 = vor.u32 %v9193_v55, %v8678_v32  ;;  %v9186_v55 = vld [vmem:[%s9953_s20 + $0xb4] sm:$0xf0]  ;;  %v8647_v14 = vor.u32 %v9185_v15, %v8646_v40  ;;  %v8659_v26 = vor.u32 %v9184_v10, %v8656_v20  ;;  %v9179_v3 = vld [vmem:[%s9953_s20 + $0x84] sm:$0xf]  ;;  %v9180_v56 = vld [vmem:[%s9953_s20 + $0x8c] sm:$0xf] }
0x11d3   :  { %v5592_v12 = vrot.slane %v5591_v17, 4  ;;  %v9182_v1 = vld [vmem:[%s9953_s20 + $0x94] sm:$0xf0]  ;;  %v9177_v40 = vld [vmem:[%s9953_s20 + $0x6c] sm:$0xf0] }
0x11d4   :  { %6346 = vmatpush.bf16.msra.mxu2 %v8679_v27  ;;  %6372 = vmatpush.bf16.msrb.mxu0 %v8687_v9  ;;  %v8616_v15 = vld [vmem:[%s9953_s20 + $0x70] sm:$0xf0] }
0x11d5   :  { %v11780_v8 = vadd.f32 %v5592_v12, %v5591_v17  ;;  %v8680_v17 = vld [vmem:[%s9953_s20 + $0xf0] sm:$0xf0]  ;;  %6385 = vmatpush.bf16.msrb.mxu1 %v8691_v50 }
0x11d6   :  { %v5517_v33 = vpop.permute.xlu1 %5516  ;;  %v8683_v12 = vor.u32 %v9191_v5, %v8680_v17  ;;  %v9436_v17 = vld [vmem:[%s9903_s6 + $0x38] sm:$0xff]  }
0x11d7   :  { %v5594_v38 = vrot.slane %v11780_v8, 2  ;;  %v5562_v18 = vmul.f32 %v9381_v29, %v5517_v33  ;;  %v9394_v50 = vunpack.c.h.bf16 %v9436_v17  ;;  %v9393_v16 = vunpack.c.l.bf16 %v9436_v17  ;;  %v8624_v17 = vld [vmem:[%s9953_s20 + $0x78] sm:$0xf0] }
0x11d8   :  { %v5537_v7 = vpop.permute.xlu0 %5536  ;;  %6359 = vmatpush.bf16.msra.mxu3 %v8683_v12  ;;  %6347 = vmatpush.bf16.msra.mxu2 %v8663_v54  ;;  %v8638_v12 = vld [vmem:[%s9953_s20 + $0x88] sm:$0xf] }
0x11d9   :  { %v5598_v61 = vadd.f32 %v5563_v19, %v5562_v18  ;;  %v5566_v29 = vmul.f32 %v9389_v46, %v5537_v7  ;;  %v8670_v46 = vld [vmem:[%s9953_s20 + $0xc8] sm:$0xf]  ;;  %v9188_v19 = vld [vmem:[%s9953_s20 + $0xcc] sm:$0xf]  ;;  %v11825_v32 = vadd.f32 %v5594_v38, %v11780_v8  ;;  %v8648_v18 = vld [vmem:[%s9953_s20 + $0xb0] sm:$0xf0] }
0x11da   :  { %v8671_v45 = vor.u32 %v9190_v11, %v8670_v46  ;;  %v8675_v2 = vor.u32 %v9188_v19, %v8672_v57  ;;  %v5582_v8 = vrot.slane %v11811_v47, 1  ;;  %v5589_v38 = vrot.slane %v11813_v37, 1  ;;  %v8614_v57 = vld [vmem:[%s9953_s20 + $0x60] sm:$0xf] }
0x11db   :  { %v5599_v53 = vrot.slane %v5598_v61, 4  ;;  %v5612_v44 = vadd.f32 %v5567_v39, %v5566_v29  ;;  %v8651_v62 = vor.u32 %v9183_v49, %v8648_v18  ;;  %v8655_v39 = vor.u32 %v9186_v55, %v8654_v4  ;;  %v9181_v29 = vld [vmem:[%s9953_s20 + $0x8c] sm:$0xf0]  ;;  %v8622_v49 = vld [vmem:[%s9953_s20 + $0x68] sm:$0xf] }
0x11dc   :  { %6360 = vmatpush.bf16.msra.mxu3 %v8667_v30  ;;  %6373 = vmatpush.bf16.msrb.mxu0 %v8671_v45  ;;  %v8639_v19 = vor.u32 %v9182_v1, %v8638_v12  ;;  %v5590_v18 = vadd.f32 %v5589_v38, %v11813_v37  ;;  %v8598_v38 = vld [vmem:[%s9953_s20 + $0x40] sm:$0xf]  ;;  %v9174_v12 = vld [vmem:[%s9953_s20 + $0x54] sm:$0xf0]  ;;  %v8608_v1 = vld [vmem:[%s9953_s20 + $0x58] sm:$0xf0] }
0x11dd   :  { %v5600_v34 = vadd.f32 %v5599_v53, %v5598_v61  ;;  %v5613_v33 = vrot.slane %v5612_v44, 4  ;;  %v8630_v61 = vld [vmem:[%s9953_s20 + $0x80] sm:$0xf]  ;;  %6386 = vmatpush.bf16.msrb.mxu1 %v8675_v2  ;;  %v8640_v53 = vld [vmem:[%s9953_s20 + $0x98] sm:$0xf0]  ;;  %6348 = vmatpush.bf16.msra.mxu2 %v8647_v14 }
0x11de   :  { %v5532_v59 = vpop.permute.xlu1 %5531  ;;  %v8631_v30 = vor.u32 %v9181_v29, %v8630_v61  ;;  %v8643_v2 = vor.u32 %v9180_v56, %v8640_v53 }
0x11df   :  { %v5601_v5 = vrot.slane %v5600_v34, 2  ;;  %v5614_v7 = vadd.f32 %v5613_v33, %v5612_v44  ;;  %v5565_v27 = vmul.f32 %v9386_v52, %v5532_v59  ;;  %v8632_v52 = vld [vmem:[%s9953_s20 + $0x90] sm:$0xf0]  ;;  %v5596_v44 = vrot.slane %v11825_v32, 1 }
0x11e0   :  { %v5552_v54 = vpop.permute.xlu0 %5551  ;;  %6361 = vmatpush.bf16.msra.mxu3 %v8651_v62  ;;  %6374 = vmatpush.bf16.msrb.mxu0 %v8655_v39  ;;  %v8635_v45 = vor.u32 %v9179_v3, %v8632_v52  ;;  %v5583_v59 = vadd.f32 %v5582_v8, %v11811_v47  ;;  %v8615_v62 = vor.u32 %v9177_v40, %v8614_v57  ;;  %v9173_v39 = vld [vmem:[%s9953_s20 + $0x4c] sm:$0xf0]  ;;  %v8600_v3 = vld [vmem:[%s9953_s20 + $0x50] sm:$0xf0]  ;;  %v8606_v52 = vld [vmem:[%s9953_s20 + $0x48] sm:$0xf] }
0x11e1   :  { %v5605_v58 = vadd.f32 %v5565_v27, %v5564_v6  ;;  %v5602_v9 = vadd.f32 %v5601_v5, %v5600_v34  ;;  %v5615_v46 = vrot.slane %v5614_v7, 2  ;;  %v9175_v34 = vld [vmem:[%s9953_s20 + $0x64] sm:$0xf]  ;;  %6387 = vmatpush.bf16.msrb.mxu1 %v8659_v26  ;;  %v9178_v6 = vld [vmem:[%s9953_s20 + $0x74] sm:$0xf0]  ;;  %v5569_v55 = vmul.f32 %v9394_v50, %v5552_v54  ;;  %6349 = vmatpush.bf16.msra.mxu2 %v8631_v30 }
0x11e2   :  { %v9176_v27 = vld [vmem:[%s9953_s20 + $0x6c] sm:$0xf]  ;;  %v5576_v47 = vadd.f32 %v5575_v22, %v11799_v60  ;;  %v8619_v37 = vor.u32 %v9175_v34, %v8616_v15  ;;  %v8623_v8 = vor.u32 %v9178_v6, %v8622_v49  ;;  %v5597_v61 = vadd.f32 %v5596_v44, %v11825_v32  ;;  %v8582_v30 = vld [vmem:[%s9953_s20 + $0x20] sm:$0xf]  ;;  %v9170_v15 = vld [vmem:[%s9953_s20 + $0x34] sm:$0xf0] }
0x11e3   :  { %v5606_v11 = vrot.slane %v5605_v58, 4  ;;  %v5603_v4 = vrot.slane %v5602_v9, 1  ;;  %v5616_v14 = vadd.f32 %v5615_v46, %v5614_v7  ;;  %v9171_v7 = vld [vmem:[%s9953_s20 + $0x44] sm:$0xf]  ;;  %v8627_v26 = vor.u32 %v9176_v27, %v8624_v17 }
0x11e4   :  { %6362 = vmatpush.bf16.msra.mxu3 %v8635_v45  ;;  %6375 = vmatpush.bf16.msrb.mxu0 %v8639_v19  ;;  %v5627_v60 = vpack.c.bf16 %v5583_v59, %v5583_v59  ;;  %v5628_v22 = vpack.c.bf16 %v5590_v18, %v5590_v18  ;;  %v8599_v32 = vor.u32 %v9173_v39, %v8598_v38  ;;  %v9169_v45 = vld [vmem:[%s9953_s20 + $0x2c] sm:$0xf0]  ;;  %v9168_v59 = vld [vmem:[%s9953_s20 + $0x2c] sm:$0xf]  ;;  %v8592_v18 = vld [vmem:[%s9953_s20 + $0x38] sm:$0xf0] }
0x11e5   :  { %v5607_v33 = vadd.f32 %v5606_v11, %v5605_v58  ;;  %6388 = vmatpush.bf16.msrb.mxu1 %v8643_v2  ;;  %v5604_v50 = vadd.f32 %v5603_v4, %v5602_v9  ;;  %v5617_v56 = vrot.slane %v5616_v14, 1  ;;  %6350 = vmatpush.bf16.msra.mxu2 %v8615_v62  ;;  %v5626_v44 = vpack.c.bf16 %v5576_v47, %v5576_v47  ;;  %v9167_v9 = vld [vmem:[%s9953_s20 + $0x24] sm:$0xf]  ;;  %v8590_v2 = vld [vmem:[%s9953_s20 + $0x28] sm:$0xf] }
0x11e6   :  { %v5547_v5 = vpop.permute.xlu1 %5546  ;;  %v8603_v11 = vor.u32 %v9171_v7, %v8600_v3  ;;  %v8607_v54 = vor.u32 %v9174_v12, %v8606_v52  ;;  %v5629_v19 = vpack.c.bf16 %v5597_v61, %v5597_v61  ;;  %v5919_v49 = vunpack.c.l.b16 %v5627_v60  ;;  %v8566_v47 = vld [vmem:[%s9953_s20] sm:$0xf]  ;;  %v8568_v61 = vld [vmem:[%s9953_s20 + $0x10] sm:$0xf0]  ;;  %v9164_v3 = vld [vmem:[%s9953_s20 + $0xc] sm:$0xf] }
0x11e7   :  { %v5608_v10 = vrot.slane %v5607_v33, 2  ;;  %v5568_v20 = vmul.f32 %v9393_v16, %v5547_v5  ;;  %v9172_v16 = vld [vmem:[%s9953_s20 + $0x4c] sm:$0xf]  ;;  %v5630_v6 = vpack.c.bf16 %v5604_v50, %v5604_v50  ;;  %v5920_v4 = vunpack.c.l.b16 %v5628_v22  ;;  %v8576_v52 = vld [vmem:[%s9953_s20 + $0x18] sm:$0xf0] }
0x11e8   :  { %6363 = vmatpush.bf16.msra.mxu3 %v8619_v37  ;;  %6376 = vmatpush.bf16.msrb.mxu0 %v8623_v8  ;;  %v8611_v34 = vor.u32 %v9172_v16, %v8608_v1  ;;  %v8583_v27 = vor.u32 %v9169_v45, %v8582_v30  ;;  %v5918_v17 = vunpack.c.l.b16 %v5626_v44  ;;  %v8591_v62 = vor.u32 %v9170_v15, %v8590_v2  ;;  %v9165_v37 = vld [vmem:[%s9953_s20 + $0xc] sm:$0xf0]  ;;  %v9163_v8 = vld [vmem:[%s9953_s20 + $0x4] sm:$0xf] }
0x11e9   :  { %v5609_v29 = vadd.f32 %v5608_v10, %v5607_v33  ;;  %v5619_v58 = vadd.f32 %v5569_v55, %v5568_v20  ;;  %6389 = vmatpush.bf16.msrb.mxu1 %v8627_v26  ;;  %v8584_v33 = vld [vmem:[%s9953_s20 + $0x30] sm:$0xf0]  ;;  %6351 = vmatpush.bf16.msra.mxu2 %v8599_v32  ;;  %v5618_v10 = vadd.f32 %v5617_v56, %v5616_v14  ;;  %v5921_v38 = vunpack.c.l.b16 %v5629_v19 }
0x11ea   :  { %v8587_v20 = vor.u32 %v9167_v9, %v8584_v33  ;;  %v8595_v7 = vor.u32 %v9168_v59, %v8592_v18  ;;  %v5927_v26 = vsel %vm5926_vm6, %v5919_v49, %v5918_v17  ;;  %v5922_v14 = vunpack.c.l.b16 %v5630_v6  ;;  %v6402_v6 = vld [vmem:[%s9960_s25] sm:$0xf] }
0x11eb   :  { %v5610_v53 = vrot.slane %v5609_v29, 1  ;;  %v5620_v46 = vrot.slane %v5619_v58, 4  ;;  %v5929_v12 = vsel %vm5928_vm7, %v5920_v4, %v5927_v26  ;;  %v8567_v50 = vor.u32 %v9165_v37, %v8566_v47 }
0x11ec   :  { %6364 = vmatpush.bf16.msra.mxu3 %v8603_v11  ;;  %6377 = vmatpush.bf16.msrb.mxu0 %v8607_v54  ;;  %v5632_v16 = vpack.c.bf16 %v5618_v10, %v5618_v10  ;;  %v8571_v1 = vor.u32 %v9163_v8, %v8568_v61  ;;  %v8579_v32 = vor.u32 %v9164_v3, %v8576_v52  ;;  %v6405_v47 = vperm.slane %v6402_v6, 1 }
0x11ed   :  { %v5611_v57 = vadd.f32 %v5610_v53, %v5609_v29  ;;  %v5621_v40 = vadd.f32 %v5620_v46, %v5619_v58  ;;  %6390 = vmatpush.bf16.msrb.mxu1 %v8611_v34  ;;  %v8574_v29 = vld [vmem:[%s9953_s20 + $0x8] sm:$0xf]  ;;  %v9166_v58 = vld [vmem:[%s9953_s20 + $0x14] sm:$0xf0]  ;;  %6352 = vmatpush.bf16.msra.mxu2 %v8583_v27  ;;  %v5931_v53 = vsel %vm5930_vm8, %v5921_v38, %v5929_v12 }
0x11ee   :  { %v8575_v56 = vor.u32 %v9166_v58, %v8574_v29  ;;  %v5933_v44 = vsel %vm5932_vm9, %v5922_v14, %v5931_v53  ;;  %v5924_v30 = vunpack.c.l.b16 %v5632_v16 }
0x11ef   :  { %v5631_v55 = vpack.c.bf16 %v5611_v57, %v5611_v57  ;;  %v5622_v5 = vrot.slane %v5621_v40, 2 }
0x11f0   :  { %6365 = vmatpush.bf16.msra.mxu3 %v8587_v20  ;;  %6378 = vmatpush.bf16.msrb.mxu0 %v8591_v62  ;;  %v6404_v62 = vperm.slane %v6402_v6, 0 }
0x11f1   :  { %v5623_v39 = vadd.f32 %v5622_v5, %v5621_v40  ;;  %v5923_v60 = vunpack.c.l.b16 %v5631_v55  ;;  %6391 = vmatpush.bf16.msrb.mxu1 %v8595_v7  ;;  %6353 = vmatpush.bf16.msra.mxu2 %v8567_v50  ;;  %v6407_v55 = vperm.slane %v6402_v6, 3 }
0x11f3   :  { %v5624_v22 = vrot.slane %v5623_v39, 1  ;;  %v5935_v54 = vsel %vm5934_vm10, %v5923_v60, %v5933_v44 }
0x11f4   :  { %6366 = vmatpush.bf16.msra.mxu3 %v8571_v1  ;;  %6379 = vmatpush.bf16.msrb.mxu0 %v8575_v56  ;;  %v5937_v9 = vsel %vm5936_vm11, %v5924_v30, %v5935_v54  ;;  %v6406_v56 = vperm.slane %v6402_v6, 2 }
0x11f5   :  { %v5625_v46 = vadd.f32 %v5624_v22, %v5623_v39  ;;  %6392 = vmatpush.bf16.msrb.mxu1 %v8579_v32 }
0x11f7   :  { %v5633_v11 = vpack.c.bf16 %v5625_v46, %v5625_v46 }
0x11f9   :  { %v5925_v45 = vunpack.c.l.b16 %v5633_v11 }
0x11fb   :  { %v5939_v19 = vsel %vm5938_vm12, %v5925_v45, %v5937_v9 }
0x11fc   :  { %v5940_v57 = vpack.c.b16 %v5939_v19, %v5939_v19 }
0x11fe   :  { %6110 = vmatmul.bf16.vlgmr.msrb.gmra.mxu2 %v5940_v57  ;;  %6123 = vmatmul.bf16.vlgmr.msrb.gmra.mxu3 %v5940_v57 }
0x11ff   :  { %6136 = vmatmul.bf16.vlgmr.msra.gmra.mxu0 %v5940_v57  ;;  %6149 = vmatmul.bf16.vlgmr.msra.gmra.mxu1 %v5940_v57 }
0x120e   :  { %6354 = vmatmul.bf16.vlgmr.msra.gmra.mxu2 %v11459_v63  ;;  %6367 = vmatmul.bf16.vlgmr.msra.gmra.mxu3 %v11459_v63 }
0x120f   :  { %6380 = vmatmul.bf16.vlgmr.msrb.gmra.mxu0 %v11459_v63  ;;  %6393 = vmatmul.bf16.vlgmr.msrb.gmra.mxu1 %v11459_v63 }
0x127c   :  { %v6137_v40 = vpop.f32.mrf.mxu0  ;;  %v6150_v34 = vpop.f32.mrf.mxu1 }
0x127d   :  { %v6151_v4 = vadd.f32 %v6150_v34, %v11521_v0  ;;  %v6138_v16 = vadd.f32 %v6137_v40, %v11504_v43 }
0x1281   :  { %v6111_v33 = vpop.f32.mrf.mxu2  ;;  %v6124_v2 = vpop.f32.mrf.mxu3 }
0x1282   :  { %v6112_v20 = vadd.f32 %v6111_v33, %v11509_v24  ;;  %v6125_v63 = vadd.f32 %v6124_v2, %v11511_v51 }
0x1284   :  { %v6139_v15 = vpop.f32.mrf.mxu0  ;;  %v6152_v49 = vpop.f32.mrf.mxu1 }
0x1289   :  { %v6113_v59 = vpop.f32.mrf.mxu2  ;;  %v6126_v18 = vpop.f32.mrf.mxu3 }
0x128c   :  { %v6381_v5 = vpop.f32.mrf.mxu0  ;;  %v6394_v27 = vpop.f32.mrf.mxu1 }
0x128d   :  { %v6401_v17 = vadd.f32 %v6394_v27, %v6151_v4  ;;  %v6400_v1 = vadd.f32 %v6381_v5, %v6138_v16  ;;  %v4907_v4 = vld [vmem:[#allocation7] sm:$0xff] }
0x128f   :  { %v6415_v10 = vadd.f32 %v6407_v55, %v6401_v17  ;;  %v6414_v32 = vadd.f32 %v6406_v56, %v6400_v1 }
0x1291   :  { %v8694_v37 = vmul.f32 -1.442695, %v6415_v10  ;;  %v6355_v8 = vpop.f32.mrf.mxu2  ;;  %v6368_v38 = vpop.f32.mrf.mxu3 }
0x1292   :  { %v6398_v39 = vadd.f32 %v6355_v8, %v6112_v20  ;;  %v6399_v7 = vadd.f32 %v6368_v38, %v6125_v63 }
0x1293   :  { %9823 = vpow2.f32 %v8694_v37 }
0x1294   :  { %v6412_v61 = vadd.f32 %v6404_v62, %v6398_v39  ;;  %v6413_v29 = vadd.f32 %v6405_v47, %v6399_v7  ;;  %v6396_v0 = vpop.f32.mrf.mxu1  ;;  %v6383_v58 = vpop.f32.mrf.mxu0 }
0x1296   :  { %v8692_v26 = vmul.f32 -1.442695, %v6412_v61  ;;  %v8693_v14 = vmul.f32 -1.442695, %v6413_v29 }
0x1298   :  { %9825 = vpow2.f32 %v8692_v26 }
0x1299   :  { %v9824_v3 = vpop.eup %9823  ;;  %9827 = vpow2.f32 %v8693_v14  ;;  %v6357_v24 = vpop.f32.mrf.mxu2 }
0x129a   :  { %v6370_v52 = vpop.f32.mrf.mxu3  ;;  %v6458_v51 = vadd.f32 1.0, %v9824_v3  ;;  %v9202_v3 = vld [vmem:[%s10247_s2 + $0x38] sm:$0xff] }
0x129b   :  { %6634 = vmatpush.bf16.msrb.mxu2 %v9202_v3 }
0x129c   :  { %9829 = vrcp.f32 %v6458_v51  ;;  %v6470_v37 = vand.u32 2147483648, %v6458_v51  ;;  %vm6464_vm7 = vweird.f32 %v6458_v51  ;;  %v6468_v8 = vand.u32 2147483647, %v6458_v51 }
0x129e   :  { %v9826_v12 = vpop.eup %9825  ;;  %v6471_v39 = vor.u32 1.1754944e-38, %v6470_v37  ;;  %vm6469_vm9 = vcmp.eq.f32.partialorder %v6468_v8, 8.507059e+37 }
0x129f   :  { %v9828_v60 = vpop.eup %9827  ;;  %v6419_v22 = vadd.f32 1.0, %v9826_v12  ;;  %v9201_v12 = vld [vmem:[%s10247_s2 + $0x30] sm:$0xff] }
0x12a0   :  { %v6438_v50 = vadd.f32 1.0, %v9828_v60  ;;  %6635 = vmatpush.bf16.msrb.mxu2 %v9201_v12 }
0x12a1   :  { %9831 = vrcp.f32 %v6419_v22  ;;  %v6431_v9 = vand.u32 2147483648, %v6419_v22  ;;  %v6429_v34 = vand.u32 2147483647, %v6419_v22  ;;  %vm6425_vm15 = vweird.f32 %v6419_v22 }
0x12a2   :  { %9833 = vrcp.f32 %v6438_v50  ;;  %v9830_v53 = vpop.eup %9829  ;;  %v6450_v33 = vand.u32 2147483648, %v6438_v50  ;;  %v6448_v40 = vand.u32 2147483647, %v6438_v50  ;;  %vm6444_vm1 = vweird.f32 %v6438_v50 }
0x12a3   :  { %v6460_v45 = vmul.f32 %v9830_v53, %v6458_v51  ;;  %9835 = vtanh.f32 %v6414_v32  ;;  %v6432_v49 = vor.u32 1.1754944e-38, %v6431_v9  ;;  %vm6430_vm3 = vcmp.eq.f32.partialorder %v6429_v34, 8.507059e+37 }
0x12a4   :  { %v6451_v18 = vor.u32 1.1754944e-38, %v6450_v33  ;;  %vm6449_vm5 = vcmp.eq.f32.partialorder %v6448_v40, 8.507059e+37  ;;  %vm6465_vm6 = vweird.f32 %v9830_v53 }
0x12a5   :  { %v6461_v15 = vsub.f32 1.0, %v6460_v45  ;;  %vm6466_vm8 = vmor %vm6464_vm7, %vm6465_vm6 }
0x12a7   :  { %v9832_v46 = vpop.eup %9831  ;;  %v6462_v10 = vmul.f32 %v9830_v53, %v6461_v15  ;;  %v9195_v15 = vld [vmem:[%s10247_s2] sm:$0xff] }
0x12a8   :  { %v9834_v44 = vpop.eup %9833  ;;  %v6421_v11 = vmul.f32 %v9832_v46, %v6419_v22  ;;  %vm6426_vm13 = vweird.f32 %v9832_v46 }
0x12a9   :  { %v6440_v54 = vmul.f32 %v9834_v44, %v6438_v50  ;;  %vm6445_vm14 = vweird.f32 %v9834_v44  ;;  %vm6427_vm0 = vmor %vm6425_vm15, %vm6426_vm13  ;;  %v9836_v55 = vpop.eup %9835  ;;  %v6463_v47 = vadd.f32 %v9830_v53, %v6462_v10  ;;  %v9200_v50 = vld [vmem:[%s10247_s2 + $0x28] sm:$0xff] }
0x12aa   :  { %v6422_v30 = vsub.f32 1.0, %v6421_v11  ;;  %vm6446_vm4 = vmor %vm6444_vm1, %vm6445_vm14  ;;  %6636 = vmatpush.bf16.msrb.mxu2 %v9200_v50  ;;  %v9198_v11 = vld [vmem:[%s10247_s2 + $0x18] sm:$0xff] }
0x12ab   :  { %v6441_v19 = vsub.f32 1.0, %v6440_v54  ;;  %v6467_v38 = vsel %vm6466_vm8, %v9830_v53, %v6463_v47 }
0x12ac   :  { %v6423_v57 = vmul.f32 %v9832_v46, %v6422_v30  ;;  %v6472_v61 = vsel %vm6469_vm9, %v6471_v39, %v6467_v38 }
0x12ad   :  { %v6442_v43 = vmul.f32 %v9834_v44, %v6441_v19  ;;  %v9197_v19 = vld [vmem:[%s10247_s2 + $0x10] sm:$0xff] }
0x12ae   :  { %v6424_v2 = vadd.f32 %v9832_v46, %v6423_v57 }
0x12af   :  { %v6443_v6 = vadd.f32 %v9834_v44, %v6442_v43  ;;  %v9196_v43 = vld [vmem:[%s10247_s2 + $0x8] sm:$0xff] }
0x12b0   :  { %v6428_v59 = vsel %vm6427_vm0, %v9832_v46, %v6424_v2  ;;  %v9199_v46 = vld [vmem:[%s10247_s2 + $0x20] sm:$0xff] }
0x12b1   :  { %v6433_v5 = vsel %vm6430_vm3, %v6432_v49, %v6428_v59  ;;  %v6447_v27 = vsel %vm6446_vm4, %v9834_v44, %v6443_v6  ;;  %6637 = vmatpush.bf16.msrb.mxu2 %v9199_v46 }
0x12b2   :  { %v6452_v17 = vsel %vm6449_vm5, %v6451_v18, %v6447_v27  ;;  %v6475_v20 = vmul.f32 %v9836_v55, %v6433_v5 }
0x12b3   :  { %v6474_v63 = vmul.f32 %v6452_v17, %v4907_v4 }
0x12b5   :  { %v11895_v62 = vadd.f32 %v6475_v20, %v6474_v63  ;;  %6638 = vmatpush.bf16.msrb.mxu2 %v9198_v11 }
0x12b7   :  { %9837 = vtanh.f32 %v11895_v62  ;;  %v6524_v58 = vmul.f32 %v11895_v62, %v11895_v62 }
0x12b9   :  { %6639 = vmatpush.bf16.msrb.mxu2 %v9197_v19 }
0x12bd   :  { %v9838_v7 = vpop.eup %9837  ;;  %6640 = vmatpush.bf16.msrb.mxu2 %v9196_v43 }
0x12be   :  { %v11898_v29 = vmul.f32 %v9838_v7, %v6472_v61 }
0x12c0   :  { %6479 = vadd.xlane.f32.xlu2 %v11898_v29  ;;  %v6482_v0 = vmul.f32 %v11898_v29, %v11898_v29 }
0x12c1   :  { %6641 = vmatpush.bf16.msrb.mxu2 %v9195_v15  ;;  %v4904_v15 = vld [vmem:[#allocation3] sm:$0xff] }
0x12c2   :  { %6483 = vadd.xlane.f32.xlu1 %v6482_v0 }
0x12c8   :  { %6521 = vadd.xlane.f32.xlu2 %v11895_v62 }
0x12d0   :  { %6525 = vadd.xlane.f32.xlu2 %v6524_v58 }
0x1333   :  { %v6480_v26 = vpop.xlane.xlu2 %6479 }
0x1334   :  { %v11906_v14 = vmul.f32 0.03125, %v6480_v26 }
0x1335   :  { %v6484_v51 = vpop.xlane.xlu1 %6483 }
0x1336   :  { %v6485_v24 = vmul.f32 32.0, %v11906_v14  ;;  %v6490_v58 = vsub.f32 %v11898_v29, %v11906_v14 }
0x1338   :  { %v6486_v52 = vmul.f32 %v6485_v24, %v11906_v14  ;;  %v6534_v14 = vperm.slane %v10007_v31, 0  ;;  %v6566_v31 = vperm.slane %v10012_v36, 0 }
0x133a   :  { %v6487_v60 = vsub.f32 %v6484_v51, %v6486_v52  ;;  %v6491_v51 = vmul.f32 %v10275_v13, %v6490_v58  ;;  %v9894_v58 = vmov 0.0  }
0x133b   :  { %v6522_v22 = vpop.xlane.xlu2 %6521 }
0x133c   :  { %v6488_v16 = vmul.f32 0.032258064, %v6487_v60  ;;  %v11913_v1 = vmul.f32 0.03125, %v6522_v22 }
0x133e   :  { %v6489_v56 = vmax.f32 %v6488_v16, 0.0  ;;  %v6527_v53 = vmul.f32 32.0, %v11913_v1  ;;  %v6532_v29 = vsub.f32 %v11895_v62, %v11913_v1 }
0x1340   :  { %9839 = vrsqrt.f32 %v6489_v56  ;;  %v6528_v32 = vmul.f32 %v6527_v53, %v11913_v1  ;;  %vm6499_vm10 = vcmp.eq.f32.partialorder %v6489_v56, inf  ;;  %v6502_v18 = vand.u32 2147483648, %v6489_v56 }
0x1341   :  { %vm6501_vm11 = vcmp.eq.f32.partialorder %v6489_v56, 0.0 }
0x1343   :  { %v6526_v44 = vpop.xlane.xlu2 %6525 }
0x1344   :  { %v6529_v54 = vsub.f32 %v6526_v44, %v6528_v32 }
0x1346   :  { %v9840_v30 = vpop.eup %9839  ;;  %v6530_v45 = vmul.f32 0.032258064, %v6529_v54  ;;  %v6536_v54 = vmul.f32 %v6534_v14, %v6532_v29 }
0x1347   :  { %v6493_v9 = vmul.f32 %v9840_v30, %v6489_v56 }
0x1348   :  { %v6531_v57 = vmax.f32 %v6530_v45, 0.0 }
0x1349   :  { %v6494_v34 = vmul.f32 %v9840_v30, %v6493_v9 }
0x134a   :  { %9841 = vrsqrt.f32 %v6531_v57  ;;  %vm6544_vm12 = vcmp.eq.f32.partialorder %v6531_v57, inf  ;;  %v6547_v47 = vand.u32 2147483648, %v6531_v57  ;;  %vm6546_vm13 = vcmp.eq.f32.partialorder %v6531_v57, 0.0 }
0x134b   :  { %v6495_v33 = vmul.f32 0.5, %v6494_v34 }
0x134d   :  { %v6496_v40 = vsub.f32 1.5, %v6495_v33 }
0x134f   :  { %v6497_v2 = vmul.f32 %v9840_v30, %v6496_v40 }
0x1350   :  { %v9842_v49 = vpop.eup %9841 }
0x1351   :  { %v6498_v6 = vmul.f32 %v6497_v2, %v6489_v56  ;;  %v6538_v59 = vmul.f32 %v9842_v49, %v6531_v57  ;;  %v6703_v2 = vld [vmem:[%s10311_s5] sm:$0xff] }
0x1353   :  { %v6500_v4 = vsel %vm6499_vm10, %v6489_v56, %v6498_v6  ;;  %v6539_v55 = vmul.f32 %v9842_v49, %v6538_v59 }
0x1354   :  { %v6503_v5 = vsel %vm6501_vm11, %v6502_v18, %v6500_v4 }
0x1355   :  { %v6504_v27 = vadd.f32 1e-06, %v6503_v5  ;;  %v6540_v17 = vmul.f32 0.5, %v6539_v55  ;;  %v4905_v55 = vld [vmem:[#allocation2] sm:$0xff] }
0x1357   :  { %9843 = vrcp.f32 %v6504_v27  ;;  %v6541_v10 = vsub.f32 1.5, %v6540_v17  ;;  %v6516_v0 = vand.u32 2147483648, %v6504_v27  ;;  %v6514_v3 = vand.u32 2147483647, %v6504_v27 }
0x1358   :  { %vm6510_vm15 = vweird.f32 %v6504_v27  ;;  %v6671_v17 = vsub.f32 1.0, %v4905_v55 }
0x1359   :  { %v6542_v20 = vmul.f32 %v9842_v49, %v6541_v10  ;;  %v6517_v52 = vor.u32 1.1754944e-38, %v6516_v0  ;;  %vm6515_vm1 = vcmp.eq.f32.partialorder %v6514_v3, 8.507059e+37  ;;  %v6704_v49 = vadd.f32 %v6703_v2, %v4904_v15 }
0x135b   :  { %v6543_v63 = vmul.f32 %v6542_v20, %v6531_v57  ;;  %6705 = vst.msk [vmem:[%s10311_s5] sm:$0xff] %vm1139_vm2, %v6704_v49 }
0x135d   :  { %v9844_v37 = vpop.eup %9843  ;;  %v6545_v8 = vsel %vm6544_vm12, %v6531_v57, %v6543_v63 }
0x135e   :  { %v6506_v38 = vmul.f32 %v9844_v37, %v6504_v27  ;;  %v6548_v39 = vsel %vm6546_vm13, %v6547_v47, %v6545_v8  ;;  %vm6511_vm14 = vweird.f32 %v9844_v37 }
0x135f   :  { %v6549_v7 = vadd.f32 1e-06, %v6548_v39  ;;  %vm6512_vm0 = vmor %vm6510_vm15, %vm6511_vm14 }
0x1360   :  { %v6507_v61 = vsub.f32 1.0, %v6506_v38 }
0x1361   :  { %9845 = vrcp.f32 %v6549_v7  ;;  %v6561_v46 = vand.u32 2147483648, %v6549_v7  ;;  %v6559_v44 = vand.u32 2147483647, %v6549_v7  ;;  %vm6555_vm4 = vweird.f32 %v6549_v7 }
0x1362   :  { %v6508_v26 = vmul.f32 %v9844_v37, %v6507_v61  ;;  %v6706_v61 = vld [vmem:[%s10325_s29] sm:$0xff] }
0x1363   :  { %vm6560_vm6 = vcmp.eq.f32.partialorder %v6559_v44, 8.507059e+37 }
0x1364   :  { %v6509_v24 = vadd.f32 %v9844_v37, %v6508_v26 }
0x1366   :  { %v6513_v12 = vsel %vm6512_vm0, %v9844_v37, %v6509_v24 }
0x1367   :  { %v9846_v60 = vpop.eup %9845  ;;  %v6518_v22 = vsel %vm6515_vm1, %v6517_v52, %v6513_v12 }
0x1368   :  { %v6519_v50 = vmul.f32 %v6518_v22, %v6491_v51  ;;  %v6551_v16 = vmul.f32 %v9846_v60, %v6549_v7  ;;  %vm6556_vm3 = vweird.f32 %v9846_v60 }
0x1369   :  { %vm6557_vm5 = vmor %vm6555_vm4, %vm6556_vm3 }
0x136a   :  { %v11926_v56 = vadd.f32 %v10281_v21, %v6519_v50  ;;  %v6552_v53 = vsub.f32 1.0, %v6551_v16  ;;  %v6562_v21 = vor.u32 1.1754944e-38, %v6561_v46 }
0x136c   :  { %v6569_v32 = vpack.c.bf16 %v11926_v56, %v11926_v56  ;;  %6679 = vst [vmem:[#allocation6] sm:$0xff] %v11926_v56  ;;  %v6553_v13 = vmul.f32 %v9846_v60, %v6552_v53 }
0x136e   :  { %6642 = vmatmul.bf16.vlgmr.msrb.gmra.mxu2 %v6569_v32  ;;  %v6554_v11 = vadd.f32 %v9846_v60, %v6553_v13  ;;  %v6683_v32 = vld [vmem:[#allocation4] sm:$0xff]  ;;  %v6698_v13 = vld [vmem:[#allocation5] sm:$0xff] }
0x1370   :  { %v6558_v30 = vsel %vm6557_vm5, %v9846_v60, %v6554_v11 }
0x1371   :  { %v6563_v62 = vsel %vm6560_vm6, %v6562_v21, %v6558_v30 }
0x1372   :  { %v6564_v1 = vmul.f32 %v6563_v62, %v6536_v54 }
0x1374   :  { %v11935_v45 = vadd.f32 %v6566_v31, %v6564_v1 }
0x1376   :  { %6680 = vst [vmem:[#allocation7] sm:$0xff] %v11935_v45 }
0x13f1   :  { %v6643_v9 = vpop.f32.mrf.mxu2 }
0x13f2   :  { %v6644_v19 = vadd.f32 %v10298_v28, %v6643_v9 }
0x13f4   :  { %v6647_v57 = vmax.f32 %v6644_v19, 0.0 }
0x13f6   :  { %v6648_v34 = vmul.f32 %v10303_v35, %v6647_v57 }
0x13f8   :  { %6649 = vadd.xlane.f32.xlu0 %v6648_v34 }
0x13f9   :  { %v6645_v33 = vpop.f32.mrf.mxu2 }
0x146b   :  { %v6650_v43 = vpop.xlane.xlu0 %6649 }
0x146c   :  { %v6651_v40 = vadd.f32 %v10313_v42, %v6650_v43 }
0x146e   :  { %v8727_v36 = vmul.f32 -1.442695, %v6651_v40 }
0x1470   :  { %9847 = vpow2.f32 %v8727_v36 }
0x1476   :  { %v9848_v6 = vpop.eup %9847 }
0x1477   :  { %v6655_v59 = vadd.f32 1.0, %v9848_v6 }
0x1479   :  { %9849 = vrcp.f32 %v6655_v59  ;;  %v6667_v35 = vand.u32 2147483648, %v6655_v59  ;;  %v6665_v27 = vand.u32 2147483647, %v6655_v59  ;;  %vm6661_vm8 = vweird.f32 %v6655_v59 }
0x147b   :  { %v6668_v10 = vor.u32 1.1754944e-38, %v6667_v35  ;;  %vm6666_vm10 = vcmp.eq.f32.partialorder %v6665_v27, 8.507059e+37 }
0x147f   :  { %v9850_v18 = vpop.eup %9849 }
0x1480   :  { %v6657_v28 = vmul.f32 %v9850_v18, %v6655_v59  ;;  %vm6662_vm7 = vweird.f32 %v9850_v18 }
0x1481   :  { %vm6663_vm9 = vmor %vm6661_vm8, %vm6662_vm7 }
0x1482   :  { %v6658_v4 = vsub.f32 1.0, %v6657_v28 }
0x1484   :  { %v6659_v5 = vmul.f32 %v9850_v18, %v6658_v4 }
0x1486   :  { %v6660_v42 = vadd.f32 %v9850_v18, %v6659_v5 }
0x1488   :  { %v6664_v20 = vsel %vm6663_vm9, %v9850_v18, %v6660_v42 }
0x1489   :  { %v6669_v63 = vsel %vm6666_vm10, %v6668_v10, %v6664_v20 }
0x148a   :  { %v6672_v47 = vmul.f32 %v6671_v17, %v6669_v63  ;;  %v6707_v37 = vsub.f32 1.0, %v6669_v63 }
0x148c   :  { %v6708_v8 = vmul.f32 4.0, %v6707_v37  ;;  %6686 = vperm.xlu0 %9742, %v6672_v47   ;;  %v6673_v38 = vmul.f32 %v6672_v47, %v4904_v15 }
0x148e   :  { %v6709_v39 = vadd.f32 1.0, %v6708_v8  ;;  %v6674_v7 = vadd.f32 %v6673_v38, %v4905_v55 }
0x1490   :  { %v6710_v0 = vmul.f32 %v6709_v39, %v4904_v15  ;;  %vm6675_vm11 = vcmp.lt.f32.partialorder %v6674_v7, 0.9  ;;  %6681 = vst.msk [vmem:[#allocation2] sm:$0xff] %vm1139_vm2, %v6674_v7 }
0x1491   :  { %v8728_v26 = vsel %vm6675_vm11, 1.0, %v9894_v58 }
0x1492   :  { %v6711_v3 = vadd.f32 %v6710_v0, %v6706_v61  ;;  %v6678_v24 = vmul.f32 %v8728_v26, %v4904_v15 }
0x1494   :  { %6712 = vst.msk [vmem:[%s10325_s29] sm:$0xff] %vm1139_vm2, %v6711_v3  ;;  %v6713_v52 = vsel %vm1139_vm2, %v6678_v24, -inf }
0x1495   :  { %6714 = vmax.xlane.f32.xlu1 %v6713_v52  ;;  %6682 = vst.msk [vmem:[#allocation3] sm:$0xff] %vm1139_vm2, %v6678_v24 }
0x14ae   :  { %6692 = vperm.xlu1 %9740, %v4904_v15  }
0x14fe   :  { %v6687_v29 = vpop.permute.xlu0 %6686 }
0x14ff   :  { %v6689_v14 = vmul.f32 %v6687_v29, %v11926_v56  ;;  %v6699_v46 = vmul.f32 %v6687_v29, %v11935_v45 }
0x1508   :  { %v6715_v51 = vpop.xlane.xlu1 %6714 }
0x1509   :  { %v6716_v12 = vrot.slane %v6715_v51, 4 }
0x150b   :  { %v6717_v60 = vmax.f32 %v6715_v51, %v6716_v12 }
0x150d   :  { %v6718_v22 = vrot.slane %v6717_v60, 2 }
0x150f   :  { %v6719_v50 = vmax.f32 %v6717_v60, %v6718_v22 }
0x1511   :  { %v6720_v16 = vrot.slane %v6719_v50, 1 }
0x1513   :  { %v6721_v53 = vmax.f32 %v6719_v50, %v6720_v16 }
0x1515   :  { %9443 = vpush %v6721_v53 }
0x1520   :  { %v6693_v44 = vpop.permute.xlu1 %6692 }
0x1521   :  { %v6695_v11 = vmul.f32 %v6693_v44, %v6689_v14  ;;  %v6700_v21 = vmul.f32 %v6699_v46, %v6693_v44 }
0x1523   :  { %v6696_v54 = vadd.f32 %v6695_v11, %v6683_v32  ;;  %v6701_v30 = vadd.f32 %v6700_v21, %v6698_v13 }
0x1525   :  { %6697 = vst [vmem:[#allocation4] sm:$0xff] %v6696_v54 }
0x1526   :  { %6702 = vst [vmem:[#allocation5] sm:$0xff] %v6701_v30 }
0x1546   :  { %s9444_s6 = spop %9443 }
0x1547   :  { %6723 = sst [smem:[#allocation8]] %s9444_s6 }
0x1548 PF:  { %9851 = vset.pattern.permute.xlu0 %v9885_v41  ;;  %v6724_v31 = vld [vmem:[#allocation2] sm:$0xff]  ;;  %6759 = vst [vmem:[%s9990_s16] sm:$0xff] %v10287_v25  ;;  %s6751_s10 = ssub.f32 1.0, %s10334_s0  ;;  %v6747_v43 = vld [vmem:[#allocation5] sm:$0xff]  ;;  %v6749_v2 = vstv %s10334_s0 }
0x1549   :  { %9852 = vrcp.f32 %v6724_v31  ;;  %6762 = vst [vmem:[%s9998_s23] sm:$0xff] %v10226_v23  ;;  %v6736_v1 = vand.u32 2147483648, %v6724_v31  ;;  %vm6730_vm2 = vweird.f32 %v6724_v31  ;;  %v6734_v9 = vand.u32 2147483647, %v6724_v31  ;;  %v6740_v23 = vld [vmem:[#allocation4] sm:$0xff] }
0x154a   :  { %v6752_v40 = vstv %s6751_s10 }
0x154b   :  { %v6737_v57 = vor.u32 1.1754944e-38, %v6736_v1  ;;  %vm6735_vm14 = vcmp.eq.f32.partialorder %v6734_v9, 8.507059e+37  ;;  %v6753_v15 = vmul.f32 %v6752_v40, %v10287_v25  ;;  %v6756_v49 = vmul.f32 %v10319_v48, %v6752_v40 }
0x154f   :  { %v9853_v56 = vpop.eup %9852 }
0x1550   :  { %v6726_v62 = vmul.f32 %v9853_v56, %v6724_v31  ;;  %vm6731_vm12 = vweird.f32 %v9853_v56 }
0x1551   :  { %vm6732_vm13 = vmor %vm6730_vm2, %vm6731_vm12 }
0x1552   :  { %v6727_v45 = vsub.f32 1.0, %v6726_v62 }
0x1554   :  { %v6728_v19 = vmul.f32 %v9853_v56, %v6727_v45 }
0x1556   :  { %v6729_v34 = vadd.f32 %v9853_v56, %v6728_v19 }
0x1558   :  { %v6733_v41 = vsel %vm6732_vm13, %v9853_v56, %v6729_v34 }
0x1559   :  { %v6738_v33 = vsel %vm6735_vm14, %v6737_v57, %v6733_v41 }
0x155a   :  { %6743 = vperm.xlu0 %9851, %v6738_v33  }
0x15cc   :  { %v6744_v36 = vpop.permute.xlu0 %6743 }
0x15cd   :  { %v6746_v6 = vmul.f32 %v6744_v36, %v6740_v23  ;;  %v6748_v59 = vmul.f32 %v6747_v43, %v6744_v36 }
0x15cf   :  { %v6750_v18 = vmul.f32 %v6749_v2, %v6746_v6  ;;  %v6755_v28 = vmul.f32 %v6749_v2, %v6748_v59 }
0x15d1   :  { %v6754_v4 = vadd.f32 %v6753_v15, %v6750_v18  ;;  %v6757_v55 = vadd.f32 %v6756_v49, %v6755_v28 }
0x15d3   :  { %6758 = vst [vmem:[%s9984_s11] sm:$0xff] %v6754_v4 }
0x15d4   :  { %8729 = vst [vmem:[%s9990_s16 + $0x8] sm:$0xff] %v6754_v4 }
0x15d5   :  { %8730 = vst [vmem:[%s9998_s23 + $0x8] sm:$0xff] %v6757_v55 }

</bundles_post_ra>
